<compile_context>
chip_gen: v7x
topology: tpu7x:2x2x1
jax: 0.10.0
libtpu: 0.0.40
codegen_flags: <defaults>
</compile_context>

<pallas_src>
import jax
import jax.numpy as jnp
from jax.experimental import pallas as pl
from jax.experimental.pallas import tpu as pltpu


def fcn_kernel(x_ref, w1_ref, b1_ref, w2_ref, b2_ref, w3_ref, b3_ref, o_ref):
    bm = x_ref.shape[0]

    # fc1 + relu  (MXU, bf16 inputs, f32 accumulation)
    x = x_ref[...].astype(jnp.bfloat16)                          # (bm, 4)
    h1 = jnp.dot(x, w1_ref[...], preferred_element_type=jnp.float32)
    h1 = jnp.maximum(h1 + b1_ref[...], 0.0)                      # (bm, H) f32

    # fc2 + relu  (dominant matmul)
    h2 = jnp.dot(h1.astype(jnp.bfloat16), w2_ref[...],
                 preferred_element_type=jnp.float32)
    h2 = jnp.maximum(h2 + b2_ref[...], 0.0)                      # (bm, H) f32

    # fc3, computed directly in lane-dense (1, bm) layout:
    #   out[0, m] = sum_k w3_row[0, k] * h2[m, k]   (A @ B^T contraction)
    out_row = jax.lax.dot_general(
        w3_ref[...], h2.astype(jnp.bfloat16),
        dimension_numbers=(((1,), (1,)), ((), ())),
        preferred_element_type=jnp.float32)                      # (1, bm)

    o_ref[...] = (out_row + b3_ref[...]).astype(o_ref.dtype)     # unmasked vst


def fcn_forward(x, params, *, bm=256, vmem_limit_bytes=32 * 1024 * 1024):
    """x: (B, 4) float32.  params: (in,out)-layout f32 weights, (1,out) biases."""
    B, D_in = x.shape
    num_tiles = pl.cdiv(B, bm)
    padded_B = num_tiles * bm
    if padded_B != B:
        # Ragged batch: zero-pad to a multiple of the batch tile, slice later.
        x = jnp.pad(x, ((0, padded_B - B), (0, 0)))

    # bf16 weights for the MXU (accumulation stays f32 inside the kernel).
    w1 = params["w1"].astype(jnp.bfloat16)                       # (4, H)
    w2 = params["w2"].astype(jnp.bfloat16)                       # (H, H)
    w3_row = params["w3"].T.astype(jnp.bfloat16)                 # (1, H)
    b1, b2, b3 = params["b1"], params["b2"], params["b3"]        # f32
    H = w1.shape[1]

    out_row = pl.pallas_call(
        fcn_kernel,
        out_shape=jax.ShapeDtypeStruct((1, padded_B), jnp.float32),
        grid=(num_tiles,),
        in_specs=[
            pl.BlockSpec((bm, D_in), lambda i: (i, 0)),          # x tile
            pl.BlockSpec((D_in, H), lambda i: (0, 0)),           # w1 (whole)
            pl.BlockSpec((1, H), lambda i: (0, 0)),              # b1
            pl.BlockSpec((H, H), lambda i: (0, 0)),              # w2 (whole)
            pl.BlockSpec((1, H), lambda i: (0, 0)),              # b2
            pl.BlockSpec((1, H), lambda i: (0, 0)),              # w3 (as row)
            pl.BlockSpec((1, 1), lambda i: (0, 0)),              # b3
        ],
        out_specs=pl.BlockSpec((1, bm), lambda i: (0, i)),       # lane-dense
        compiler_params=pltpu.CompilerParams(
            dimension_semantics=("parallel",),
            vmem_limit_bytes=vmem_limit_bytes),
    )(x, w1, b1, w2, b2, w3_row, b3)

    return out_row[0, :B].reshape(B, 1)


def init_params(key):
    """Deterministic init matching PyTorch nn.Linear default:
    U(-1/sqrt(fan_in), 1/sqrt(fan_in)) for both weight and bias."""
    def linear(key, fan_in, fan_out):
        kw, kb = jax.random.split(key)
        bound = 1.0 / jnp.sqrt(fan_in)
        # Stored as (in, out): transpose of PyTorch's (out, in) weight.
        w = jax.random.uniform(kw, (fan_in, fan_out), jnp.float32, -bound, bound)
        b = jax.random.uniform(kb, (1, fan_out), jnp.float32, -bound, bound)
        return w, b

    k1, k2, k3 = jax.random.split(key, 3)
    w1, b1 = linear(k1, 4, 1024)
    w2, b2 = linear(k2, 1024, 1024)
    w3, b3 = linear(k3, 1024, 1)
    return {"w1": w1, "b1": b1, "w2": w2, "b2": b2, "w3": w3, "b3": b3}


def fcn_reference(x, p):
    """Reference mirroring the kernel's dtype path (bf16 inputs, f32 accum)."""
    w1 = p["w1"].astype(jnp.bfloat16)
    w2 = p["w2"].astype(jnp.bfloat16)
    w3 = p["w3"].astype(jnp.bfloat16)
    h1 = jnp.maximum(
        jnp.dot(x.astype(jnp.bfloat16), w1,
                preferred_element_type=jnp.float32) + p["b1"], 0.0)
    h2 = jnp.maximum(
        jnp.dot(h1.astype(jnp.bfloat16), w2,
                preferred_element_type=jnp.float32) + p["b2"], 0.0)
    return jnp.dot(h2.astype(jnp.bfloat16), w3,
                   preferred_element_type=jnp.float32) + p["b3"]


if __name__ == "__main__":
    key = jax.random.PRNGKey(0)
    kp, kx = jax.random.split(key)

    params = init_params(kp)
    # Non-multiple of the batch tile on purpose: exercises the ragged path,
    # and cdiv(500, 256) = 2 grid steps so both v7x TensorCores get work.
    B = 500
    x = jax.random.normal(kx, (B, 4), jnp.float32)

    out = jax.block_until_ready(fcn_forward(x, params))
    ref = fcn_reference(x, params)

    assert out.shape == (B, 1)
    assert jnp.allclose(out, ref, atol=2e-2, rtol=2e-2), "mismatch vs reference"

    print("KERNEL_OK")
</pallas_src>

<mosaic_0001>
module attributes {stable_mosaic.version = 11 : i64} {
  func.func @fcn_kernel(%arg0: i32, %arg1: memref<256x4xf32, #tpu.memory_space<vmem>>, %arg2: memref<4x1024xbf16, #tpu.memory_space<vmem>>, %arg3: memref<1x1024xf32, #tpu.memory_space<vmem>>, %arg4: memref<1024x1024xbf16, #tpu.memory_space<vmem>>, %arg5: memref<1x1024xf32, #tpu.memory_space<vmem>>, %arg6: memref<1x1024xbf16, #tpu.memory_space<vmem>>, %arg7: memref<1x1xf32, #tpu.memory_space<vmem>>, %arg8: memref<1x256xf32, #tpu.memory_space<vmem>>) attributes {dimension_semantics = [#tpu.dimension_semantics<parallel>], iteration_bounds = array<i64: 2>, scalar_prefetch = 0 : i64, scratch_operands = 0 : i64, tpu.core_type = #tpu.core_type<tc>, window_params = [{transform_indices = @transform_0, window_bounds = array<i64: 256, 4>}, {pipeline_mode = #tpu.pipeline_mode<synchronous>, transform_indices = @transform_1, window_bounds = array<i64: 4, 1024>}, {pipeline_mode = #tpu.pipeline_mode<synchronous>, transform_indices = @transform_2, window_bounds = array<i64: 1, 1024>}, {pipeline_mode = #tpu.pipeline_mode<synchronous>, transform_indices = @transform_3, window_bounds = array<i64: 1024, 1024>}, {pipeline_mode = #tpu.pipeline_mode<synchronous>, transform_indices = @transform_4, window_bounds = array<i64: 1, 1024>}, {pipeline_mode = #tpu.pipeline_mode<synchronous>, transform_indices = @transform_5, window_bounds = array<i64: 1, 1024>}, {pipeline_mode = #tpu.pipeline_mode<synchronous>, transform_indices = @transform_6, window_bounds = array<i64: 1, 1>}, {transform_indices = @transform_7, window_bounds = array<i64: 1, 256>}]} {
    %c0 = arith.constant 0 : index
    %c0_0 = arith.constant 0 : index
    %0 = vector.load %arg1[%c0, %c0_0] : memref<256x4xf32, #tpu.memory_space<vmem>>, vector<256x4xf32>
    %1 = arith.truncf %0 : vector<256x4xf32> to vector<256x4xbf16>
    %c0_1 = arith.constant 0 : index
    %c0_2 = arith.constant 0 : index
    %2 = vector.load %arg2[%c0_1, %c0_2] : memref<4x1024xbf16, #tpu.memory_space<vmem>>, vector<4x1024xbf16>
    %cst = arith.constant dense<0.000000e+00> : vector<256x1024xf32>
    %3 = tpu.matmul %1, %2, %cst {dimension_numbers = #tpu.dot_dimension_numbers<[1], [0], [0], [1], [0, 0, 1, 1], [], []>} : vector<256x4xbf16>, vector<4x1024xbf16>, vector<256x1024xf32> -> vector<256x1024xf32>
    %c0_3 = arith.constant 0 : index
    %c0_4 = arith.constant 0 : index
    %4 = vector.load %arg3[%c0_3, %c0_4] : memref<1x1024xf32, #tpu.memory_space<vmem>>, vector<1x1024xf32>
    %5 = vector.broadcast %4 : vector<1x1024xf32> to vector<256x1024xf32>
    %6 = arith.addf %3, %5 : vector<256x1024xf32>
    %cst_5 = arith.constant 0.000000e+00 : f32
    %7 = vector.broadcast %cst_5 : f32 to vector<256x1024xf32>
    %8 = arith.maximumf %6, %7 : vector<256x1024xf32>
    %9 = arith.truncf %8 : vector<256x1024xf32> to vector<256x1024xbf16>
    %c0_6 = arith.constant 0 : index
    %c0_7 = arith.constant 0 : index
    %10 = vector.load %arg4[%c0_6, %c0_7] : memref<1024x1024xbf16, #tpu.memory_space<vmem>>, vector<1024x1024xbf16>
    %cst_8 = arith.constant dense<0.000000e+00> : vector<256x1024xf32>
    %11 = tpu.matmul %9, %10, %cst_8 {dimension_numbers = #tpu.dot_dimension_numbers<[1], [0], [0], [1], [0, 0, 1, 1], [], []>} : vector<256x1024xbf16>, vector<1024x1024xbf16>, vector<256x1024xf32> -> vector<256x1024xf32>
    %c0_9 = arith.constant 0 : index
    %c0_10 = arith.constant 0 : index
    %12 = vector.load %arg5[%c0_9, %c0_10] : memref<1x1024xf32, #tpu.memory_space<vmem>>, vector<1x1024xf32>
    %13 = vector.broadcast %12 : vector<1x1024xf32> to vector<256x1024xf32>
    %14 = arith.addf %11, %13 : vector<256x1024xf32>
    %cst_11 = arith.constant 0.000000e+00 : f32
    %15 = vector.broadcast %cst_11 : f32 to vector<256x1024xf32>
    %16 = arith.maximumf %14, %15 : vector<256x1024xf32>
    %c0_12 = arith.constant 0 : index
    %c0_13 = arith.constant 0 : index
    %17 = vector.load %arg6[%c0_12, %c0_13] : memref<1x1024xbf16, #tpu.memory_space<vmem>>, vector<1x1024xbf16>
    %18 = arith.truncf %16 : vector<256x1024xf32> to vector<256x1024xbf16>
    %cst_14 = arith.constant dense<0.000000e+00> : vector<1x256xf32>
    %19 = tpu.matmul %17, %18, %cst_14 {dimension_numbers = #tpu.dot_dimension_numbers<[1], [1], [0], [0], [0, 0, 1, 0], [], []>} : vector<1x1024xbf16>, vector<256x1024xbf16>, vector<1x256xf32> -> vector<1x256xf32>
    %c0_15 = arith.constant 0 : index
    %c0_16 = arith.constant 0 : index
    %20 = vector.load %arg7[%c0_15, %c0_16] : memref<1x1xf32, #tpu.memory_space<vmem>>, vector<1x1xf32>
    %21 = vector.broadcast %20 : vector<1x1xf32> to vector<1x256xf32>
    %22 = arith.addf %19, %21 : vector<1x256xf32>
    %c0_17 = arith.constant 0 : index
    %c0_18 = arith.constant 0 : index
    %23 = vector.load %arg8[%c0_17, %c0_18] : memref<1x256xf32, #tpu.memory_space<vmem>>, vector<1x256xf32>
    tpu.vector_store %arg8[%c0_17, %c0_18], %22 {strides = array<i32>} : memref<1x256xf32, #tpu.memory_space<vmem>>, vector<1x256xf32>,
    return
  }
  func.func @transform_0(%arg0: i32) -> (i32, i32) {
    %c0_i32 = arith.constant 0 : i32
    %c0_i32_0 = arith.constant 0 : i32
    return %arg0, %c0_i32 : i32, i32
  }
  func.func @transform_1(%arg0: i32) -> (i32, i32) {
    %c0_i32 = arith.constant 0 : i32
    %c0_i32_0 = arith.constant 0 : i32
    %c0_i32_1 = arith.constant 0 : i32
    return %c0_i32, %c0_i32_0 : i32, i32
  }
  func.func @transform_2(%arg0: i32) -> (i32, i32) {
    %c0_i32 = arith.constant 0 : i32
    %c0_i32_0 = arith.constant 0 : i32
    %c0_i32_1 = arith.constant 0 : i32
    return %c0_i32, %c0_i32_0 : i32, i32
  }
  func.func @transform_3(%arg0: i32) -> (i32, i32) {
    %c0_i32 = arith.constant 0 : i32
    %c0_i32_0 = arith.constant 0 : i32
    %c0_i32_1 = arith.constant 0 : i32
    return %c0_i32, %c0_i32_0 : i32, i32
  }
  func.func @transform_4(%arg0: i32) -> (i32, i32) {
    %c0_i32 = arith.constant 0 : i32
    %c0_i32_0 = arith.constant 0 : i32
    %c0_i32_1 = arith.constant 0 : i32
    return %c0_i32, %c0_i32_0 : i32, i32
  }
  func.func @transform_5(%arg0: i32) -> (i32, i32) {
    %c0_i32 = arith.constant 0 : i32
    %c0_i32_0 = arith.constant 0 : i32
    %c0_i32_1 = arith.constant 0 : i32
    return %c0_i32, %c0_i32_0 : i32, i32
  }
  func.func @transform_6(%arg0: i32) -> (i32, i32) {
    %c0_i32 = arith.constant 0 : i32
    %c0_i32_0 = arith.constant 0 : i32
    %c0_i32_1 = arith.constant 0 : i32
    return %c0_i32, %c0_i32_0 : i32, i32
  }
  func.func @transform_7(%arg0: i32) -> (i32, i32) {
    %c0_i32 = arith.constant 0 : i32
    %c0_i32_0 = arith.constant 0 : i32
    return %c0_i32, %arg0 : i32, i32
  }
}

</mosaic_0001>

<bundles_post_ra>
// kernel: tpu_custom_call.1
= control target key start
LH: loop header
LB: loop body
LE: loop exit
PB: predicated region body
PF: predicated region fallthrough
CT: control target
= control target key end

     0   :  { %s13067_s0 = inlined_call_operand.vmem [shape: f32[512,4], index: 0, kind: input, shape index: {}]   ;;  %s13068_s1 = inlined_call_operand.hbm [shape: bf16[4,1024], index: 1, kind: input, shape index: {}]   ;;  %s13069_s2 = inlined_call_operand.hbm [shape: f32[1,1024], index: 2, kind: input, shape index: {}]   ;;  %s13070_s3 = inlined_call_operand.hbm [shape: bf16[1024,1024], index: 3, kind: input, shape index: {}]   ;;  %s13071_s4 = inlined_call_operand.hbm [shape: f32[1,1024], index: 4, kind: input, shape index: {}]   ;;  %s13072_s5 = inlined_call_operand.hbm [shape: bf16[1,1024], index: 5, kind: input, shape index: {}]   ;;  %s13073_s6 = inlined_call_operand.<no memory space> [shape: f32[1,1], index: 6, kind: input, shape index: {}]   ;;  %s13074_s7 = inlined_call_operand.hbm [shape: f32[1,512], index: 7, kind: output, shape index: {}]  }
   0x1   :  { %13323 = sst [smem:[#allocation153_spill]] %s13068_s1  ;;  %v12_v0 = vstv %s13073_s6 }
   0x2   :  { %13324 = sst [smem:[#allocation154_spill]] %s13069_s2  ;;  %13 = vst [vmem:[#allocation2] sm:$0x1] %v12_v0 }
   0x3   :  { %14 = vsyncpa [#allocation4], 0 }
   0x4   :  { %15 = vsyncpa [#allocation7], 0 }
   0x5   :  { %16 = vsyncpa [#allocation10], 0 }
   0x6   :  { %17 = vsyncpa [#allocation5], 0 }
   0x7   :  { %19 = vsyncpa [#allocation5 + $0x1], 0  ;;  %s10683_s26 = smov 0   ;;  %s10685_s27 = smov 0  }
   0x8   :  { %s10687_s28 = smov 0   ;;  %s10689_s29 = smov 0  }
   0x9 LB: > { %s10704_s6 = sadd.s32 4294967295, %s10627_s29   ;;  %s8672_s30 = sadd.s32 4294967294, %s10627_s29   ;;  %s10627_s29 = sphi %s10689_s29, %s13819_s29   ;;  %s10623_s28 = sphi %s10687_s28, %s13818_s28   ;;  %s10619_s27 = sphi %s10685_s27, %s13817_s27   ;;  %s10615_s26 = sphi %s10683_s26, %s13816_s26  }
   0xa   : > { %s10708_s8 = sadd.s32 1, %s10627_s29   ;;  %s184_s9 = sadd.s32 1, %s10623_s28 }
   0xb   : > { %s181_s10 = ssub.s32 %s10627_s29, %s10708_s8  ;;  %p194_p0 = scmp.ne.s32.totalorder %s10623_s28, %s10619_s27 }
   0xc   : > { %p182_p1 = scmp.eq.s32.totalorder %s181_s10, 0  ;;  %p195_p2 = scmp.eq.s32.totalorder %s10704_s6, 1 }
   0xd   : > { %p200_p3 = scmp.ne.s32.totalorder %s10619_s27, %s10615_s26  ;;  %p201_p4 = scmp.eq.s32.totalorder %s8672_s30, 1 }
   0xe   : > { %s10719_s11 = scalar_select %p182_p1, %s10623_s28, %s184_s9  }
   0xf   : > { %p10721_p5 = por %p195_p2, %p194_p0  ;;  %p10725_p6 = por %p201_p4, %p200_p3 }
  0x10   : > { %p8673_p7 = scmp.ge.s32.totalorder %s10627_s29, 1  ;;  %p208_p8 = scmp.lt.s32.totalorder %s10627_s29, 3 }
  0x11   : > { %s13325_s12 = scalar_select %p10721_p5, 1, 0 }
  0x12   : > { %s13326_s13 = scalar_select %p10725_p6, 1, 0 }
  0x13   : > { %p13075_p9 = scmp.eq.s32.totalorder %s10704_s6, 0  ;;  %p10732_p10 = pnand %p8673_p7, %p208_p8 }
  0x14   : > { %s10629_s15 = smov [#allocation6]   ;;  %s10630_s17 = smov [#allocation9]  }
  0x15   : > { %s13327_s14 = scalar_select %p10732_p10, 1, 0 }
  0x16   : > { %s232_s16 = sshll.u32 %s10629_s15, 4  ;;  %p10333_p11 = pneg %p10732_p10  ;;  %s233_s16 = int_to_ptr.vmem [resolvable:$true] %s232_s16 }
  0x17   : > { %s256_s18 = sshll.u32 %s10630_s17, 4  ;;  %s10631_s20 = smov [#allocation3]   ;;  %s10744_s18 = int_to_ptr.vmem [resolvable:$true] %s256_s18 }
  0x18   : > { %p10740_p12 = pnand %p13075_p9, %p10333_p11  ;;  %s221_s21 = sshll.u32 %s10631_s20, 4  ;;  %s10746_s21 = int_to_ptr.vmem [resolvable:$true] %s221_s21 }
  0x19   : > { %s13329_s2 = sld [smem:[#allocation154_spill]] }
  0x1a   : > { %p10756_p0 = pneg %p10740_p12 }
  0x1f   : > { %s10413_s24 = scalar_lea.hbm %s13329_s2, 128 }
  0x20   : > { %p10414_p13 = scmp.ne.s32.totalorder %s13329_s2, %s10413_s24  ;;  %p10420_p3 = scmp.lt.u32.totalorder %s10413_s24, %s13329_s2 }
  0x22   : > { %p10416_p1 = pnand %p10756_p0, %p10414_p13 }
  0x24   : > { %p10417_p2 = pneg %p10416_p1 }
  0x26   : > { %p10422_p4 = pnand %p10420_p3, %p10417_p2 }
  0x28   : > { %10425 = shalt.err (!%p10422_p4)
}
  0x29   : > { %s10426_s17 = scalar_lea.vmem %s233_s16, 128  ;;  %p10434_p9 = scmp.lt.s32.totalorder %s233_s16, %s233_s16 }
  0x2a   : > { %p10427_p7 = scmp.ne.s32.totalorder %s233_s16, %s10426_s17  ;;  %p10435_p6 = scmp.lt.s32.totalorder %s10426_s17, %s10426_s17 }
  0x2c   : > { %p10429_p8 = pnand %p10427_p7, %p10756_p0  ;;  %p10436_p5 = por %p10435_p6, %p10434_p9 }
  0x2e   : > { %p10430_p11 = pneg %p10429_p8 }
  0x30   : > { %p10437_p10 = pnand %p10436_p5, %p10430_p11 }
  0x32   : > { %10440 = shalt.err (!%p10437_p10)
}
  0x33   : > { %10339 = dma.hbm_to_vmem [thread:$0]  (!%p10740_p12), %s13329_s2, 128, %s233_s16, [#allocation7]  }
  0x34   : > { %s10441_s25 = scalar_lea.hbm %s13071_s4, 128 }
  0x35   : > { %p10442_p13 = scmp.ne.s32.totalorder %s13071_s4, %s10441_s25  ;;  %p10448_p5 = scmp.lt.u32.totalorder %s10441_s25, %s13071_s4 }
  0x37   : > { %p10444_p1 = pnand %p10442_p13, %p10756_p0 }
  0x39   : > { %p10445_p6 = pneg %p10444_p1 }
  0x3b   : > { %p10450_p9 = pnand %p10448_p5, %p10445_p6 }
  0x3d   : > { %10453 = shalt.err (!%p10450_p9)
}
  0x3e   : > { %s10454_s16 = scalar_lea.vmem %s10744_s18, 128  ;;  %p10462_p4 = scmp.lt.s32.totalorder %s10744_s18, %s10744_s18 }
  0x3f   : > { %p10455_p10 = scmp.ne.s32.totalorder %s10744_s18, %s10454_s16  ;;  %p10463_p7 = scmp.lt.s32.totalorder %s10454_s16, %s10454_s16 }
  0x41   : > { %p10457_p2 = pnand %p10455_p10, %p10756_p0  ;;  %p10464_p8 = por %p10463_p7, %p10462_p4 }
  0x43   : > { %p10458_p3 = pneg %p10457_p2 }
  0x45   : > { %p10465_p11 = pnand %p10464_p8, %p10458_p3 }
  0x47   : > { %10468 = shalt.err (!%p10465_p11)
}
  0x48   : > { %10345 = dma.hbm_to_vmem [thread:$0]  (!%p10740_p12), %s13071_s4, 128, %s10744_s18, [#allocation10]  }
  0x49   : > { %s13331_s1 = sld [smem:[#allocation153_spill]] }
  0x4f   : > { %s10469_s25 = scalar_lea.hbm %s13331_s1, 256 }
  0x50   : > { %p10470_p13 = scmp.ne.s32.totalorder %s13331_s1, %s10469_s25  ;;  %p10476_p5 = scmp.lt.u32.totalorder %s10469_s25, %s13331_s1 }
  0x52   : > { %p10472_p1 = pnand %p10470_p13, %p10756_p0 }
  0x54   : > { %p10473_p6 = pneg %p10472_p1 }
  0x56   : > { %p10478_p9 = pnand %p10476_p5, %p10473_p6 }
  0x58   : > { %10481 = shalt.err (!%p10478_p9)
}
  0x59   : > { %s10482_s18 = scalar_lea.vmem %s10746_s21, 256  ;;  %p10490_p4 = scmp.lt.s32.totalorder %s10746_s21, %s10746_s21 }
  0x5a   : > { %p10483_p10 = scmp.ne.s32.totalorder %s10746_s21, %s10482_s18  ;;  %p10491_p7 = scmp.lt.s32.totalorder %s10482_s18, %s10482_s18 }
  0x5c   : > { %p10485_p2 = pnand %p10483_p10, %p10756_p0  ;;  %p10492_p8 = por %p10491_p7, %p10490_p4 }
  0x5e   : > { %p10486_p3 = pneg %p10485_p2 }
  0x60   : > { %p10493_p11 = pnand %p10492_p8, %p10486_p3 }
  0x62   : > { %10496 = shalt.err (!%p10493_p11)
}
  0x63   : > { %10336 = dma.hbm_to_vmem [thread:$0]  (!%p10740_p12), %s13331_s1, 256, %s10746_s21, [#allocation4]  }
  0x64   : > { %s10632_s22 = smov [#allocation8]   ;;  %s10497_s30 = scalar_lea.hbm %s13070_s3, 65536 }
  0x65   : > { %s242_s23 = sshll.u32 %s10632_s22, 4  ;;  %p10498_p13 = scmp.ne.s32.totalorder %s13070_s3, %s10497_s30  ;;  %s243_s23 = int_to_ptr.vmem [resolvable:$true] %s242_s23 }
  0x66   : > { %p10504_p5 = scmp.lt.u32.totalorder %s10497_s30, %s13070_s3 }
  0x67   : > { %p10500_p1 = pnand %p10498_p13, %p10756_p0 }
  0x69   : > { %p10501_p6 = pneg %p10500_p1 }
  0x6b   : > { %p10506_p9 = pnand %p10504_p5, %p10501_p6 }
  0x6d   : > { %10509 = shalt.err (!%p10506_p9)
}
  0x6e   : > { %s10510_s21 = scalar_lea.vmem %s243_s23, 65536  ;;  %p10518_p4 = scmp.lt.s32.totalorder %s243_s23, %s243_s23 }
  0x6f   : > { %p10511_p10 = scmp.ne.s32.totalorder %s243_s23, %s10510_s21  ;;  %p10519_p7 = scmp.lt.s32.totalorder %s10510_s21, %s10510_s21 }
  0x71   : > { %p10513_p2 = pnand %p10511_p10, %p10756_p0  ;;  %p10520_p8 = por %p10519_p7, %p10518_p4 }
  0x73   : > { %p10514_p3 = pneg %p10513_p2 }
  0x75   : > { %p10521_p11 = pnand %p10520_p8, %p10514_p3 }
  0x77   : > { %10524 = shalt.err (!%p10521_p11)
}
  0x78   : > { %s10633_s16 = smov 512   ;;  %s10634_s20 = smov 32  }
  0x79   : > { %10342 = dma.hbm_to_vmem [thread:$0]  (!%p10740_p12), %s13070_s3, 65536, %s243_s23, [#allocation7], %s10633_s16, %s10633_s16, %s10634_s20  }
  0x7a   : > { %s10635_s25 = smov [#allocation11]   ;;  %s10525_s17 = scalar_lea.hbm %s13072_s5, 128 }
  0x7b   : > { %s267_s30 = sshll.u32 %s10635_s25, 4  ;;  %p10526_p13 = scmp.ne.s32.totalorder %s13072_s5, %s10525_s17  ;;  %s268_s30 = int_to_ptr.vmem [resolvable:$true] %s267_s30 }
  0x7c   : > { %p10532_p5 = scmp.lt.u32.totalorder %s10525_s17, %s13072_s5 }
  0x7d   : > { %p10528_p1 = pnand %p10526_p13, %p10756_p0 }
  0x7f   : > { %p10529_p6 = pneg %p10528_p1 }
  0x81   : > { %p10534_p9 = pnand %p10532_p5, %p10529_p6 }
  0x83   : > { %10537 = shalt.err (!%p10534_p9)
}
  0x84   : > { %s10538_s23 = scalar_lea.vmem %s268_s30, 128  ;;  %p10546_p4 = scmp.lt.s32.totalorder %s268_s30, %s268_s30 }
  0x85   : > { %p10539_p10 = scmp.ne.s32.totalorder %s268_s30, %s10538_s23  ;;  %p10547_p7 = scmp.lt.s32.totalorder %s10538_s23, %s10538_s23 }
  0x87   : > { %p10541_p2 = pnand %p10539_p10, %p10756_p0  ;;  %p10548_p8 = por %p10547_p7, %p10546_p4 }
  0x89   : > { %p10542_p3 = pneg %p10541_p2 }
  0x8b   : > { %p10549_p11 = pnand %p10548_p8, %p10542_p3 }
  0x8d   : > { %10552 = shalt.err (!%p10549_p11)
}
  0x8e   : > { %10348 = dma.hbm_to_vmem [thread:$0]  (!%p10740_p12), %s13072_s5, 128, %s268_s30, [#allocation10]  }
  0x8f   : > { %p13332_p13 = scmp.ne.s32.totalorder %s13327_s14, 0 }
  0x91   : > { %292 = sbr.rel (%p13332_p13) target bundleno = 2041 (0x7f9), region = 48 }
  0x98   : > { %p13333_p1 = scmp.eq.s32.totalorder %s10704_s6, 0 }
  0x9a   : > { %10598 = dma.done.wait (%p13333_p1), [#allocation4], 256   ;;  %p13334_p0 = pmov %p13333_p1 }
  0x9c   : > { %10600 = vsyncadd (%p13334_p0), [#allocation4], 4294967040  ;;  %p13335_p6 = pmov %p13334_p0 }
  0x9d   : > { %p13336_p5 = pmov %p13334_p0 }
  0x9e   : > { %10602 = dma.done.wait (%p13335_p6), [#allocation7], 65664  }
  0x9f   : > { %10604 = vsyncadd (%p13336_p5), [#allocation7], 4294901632  ;;  %p13337_p9 = pmov %p13334_p0 }
  0xa0   : > { %p13338_p12 = pmov %p13334_p0 }
  0xa1   : > { %10606 = dma.done.wait (%p13337_p9), [#allocation10], 256  }
  0xa2   : > { %10608 = vsyncadd (%p13338_p12), [#allocation10], 4294967040  ;;  %v13078_v1 = vlaneseq  ;;  %v10636_v2 = vmov 1983009808   ;;  %v13082_v4 = vmov 0   ;;  %s10870_s1 = sshll.u32 %s10704_s6, 5 }
  0xa3   : > { %v444_v3 = vunpack.c.l.s4 %v10636_v2  ;;  %582 = vmatprep.mubr.bf16.mxu1 %v13082_v4  ;;  %968 = vmatprep.mubr.bf16.mxu0 %v13082_v4  ;;  %p341_p10 = scmp.lt.s32.totalorder %s10870_s1, 63  ;;  %v396_v8 = vld [vmem:[#allocation3] sm:$0xff]  ;;  %v2218_v9 = vld [vmem:[#allocation9] sm:$0xff]  ;;  %vm525_vm0 = vcmask 1041408   ;;  %vm476_vm1 = vcmask 31744   ;;  %v397_v32 = vld [vmem:[#allocation3 + $0x8] sm:$0xff]  ;;  %s13025_s17 = scalar_lea.hbm %s13074_s7, %s10870_s1 }
  0xa4   : > { %v10874_v5 = vshrl.u32 %v13078_v1, 7  ;;  %10406 = vset.pattern.permute.xlu0 %v13082_v4  ;;  %v442_v16 = vcombine.high %v396_v8, %v396_v8  ;;  %v459_v33 = vcombine.high %v397_v32, %v397_v32  ;;  %v1706_v40 = vld [vmem:[#allocation8] sm:$0xff]  ;;  %s337_s22 = sand.u32 1, %s10619_s27   ;;  %p13814_p3 = scmp.ne.s32.totalorder %s13325_s12, 0 }
  0xa5   : > { %v445_v6 = vunpack.c.0.s8 %v444_v3  ;;  %s342_s2 = scalar_select %p341_p10, %s10870_s1, 63  ;;  %v1710_v41 = vld [vmem:[#allocation8 + $0x20] sm:$0xff] }
  0xa6   : > { %13339 = vst [vmem:[#allocation17_spill] sm:$0xff] %v10874_v5  ;;  %v406_v10 = vsub.s32 1, %v10874_v5  ;;  %v13081_v11 = vsub.s32 2, %v10874_v5  ;;  %v418_v12 = vsub.s32 4, %v10874_v5  ;;  %v422_v13 = vsub.s32 5, %v10874_v5  ;;  %v1714_v47 = vld [vmem:[#allocation8 + $0x40] sm:$0xff] }
  0xa7   : > { %v448_v7 = vsub.s32 %v445_v6, %v10874_v5  ;;  %s8688_s14 = sshll.u32 %s342_s2, 3  ;;  %v13080_v14 = vsub.s32 6, %v10874_v5  ;;  %v13079_v15 = vsub.s32 7, %v10874_v5  ;;  %v8758_v42 = vcombine.high %v1706_v40, %v1710_v41  ;;  %v1718_v48 = vld [vmem:[#allocation8 + $0x60] sm:$0xff]  ;;  %s8686_s24 = sshll.u32 %s337_s22, 1 }
  0xa8   : > { %s10884_s9 = scalar_lea.vmem %s13067_s0, %s8688_s14  ;;  %v10893_v18 = vrot.slane %v2218_v9, %v406_v10  ;;  %v10897_v19 = vrot.slane %v2218_v9, %v13081_v11  ;;  %v10901_v20 = vrot.slane %v2218_v9, %v418_v12  ;;  %v10905_v21 = vrot.slane %v2218_v9, %v422_v13  ;;  %v1722_v54 = vld [vmem:[#allocation8 + $0x80] sm:$0xff]  ;;  %s339_s25 = scalar_lea.vmem [#allocation12], %s8686_s24 }
  0xa9   : > { %v449_v17 = vrot.slane %v396_v8, %v448_v7  ;;  %v348_v22 = vld [vmem:[%s10884_s9] sm:$0xff]  ;;  %v349_v23 = vld [vmem:[%s10884_s9 + $0x8] sm:$0xff]  ;;  %v456_v24 = vrot.slane %v442_v16, %v448_v7  ;;  %v10911_v26 = vrot.slane %v2218_v9, %v13080_v14  ;;  %v10915_v27 = vrot.slane %v2218_v9, %v13079_v15  ;;  %v350_v35 = vld [vmem:[%s10884_s9 + $0x10] sm:$0xff]  ;;  %s8563_s30 = sshll.u32 %s339_s25, 4  ;;  %s8549_s18 = scalar_lea.sflag [#allocation5], %s337_s22  ;;  %s13027_s30 = int_to_ptr.vmem [resolvable:$true] %s8563_s30 }
  0xaa   : > { %13340 = vst [vmem:[#allocation18_spill] sm:$0xff] %v10893_v18  ;;  %13341 = vst [vmem:[#allocation19_spill] sm:$0xff] %v10897_v19  ;;  %v10919_v29 = vpack.c.bf16 %v349_v23, %v348_v22  ;;  %v466_v34 = vrot.slane %v397_v32, %v448_v7  ;;  %v351_v36 = vld [vmem:[%s10884_s9 + $0x18] sm:$0xff]  ;;  %v473_v37 = vrot.slane %v459_v33, %v448_v7  ;;  %v352_v49 = vld [vmem:[%s10884_s9 + $0x20] sm:$0xff]  ;;  %s10553_s21 = scalar_lea.vmem %s13027_s30, 32  ;;  %s10639_s23 = smov [#allocation12]  }
  0xab   : > { %13342 = vst [vmem:[#allocation20_spill] sm:$0xff] %v10901_v20  ;;  %13343 = vst [vmem:[#allocation21_spill] sm:$0xff] %v10905_v21  ;;  %v457_v25 = vcombine.high %v449_v17, %v449_v17  ;;  %v527_v28 = vsel %vm525_vm0, %v449_v17, 0  ;;  %v458_v30 = vcombine.high %v456_v24, %v456_v24  ;;  %v533_v31 = vsel %vm525_vm0, %v456_v24, 0  ;;  %v353_v50 = vld [vmem:[%s10884_s9 + $0x28] sm:$0xff]  ;;  %v1726_v55 = vld [vmem:[#allocation8 + $0xa0] sm:$0xff]  ;;  %p10554_p2 = scmp.ne.s32.totalorder %s13027_s30, %s10553_s21 }
  0xac   : > { %13344 = vst [vmem:[#allocation22_spill] sm:$0xff] %v10911_v26  ;;  %13345 = vst [vmem:[#allocation23_spill] sm:$0xff] %v10915_v27  ;;  %v474_v38 = vcombine.high %v466_v34, %v466_v34  ;;  %v539_v39 = vsel %vm525_vm0, %v466_v34, 0  ;;  %v475_v43 = vcombine.high %v473_v37, %v473_v37  ;;  %v10931_v44 = vsel %vm525_vm0, %v473_v37, 0  ;;  %v354_v56 = vld [vmem:[%s10884_s9 + $0x30] sm:$0xff]  ;;  %v355_v57 = vld [vmem:[%s10884_s9 + $0x38] sm:$0xff] }
  0xad   : > { %8689 = vmatprep.subr.msk.bf16.mxu1 %vm525_vm0, %v457_v25  ;;  %v10933_v45 = vpack.c.bf16 %v351_v36, %v350_v35  ;;  %v8757_v46 = vcombine.low %v1706_v40, %v1710_v41  ;;  %v8765_v51 = vcombine.low %v1714_v47, %v1718_v48  ;;  %v8766_v52 = vcombine.high %v1714_v47, %v1718_v48  ;;  %v1730_v61 = vld [vmem:[#allocation8 + $0xc0] sm:$0xff]  ;;  %v357_v0 = vld [vmem:[%s10884_s9 + $0x48] sm:$0xff]  ;;  %v358_v9 = vld [vmem:[%s10884_s9 + $0x50] sm:$0xff]  ;;  %p10555_p4 = pnand %p10554_p2, %p13814_p3  ;;  %s10557_s16 = sshll.u32 %s10639_s23, 4  ;;  %s10558_s16 = int_to_ptr.vmem [resolvable:$false] %s10557_s16 }
  0xae   : > { %551 = vmatpush1.bf16.msra.mxu1 %v527_v28  ;;  %8723 = vmatprep.subr.msk.bf16.mxu0 %vm525_vm0, %v474_v38  ;;  %v10944_v53 = vpack.c.bf16 %v353_v50, %v352_v49  ;;  %v8773_v58 = vcombine.low %v1722_v54, %v1726_v55  ;;  %v8774_v59 = vcombine.high %v1722_v54, %v1726_v55  ;;  %v1734_v62 = vld [vmem:[#allocation8 + $0xe0] sm:$0xff]  ;;  %v362_v36 = vld [vmem:[%s10884_s9 + $0x70] sm:$0xff]  ;;  %v365_v50 = vld [vmem:[%s10884_s9 + $0x88] sm:$0xff]  ;;  %v13357_v21 = vmov 0   ;;  %s10559_s20 = scalar_lea.vmem %s10558_s16, 64  ;;  %p10560_p8 = scmp.lt.s32.totalorder %s13027_s30, %s10558_s16 }
  0xaf   : > { %8706 = vmatprep.subr.msk.bf16.mxu1 %vm525_vm0, %v458_v30  ;;  %937 = vmatpush1.bf16.msra.mxu0 %v539_v39  ;;  %v10954_v60 = vpack.c.bf16 %v355_v57, %v354_v56  ;;  %v356_v63 = vld [vmem:[%s10884_s9 + $0x40] sm:$0xff]  ;;  %v8781_v2 = vcombine.low %v1730_v61, %v1734_v62  ;;  %v8782_v3 = vcombine.high %v1730_v61, %v1734_v62  ;;  %v359_v16 = vld [vmem:[%s10884_s9 + $0x58] sm:$0xff]  ;;  %v361_v30 = vld [vmem:[%s10884_s9 + $0x68] sm:$0xff]  ;;  %p10556_p7 = pneg %p10555_p4  ;;  %p10561_p11 = scmp.lt.s32.totalorder %s10559_s20, %s10553_s21 }
  0xb0   : > { %4820 = vmatprep.subr.bf16.mxu0 %v8758_v42  ;;  %v10964_v6 = vpack.c.bf16 %v357_v0, %v356_v63  ;;  %v1738_v7 = vld [vmem:[#allocation8 + $0x100] sm:$0xff]  ;;  %v10974_v23 = vpack.c.bf16 %v359_v16, %v358_v9  ;;  %v366_v61 = vld [vmem:[%s10884_s9 + $0x90] sm:$0xff] }
  0xb1   : > { %8690 = vmatmul.mubr.msk.bf16.vlgmr.msra.gmra.mrb[0].mxu1 %vm476_vm1, %v10919_v29  ;;  %v1742_v8 = vld [vmem:[#allocation8 + $0x120] sm:$0xff]  ;;  %p10562_p13 = por %p10561_p11, %p10560_p8 }
  0xb2   : > { %744 = vmatpush1.bf16.msra.mxu1 %v533_v31  ;;  %592 = vmatprep.mubr.bf16.mxu1 %v13082_v4  ;;  %v8789_v17 = vcombine.low %v1738_v7, %v1742_v8  ;;  %v8790_v22 = vcombine.high %v1738_v7, %v1742_v8  ;;  %v1746_v24 = vld [vmem:[#allocation8 + $0x140] sm:$0xff] }
  0xb3   : > { %8740 = vmatprep.subr.msk.bf16.mxu1 %vm525_vm0, %v475_v43  ;;  %8724 = vmatmul.mubr.msk.bf16.vlgmr.msra.gmra.mrb[0].mxu0 %vm476_vm1, %v10919_v29  ;;  %v1750_v25 = vld [vmem:[#allocation8 + $0x160] sm:$0xff]  ;;  %p10563_p1 = pnand %p10562_p13, %p10556_p7 }
  0xb4   : > { %978 = vmatprep.mubr.bf16.mxu0 %v13082_v4  ;;  %4821 = vmatpush1.bf16.msra.mxu0 %v8757_v46  ;;  %v360_v28 = vld [vmem:[%s10884_s9 + $0x60] sm:$0xff]  ;;  %v8797_v31 = vcombine.low %v1746_v24, %v1750_v25  ;;  %v8798_v32 = vcombine.high %v1746_v24, %v1750_v25  ;;  %v363_v37 = vld [vmem:[%s10884_s9 + $0x78] sm:$0xff]  ;;  %v369_v24 = vld [vmem:[%s10884_s9 + $0xa8] sm:$0xff] }
  0xb5   : > { %4822 = vmatprep.subr.bf16.mxu0 %v8766_v52  ;;  %v10984_v33 = vpack.c.bf16 %v361_v30, %v360_v28  ;;  %v1754_v34 = vld [vmem:[#allocation8 + $0x180] sm:$0xff]  ;;  %v10994_v40 = vpack.c.bf16 %v363_v37, %v362_v36  ;;  %v370_v36 = vld [vmem:[%s10884_s9 + $0xb0] sm:$0xff] }
  0xb6   : > { %v1758_v35 = vld [vmem:[#allocation8 + $0x1a0] sm:$0xff] }
  0xb7   : > { %v8805_v38 = vcombine.low %v1754_v34, %v1758_v35  ;;  %v8806_v39 = vcombine.high %v1754_v34, %v1758_v35  ;;  %v1762_v41 = vld [vmem:[#allocation8 + $0x1c0] sm:$0xff] }
  0xb8   : > { %4823 = vmatpush1.bf16.msra.mxu0 %v8765_v51  ;;  %v1766_v42 = vld [vmem:[#allocation8 + $0x1e0] sm:$0xff] }
  0xb9   : > { %8691 = vmatmul.mubr.msk.bf16.gmra.mrb[4].mxu1 %vm476_vm1, %v10933_v45  ;;  %4824 = vmatprep.subr.bf16.mxu0 %v8774_v59  ;;  %v8813_v43 = vcombine.low %v1762_v41, %v1766_v42  ;;  %v8814_v46 = vcombine.high %v1762_v41, %v1766_v42  ;;  %v1770_v47 = vld [vmem:[#allocation8 + $0x200] sm:$0xff] }
  0xba   : > { %602 = vmatprep.mubr.bf16.mxu1 %v13082_v4  ;;  %v1774_v48 = vld [vmem:[#allocation8 + $0x220] sm:$0xff] }
  0xbb   : > { %8725 = vmatmul.mubr.msk.bf16.gmra.mrb[4].mxu0 %vm476_vm1, %v10933_v45  ;;  %v364_v49 = vld [vmem:[%s10884_s9 + $0x80] sm:$0xff]  ;;  %v8822_v51 = vcombine.high %v1770_v47, %v1774_v48  ;;  %v8821_v54 = vcombine.low %v1770_v47, %v1774_v48  ;;  %v367_v62 = vld [vmem:[%s10884_s9 + $0x98] sm:$0xff] }
  0xbc   : > { %988 = vmatprep.mubr.bf16.mxu0 %v13082_v4  ;;  %4825 = vmatpush1.bf16.msra.mxu0 %v8773_v58  ;;  %v11004_v52 = vpack.c.bf16 %v365_v50, %v364_v49  ;;  %v1778_v55 = vld [vmem:[#allocation8 + $0x240] sm:$0xff] }
  0xbd   : > { %4826 = vmatprep.subr.bf16.mxu0 %v8782_v3  ;;  %v1782_v56 = vld [vmem:[#allocation8 + $0x260] sm:$0xff] }
  0xbe   : > { %v8830_v57 = vcombine.high %v1778_v55, %v1782_v56  ;;  %v1786_v58 = vld [vmem:[#allocation8 + $0x280] sm:$0xff]  ;;  %v8829_v63 = vcombine.low %v1778_v55, %v1782_v56  ;;  %v374_v56 = vld [vmem:[%s10884_s9 + $0xd0] sm:$0xff] }
  0xbf   : > { %v1790_v59 = vld [vmem:[#allocation8 + $0x2a0] sm:$0xff] }
  0xc0   : > { %4827 = vmatpush1.bf16.msra.mxu0 %v8781_v2  ;;  %v8838_v0 = vcombine.high %v1786_v58, %v1790_v59  ;;  %v11014_v2 = vpack.c.bf16 %v367_v62, %v366_v61  ;;  %v8837_v3 = vcombine.low %v1786_v58, %v1790_v59  ;;  %v1794_v7 = vld [vmem:[#allocation8 + $0x2c0] sm:$0xff]  ;;  %v377_v61 = vld [vmem:[%s10884_s9 + $0xe8] sm:$0xff] }
  0xc1   : > { %8692 = vmatmul.mubr.msk.bf16.gmra.mrb[8].mxu1 %vm476_vm1, %v10944_v53  ;;  %4828 = vmatprep.subr.bf16.mxu0 %v8790_v22  ;;  %v1798_v8 = vld [vmem:[#allocation8 + $0x2e0] sm:$0xff] }
  0xc2   : > { %612 = vmatprep.mubr.bf16.mxu1 %v13082_v4  ;;  %v8846_v9 = vcombine.high %v1794_v7, %v1798_v8  ;;  %v1802_v16 = vld [vmem:[#allocation8 + $0x300] sm:$0xff]  ;;  %v8845_v25 = vcombine.low %v1794_v7, %v1798_v8 }
  0xc3   : > { %8726 = vmatmul.mubr.msk.bf16.gmra.mrb[8].mxu0 %vm476_vm1, %v10944_v53  ;;  %v368_v22 = vld [vmem:[%s10884_s9 + $0xa0] sm:$0xff]  ;;  %v371_v37 = vld [vmem:[%s10884_s9 + $0xb8] sm:$0xff] }
  0xc4   : > { %998 = vmatprep.mubr.bf16.mxu0 %v13082_v4  ;;  %4829 = vmatpush1.bf16.msra.mxu0 %v8789_v17  ;;  %v1806_v17 = vld [vmem:[#allocation8 + $0x320] sm:$0xff]  ;;  %v11024_v30 = vpack.c.bf16 %v369_v24, %v368_v22  ;;  %v11034_v42 = vpack.c.bf16 %v371_v37, %v370_v36  ;;  %v11098_v22 = vld [vmem:[#allocation8 + $0x28] sm:$0xff] }
  0xc5   : > { %4830 = vmatprep.subr.bf16.mxu0 %v8798_v32  ;;  %v8854_v28 = vcombine.high %v1802_v16, %v1806_v17  ;;  %v1810_v32 = vld [vmem:[#allocation8 + $0x340] sm:$0xff] }
  0xc6   : > { %v1814_v34 = vld [vmem:[#allocation8 + $0x360] sm:$0xff] }
  0xc7   : > { %v8862_v35 = vcombine.high %v1810_v32, %v1814_v34  ;;  %v1822_v41 = vld [vmem:[#allocation8 + $0x3a0] sm:$0xff] }
  0xc8   : > { %4831 = vmatpush1.bf16.msra.mxu0 %v8797_v31  ;;  %v8853_v31 = vcombine.low %v1802_v16, %v1806_v17  ;;  %v1826_v47 = vld [vmem:[#allocation8 + $0x3c0] sm:$0xff] }
  0xc9   : > { %8693 = vmatmul.mubr.msk.bf16.gmra.mrb[12].mxu1 %vm476_vm1, %v10954_v60  ;;  %4832 = vmatprep.subr.bf16.mxu0 %v8806_v39  ;;  %v1818_v39 = vld [vmem:[#allocation8 + $0x380] sm:$0xff] }
  0xca   : > { %622 = vmatprep.mubr.bf16.mxu1 %v13082_v4  ;;  %v1830_v48 = vld [vmem:[#allocation8 + $0x3e0] sm:$0xff] }
  0xcb   : > { %8727 = vmatmul.mubr.msk.bf16.gmra.mrb[12].mxu0 %vm476_vm1, %v10954_v60  ;;  %v8878_v49 = vcombine.high %v1826_v47, %v1830_v48  ;;  %v372_v50 = vld [vmem:[%s10884_s9 + $0xc0] sm:$0xff] }
  0xcc   : > { %1008 = vmatprep.mubr.bf16.mxu0 %v13082_v4  ;;  %4833 = vmatpush1.bf16.msra.mxu0 %v8805_v38  ;;  %v8861_v38 = vcombine.low %v1810_v32, %v1814_v34  ;;  %v376_v59 = vld [vmem:[%s10884_s9 + $0xe0] sm:$0xff] }
  0xcd   : > { %4834 = vmatprep.subr.bf16.mxu0 %v8814_v46  ;;  %v8869_v46 = vcombine.low %v1818_v39, %v1822_v41  ;;  %v11064_v62 = vpack.c.bf16 %v377_v61, %v376_v59  ;;  %v11086_v7 = vld [vmem:[#allocation8 + $0x400] sm:$0xff] }
  0xce   : > { %v11088_v8 = vld [vmem:[#allocation8 + $0x420] sm:$0xff] }
  0xcf   : > { %v8885_v16 = vcombine.low %v11086_v7, %v11088_v8  ;;  %v8886_v17 = vcombine.high %v11086_v7, %v11088_v8 }
  0xd0   : > { %4835 = vmatpush1.bf16.msra.mxu0 %v8813_v43  ;;  %v8870_v43 = vcombine.high %v1818_v39, %v1822_v41 }
  0xd1   : > { %8694 = vmatmul.mubr.msk.bf16.gmra.mrb[16].mxu1 %vm476_vm1, %v10964_v6  ;;  %4836 = vmatprep.subr.bf16.mxu0 %v8822_v51  ;;  %v373_v51 = vld [vmem:[%s10884_s9 + $0xc8] sm:$0xff] }
  0xd2   : > { %632 = vmatprep.mubr.bf16.mxu1 %v13082_v4  ;;  %v11044_v55 = vpack.c.bf16 %v373_v51, %v372_v50  ;;  %v1842_v51 = vld [vmem:[#allocation8 + $0x440] sm:$0xff] }
  0xd3   : > { %8728 = vmatmul.mubr.msk.bf16.gmra.mrb[16].mxu0 %vm476_vm1, %v10964_v6 }
  0xd4   : > { %1018 = vmatprep.mubr.bf16.mxu0 %v13082_v4  ;;  %4837 = vmatpush1.bf16.msra.mxu0 %v8821_v54  ;;  %v8877_v54 = vcombine.low %v1826_v47, %v1830_v48 }
  0xd5   : > { %4838 = vmatprep.subr.bf16.mxu0 %v8830_v57  ;;  %v375_v57 = vld [vmem:[%s10884_s9 + $0xd8] sm:$0xff] }
  0xd6   : > { %v11054_v58 = vpack.c.bf16 %v375_v57, %v374_v56 }
  0xd8   : > { %4839 = vmatpush1.bf16.msra.mxu0 %v8829_v63  ;;  %v378_v63 = vld [vmem:[%s10884_s9 + $0xf0] sm:$0xff] }
  0xd9   : > { %8695 = vmatmul.mubr.msk.bf16.gmra.mrb[20].mxu1 %vm476_vm1, %v10974_v23  ;;  %4840 = vmatprep.subr.bf16.mxu0 %v8838_v0  ;;  %v379_v0 = vld [vmem:[%s10884_s9 + $0xf8] sm:$0xff] }
  0xda   : > { %642 = vmatprep.mubr.bf16.mxu1 %v13082_v4 }
  0xdb   : > { %8729 = vmatmul.mubr.msk.bf16.gmra.mrb[20].mxu0 %vm476_vm1, %v10974_v23 }
  0xdc   : > { %1028 = vmatprep.mubr.bf16.mxu0 %v13082_v4  ;;  %4841 = vmatpush1.bf16.msra.mxu0 %v8837_v3  ;;  %v11074_v3 = vpack.c.bf16 %v379_v0, %v378_v63 }
  0xdd   : > { %4842 = vmatprep.subr.bf16.mxu0 %v8846_v9  ;;  %v11090_v9 = vld [vmem:[#allocation8 + $0x8] sm:$0xff] }
  0xe0   : > { %4843 = vmatpush1.bf16.msra.mxu0 %v8845_v25  ;;  %v8760_v25 = vcombine.high %v11090_v9, %v11098_v22 }
  0xe1   : > { %8696 = vmatmul.mubr.msk.bf16.gmra.mrb[24].mxu1 %vm476_vm1, %v10984_v33  ;;  %4844 = vmatprep.subr.bf16.mxu0 %v8854_v28  ;;  %v398_v28 = vld [vmem:[#allocation6] sm:$0xff] }
  0xe2   : > { %652 = vmatprep.mubr.bf16.mxu1 %v13082_v4  ;;  %v11141_v32 = vrot.slane %v398_v28, %v406_v10  ;;  %v11154_v10 = vrot.slane %v398_v28, %v422_v13 }
  0xe3   : > { %8730 = vmatmul.mubr.msk.bf16.gmra.mrb[24].mxu0 %vm476_vm1, %v10984_v33 }
  0xe4   : > { %1038 = vmatprep.mubr.bf16.mxu0 %v13082_v4  ;;  %4845 = vmatpush1.bf16.msra.mxu0 %v8853_v31 }
  0xe5   : > { %4846 = vmatprep.subr.bf16.mxu0 %v8862_v35 }
  0xe8   : > { %4847 = vmatpush1.bf16.msra.mxu0 %v8861_v38 }
  0xe9   : > { %8697 = vmatmul.mubr.msk.bf16.gmra.mrb[28].mxu1 %vm476_vm1, %v10994_v40  ;;  %4848 = vmatprep.subr.bf16.mxu0 %v8870_v43  ;;  %v11149_v43 = vrot.slane %v398_v28, %v418_v12 }
  0xea   : > { %662 = vmatprep.mubr.bf16.mxu1 %v13082_v4 }
  0xeb   : > { %8731 = vmatmul.mubr.msk.bf16.gmra.mrb[28].mxu0 %vm476_vm1, %v10994_v40 }
  0xec   : > { %1048 = vmatprep.mubr.bf16.mxu0 %v13082_v4  ;;  %4849 = vmatpush1.bf16.msra.mxu0 %v8869_v46 }
  0xed   : > { %4850 = vmatprep.subr.bf16.mxu0 %v8878_v49 }
  0xf0   : > { %4851 = vmatpush1.bf16.msra.mxu0 %v8877_v54  ;;  %v1846_v54 = vld [vmem:[#allocation8 + $0x460] sm:$0xff] }
  0xf1   : > { %8698 = vmatmul.mubr.msk.bf16.gmra.mrb[32].mxu1 %vm476_vm1, %v11004_v52  ;;  %5013 = vmatprep.subr.bf16.mxu0 %v8886_v17  ;;  %v8894_v17 = vcombine.high %v1842_v51, %v1846_v54 }
  0xf2   : > { %672 = vmatprep.mubr.bf16.mxu1 %v13082_v4 }
  0xf3   : > { %8732 = vmatmul.mubr.msk.bf16.gmra.mrb[32].mxu0 %vm476_vm1, %v11004_v52 }
  0xf4   : > { %1058 = vmatprep.mubr.bf16.mxu0 %v13082_v4 }
  0xf9   : > { %8699 = vmatmul.mubr.msk.bf16.gmra.mrb[36].mxu1 %vm476_vm1, %v11014_v2 }
  0xfa   : > { %682 = vmatprep.mubr.bf16.mxu1 %v13082_v4 }
  0xfb   : > { %8733 = vmatmul.mubr.msk.bf16.gmra.mrb[36].mxu0 %vm476_vm1, %v11014_v2 }
  0xfc   : > { %1068 = vmatprep.mubr.bf16.mxu0 %v13082_v4 }
 0x101   : > { %8700 = vmatmul.mubr.msk.bf16.gmra.mrb[40].mxu1 %vm476_vm1, %v11024_v30 }
 0x102   : > { %692 = vmatprep.mubr.bf16.mxu1 %v13082_v4 }
 0x103   : > { %8734 = vmatmul.mubr.msk.bf16.gmra.mrb[40].mxu0 %vm476_vm1, %v11024_v30 }
 0x104   : > { %1078 = vmatprep.mubr.bf16.mxu0 %v13082_v4 }
 0x109   : > { %8701 = vmatmul.mubr.msk.bf16.gmra.mrb[44].mxu1 %vm476_vm1, %v11034_v42 }
 0x10a   : > { %702 = vmatprep.mubr.bf16.mxu1 %v13082_v4 }
 0x10b   : > { %8735 = vmatmul.mubr.msk.bf16.gmra.mrb[44].mxu0 %vm476_vm1, %v11034_v42 }
 0x10c   : > { %1088 = vmatprep.mubr.bf16.mxu0 %v13082_v4 }
 0x111   : > { %8702 = vmatmul.mubr.msk.bf16.gmra.mrb[48].mxu1 %vm476_vm1, %v11044_v55 }
 0x112   : > { %712 = vmatprep.mubr.bf16.mxu1 %v13082_v4 }
 0x113   : > { %8736 = vmatmul.mubr.msk.bf16.gmra.mrb[48].mxu0 %vm476_vm1, %v11044_v55 }
 0x114   : > { %1098 = vmatprep.mubr.bf16.mxu0 %v13082_v4 }
 0x119   : > { %8703 = vmatmul.mubr.msk.bf16.gmra.mrb[52].mxu1 %vm476_vm1, %v11054_v58 }
 0x11a   : > { %722 = vmatprep.mubr.bf16.mxu1 %v13082_v4 }
 0x11b   : > { %8737 = vmatmul.mubr.msk.bf16.gmra.mrb[52].mxu0 %vm476_vm1, %v11054_v58 }
 0x11c   : > { %1108 = vmatprep.mubr.bf16.mxu0 %v13082_v4 }
 0x121   : > { %8704 = vmatmul.mubr.msk.bf16.gmra.mrb[56].mxu1 %vm476_vm1, %v11064_v62 }
 0x122   : > { %732 = vmatprep.mubr.bf16.mxu1 %v13082_v4 }
 0x123   : > { %8738 = vmatmul.mubr.msk.bf16.gmra.mrb[56].mxu0 %vm476_vm1, %v11064_v62 }
 0x124   : > { %1118 = vmatprep.mubr.bf16.mxu0 %v13082_v4 }
 0x129   : > { %8705 = vmatmul.mubr.msk.bf16.gmra.mrb[60].mxu1 %vm476_vm1, %v11074_v3 }
 0x12a   : > { %775 = vmatprep.mubr.bf16.mxu1 %v13082_v4 }
 0x12b   : > { %8739 = vmatmul.mubr.msk.bf16.gmra.mrb[60].mxu0 %vm476_vm1, %v11074_v3 }
 0x131   : > { %8707 = vmatmul.mubr.msk.bf16.vlgmr.msra.gmra.mrb[64].mxu1 %vm476_vm1, %v10919_v29 }
 0x132   : > { %1130 = vmatpush1.bf16.msra.mxu1 %v10931_v44  ;;  %785 = vmatprep.mubr.bf16.mxu1 %v13082_v4  ;;  %v11132_v44 = vsub.s32 0, %v10874_v5 }
 0x133   : > { %5592 = vmatprep.subr.bf16.mxu1 %v8760_v25 }
 0x134   : > { %13346 = vst [vmem:[#allocation24_spill] sm:$0xff] %v11132_v44  ;;  %v11135_v31 = vrot.slane %v398_v28, %v11132_v44 }
 0x139   : > { %8708 = vmatmul.mubr.msk.bf16.gmra.mrb[68].mxu1 %vm476_vm1, %v10933_v45 }
 0x13a   : > { %795 = vmatprep.mubr.bf16.mxu1 %v13082_v4 }
 0x141   : > { %8709 = vmatmul.mubr.msk.bf16.gmra.mrb[72].mxu1 %vm476_vm1, %v10944_v53 }
 0x142   : > { %805 = vmatprep.mubr.bf16.mxu1 %v13082_v4 }
 0x149   : > { %8710 = vmatmul.mubr.msk.bf16.gmra.mrb[76].mxu1 %vm476_vm1, %v10954_v60 }
 0x14a   : > { %815 = vmatprep.mubr.bf16.mxu1 %v13082_v4 }
 0x151   : > { %8711 = vmatmul.mubr.msk.bf16.gmra.mrb[80].mxu1 %vm476_vm1, %v10964_v6 }
 0x152   : > { %825 = vmatprep.mubr.bf16.mxu1 %v13082_v4 }
 0x159   : > { %8712 = vmatmul.mubr.msk.bf16.gmra.mrb[84].mxu1 %vm476_vm1, %v10974_v23 }
 0x15a   : > { %835 = vmatprep.mubr.bf16.mxu1 %v13082_v4 }
 0x161   : > { %8713 = vmatmul.mubr.msk.bf16.gmra.mrb[88].mxu1 %vm476_vm1, %v10984_v33 }
 0x162   : > { %845 = vmatprep.mubr.bf16.mxu1 %v13082_v4 }
 0x169   : > { %8714 = vmatmul.mubr.msk.bf16.gmra.mrb[92].mxu1 %vm476_vm1, %v10994_v40 }
 0x16a   : > { %855 = vmatprep.mubr.bf16.mxu1 %v13082_v4 }
 0x171   : > { %8715 = vmatmul.mubr.msk.bf16.gmra.mrb[96].mxu1 %vm476_vm1, %v11004_v52 }
 0x172   : > { %865 = vmatprep.mubr.bf16.mxu1 %v13082_v4 }
 0x179   : > { %8716 = vmatmul.mubr.msk.bf16.gmra.mrb[100].mxu1 %vm476_vm1, %v11014_v2 }
 0x17a   : > { %875 = vmatprep.mubr.bf16.mxu1 %v13082_v4 }
 0x181   : > { %8717 = vmatmul.mubr.msk.bf16.gmra.mrb[104].mxu1 %vm476_vm1, %v11024_v30 }
 0x182   : > { %885 = vmatprep.mubr.bf16.mxu1 %v13082_v4 }
 0x184   : > { %v584_v34 = vpop.f32.mrb[0].mxu1 }
 0x185   : > { %v585_v35 = vadd.f32 %v584_v34, %v11135_v31  ;;  %v586_v36 = vpop.f32.mrb[1].mxu1 }
 0x186   : > { %v588_v37 = vpop.f32.mrb[2].mxu1  ;;  %v587_v38 = vadd.f32 %v586_v36, %v11141_v32  ;;  %v970_v12 = vpop.f32.mrb[0].mxu0  ;;  %v1850_v36 = vld [vmem:[#allocation8 + $0x480] sm:$0xff] }
 0x187   : > { %v589_v39 = vadd.f32 %v588_v37, %v11135_v31  ;;  %v590_v41 = vpop.f32.mrb[3].mxu1  ;;  %v1322_v47 = vmax.f32 %v585_v35, 0.0  ;;  %v971_v13 = vadd.f32 %v970_v12, %v11149_v43  ;;  %v972_v61 = vpop.f32.mrb[1].mxu0  ;;  %v1854_v37 = vld [vmem:[#allocation8 + $0x4a0] sm:$0xff]  ;;  %v8893_v12 = vcombine.low %v1842_v51, %v1846_v54 }
 0x188   : > { %v591_v46 = vadd.f32 %v590_v41, %v11141_v32  ;;  %v1323_v49 = vmax.f32 %v587_v38, 0.0  ;;  %v973_v25 = vadd.f32 %v972_v61, %v11154_v10  ;;  %v974_v28 = vpop.f32.mrb[2].mxu0 }
 0x189   : > { %v1330_v48 = vmax.f32 %v589_v39, 0.0  ;;  %8718 = vmatmul.mubr.msk.bf16.gmra.mrb[108].mxu1 %vm476_vm1, %v11034_v42  ;;  %v1326_v38 = vmax.f32 %v971_v13, 0.0  ;;  %v975_v39 = vadd.f32 %v974_v28, %v11149_v43  ;;  %v976_v41 = vpop.f32.mrb[3].mxu0 }
 0x18a   : > { %v1331_v50 = vmax.f32 %v591_v46, 0.0  ;;  %895 = vmatprep.mubr.bf16.mxu1 %v13082_v4 }
 0x18b   : > { %v11159_v56 = vpack.c.bf16 %v1330_v48, %v1322_v47  ;;  %v1327_v48 = vmax.f32 %v973_v25, 0.0 }
 0x18c   : > { %v594_v57 = vpop.f32.mrb[4].mxu1  ;;  %v11161_v59 = vpack.c.bf16 %v1331_v50, %v1323_v49  ;;  %v977_v49 = vadd.f32 %v976_v41, %v11154_v10  ;;  %v1858_v41 = vld [vmem:[#allocation8 + $0x4c0] sm:$0xff] }
 0x18d   : > { %13347 = vst [vmem:[#allocation25_spill] sm:$0xff] %v11159_v56  ;;  %v596_v63 = vpop.f32.mrb[5].mxu1  ;;  %v595_v0 = vadd.f32 %v594_v57, %v11135_v31  ;;  %v1334_v57 = vmax.f32 %v975_v39, 0.0 }
 0x18e   : > { %13348 = vst [vmem:[#allocation26_spill] sm:$0xff] %v11161_v59  ;;  %v598_v34 = vpop.f32.mrb[6].mxu1  ;;  %4852 = vmatprep.mubr.bf16.mxu0 %v11161_v59  ;;  %v597_v35 = vadd.f32 %v596_v63, %v11141_v32  ;;  %v8902_v63 = vcombine.high %v1850_v36, %v1854_v37  ;;  %v1335_v28 = vmax.f32 %v977_v49, 0.0 }
 0x18f   : > { %v600_v46 = vpop.f32.mrb[7].mxu1  ;;  %4853 = vmatmul.mubr.bf16.vlgmr.msra.gmra.mrb[64].mxu0 %v11159_v56  ;;  %v599_v47 = vadd.f32 %v598_v34, %v11135_v31  ;;  %v1338_v13 = vmax.f32 %v595_v0, 0.0  ;;  %v11179_v1 = vpack.c.bf16 %v1334_v57, %v1326_v38  ;;  %v8901_v0 = vcombine.low %v1850_v36, %v1854_v37 }
 0x190   : > { %v601_v50 = vadd.f32 %v600_v46, %v11141_v32  ;;  %5014 = vmatpush1.bf16.msra.mxu0 %v8885_v16  ;;  %v1339_v34 = vmax.f32 %v597_v35, 0.0  ;;  %v1862_v46 = vld [vmem:[#allocation8 + $0x4e0] sm:$0xff]  ;;  %v11183_v8 = vpack.c.bf16 %v1335_v28, %v1327_v48  ;;  %v980_v16 = vpop.f32.mrb[4].mxu0 }
 0x191   : > { %8719 = vmatmul.mubr.msk.bf16.gmra.mrb[112].mxu1 %vm476_vm1, %v11044_v55  ;;  %v1346_v61 = vmax.f32 %v599_v47, 0.0  ;;  %5015 = vmatprep.subr.bf16.mxu0 %v8894_v17  ;;  %13349 = vst [vmem:[#allocation27_spill] sm:$0xff] %v11179_v1  ;;  %v981_v17 = vadd.f32 %v980_v16, %v11149_v43  ;;  %v982_v35 = vpop.f32.mrb[5].mxu0  ;;  %v8910_v49 = vcombine.high %v1858_v41, %v1862_v46  ;;  %v11344_v1 = vld [vmem:[#allocation8 + $0x108] sm:$0xff] }
 0x192   : > { %v1347_v25 = vmax.f32 %v601_v50, 0.0  ;;  %905 = vmatprep.mubr.bf16.mxu1 %v13082_v4  ;;  %13351 = vst [vmem:[#allocation29_spill] sm:$0xff] %v11183_v8  ;;  %v983_v38 = vadd.f32 %v982_v35, %v11154_v10  ;;  %v984_v50 = vpop.f32.mrb[6].mxu0 }
 0x193   : > { %v11181_v7 = vpack.c.bf16 %v1346_v61, %v1338_v13  ;;  %v1866_v13 = vld [vmem:[#allocation8 + $0x500] sm:$0xff]  ;;  %v985_v36 = vadd.f32 %v984_v50, %v11149_v43  ;;  %v986_v37 = vpop.f32.mrb[7].mxu0 }
 0x194   : > { %v604_v51 = vpop.f32.mrb[8].mxu1  ;;  %v11185_v54 = vpack.c.bf16 %v1347_v25, %v1339_v34  ;;  %5016 = vmatpush1.bf16.msra.mxu0 %v8893_v12  ;;  %v1870_v61 = vld [vmem:[#allocation8 + $0x520] sm:$0xff]  ;;  %v1342_v12 = vmax.f32 %v981_v17, 0.0  ;;  %v1343_v34 = vmax.f32 %v983_v38, 0.0  ;;  %v987_v25 = vadd.f32 %v986_v37, %v11154_v10 }
 0x195   : > { %13350 = vst [vmem:[#allocation28_spill] sm:$0xff] %v11181_v7  ;;  %v606_v39 = vpop.f32.mrb[9].mxu1  ;;  %v605_v47 = vadd.f32 %v604_v51, %v11135_v31  ;;  %5017 = vmatprep.subr.bf16.mxu0 %v8902_v63  ;;  %v8909_v51 = vcombine.low %v1858_v41, %v1862_v46  ;;  %v1350_v35 = vmax.f32 %v985_v36, 0.0  ;;  %v8918_v50 = vcombine.high %v1866_v13, %v1870_v61  ;;  %v1874_v38 = vld [vmem:[#allocation8 + $0x540] sm:$0xff] }
 0x196   : > { %13352 = vst [vmem:[#allocation30_spill] sm:$0xff] %v11185_v54  ;;  %v608_v57 = vpop.f32.mrb[10].mxu1  ;;  %4862 = vmatprep.mubr.bf16.mxu0 %v11185_v54  ;;  %v607_v48 = vadd.f32 %v606_v39, %v11141_v32  ;;  %v1351_v15 = vmax.f32 %v987_v25, 0.0  ;;  %v990_v46 = vpop.f32.mrb[8].mxu0 }
 0x197   : > { %v610_v28 = vpop.f32.mrb[11].mxu1  ;;  %4863 = vmatmul.mubr.bf16.gmra.mrb[68].mxu0 %v11181_v7  ;;  %v609_v63 = vadd.f32 %v608_v57, %v11135_v31  ;;  %v1354_v17 = vmax.f32 %v605_v47, 0.0  ;;  %v1878_v57 = vld [vmem:[#allocation8 + $0x560] sm:$0xff]  ;;  %v11200_v37 = vpack.c.bf16 %v1350_v35, %v1342_v12  ;;  %v8917_v47 = vcombine.low %v1866_v13, %v1870_v61 }
 0x198   : > { %v611_v16 = vadd.f32 %v610_v28, %v11141_v32  ;;  %5018 = vmatpush1.bf16.msra.mxu0 %v8901_v0  ;;  %v1355_v14 = vmax.f32 %v607_v48, 0.0  ;;  %v11204_v41 = vpack.c.bf16 %v1351_v15, %v1343_v34  ;;  %v992_v48 = vpop.f32.mrb[9].mxu0 }
 0x199   : > { %8720 = vmatmul.mubr.msk.bf16.gmra.mrb[116].mxu1 %vm476_vm1, %v11054_v58  ;;  %v1362_v39 = vmax.f32 %v609_v63, 0.0  ;;  %5019 = vmatprep.subr.bf16.mxu0 %v8910_v49  ;;  %13353 = vst [vmem:[#allocation31_spill] sm:$0xff] %v11200_v37  ;;  %v991_v49 = vadd.f32 %v990_v46, %v11149_v43  ;;  %v993_v12 = vadd.f32 %v992_v48, %v11154_v10  ;;  %v994_v35 = vpop.f32.mrb[10].mxu0 }
 0x19a   : > { %v1363_v11 = vmax.f32 %v611_v16, 0.0  ;;  %915 = vmatprep.mubr.bf16.mxu1 %v13082_v4  ;;  %13355 = vst [vmem:[#allocation33_spill] sm:$0xff] %v11204_v41  ;;  %v8926_v16 = vcombine.high %v1874_v38, %v1878_v57  ;;  %v995_v13 = vadd.f32 %v994_v35, %v11149_v43  ;;  %v996_v61 = vpop.f32.mrb[11].mxu0  ;;  %v8925_v48 = vcombine.low %v1874_v38, %v1878_v57 }
 0x19b   : > { %v11202_v28 = vpack.c.bf16 %v1362_v39, %v1354_v17  ;;  %v1358_v34 = vmax.f32 %v991_v49, 0.0  ;;  %v997_v46 = vadd.f32 %v996_v61, %v11154_v10 }
 0x19c   : > { %v614_v0 = vpop.f32.mrb[12].mxu1  ;;  %v11206_v36 = vpack.c.bf16 %v1363_v11, %v1355_v14  ;;  %5020 = vmatpush1.bf16.msra.mxu0 %v8909_v51  ;;  %v1882_v11 = vld [vmem:[#allocation8 + $0x580] sm:$0xff]  ;;  %v1366_v24 = vmax.f32 %v995_v13, 0.0 }
 0x19d   : > { %13354 = vst [vmem:[#allocation32_spill] sm:$0xff] %v11202_v28  ;;  %v616_v63 = vpop.f32.mrb[13].mxu1  ;;  %v615_v25 = vadd.f32 %v614_v0, %v11135_v31  ;;  %5021 = vmatprep.subr.bf16.mxu0 %v8918_v50  ;;  %v1886_v14 = vld [vmem:[#allocation8 + $0x5a0] sm:$0xff]  ;;  %v1359_v50 = vmax.f32 %v993_v12, 0.0  ;;  %v1367_v4 = vmax.f32 %v997_v46, 0.0 }
 0x19e   : > { %13356 = vst [vmem:[#allocation34_spill] sm:$0xff] %v11206_v36  ;;  %v618_v17 = vpop.f32.mrb[14].mxu1  ;;  %4872 = vmatprep.mubr.bf16.mxu0 %v11206_v36  ;;  %v617_v15 = vadd.f32 %v616_v63, %v11141_v32  ;;  %v8934_v35 = vcombine.high %v1882_v11, %v1886_v14  ;;  %v1890_v12 = vld [vmem:[#allocation8 + $0x5c0] sm:$0xff]  ;;  %v11221_v61 = vpack.c.bf16 %v1366_v24, %v1358_v34  ;;  %v1000_v57 = vpop.f32.mrb[12].mxu0 }
 0x19f   : > { %v620_v51 = vpop.f32.mrb[15].mxu1  ;;  %4873 = vmatmul.mubr.bf16.gmra.mrb[72].mxu0 %v11202_v28  ;;  %v619_v39 = vadd.f32 %v618_v17, %v11135_v31  ;;  %v1370_v49 = vmax.f32 %v615_v25, 0.0  ;;  %v1894_v17 = vld [vmem:[#allocation8 + $0x5e0] sm:$0xff]  ;;  %v11225_v38 = vpack.c.bf16 %v1367_v4, %v1359_v50  ;;  %v8933_v25 = vcombine.low %v1882_v11, %v1886_v14 }
 0x1a0   : > { %v621_v0 = vadd.f32 %v620_v51, %v11141_v32  ;;  %5022 = vmatpush1.bf16.msra.mxu0 %v8917_v47  ;;  %v1371_v27 = vmax.f32 %v617_v15, 0.0  ;;  %13358 = vst [vmem:[#allocation35_spill] sm:$0xff] %v11221_v61  ;;  %v1002_v15 = vpop.f32.mrb[13].mxu0  ;;  %v11278_v61 = vld [vmem:[#allocation8 + $0xa8] sm:$0xff] }
 0x1a1   : > { %8721 = vmatmul.mubr.msk.bf16.gmra.mrb[120].mxu1 %vm476_vm1, %v11064_v62  ;;  %v1378_v63 = vmax.f32 %v619_v39, 0.0  ;;  %5023 = vmatprep.subr.bf16.mxu0 %v8926_v16  ;;  %13360 = vst [vmem:[#allocation37_spill] sm:$0xff] %v11225_v38  ;;  %v1001_v16 = vadd.f32 %v1000_v57, %v11149_v43  ;;  %v1003_v24 = vadd.f32 %v1002_v15, %v11154_v10  ;;  %v1004_v34 = vpop.f32.mrb[14].mxu0 }
 0x1a2   : > { %v1379_v26 = vmax.f32 %v621_v0, 0.0  ;;  %925 = vmatprep.mubr.bf16.mxu1 %v13357_v21  ;;  %v8942_v0 = vcombine.high %v1890_v12, %v1894_v17  ;;  %v1005_v11 = vadd.f32 %v1004_v34, %v11149_v43  ;;  %v1006_v14 = vpop.f32.mrb[15].mxu0  ;;  %v8941_v15 = vcombine.low %v1890_v12, %v1894_v17 }
 0x1a3   : > { %v11223_v51 = vpack.c.bf16 %v1378_v63, %v1370_v49  ;;  %v1374_v50 = vmax.f32 %v1001_v16, 0.0  ;;  %v1007_v57 = vadd.f32 %v1006_v14, %v11154_v10 }
 0x1a4   : > { %v624_v47 = vpop.f32.mrb[16].mxu1  ;;  %v11227_v13 = vpack.c.bf16 %v1379_v26, %v1371_v27  ;;  %5024 = vmatpush1.bf16.msra.mxu0 %v8925_v48  ;;  %v1898_v26 = vld [vmem:[#allocation8 + $0x600] sm:$0xff]  ;;  %v1382_v20 = vmax.f32 %v1005_v11, 0.0 }
 0x1a5   : > { %13359 = vst [vmem:[#allocation36_spill] sm:$0xff] %v11223_v51  ;;  %v626_v39 = vpop.f32.mrb[17].mxu1  ;;  %v625_v46 = vadd.f32 %v624_v47, %v11135_v31  ;;  %5025 = vmatprep.subr.bf16.mxu0 %v8934_v35  ;;  %v1902_v27 = vld [vmem:[#allocation8 + $0x620] sm:$0xff]  ;;  %v1375_v35 = vmax.f32 %v1003_v24, 0.0  ;;  %v1383_v19 = vmax.f32 %v1007_v57, 0.0 }
 0x1a6   : > { %13361 = vst [vmem:[#allocation38_spill] sm:$0xff] %v11227_v13  ;;  %v628_v49 = vpop.f32.mrb[18].mxu1  ;;  %4882 = vmatprep.mubr.bf16.mxu0 %v11227_v13  ;;  %v627_v4 = vadd.f32 %v626_v39, %v11141_v32  ;;  %v8950_v34 = vcombine.high %v1898_v26, %v1902_v27  ;;  %v11242_v24 = vld [vmem:[#allocation8 + $0x640] sm:$0xff]  ;;  %v11246_v14 = vpack.c.bf16 %v1382_v20, %v1374_v50 }
 0x1a7   : > { %v630_v48 = vpop.f32.mrb[19].mxu1  ;;  %4883 = vmatmul.mubr.bf16.gmra.mrb[76].mxu0 %v11223_v51  ;;  %v629_v63 = vadd.f32 %v628_v49, %v11135_v31  ;;  %v1386_v16 = vmax.f32 %v625_v46, 0.0  ;;  %v11244_v49 = vld [vmem:[#allocation8 + $0x660] sm:$0xff]  ;;  %v11250_v17 = vpack.c.bf16 %v1383_v19, %v1375_v35 }
 0x1a8   : > { %v631_v47 = vadd.f32 %v630_v48, %v11141_v32  ;;  %5026 = vmatpush1.bf16.msra.mxu0 %v8933_v25  ;;  %v1387_v18 = vmax.f32 %v627_v4, 0.0  ;;  %13362 = vst [vmem:[#allocation39_spill] sm:$0xff] %v11246_v14  ;;  %v1010_v25 = vpop.f32.mrb[16].mxu0  ;;  %v11256_v4 = vld [vmem:[#allocation8 + $0x68] sm:$0xff]  ;;  %v8949_v48 = vcombine.low %v1898_v26, %v1902_v27  ;;  %v8958_v19 = vcombine.high %v11242_v24, %v11244_v49  ;;  %v11267_v26 = vld [vmem:[#allocation8 + $0x6a0] sm:$0xff] }
 0x1a9   : > { %8722 = vmatmul.mubr.msk.bf16.gmra.mrb[124].mxu1 %vm476_vm1, %v11074_v3  ;;  %v1394_v39 = vmax.f32 %v629_v63, 0.0  ;;  %5027 = vmatprep.subr.bf16.mxu0 %v8942_v0  ;;  %13364 = vst [vmem:[#allocation41_spill] sm:$0xff] %v11250_v17  ;;  %v11254_v0 = vld [vmem:[#allocation8 + $0x48] sm:$0xff]  ;;  %v1011_v63 = vadd.f32 %v1010_v25, %v11149_v43  ;;  %v1012_v57 = vpop.f32.mrb[17].mxu0 }
 0x1aa   : > { %v1395_v44 = vmax.f32 %v631_v47, 0.0  ;;  %1161 = vmatprep.mubr.bf16.mxu1 %v13357_v21  ;;  %v1013_v50 = vadd.f32 %v1012_v57, %v11154_v10  ;;  %v11276_v17 = vld [vmem:[#allocation8 + $0x88] sm:$0xff] }
 0x1ab   : > { %v11248_v12 = vpack.c.bf16 %v1394_v39, %v1386_v16  ;;  %v1390_v27 = vmax.f32 %v1011_v63, 0.0  ;;  %v8957_v63 = vcombine.low %v11242_v24, %v11244_v49  ;;  %v8767_v24 = vcombine.low %v11254_v0, %v11256_v4  ;;  %v11292_v49 = vld [vmem:[#allocation8 + $0x6c0] sm:$0xff] }
 0x1ac   : > { %v634_v46 = vpop.f32.mrb[20].mxu1  ;;  %v11252_v11 = vpack.c.bf16 %v1395_v44, %v1387_v18  ;;  %5028 = vmatpush1.bf16.msra.mxu0 %v8941_v15  ;;  %v1014_v18 = vpop.f32.mrb[18].mxu0  ;;  %v11265_v15 = vld [vmem:[#allocation8 + $0x680] sm:$0xff]  ;;  %v1391_v57 = vmax.f32 %v1013_v50, 0.0 }
 0x1ad   : > { %13363 = vst [vmem:[#allocation40_spill] sm:$0xff] %v11248_v12  ;;  %v636_v47 = vpop.f32.mrb[21].mxu1  ;;  %v635_v20 = vadd.f32 %v634_v46, %v11135_v31  ;;  %5029 = vmatprep.subr.bf16.mxu0 %v8950_v34  ;;  %v1015_v16 = vadd.f32 %v1014_v18, %v11149_v43  ;;  %v1016_v39 = vpop.f32.mrb[19].mxu0  ;;  %v8768_v46 = vcombine.high %v11254_v0, %v11256_v4 }
 0x1ae   : > { %13365 = vst [vmem:[#allocation42_spill] sm:$0xff] %v11252_v11  ;;  %v638_v44 = vpop.f32.mrb[22].mxu1  ;;  %4892 = vmatprep.mubr.bf16.mxu0 %v11252_v11  ;;  %v637_v35 = vadd.f32 %v636_v47, %v11141_v32  ;;  %v1017_v14 = vadd.f32 %v1016_v39, %v11154_v10  ;;  %v8966_v50 = vcombine.high %v11265_v15, %v11267_v26 }
 0x1af   : > { %v640_v34 = vpop.f32.mrb[23].mxu1  ;;  %4893 = vmatmul.mubr.bf16.gmra.mrb[80].mxu0 %v11248_v12  ;;  %v639_v25 = vadd.f32 %v638_v44, %v11135_v31  ;;  %v1398_v18 = vmax.f32 %v1015_v16, 0.0  ;;  %v1402_v44 = vmax.f32 %v635_v20, 0.0  ;;  %v1020_v16 = vpop.f32.mrb[20].mxu0 }
 0x1b0   : > { %v641_v47 = vadd.f32 %v640_v34, %v11141_v32  ;;  %5030 = vmatpush1.bf16.msra.mxu0 %v8949_v48  ;;  %v1399_v39 = vmax.f32 %v1017_v14, 0.0  ;;  %v13366_v34 = vcombine.low %v11090_v9, %v11098_v22  ;;  %v1403_v37 = vmax.f32 %v637_v35, 0.0  ;;  %v11302_v22 = vld [vmem:[#allocation8 + $0xc8] sm:$0xff] }
 0x1b1   : > { %8741 = vmatmul.mubr.msk.bf16.vlgmr.msra.gmra.mrb[128].mxu1 %vm476_vm1, %v10919_v29  ;;  %v1410_v38 = vmax.f32 %v639_v25, 0.0  ;;  %5031 = vmatprep.subr.bf16.mxu0 %v8958_v19  ;;  %v11294_v29 = vld [vmem:[#allocation8 + $0x6e0] sm:$0xff]  ;;  %v11296_v20 = vpack.c.bf16 %v1398_v18, %v1390_v27  ;;  %v8776_v9 = vcombine.high %v11276_v17, %v11278_v61  ;;  %v11304_v14 = vld [vmem:[#allocation8 + $0xe8] sm:$0xff]  ;;  %v8775_v27 = vcombine.low %v11276_v17, %v11278_v61 }
 0x1b2   : > { %5593 = vmatpush1.bf16.msra.mxu1 %v13366_v34  ;;  %v1411_v48 = vmax.f32 %v641_v47, 0.0  ;;  %1171 = vmatprep.mubr.bf16.mxu1 %v13357_v21  ;;  %v11306_v35 = vpack.c.bf16 %v1399_v39, %v1391_v57  ;;  %v1021_v25 = vadd.f32 %v1020_v16, %v11149_v43  ;;  %v11315_v47 = vld [vmem:[#allocation8 + $0x800] sm:$0xff]  ;;  %v11319_v57 = vld [vmem:[#allocation8 + $0x408] sm:$0xff]  ;;  %v8974_v61 = vcombine.high %v11292_v49, %v11294_v29 }
 0x1b3   : > { %13367 = vst [vmem:[#allocation43_spill] sm:$0xff] %v11296_v20  ;;  %v11298_v19 = vpack.c.bf16 %v1410_v38, %v1402_v44  ;;  %5594 = vmatprep.subr.bf16.mxu1 %v8768_v46  ;;  %v8965_v38 = vcombine.low %v11265_v15, %v11267_v26  ;;  %v1022_v46 = vpop.f32.mrb[21].mxu0  ;;  %v11317_v18 = vld [vmem:[#allocation8 + $0x820] sm:$0xff]  ;;  %v11327_v26 = vld [vmem:[#allocation8 + $0x428] sm:$0xff]  ;;  %v8973_v20 = vcombine.low %v11292_v49, %v11294_v29 }
 0x1b4   : > { %13369 = vst [vmem:[#allocation45_spill] sm:$0xff] %v11306_v35  ;;  %v644_v0 = vpop.f32.mrb[24].mxu1  ;;  %v11308_v4 = vpack.c.bf16 %v1411_v48, %v1403_v37  ;;  %5032 = vmatpush1.bf16.msra.mxu0 %v8957_v63  ;;  %v1023_v17 = vadd.f32 %v1022_v46, %v11154_v10  ;;  %v1024_v63 = vpop.f32.mrb[22].mxu0  ;;  %v11331_v48 = vld [vmem:[#allocation8 + $0x700] sm:$0xff]  ;;  %v1406_v16 = vmax.f32 %v1021_v25, 0.0 }
 0x1b5   : > { %13368 = vst [vmem:[#allocation44_spill] sm:$0xff] %v11298_v19  ;;  %v646_v44 = vpop.f32.mrb[25].mxu1  ;;  %v645_v37 = vadd.f32 %v644_v0, %v11135_v31  ;;  %5033 = vmatprep.subr.bf16.mxu0 %v8966_v50  ;;  %v11333_v50 = vld [vmem:[#allocation8 + $0x720] sm:$0xff]  ;;  %v1025_v0 = vadd.f32 %v1024_v63, %v11149_v43  ;;  %v1026_v46 = vpop.f32.mrb[23].mxu0  ;;  %v11346_v63 = vld [vmem:[#allocation8 + $0x128] sm:$0xff] }
 0x1b6   : > { %13370 = vst [vmem:[#allocation46_spill] sm:$0xff] %v11308_v4  ;;  %v648_v39 = vpop.f32.mrb[26].mxu1  ;;  %4902 = vmatprep.mubr.bf16.mxu0 %v11308_v4  ;;  %5595 = vmatpush1.bf16.msra.mxu1 %v8767_v24  ;;  %v647_v34 = vadd.f32 %v646_v44, %v11141_v32  ;;  %v8784_v24 = vcombine.high %v11302_v22, %v11304_v14  ;;  %v1407_v44 = vmax.f32 %v1023_v17, 0.0  ;;  %v11357_v49 = vld [vmem:[#allocation8 + $0x740] sm:$0xff] }
 0x1b7   : > { %v650_v15 = vpop.f32.mrb[27].mxu1  ;;  %4903 = vmatmul.mubr.bf16.gmra.mrb[84].mxu0 %v11298_v19  ;;  %v649_v35 = vadd.f32 %v648_v39, %v11135_v31  ;;  %5596 = vmatprep.subr.bf16.mxu1 %v8776_v9  ;;  %v1027_v41 = vadd.f32 %v1026_v46, %v11154_v10  ;;  %v1414_v8 = vmax.f32 %v1025_v0, 0.0  ;;  %v1418_v9 = vmax.f32 %v645_v37, 0.0  ;;  %v11359_v29 = vld [vmem:[#allocation8 + $0x760] sm:$0xff]  ;;  %v11371_v0 = vld [vmem:[#allocation8 + $0x148] sm:$0xff] }
 0x1b8   : > { %v651_v25 = vadd.f32 %v650_v15, %v11141_v32  ;;  %5034 = vmatpush1.bf16.msra.mxu0 %v8965_v38  ;;  %v8982_v17 = vcombine.high %v11331_v48, %v11333_v50  ;;  %v1419_v15 = vmax.f32 %v647_v34, 0.0  ;;  %v8783_v38 = vcombine.low %v11302_v22, %v11304_v14  ;;  %v11373_v22 = vld [vmem:[#allocation8 + $0x168] sm:$0xff] }
 0x1b9   : > { %8742 = vmatmul.mubr.msk.bf16.gmra.mrb[132].mxu1 %vm476_vm1, %v10933_v45  ;;  %v1426_v39 = vmax.f32 %v649_v35, 0.0  ;;  %5035 = vmatprep.subr.bf16.mxu0 %v8974_v61  ;;  %v1415_v46 = vmax.f32 %v1027_v41, 0.0  ;;  %v11361_v45 = vpack.c.bf16 %v1414_v8, %v1406_v16  ;;  %v8792_v41 = vcombine.high %v11344_v1, %v11346_v63  ;;  %v1030_v61 = vpop.f32.mrb[24].mxu0 }
 0x1ba   : > { %v1427_v19 = vmax.f32 %v651_v25, 0.0  ;;  %1181 = vmatprep.mubr.bf16.mxu1 %v13357_v21  ;;  %5597 = vmatpush1.bf16.msra.mxu1 %v8775_v27  ;;  %v8981_v8 = vcombine.low %v11331_v48, %v11333_v50  ;;  %v1031_v14 = vadd.f32 %v1030_v61, %v11149_v43  ;;  %v1032_v16 = vpop.f32.mrb[25].mxu0  ;;  %v8791_v48 = vcombine.low %v11344_v1, %v11346_v63  ;;  %v11386_v50 = vld [vmem:[#allocation8 + $0x780] sm:$0xff] }
 0x1bb   : > { %13371 = vst [vmem:[#allocation47_spill] sm:$0xff] %v11361_v45  ;;  %v11363_v35 = vpack.c.bf16 %v1426_v39, %v1418_v9  ;;  %5598 = vmatprep.subr.bf16.mxu1 %v8784_v24  ;;  %v11367_v37 = vpack.c.bf16 %v1415_v46, %v1407_v44  ;;  %v8990_v44 = vcombine.high %v11357_v49, %v11359_v29  ;;  %v1034_v9 = vpop.f32.mrb[26].mxu0  ;;  %v11388_v46 = vld [vmem:[#allocation8 + $0x7a0] sm:$0xff]  ;;  %v11397_v45 = vld [vmem:[#allocation8 + $0x188] sm:$0xff] }
 0x1bc   : > { %v654_v34 = vpop.f32.mrb[28].mxu1  ;;  %v11369_v27 = vpack.c.bf16 %v1427_v19, %v1419_v15  ;;  %5036 = vmatpush1.bf16.msra.mxu0 %v8973_v20  ;;  %v1033_v19 = vadd.f32 %v1032_v16, %v11154_v10  ;;  %v1035_v15 = vadd.f32 %v1034_v9, %v11149_v43  ;;  %v1036_v61 = vpop.f32.mrb[27].mxu0  ;;  %v8989_v9 = vcombine.low %v11357_v49, %v11359_v29  ;;  %v11410_v49 = vld [vmem:[#allocation8 + $0x7c0] sm:$0xff] }
 0x1bd   : > { %13372 = vst [vmem:[#allocation48_spill] sm:$0xff] %v11363_v35  ;;  %13373 = vst [vmem:[#allocation49_spill] sm:$0xff] %v11367_v37  ;;  %v656_v24 = vpop.f32.mrb[29].mxu1  ;;  %v655_v25 = vadd.f32 %v654_v34, %v11135_v31  ;;  %5037 = vmatprep.subr.bf16.mxu0 %v8982_v17  ;;  %v1422_v17 = vmax.f32 %v1031_v14, 0.0  ;;  %v1037_v1 = vadd.f32 %v1036_v61, %v11154_v10  ;;  %v11399_v14 = vld [vmem:[#allocation8 + $0x1a8] sm:$0xff]  ;;  %v11412_v29 = vld [vmem:[#allocation8 + $0x7e0] sm:$0xff] }
 0x1be   : > { %13374 = vst [vmem:[#allocation50_spill] sm:$0xff] %v11369_v27  ;;  %v658_v39 = vpop.f32.mrb[30].mxu1  ;;  %4912 = vmatprep.mubr.bf16.mxu0 %v11369_v27  ;;  %v657_v20 = vadd.f32 %v656_v24, %v11141_v32  ;;  %5599 = vmatpush1.bf16.msra.mxu1 %v8783_v38  ;;  %v8800_v38 = vcombine.high %v11371_v0, %v11373_v22  ;;  %v1423_v24 = vmax.f32 %v1033_v19, 0.0  ;;  %v1430_v37 = vmax.f32 %v1035_v15, 0.0  ;;  %v1040_v15 = vpop.f32.mrb[28].mxu0 }
 0x1bf   : > { %v660_v34 = vpop.f32.mrb[31].mxu1  ;;  %4913 = vmatmul.mubr.bf16.gmra.mrb[88].mxu0 %v11363_v35  ;;  %v659_v16 = vadd.f32 %v658_v39, %v11135_v31  ;;  %5600 = vmatprep.subr.bf16.mxu1 %v8792_v41  ;;  %v1434_v41 = vmax.f32 %v655_v25, 0.0  ;;  %v8998_v19 = vcombine.high %v11386_v50, %v11388_v46  ;;  %v1431_v61 = vmax.f32 %v1037_v1, 0.0  ;;  %v11424_v1 = vld [vmem:[#allocation8 + $0x1c8] sm:$0xff] }
 0x1c0   : > { %v661_v63 = vadd.f32 %v660_v34, %v11141_v32  ;;  %5038 = vmatpush1.bf16.msra.mxu0 %v8981_v8  ;;  %v1435_v34 = vmax.f32 %v657_v20, 0.0  ;;  %v8799_v8 = vcombine.low %v11371_v0, %v11373_v22  ;;  %v11426_v0 = vld [vmem:[#allocation8 + $0x1e8] sm:$0xff]  ;;  %v1041_v22 = vadd.f32 %v1040_v15, %v11149_v43 }
 0x1c1   : > { %8743 = vmatmul.mubr.msk.bf16.gmra.mrb[136].mxu1 %vm476_vm1, %v10944_v53  ;;  %v1442_v39 = vmax.f32 %v659_v16, 0.0  ;;  %5039 = vmatprep.subr.bf16.mxu0 %v8990_v44  ;;  %v11414_v53 = vpack.c.bf16 %v1430_v37, %v1422_v17  ;;  %v8808_v44 = vcombine.high %v11397_v45, %v11399_v14  ;;  %v11420_v20 = vpack.c.bf16 %v1431_v61, %v1423_v24  ;;  %v1042_v17 = vpop.f32.mrb[29].mxu0 }
 0x1c2   : > { %v1443_v35 = vmax.f32 %v661_v63, 0.0  ;;  %1191 = vmatprep.mubr.bf16.mxu1 %v13357_v21  ;;  %5601 = vmatpush1.bf16.msra.mxu1 %v8791_v48  ;;  %v8997_v37 = vcombine.low %v11386_v50, %v11388_v46  ;;  %v9006_v24 = vcombine.high %v11410_v49, %v11412_v29  ;;  %v8807_v50 = vcombine.low %v11397_v45, %v11399_v14  ;;  %v1775_v45 = vld [vmem:[#allocation8 + $0x228] sm:$0xff] }
 0x1c3   : > { %13375 = vst [vmem:[#allocation51_spill] sm:$0xff] %v11414_v53  ;;  %v11416_v25 = vpack.c.bf16 %v1442_v39, %v1434_v41  ;;  %5602 = vmatprep.subr.bf16.mxu1 %v8800_v38  ;;  %13377 = vst [vmem:[#allocation53_spill] sm:$0xff] %v11420_v20  ;;  %v1044_v41 = vpop.f32.mrb[30].mxu0  ;;  %v1438_v46 = vmax.f32 %v1041_v22, 0.0  ;;  %v1771_v53 = vld [vmem:[#allocation8 + $0x208] sm:$0xff]  ;;  %v9005_v14 = vcombine.low %v11410_v49, %v11412_v29 }
 0x1c4   : > { %v664_v16 = vpop.f32.mrb[32].mxu1  ;;  %v11422_v48 = vpack.c.bf16 %v1443_v35, %v1435_v34  ;;  %5040 = vmatpush1.bf16.msra.mxu0 %v8989_v9  ;;  %v1043_v35 = vadd.f32 %v1042_v17, %v11154_v10  ;;  %v1045_v61 = vadd.f32 %v1044_v41, %v11149_v43  ;;  %v1046_v34 = vpop.f32.mrb[31].mxu0 }
 0x1c5   : > { %13376 = vst [vmem:[#allocation52_spill] sm:$0xff] %v11416_v25  ;;  %v666_v38 = vpop.f32.mrb[33].mxu1  ;;  %v665_v63 = vadd.f32 %v664_v16, %v11135_v31  ;;  %5041 = vmatprep.subr.bf16.mxu0 %v8998_v19  ;;  %v8816_v16 = vcombine.high %v11424_v1, %v11426_v0 }
 0x1c6   : > { %13378 = vst [vmem:[#allocation54_spill] sm:$0xff] %v11422_v48  ;;  %v668_v39 = vpop.f32.mrb[34].mxu1  ;;  %4922 = vmatprep.mubr.bf16.mxu0 %v11422_v48  ;;  %v667_v9 = vadd.f32 %v666_v38, %v11141_v32  ;;  %5603 = vmatpush1.bf16.msra.mxu1 %v8799_v8  ;;  %v1439_v17 = vmax.f32 %v1043_v35, 0.0  ;;  %v1047_v38 = vadd.f32 %v1046_v34, %v11154_v10  ;;  %v1446_v22 = vmax.f32 %v1045_v61, 0.0 }
 0x1c7   : > { %v670_v19 = vpop.f32.mrb[35].mxu1  ;;  %4923 = vmatmul.mubr.bf16.gmra.mrb[92].mxu0 %v11416_v25  ;;  %v669_v15 = vadd.f32 %v668_v39, %v11135_v31  ;;  %5604 = vmatprep.subr.bf16.mxu1 %v8808_v44  ;;  %v1450_v41 = vmax.f32 %v665_v63, 0.0  ;;  %v9014_v35 = vcombine.high %v11315_v47, %v11317_v18 }
 0x1c8   : > { %v671_v8 = vadd.f32 %v670_v19, %v11141_v32  ;;  %5042 = vmatpush1.bf16.msra.mxu0 %v8997_v37  ;;  %v1447_v39 = vmax.f32 %v1047_v38, 0.0  ;;  %v1451_v34 = vmax.f32 %v667_v9, 0.0  ;;  %v8815_v37 = vcombine.low %v11424_v1, %v11426_v0  ;;  %v1779_v9 = vld [vmem:[#allocation8 + $0x248] sm:$0xff] }
 0x1c9   : > { %8744 = vmatmul.mubr.msk.bf16.gmra.mrb[140].mxu1 %vm476_vm1, %v10954_v60  ;;  %v1458_v44 = vmax.f32 %v669_v15, 0.0  ;;  %5043 = vmatprep.subr.bf16.mxu0 %v9006_v24  ;;  %v11455_v49 = vpack.c.bf16 %v1446_v22, %v1438_v46  ;;  %v8824_v60 = vcombine.high %v1771_v53, %v1775_v45  ;;  %v1050_v24 = vpop.f32.mrb[32].mxu0  ;;  %v1783_v15 = vld [vmem:[#allocation8 + $0x268] sm:$0xff] }
 0x1ca   : > { %v1459_v20 = vmax.f32 %v671_v8, 0.0  ;;  %1201 = vmatprep.mubr.bf16.mxu1 %v13357_v21  ;;  %5605 = vmatpush1.bf16.msra.mxu1 %v8807_v50  ;;  %v11459_v63 = vpack.c.bf16 %v1447_v39, %v1439_v17  ;;  %v1051_v50 = vadd.f32 %v1050_v24, %v11149_v43  ;;  %v1052_v38 = vpop.f32.mrb[33].mxu0 }
 0x1cb   : > { %13379 = vst [vmem:[#allocation55_spill] sm:$0xff] %v11455_v49  ;;  %v11457_v29 = vpack.c.bf16 %v1458_v44, %v1450_v41  ;;  %5606 = vmatprep.subr.bf16.mxu1 %v8816_v16  ;;  %v1053_v0 = vadd.f32 %v1052_v38, %v11154_v10  ;;  %v1054_v46 = vpop.f32.mrb[34].mxu0  ;;  %v1787_v38 = vld [vmem:[#allocation8 + $0x288] sm:$0xff] }
 0x1cc   : > { %13381 = vst [vmem:[#allocation57_spill] sm:$0xff] %v11459_v63  ;;  %v674_v61 = vpop.f32.mrb[36].mxu1  ;;  %v11461_v19 = vpack.c.bf16 %v1459_v20, %v1451_v34  ;;  %5044 = vmatpush1.bf16.msra.mxu0 %v9005_v14  ;;  %v8823_v20 = vcombine.low %v1771_v53, %v1775_v45  ;;  %v1454_v22 = vmax.f32 %v1051_v50, 0.0  ;;  %v1055_v14 = vadd.f32 %v1054_v46, %v11149_v43  ;;  %v1056_v41 = vpop.f32.mrb[35].mxu0 }
 0x1cd   : > { %13380 = vst [vmem:[#allocation56_spill] sm:$0xff] %v11457_v29  ;;  %v676_v8 = vpop.f32.mrb[37].mxu1  ;;  %v675_v1 = vadd.f32 %v674_v61, %v11135_v31  ;;  %5206 = vmatprep.subr.bf16.mxu0 %v9014_v35  ;;  %v8832_v35 = vcombine.high %v1779_v9, %v1783_v15  ;;  %v1455_v34 = vmax.f32 %v1053_v0, 0.0  ;;  %v1057_v24 = vadd.f32 %v1056_v41, %v11154_v10 }
 0x1ce   : > { %13382 = vst [vmem:[#allocation58_spill] sm:$0xff] %v11461_v19  ;;  %v678_v16 = vpop.f32.mrb[38].mxu1  ;;  %4932 = vmatprep.mubr.bf16.mxu0 %v11461_v19  ;;  %v677_v17 = vadd.f32 %v676_v8, %v11141_v32  ;;  %5607 = vmatpush1.bf16.msra.mxu1 %v8815_v37  ;;  %v1791_v8 = vld [vmem:[#allocation8 + $0x2a8] sm:$0xff]  ;;  %v1462_v37 = vmax.f32 %v1055_v14, 0.0  ;;  %v1060_v14 = vpop.f32.mrb[36].mxu0 }
 0x1cf   : > { %v680_v44 = vpop.f32.mrb[39].mxu1  ;;  %4933 = vmatmul.mubr.bf16.gmra.mrb[96].mxu0 %v11457_v29  ;;  %v679_v39 = vadd.f32 %v678_v16, %v11135_v31  ;;  %5608 = vmatprep.subr.bf16.mxu1 %v8824_v60  ;;  %v1466_v53 = vmax.f32 %v675_v1, 0.0  ;;  %v1463_v50 = vmax.f32 %v1057_v24, 0.0  ;;  %v8831_v60 = vcombine.low %v1779_v9, %v1783_v15  ;;  %v1795_v1 = vld [vmem:[#allocation8 + $0x2c8] sm:$0xff]  ;;  %v1062_v24 = vpop.f32.mrb[37].mxu0 }
 0x1d0   : > { %v681_v61 = vadd.f32 %v680_v44, %v11141_v32  ;;  %v1467_v46 = vmax.f32 %v677_v17, 0.0  ;;  %v11476_v0 = vpack.c.bf16 %v1462_v37, %v1454_v22  ;;  %v8840_v41 = vcombine.high %v1787_v38, %v1791_v8 }
 0x1d1   : > { %8745 = vmatmul.mubr.msk.bf16.gmra.mrb[144].mxu1 %vm476_vm1, %v10964_v6  ;;  %v1474_v45 = vmax.f32 %v679_v39, 0.0  ;;  %v11480_v44 = vpack.c.bf16 %v1463_v50, %v1455_v34  ;;  %v1799_v39 = vld [vmem:[#allocation8 + $0x2e8] sm:$0xff]  ;;  %v1061_v17 = vadd.f32 %v1060_v14, %v11149_v43  ;;  %v1063_v15 = vadd.f32 %v1062_v24, %v11154_v10 }
 0x1d2   : > { %v1475_v49 = vmax.f32 %v681_v61, 0.0  ;;  %1211 = vmatprep.mubr.bf16.mxu1 %v13357_v21  ;;  %5609 = vmatpush1.bf16.msra.mxu1 %v8823_v20  ;;  %13383 = vst [vmem:[#allocation59_spill] sm:$0xff] %v11476_v0  ;;  %v1064_v20 = vpop.f32.mrb[38].mxu0  ;;  %v8839_v34 = vcombine.low %v1787_v38, %v1791_v8  ;;  %v1803_v0 = vld [vmem:[#allocation8 + $0x308] sm:$0xff] }
 0x1d3   : > { %v11478_v16 = vpack.c.bf16 %v1474_v45, %v1466_v53  ;;  %5610 = vmatprep.subr.bf16.mxu1 %v8832_v35  ;;  %13385 = vst [vmem:[#allocation61_spill] sm:$0xff] %v11480_v44  ;;  %v1065_v37 = vadd.f32 %v1064_v20, %v11149_v43  ;;  %v1066_v53 = vpop.f32.mrb[39].mxu0 }
 0x1d4   : > { %v684_v63 = vpop.f32.mrb[40].mxu1  ;;  %v11482_v6 = vpack.c.bf16 %v1475_v49, %v1467_v46  ;;  %v1470_v49 = vmax.f32 %v1061_v17, 0.0  ;;  %v1471_v46 = vmax.f32 %v1063_v15, 0.0  ;;  %v1067_v14 = vadd.f32 %v1066_v53, %v11154_v10 }
 0x1d5   : > { %13384 = vst [vmem:[#allocation60_spill] sm:$0xff] %v11478_v16  ;;  %v686_v61 = vpop.f32.mrb[41].mxu1  ;;  %v685_v9 = vadd.f32 %v684_v63, %v11135_v31  ;;  %v8848_v63 = vcombine.high %v1795_v1, %v1799_v39 }
 0x1d6   : > { %13386 = vst [vmem:[#allocation62_spill] sm:$0xff] %v11482_v6  ;;  %v688_v22 = vpop.f32.mrb[42].mxu1  ;;  %4942 = vmatprep.mubr.bf16.mxu0 %v11482_v6  ;;  %v687_v35 = vadd.f32 %v686_v61, %v11141_v32  ;;  %5611 = vmatpush1.bf16.msra.mxu1 %v8831_v60  ;;  %v1807_v61 = vld [vmem:[#allocation8 + $0x328] sm:$0xff]  ;;  %v1478_v60 = vmax.f32 %v1065_v37, 0.0  ;;  %v1479_v17 = vmax.f32 %v1067_v14, 0.0  ;;  %v1070_v37 = vpop.f32.mrb[40].mxu0 }
 0x1d7   : > { %v690_v45 = vpop.f32.mrb[43].mxu1  ;;  %4943 = vmatmul.mubr.bf16.gmra.mrb[100].mxu0 %v11478_v16  ;;  %v689_v50 = vadd.f32 %v688_v22, %v11135_v31  ;;  %5612 = vmatprep.subr.bf16.mxu1 %v8840_v41  ;;  %v1482_v38 = vmax.f32 %v685_v9, 0.0  ;;  %v8847_v41 = vcombine.low %v1795_v1, %v1799_v39  ;;  %v8856_v53 = vcombine.high %v1803_v0, %v1807_v61  ;;  %v1811_v9 = vld [vmem:[#allocation8 + $0x348] sm:$0xff]  ;;  %v1072_v14 = vpop.f32.mrb[41].mxu0 }
 0x1d8   : > { %v691_v24 = vadd.f32 %v690_v45, %v11141_v32  ;;  %v1483_v20 = vmax.f32 %v687_v35, 0.0  ;;  %v11497_v15 = vpack.c.bf16 %v1478_v60, %v1470_v49  ;;  %v11501_v45 = vpack.c.bf16 %v1479_v17, %v1471_v46 }
 0x1d9   : > { %8746 = vmatmul.mubr.msk.bf16.gmra.mrb[148].mxu1 %vm476_vm1, %v10974_v23  ;;  %v1490_v8 = vmax.f32 %v689_v50, 0.0  ;;  %v1815_v50 = vld [vmem:[#allocation8 + $0x368] sm:$0xff]  ;;  %v1071_v35 = vadd.f32 %v1070_v37, %v11149_v43  ;;  %v1073_v39 = vadd.f32 %v1072_v14, %v11154_v10  ;;  %v8855_v46 = vcombine.low %v1803_v0, %v1807_v61 }
 0x1da   : > { %v1491_v44 = vmax.f32 %v691_v24, 0.0  ;;  %1221 = vmatprep.mubr.bf16.mxu1 %v13357_v21  ;;  %5613 = vmatpush1.bf16.msra.mxu1 %v8839_v34  ;;  %13387 = vst [vmem:[#allocation63_spill] sm:$0xff] %v11497_v15  ;;  %13389 = vst [vmem:[#allocation65_spill] sm:$0xff] %v11501_v45  ;;  %v1074_v34 = vpop.f32.mrb[42].mxu0  ;;  %v1819_v15 = vld [vmem:[#allocation8 + $0x388] sm:$0xff] }
 0x1db   : > { %v11499_v22 = vpack.c.bf16 %v1490_v8, %v1482_v38  ;;  %5614 = vmatprep.subr.bf16.mxu1 %v8848_v63  ;;  %v1075_v60 = vadd.f32 %v1074_v34, %v11149_v43  ;;  %v1076_v38 = vpop.f32.mrb[43].mxu0 }
 0x1dc   : > { %v694_v16 = vpop.f32.mrb[44].mxu1  ;;  %v11503_v23 = vpack.c.bf16 %v1491_v44, %v1483_v20  ;;  %v1486_v44 = vmax.f32 %v1071_v35, 0.0  ;;  %v1487_v20 = vmax.f32 %v1073_v39, 0.0  ;;  %v1077_v37 = vadd.f32 %v1076_v38, %v11154_v10 }
 0x1dd   : > { %13388 = vst [vmem:[#allocation64_spill] sm:$0xff] %v11499_v22  ;;  %v696_v24 = vpop.f32.mrb[45].mxu1  ;;  %v695_v1 = vadd.f32 %v694_v16, %v11135_v31  ;;  %v8864_v16 = vcombine.high %v1811_v9, %v1815_v50 }
 0x1de   : > { %13390 = vst [vmem:[#allocation66_spill] sm:$0xff] %v11503_v23  ;;  %v698_v49 = vpop.f32.mrb[46].mxu1  ;;  %4952 = vmatprep.mubr.bf16.mxu0 %v11503_v23  ;;  %v697_v63 = vadd.f32 %v696_v24, %v11141_v32  ;;  %5615 = vmatpush1.bf16.msra.mxu1 %v8847_v41  ;;  %v1823_v24 = vld [vmem:[#allocation8 + $0x3a8] sm:$0xff]  ;;  %v1494_v41 = vmax.f32 %v1075_v60, 0.0  ;;  %v1495_v35 = vmax.f32 %v1077_v37, 0.0  ;;  %v1080_v60 = vpop.f32.mrb[44].mxu0 }
 0x1df   : > { %v700_v8 = vpop.f32.mrb[47].mxu1  ;;  %4953 = vmatmul.mubr.bf16.gmra.mrb[104].mxu0 %v11499_v22  ;;  %v699_v17 = vadd.f32 %v698_v49, %v11135_v31  ;;  %5616 = vmatprep.subr.bf16.mxu1 %v8856_v53  ;;  %v1498_v0 = vmax.f32 %v695_v1, 0.0  ;;  %v8863_v53 = vcombine.low %v1811_v9, %v1815_v50  ;;  %v8872_v38 = vcombine.high %v1819_v15, %v1823_v24  ;;  %v1827_v1 = vld [vmem:[#allocation8 + $0x3c8] sm:$0xff]  ;;  %v1082_v37 = vpop.f32.mrb[45].mxu0 }
 0x1e0   : > { %v701_v14 = vadd.f32 %v700_v8, %v11141_v32  ;;  %v1499_v34 = vmax.f32 %v697_v63, 0.0  ;;  %v11518_v39 = vpack.c.bf16 %v1494_v41, %v1486_v44  ;;  %v11522_v8 = vpack.c.bf16 %v1495_v35, %v1487_v20 }
 0x1e1   : > { %8747 = vmatmul.mubr.msk.bf16.gmra.mrb[152].mxu1 %vm476_vm1, %v10984_v33  ;;  %v1506_v61 = vmax.f32 %v699_v17, 0.0  ;;  %v1831_v17 = vld [vmem:[#allocation8 + $0x3e8] sm:$0xff]  ;;  %v1081_v63 = vadd.f32 %v1080_v60, %v11149_v43  ;;  %v1083_v50 = vadd.f32 %v1082_v37, %v11154_v10  ;;  %v8871_v20 = vcombine.low %v1819_v15, %v1823_v24 }
 0x1e2   : > { %v1507_v45 = vmax.f32 %v701_v14, 0.0  ;;  %1231 = vmatprep.mubr.bf16.mxu1 %v13357_v21  ;;  %5617 = vmatpush1.bf16.msra.mxu1 %v8855_v46  ;;  %13391 = vst [vmem:[#allocation67_spill] sm:$0xff] %v11518_v39  ;;  %13393 = vst [vmem:[#allocation69_spill] sm:$0xff] %v11522_v8  ;;  %v1084_v46 = vpop.f32.mrb[46].mxu0 }
 0x1e3   : > { %v11520_v49 = vpack.c.bf16 %v1506_v61, %v1498_v0  ;;  %5618 = vmatprep.subr.bf16.mxu1 %v8864_v16  ;;  %v1085_v41 = vadd.f32 %v1084_v46, %v11149_v43  ;;  %v1086_v0 = vpop.f32.mrb[47].mxu0  ;;  %v8879_v46 = vcombine.low %v1827_v1, %v1831_v17 }
 0x1e4   : > { %v704_v22 = vpop.f32.mrb[48].mxu1  ;;  %v11524_v33 = vpack.c.bf16 %v1507_v45, %v1499_v34  ;;  %v1502_v45 = vmax.f32 %v1081_v63, 0.0  ;;  %v1503_v34 = vmax.f32 %v1083_v50, 0.0  ;;  %v1087_v60 = vadd.f32 %v1086_v0, %v11154_v10 }
 0x1e5   : > { %13392 = vst [vmem:[#allocation68_spill] sm:$0xff] %v11520_v49  ;;  %v706_v14 = vpop.f32.mrb[49].mxu1  ;;  %v705_v9 = vadd.f32 %v704_v22, %v11135_v31  ;;  %v8880_v22 = vcombine.high %v1827_v1, %v1831_v17  ;;  %v1510_v39 = vmax.f32 %v1085_v41, 0.0 }
 0x1e6   : > { %13394 = vst [vmem:[#allocation70_spill] sm:$0xff] %v11524_v33  ;;  %v708_v44 = vpop.f32.mrb[50].mxu1  ;;  %4962 = vmatprep.mubr.bf16.mxu0 %v11524_v33  ;;  %v707_v16 = vadd.f32 %v706_v14, %v11141_v32  ;;  %5619 = vmatpush1.bf16.msra.mxu1 %v8863_v53  ;;  %v1511_v53 = vmax.f32 %v1087_v60, 0.0 }
 0x1e7   : > { %v710_v61 = vpop.f32.mrb[51].mxu1  ;;  %4963 = vmatmul.mubr.bf16.gmra.mrb[108].mxu0 %v11520_v49  ;;  %v709_v35 = vadd.f32 %v708_v44, %v11135_v31  ;;  %5620 = vmatprep.subr.bf16.mxu1 %v8872_v38  ;;  %v1514_v15 = vmax.f32 %v705_v9, 0.0  ;;  %v11539_v38 = vpack.c.bf16 %v1510_v39, %v1502_v45  ;;  %v8888_v44 = vcombine.high %v11319_v57, %v11327_v26 }
 0x1e8   : > { %v711_v37 = vadd.f32 %v710_v61, %v11141_v32  ;;  %v1515_v63 = vmax.f32 %v707_v16, 0.0  ;;  %v11545_v41 = vpack.c.bf16 %v1511_v53, %v1503_v34 }
 0x1e9   : > { %8748 = vmatmul.mubr.msk.bf16.gmra.mrb[156].mxu1 %vm476_vm1, %v10994_v40  ;;  %v1522_v24 = vmax.f32 %v709_v35, 0.0  ;;  %13395 = vst [vmem:[#allocation71_spill] sm:$0xff] %v11539_v38  ;;  %v1090_v40 = vpop.f32.mrb[48].mxu0 }
 0x1ea   : > { %v1523_v14 = vmax.f32 %v711_v37, 0.0  ;;  %1241 = vmatprep.mubr.bf16.mxu1 %v13357_v21  ;;  %5621 = vmatpush1.bf16.msra.mxu1 %v8871_v20  ;;  %13397 = vst [vmem:[#allocation73_spill] sm:$0xff] %v11545_v41  ;;  %v1091_v16 = vadd.f32 %v1090_v40, %v11149_v43  ;;  %v1092_v61 = vpop.f32.mrb[49].mxu0 }
 0x1eb   : > { %v11541_v50 = vpack.c.bf16 %v1522_v24, %v1514_v15  ;;  %5622 = vmatprep.subr.bf16.mxu1 %v8880_v22  ;;  %v1093_v39 = vadd.f32 %v1092_v61, %v11154_v10  ;;  %v1094_v17 = vpop.f32.mrb[50].mxu0 }
 0x1ec   : > { %v714_v9 = vpop.f32.mrb[52].mxu1  ;;  %v11547_v0 = vpack.c.bf16 %v1523_v14, %v1515_v63  ;;  %v1518_v22 = vmax.f32 %v1091_v16, 0.0  ;;  %v1095_v34 = vadd.f32 %v1094_v17, %v11149_v43  ;;  %v1096_v60 = vpop.f32.mrb[51].mxu0 }
 0x1ed   : > { %13396 = vst [vmem:[#allocation72_spill] sm:$0xff] %v11541_v50  ;;  %v716_v35 = vpop.f32.mrb[53].mxu1  ;;  %v715_v1 = vadd.f32 %v714_v9, %v11135_v31  ;;  %v1519_v24 = vmax.f32 %v1093_v39, 0.0  ;;  %v1097_v53 = vadd.f32 %v1096_v60, %v11154_v10 }
 0x1ee   : > { %13398 = vst [vmem:[#allocation74_spill] sm:$0xff] %v11547_v0  ;;  %v718_v20 = vpop.f32.mrb[54].mxu1  ;;  %4972 = vmatprep.mubr.bf16.mxu0 %v11547_v0  ;;  %v717_v45 = vadd.f32 %v716_v35, %v11141_v32  ;;  %5623 = vmatpush1.bf16.msra.mxu1 %v8879_v46  ;;  %v1526_v14 = vmax.f32 %v1095_v34, 0.0  ;;  %v1100_v39 = vpop.f32.mrb[52].mxu0 }
 0x1ef   : > { %v720_v37 = vpop.f32.mrb[55].mxu1  ;;  %4973 = vmatmul.mubr.bf16.gmra.mrb[112].mxu0 %v11541_v50  ;;  %v719_v15 = vadd.f32 %v718_v20, %v11135_v31  ;;  %5785 = vmatprep.subr.bf16.mxu1 %v8888_v44  ;;  %v1530_v46 = vmax.f32 %v715_v1, 0.0  ;;  %v1527_v9 = vmax.f32 %v1097_v53, 0.0  ;;  %v1101_v34 = vadd.f32 %v1100_v39, %v11149_v43 }
 0x1f0   : > { %v721_v63 = vadd.f32 %v720_v37, %v11141_v32  ;;  %v1531_v16 = vmax.f32 %v717_v45, 0.0  ;;  %v11562_v35 = vpack.c.bf16 %v1526_v14, %v1518_v22 }
 0x1f1   : > { %8749 = vmatmul.mubr.msk.bf16.gmra.mrb[160].mxu1 %vm476_vm1, %v11004_v52  ;;  %v1538_v40 = vmax.f32 %v719_v15, 0.0  ;;  %v11566_v44 = vpack.c.bf16 %v1527_v9, %v1519_v24  ;;  %v1102_v52 = vpop.f32.mrb[53].mxu0  ;;  %v1534_v24 = vmax.f32 %v1101_v34, 0.0 }
 0x1f2   : > { %v1539_v61 = vmax.f32 %v721_v63, 0.0  ;;  %1251 = vmatprep.mubr.bf16.mxu1 %v13357_v21  ;;  %13399 = vst [vmem:[#allocation75_spill] sm:$0xff] %v11562_v35  ;;  %v1103_v45 = vadd.f32 %v1102_v52, %v11154_v10  ;;  %v1104_v15 = vpop.f32.mrb[54].mxu0 }
 0x1f3   : > { %v11564_v17 = vpack.c.bf16 %v1538_v40, %v1530_v46  ;;  %13401 = vst [vmem:[#allocation77_spill] sm:$0xff] %v11566_v44  ;;  %v1105_v63 = vadd.f32 %v1104_v15, %v11149_v43  ;;  %v1106_v14 = vpop.f32.mrb[55].mxu0 }
 0x1f4   : > { %v724_v20 = vpop.f32.mrb[56].mxu1  ;;  %v11568_v60 = vpack.c.bf16 %v1539_v61, %v1531_v16  ;;  %v1535_v9 = vmax.f32 %v1103_v45, 0.0  ;;  %v1107_v16 = vadd.f32 %v1106_v14, %v11154_v10 }
 0x1f5   : > { %13400 = vst [vmem:[#allocation76_spill] sm:$0xff] %v11564_v17  ;;  %v726_v1 = vpop.f32.mrb[57].mxu1  ;;  %v725_v37 = vadd.f32 %v724_v20, %v11135_v31  ;;  %v1542_v39 = vmax.f32 %v1105_v63, 0.0 }
 0x1f6   : > { %13402 = vst [vmem:[#allocation78_spill] sm:$0xff] %v11568_v60  ;;  %v728_v53 = vpop.f32.mrb[58].mxu1  ;;  %4982 = vmatprep.mubr.bf16.mxu0 %v11568_v60  ;;  %v727_v22 = vadd.f32 %v726_v1, %v11141_v32  ;;  %v1543_v34 = vmax.f32 %v1107_v16, 0.0 }
 0x1f7   : > { %v730_v46 = vpop.f32.mrb[59].mxu1  ;;  %4983 = vmatmul.mubr.bf16.gmra.mrb[116].mxu0 %v11564_v17  ;;  %v729_v40 = vadd.f32 %v728_v53, %v11135_v31  ;;  %v1546_v20 = vmax.f32 %v725_v37, 0.0  ;;  %v11583_v35 = vpack.c.bf16 %v1542_v39, %v1534_v24  ;;  %v1110_v53 = vpop.f32.mrb[56].mxu0  ;;  %v11602_v24 = vld [vmem:[#allocation6] sm:$0xff] }
 0x1f8   : > { %v731_v61 = vadd.f32 %v730_v46, %v11141_v32  ;;  %v1547_v1 = vmax.f32 %v727_v22, 0.0  ;;  %v11587_v45 = vpack.c.bf16 %v1543_v34, %v1535_v9  ;;  %v1111_v63 = vadd.f32 %v1110_v53, %v11149_v43 }
 0x1f9   : > { %8750 = vmatmul.mubr.msk.bf16.gmra.mrb[164].mxu1 %vm476_vm1, %v11014_v2  ;;  %v1554_v52 = vmax.f32 %v729_v40, 0.0  ;;  %13403 = vst [vmem:[#allocation79_spill] sm:$0xff] %v11583_v35  ;;  %v1112_v2 = vpop.f32.mrb[57].mxu0  ;;  %v13407_v35 = vsub.s32 2, %v10874_v5 }
 0x1fa   : > { %v1555_v15 = vmax.f32 %v731_v61, 0.0  ;;  %1261 = vmatprep.mubr.bf16.mxu1 %v13357_v21  ;;  %13405 = vst [vmem:[#allocation81_spill] sm:$0xff] %v11587_v45  ;;  %v1113_v22 = vadd.f32 %v1112_v2, %v11154_v10  ;;  %v1114_v16 = vpop.f32.mrb[58].mxu0  ;;  %v1550_v39 = vmax.f32 %v1111_v63, 0.0 }
 0x1fb   : > { %v11585_v44 = vpack.c.bf16 %v1554_v52, %v1546_v20  ;;  %v1115_v20 = vadd.f32 %v1114_v16, %v11149_v43  ;;  %v1116_v52 = vpop.f32.mrb[59].mxu0  ;;  %v11607_v63 = vrot.slane %v11602_v24, %v13407_v35 }
 0x1fc   : > { %v734_v14 = vpop.f32.mrb[60].mxu1  ;;  %v11589_v46 = vpack.c.bf16 %v1555_v15, %v1547_v1  ;;  %v1551_v15 = vmax.f32 %v1113_v22, 0.0  ;;  %v1117_v53 = vadd.f32 %v1116_v52, %v11154_v10 }
 0x1fd   : > { %13404 = vst [vmem:[#allocation80_spill] sm:$0xff] %v11585_v44  ;;  %v736_v37 = vpop.f32.mrb[61].mxu1  ;;  %v735_v40 = vadd.f32 %v734_v14, %v11135_v31  ;;  %v1558_v2 = vmax.f32 %v1115_v20, 0.0 }
 0x1fe   : > { %13406 = vst [vmem:[#allocation82_spill] sm:$0xff] %v11589_v46  ;;  %v738_v61 = vpop.f32.mrb[62].mxu1  ;;  %4992 = vmatprep.mubr.bf16.mxu0 %v11589_v46  ;;  %v737_v9 = vadd.f32 %v736_v37, %v11141_v32  ;;  %v1559_v45 = vmax.f32 %v1117_v53, 0.0 }
 0x1ff   : > { %v740_v34 = vpop.f32.mrb[63].mxu1  ;;  %4993 = vmatmul.mubr.bf16.gmra.mrb[120].mxu0 %v11585_v44  ;;  %v739_v1 = vadd.f32 %v738_v61, %v11135_v31  ;;  %v1562_v37 = vmax.f32 %v735_v40, 0.0  ;;  %v13408_v31 = vsub.s32 3, %v10874_v5  ;;  %v11617_v20 = vpack.c.bf16 %v1558_v2, %v1550_v39 }
 0x200   : > { %v741_v14 = vadd.f32 %v740_v34, %v11141_v32  ;;  %v1563_v32 = vmax.f32 %v737_v9, 0.0  ;;  %v11621_v35 = vpack.c.bf16 %v1559_v45, %v1551_v15  ;;  %v1120_v34 = vpop.f32.mrb[60].mxu0 }
 0x201   : > { %8751 = vmatmul.mubr.msk.bf16.gmra.mrb[168].mxu1 %vm476_vm1, %v11024_v30  ;;  %v1570_v16 = vmax.f32 %v739_v1, 0.0  ;;  %v11614_v22 = vrot.slane %v11602_v24, %v13408_v31  ;;  %13409 = vst [vmem:[#allocation83_spill] sm:$0xff] %v11617_v20  ;;  %v1121_v1 = vadd.f32 %v1120_v34, %v11149_v43  ;;  %v1122_v53 = vpop.f32.mrb[61].mxu0 }
 0x202   : > { %v1571_v61 = vmax.f32 %v741_v14, 0.0  ;;  %1271 = vmatprep.mubr.bf16.mxu1 %v13357_v21  ;;  %13411 = vst [vmem:[#allocation85_spill] sm:$0xff] %v11621_v35  ;;  %v1123_v9 = vadd.f32 %v1122_v53, %v11154_v10  ;;  %v1124_v14 = vpop.f32.mrb[62].mxu0 }
 0x203   : > { %v11619_v52 = vpack.c.bf16 %v1570_v16, %v1562_v37  ;;  %v1566_v45 = vmax.f32 %v1121_v1, 0.0  ;;  %v1125_v15 = vadd.f32 %v1124_v14, %v11149_v43  ;;  %v1126_v37 = vpop.f32.mrb[63].mxu0  ;;  %v1970_v14 = vld [vmem:[#allocation8 + $0x840] sm:$0xff] }
 0x204   : > { %v777_v30 = vpop.f32.mrb[64].mxu1  ;;  %v11623_v40 = vpack.c.bf16 %v1571_v61, %v1563_v32  ;;  %v1567_v61 = vmax.f32 %v1123_v9, 0.0  ;;  %v1127_v34 = vadd.f32 %v1126_v37, %v11154_v10 }
 0x205   : > { %13410 = vst [vmem:[#allocation84_spill] sm:$0xff] %v11619_v52  ;;  %v778_v31 = vadd.f32 %v777_v30, %v11607_v63  ;;  %v779_v38 = vpop.f32.mrb[65].mxu1  ;;  %v1574_v53 = vmax.f32 %v1125_v15, 0.0 }
 0x206   : > { %13412 = vst [vmem:[#allocation86_spill] sm:$0xff] %v11623_v40  ;;  %v780_v39 = vadd.f32 %v779_v38, %v11614_v22  ;;  %v781_v2 = vpop.f32.mrb[66].mxu1  ;;  %5002 = vmatprep.mubr.bf16.mxu0 %v11623_v40  ;;  %v1575_v1 = vmax.f32 %v1127_v34, 0.0  ;;  %v1978_v34 = vld [vmem:[#allocation8 + $0x880] sm:$0xff] }
 0x207   : > { %v782_v16 = vadd.f32 %v781_v2, %v11607_v63  ;;  %v783_v32 = vpop.f32.mrb[67].mxu1  ;;  %5003 = vmatmul.mubr.bf16.gmra.mrb[124].mxu0 %v11619_v52  ;;  %v1324_v20 = vmax.f32 %v778_v31, 0.0  ;;  %v1974_v2 = vld [vmem:[#allocation8 + $0x860] sm:$0xff]  ;;  %v11638_v41 = vpack.c.bf16 %v1574_v53, %v1566_v45 }
 0x208   : > { %v784_v30 = vadd.f32 %v783_v32, %v11614_v22  ;;  %v1325_v35 = vmax.f32 %v780_v39, 0.0  ;;  %v11642_v10 = vpack.c.bf16 %v1575_v1, %v1567_v61  ;;  %v13417_v61 = vcombine.low %v11315_v47, %v11317_v18 }
 0x209   : > { %v1332_v38 = vmax.f32 %v782_v16, 0.0  ;;  %8752 = vmatmul.mubr.msk.bf16.gmra.mrb[172].mxu1 %vm476_vm1, %v11034_v42  ;;  %13413 = vst [vmem:[#allocation87_spill] sm:$0xff] %v11638_v41  ;;  %v9022_v42 = vcombine.high %v1970_v14, %v1974_v2  ;;  %v9021_v53 = vcombine.low %v1970_v14, %v1974_v2  ;;  %v1990_v41 = vld [vmem:[#allocation8 + $0x8e0] sm:$0xff] }
 0x20a   : > { %v1333_v43 = vmax.f32 %v784_v30, 0.0  ;;  %1281 = vmatprep.mubr.bf16.mxu1 %v13357_v21  ;;  %13415 = vst [vmem:[#allocation89_spill] sm:$0xff] %v11642_v10  ;;  %v1982_v30 = vld [vmem:[#allocation8 + $0x8a0] sm:$0xff] }
 0x20b   : > { %v11640_v9 = vpack.c.bf16 %v1332_v38, %v1324_v20  ;;  %v9029_v18 = vcombine.low %v1978_v34, %v1982_v30 }
 0x20c   : > { %v11644_v37 = vpack.c.bf16 %v1333_v43, %v1325_v35  ;;  %v787_v31 = vpop.f32.mrb[68].mxu1  ;;  %v9030_v43 = vcombine.high %v1978_v34, %v1982_v30 }
 0x20d   : > { %13414 = vst [vmem:[#allocation88_spill] sm:$0xff] %v11640_v9  ;;  %v788_v15 = vadd.f32 %v787_v31, %v11607_v63  ;;  %v789_v16 = vpop.f32.mrb[69].mxu1 }
 0x20e   : > { %13416 = vst [vmem:[#allocation90_spill] sm:$0xff] %v11644_v37  ;;  %v790_v39 = vadd.f32 %v789_v16, %v11614_v22  ;;  %v791_v32 = vpop.f32.mrb[70].mxu1  ;;  %5045 = vmatprep.mubr.bf16.mxu0 %v11644_v37 }
 0x20f   : > { %v792_v45 = vadd.f32 %v791_v32, %v11607_v63  ;;  %v793_v20 = vpop.f32.mrb[71].mxu1  ;;  %5046 = vmatmul.mubr.bf16.vlgmr.msra.gmra.mrb[64].mxu0 %v11640_v9  ;;  %v1340_v38 = vmax.f32 %v788_v15, 0.0  ;;  %v1986_v32 = vld [vmem:[#allocation8 + $0x8c0] sm:$0xff] }
 0x210   : > { %v794_v35 = vadd.f32 %v793_v20, %v11614_v22  ;;  %5207 = vmatpush1.bf16.msra.mxu0 %v13417_v61  ;;  %v1341_v31 = vmax.f32 %v790_v39, 0.0  ;;  %v1994_v39 = vld [vmem:[#allocation8 + $0x900] sm:$0xff]  ;;  %v9037_v34 = vcombine.low %v1986_v32, %v1990_v41 }
 0x211   : > { %v1348_v1 = vmax.f32 %v792_v45, 0.0  ;;  %8753 = vmatmul.mubr.msk.bf16.gmra.mrb[176].mxu1 %vm476_vm1, %v11044_v55  ;;  %5208 = vmatprep.subr.bf16.mxu0 %v9022_v42  ;;  %v9038_v55 = vcombine.high %v1986_v32, %v1990_v41  ;;  %v1998_v45 = vld [vmem:[#allocation8 + $0x920] sm:$0xff] }
 0x212   : > { %v1349_v16 = vmax.f32 %v794_v35, 0.0  ;;  %1291 = vmatprep.mubr.bf16.mxu1 %v13357_v21  ;;  %v9045_v41 = vcombine.low %v1994_v39, %v1998_v45 }
 0x213   : > { %v11658_v10 = vpack.c.bf16 %v1348_v1, %v1340_v38  ;;  %v9046_v1 = vcombine.high %v1994_v39, %v1998_v45 }
 0x214   : > { %v11660_v20 = vpack.c.bf16 %v1349_v16, %v1341_v31  ;;  %v797_v47 = vpop.f32.mrb[72].mxu1  ;;  %5209 = vmatpush1.bf16.msra.mxu0 %v9021_v53  ;;  %v2002_v16 = vld [vmem:[#allocation8 + $0x940] sm:$0xff] }
 0x215   : > { %13418 = vst [vmem:[#allocation91_spill] sm:$0xff] %v11658_v10  ;;  %v798_v14 = vadd.f32 %v797_v47, %v11607_v63  ;;  %v799_v2 = vpop.f32.mrb[73].mxu1  ;;  %5210 = vmatprep.subr.bf16.mxu0 %v9030_v43  ;;  %v2006_v47 = vld [vmem:[#allocation8 + $0x960] sm:$0xff] }
 0x216   : > { %13419 = vst [vmem:[#allocation92_spill] sm:$0xff] %v11660_v20  ;;  %v800_v15 = vadd.f32 %v799_v2, %v11614_v22  ;;  %v801_v42 = vpop.f32.mrb[74].mxu1  ;;  %5055 = vmatprep.mubr.bf16.mxu0 %v11660_v20  ;;  %v9053_v39 = vcombine.low %v2002_v16, %v2006_v47 }
 0x217   : > { %v802_v35 = vadd.f32 %v801_v42, %v11607_v63  ;;  %v803_v61 = vpop.f32.mrb[75].mxu1  ;;  %5056 = vmatmul.mubr.bf16.gmra.mrb[68].mxu0 %v11658_v10  ;;  %v1356_v30 = vmax.f32 %v798_v14, 0.0 }
 0x218   : > { %v804_v53 = vadd.f32 %v803_v61, %v11614_v22  ;;  %5211 = vmatpush1.bf16.msra.mxu0 %v9029_v18  ;;  %v1357_v43 = vmax.f32 %v800_v15, 0.0  ;;  %v2010_v15 = vld [vmem:[#allocation8 + $0x980] sm:$0xff] }
 0x219   : > { %v1364_v38 = vmax.f32 %v802_v35, 0.0  ;;  %8754 = vmatmul.mubr.msk.bf16.gmra.mrb[180].mxu1 %vm476_vm1, %v11054_v58  ;;  %5212 = vmatprep.subr.bf16.mxu0 %v9038_v55  ;;  %v9054_v58 = vcombine.high %v2002_v16, %v2006_v47  ;;  %v2014_v35 = vld [vmem:[#allocation8 + $0x9a0] sm:$0xff] }
 0x21a   : > { %v1365_v31 = vmax.f32 %v804_v53, 0.0  ;;  %1301 = vmatprep.mubr.bf16.mxu1 %v13357_v21  ;;  %v9061_v16 = vcombine.low %v2010_v15, %v2014_v35 }
 0x21b   : > { %v11671_v2 = vpack.c.bf16 %v1364_v38, %v1356_v30 }
 0x21c   : > { %v11673_v42 = vpack.c.bf16 %v1365_v31, %v1357_v43  ;;  %v807_v61 = vpop.f32.mrb[76].mxu1  ;;  %5213 = vmatpush1.bf16.msra.mxu0 %v9037_v34 }
 0x21d   : > { %13420 = vst [vmem:[#allocation93_spill] sm:$0xff] %v11671_v2  ;;  %v808_v32 = vadd.f32 %v807_v61, %v11607_v63  ;;  %v809_v18 = vpop.f32.mrb[77].mxu1  ;;  %5214 = vmatprep.subr.bf16.mxu0 %v9046_v1  ;;  %v9062_v1 = vcombine.high %v2010_v15, %v2014_v35  ;;  %v2018_v61 = vld [vmem:[#allocation8 + $0x9c0] sm:$0xff] }
 0x21e   : > { %13421 = vst [vmem:[#allocation94_spill] sm:$0xff] %v11673_v42  ;;  %v810_v14 = vadd.f32 %v809_v18, %v11614_v22  ;;  %v811_v55 = vpop.f32.mrb[78].mxu1  ;;  %5065 = vmatprep.mubr.bf16.mxu0 %v11673_v42  ;;  %v2022_v18 = vld [vmem:[#allocation8 + $0x9e0] sm:$0xff] }
 0x21f   : > { %v812_v53 = vadd.f32 %v811_v55, %v11607_v63  ;;  %v813_v30 = vpop.f32.mrb[79].mxu1  ;;  %5066 = vmatmul.mubr.bf16.gmra.mrb[72].mxu0 %v11671_v2  ;;  %v1372_v45 = vmax.f32 %v808_v32, 0.0  ;;  %v9069_v15 = vcombine.low %v2018_v61, %v2022_v18 }
 0x220   : > { %v814_v34 = vadd.f32 %v813_v30, %v11614_v22  ;;  %5215 = vmatpush1.bf16.msra.mxu0 %v9045_v41  ;;  %v1373_v43 = vmax.f32 %v810_v14, 0.0  ;;  %v2030_v14 = vld [vmem:[#allocation8 + $0xa20] sm:$0xff] }
 0x221   : > { %v1380_v38 = vmax.f32 %v812_v53, 0.0  ;;  %8755 = vmatmul.mubr.msk.bf16.gmra.mrb[184].mxu1 %vm476_vm1, %v11064_v62  ;;  %5216 = vmatprep.subr.bf16.mxu0 %v9054_v58  ;;  %v9070_v62 = vcombine.high %v2018_v61, %v2022_v18  ;;  %v1847_v61 = vld [vmem:[#allocation8 + $0x468] sm:$0xff] }
 0x222   : > { %v1381_v31 = vmax.f32 %v814_v34, 0.0  ;;  %1311 = vmatprep.mubr.bf16.mxu1 %v13357_v21  ;;  %v2026_v21 = vld [vmem:[#allocation8 + $0xa00] sm:$0xff] }
 0x223   : > { %v11684_v55 = vpack.c.bf16 %v1380_v38, %v1372_v45  ;;  %v9078_v38 = vcombine.high %v2026_v21, %v2030_v14  ;;  %v9077_v18 = vcombine.low %v2026_v21, %v2030_v14  ;;  %v1851_v14 = vld [vmem:[#allocation8 + $0x488] sm:$0xff] }
 0x224   : > { %v11686_v8 = vpack.c.bf16 %v1381_v31, %v1373_v43  ;;  %v817_v30 = vpop.f32.mrb[80].mxu1  ;;  %5217 = vmatpush1.bf16.msra.mxu0 %v9053_v39  ;;  %v2034_v31 = vld [vmem:[#allocation8 + $0xa40] sm:$0xff] }
 0x225   : > { %13422 = vst [vmem:[#allocation95_spill] sm:$0xff] %v11684_v55  ;;  %v818_v47 = vadd.f32 %v817_v30, %v11607_v63  ;;  %v819_v41 = vpop.f32.mrb[81].mxu1  ;;  %5218 = vmatprep.subr.bf16.mxu0 %v9062_v1  ;;  %v2038_v30 = vld [vmem:[#allocation8 + $0xa60] sm:$0xff] }
 0x226   : > { %13423 = vst [vmem:[#allocation96_spill] sm:$0xff] %v11686_v8  ;;  %v820_v32 = vadd.f32 %v819_v41, %v11614_v22  ;;  %v821_v58 = vpop.f32.mrb[82].mxu1  ;;  %5075 = vmatprep.mubr.bf16.mxu0 %v11686_v8  ;;  %v2054_v8 = vld [vmem:[#allocation8 + $0xae0] sm:$0xff] }
 0x227   : > { %v822_v53 = vadd.f32 %v821_v58, %v11607_v63  ;;  %v823_v34 = vpop.f32.mrb[83].mxu1  ;;  %5076 = vmatmul.mubr.bf16.gmra.mrb[76].mxu0 %v11684_v55  ;;  %v1388_v35 = vmax.f32 %v818_v47, 0.0 }
 0x228   : > { %v824_v39 = vadd.f32 %v823_v34, %v11614_v22  ;;  %5219 = vmatpush1.bf16.msra.mxu0 %v9061_v16  ;;  %v1389_v1 = vmax.f32 %v820_v32, 0.0  ;;  %v1843_v16 = vld [vmem:[#allocation8 + $0x448] sm:$0xff] }
 0x229   : > { %v1396_v45 = vmax.f32 %v822_v53, 0.0  ;;  %8756 = vmatmul.mubr.msk.bf16.gmra.mrb[188].mxu1 %vm476_vm1, %v11074_v3  ;;  %5220 = vmatprep.subr.bf16.mxu0 %v9070_v62  ;;  %v9086_v62 = vcombine.high %v2034_v31, %v2038_v30 }
 0x22a   : > { %v1397_v43 = vmax.f32 %v824_v39, 0.0  ;;  %5624 = vmatprep.mubr.bf16.mxu1 %v11161_v59  ;;  %v2042_v39 = vld [vmem:[#allocation8 + $0xa80] sm:$0xff] }
 0x22b   : > { %v11697_v41 = vpack.c.bf16 %v1396_v45, %v1388_v35  ;;  %v2046_v35 = vld [vmem:[#allocation8 + $0xaa0] sm:$0xff] }
 0x22c   : > { %v11699_v58 = vpack.c.bf16 %v1397_v43, %v1389_v1  ;;  %v827_v34 = vpop.f32.mrb[84].mxu1  ;;  %5221 = vmatpush1.bf16.msra.mxu0 %v9069_v15  ;;  %v8896_v43 = vcombine.high %v1843_v16, %v1847_v61  ;;  %v1855_v15 = vld [vmem:[#allocation8 + $0x4a8] sm:$0xff] }
 0x22d   : > { %13424 = vst [vmem:[#allocation97_spill] sm:$0xff] %v11697_v41  ;;  %v828_v47 = vadd.f32 %v827_v34, %v11607_v63  ;;  %v829_v3 = vpop.f32.mrb[85].mxu1  ;;  %5222 = vmatprep.subr.bf16.mxu0 %v9078_v38  ;;  %v9085_v38 = vcombine.low %v2034_v31, %v2038_v30  ;;  %v8904_v31 = vcombine.high %v1851_v14, %v1855_v15  ;;  %v1859_v30 = vld [vmem:[#allocation8 + $0x4c8] sm:$0xff] }
 0x22e   : > { %13425 = vst [vmem:[#allocation98_spill] sm:$0xff] %v11699_v58  ;;  %v830_v32 = vadd.f32 %v829_v3, %v11614_v22  ;;  %v831_v53 = vpop.f32.mrb[86].mxu1  ;;  %5085 = vmatprep.mubr.bf16.mxu0 %v11699_v58  ;;  %v9094_v3 = vcombine.high %v2042_v39, %v2046_v35 }
 0x22f   : > { %v832_v45 = vadd.f32 %v831_v53, %v11607_v63  ;;  %v833_v1 = vpop.f32.mrb[87].mxu1  ;;  %5086 = vmatmul.mubr.bf16.gmra.mrb[80].mxu0 %v11697_v41  ;;  %v1404_v34 = vmax.f32 %v828_v47, 0.0  ;;  %v13426_v53 = vcombine.low %v11319_v57, %v11327_v26  ;;  %v8895_v41 = vcombine.low %v1843_v16, %v1847_v61  ;;  %v11720_v57 = vld [vmem:[#allocation8 + $0x808] sm:$0xff] }
 0x230   : > { %v834_v21 = vadd.f32 %v833_v1, %v11614_v22  ;;  %5223 = vmatpush1.bf16.msra.mxu0 %v9077_v18  ;;  %v1405_v58 = vmax.f32 %v830_v32, 0.0  ;;  %v2050_v1 = vld [vmem:[#allocation8 + $0xac0] sm:$0xff]  ;;  %v1863_v18 = vld [vmem:[#allocation8 + $0x4e8] sm:$0xff]  ;;  %v9093_v32 = vcombine.low %v2042_v39, %v2046_v35  ;;  %v8903_v39 = vcombine.low %v1851_v14, %v1855_v15 }
 0x231   : > { %v1412_v59 = vmax.f32 %v832_v45, 0.0  ;;  %5625 = vmatmul.mubr.bf16.vlgmr.msra.gmra.mrb[192].mxu1 %v11159_v56  ;;  %5224 = vmatprep.subr.bf16.mxu0 %v9086_v62  ;;  %v11716_v45 = vld [vmem:[#allocation8 + $0xc00] sm:$0xff]  ;;  %v9101_v56 = vcombine.low %v2050_v1, %v2054_v8 }
 0x232   : > { %v1413_v55 = vmax.f32 %v834_v21, 0.0  ;;  %5634 = vmatprep.mubr.bf16.mxu1 %v11185_v54  ;;  %5786 = vmatpush1.bf16.msra.mxu1 %v13426_v53  ;;  %v11718_v21 = vld [vmem:[#allocation8 + $0xc20] sm:$0xff]  ;;  %v1871_v54 = vld [vmem:[#allocation8 + $0x528] sm:$0xff] }
 0x233   : > { %v11712_v2 = vpack.c.bf16 %v1412_v59, %v1404_v34  ;;  %5787 = vmatprep.subr.bf16.mxu1 %v8896_v43  ;;  %v9102_v59 = vcombine.high %v2050_v1, %v2054_v8  ;;  %v11725_v43 = vld [vmem:[#allocation8 + $0x828] sm:$0xff]  ;;  %v2058_v35 = vld [vmem:[#allocation8 + $0xb00] sm:$0xff] }
 0x234   : > { %v11714_v47 = vpack.c.bf16 %v1413_v55, %v1405_v58  ;;  %v837_v62 = vpop.f32.mrb[88].mxu1  ;;  %5225 = vmatpush1.bf16.msra.mxu0 %v9085_v38  ;;  %v2062_v38 = vld [vmem:[#allocation8 + $0xb20] sm:$0xff]  ;;  %v1875_v1 = vld [vmem:[#allocation8 + $0x548] sm:$0xff] }
 0x235   : > { %13427 = vst [vmem:[#allocation99_spill] sm:$0xff] %v11712_v2  ;;  %v838_v26 = vadd.f32 %v837_v62, %v11607_v63  ;;  %v839_v16 = vpop.f32.mrb[89].mxu1  ;;  %5226 = vmatprep.subr.bf16.mxu0 %v9094_v3  ;;  %v8912_v62 = vcombine.high %v1859_v30, %v1863_v18  ;;  %v9110_v15 = vcombine.high %v2058_v35, %v2062_v38 }
 0x236   : > { %13428 = vst [vmem:[#allocation100_spill] sm:$0xff] %v11714_v47  ;;  %v840_v55 = vadd.f32 %v839_v16, %v11614_v22  ;;  %v841_v58 = vpop.f32.mrb[90].mxu1  ;;  %5095 = vmatprep.mubr.bf16.mxu0 %v11714_v47  ;;  %5788 = vmatpush1.bf16.msra.mxu1 %v8895_v41  ;;  %v1867_v16 = vld [vmem:[#allocation8 + $0x508] sm:$0xff] }
 0x237   : > { %v842_v3 = vadd.f32 %v841_v58, %v11607_v63  ;;  %v843_v53 = vpop.f32.mrb[91].mxu1  ;;  %5096 = vmatmul.mubr.bf16.gmra.mrb[84].mxu0 %v11712_v2  ;;  %5789 = vmatprep.subr.bf16.mxu1 %v8904_v31  ;;  %v1420_v41 = vmax.f32 %v838_v26, 0.0  ;;  %v8911_v58 = vcombine.low %v1859_v30, %v1863_v18  ;;  %v2066_v31 = vld [vmem:[#allocation8 + $0xb40] sm:$0xff]  ;;  %v1879_v26 = vld [vmem:[#allocation8 + $0x568] sm:$0xff] }
 0x238   : > { %v844_v61 = vadd.f32 %v843_v53, %v11614_v22  ;;  %5227 = vmatpush1.bf16.msra.mxu0 %v9093_v32  ;;  %v1421_v34 = vmax.f32 %v840_v55, 0.0  ;;  %v2070_v2 = vld [vmem:[#allocation8 + $0xb60] sm:$0xff]  ;;  %v8920_v53 = vcombine.high %v1867_v16, %v1871_v54 }
 0x239   : > { %v1428_v14 = vmax.f32 %v842_v3, 0.0  ;;  %5635 = vmatmul.mubr.bf16.gmra.mrb[196].mxu1 %v11181_v7  ;;  %5228 = vmatprep.subr.bf16.mxu0 %v9102_v59  ;;  %v9109_v59 = vcombine.low %v2058_v35, %v2062_v38  ;;  %v9118_v3 = vcombine.high %v2066_v31, %v2070_v2  ;;  %v1883_v38 = vld [vmem:[#allocation8 + $0x588] sm:$0xff] }
 0x23a   : > { %v1429_v47 = vmax.f32 %v844_v61, 0.0  ;;  %5644 = vmatprep.mubr.bf16.mxu1 %v11206_v36  ;;  %5790 = vmatpush1.bf16.msra.mxu1 %v8903_v39  ;;  %v8919_v39 = vcombine.low %v1867_v16, %v1871_v54  ;;  %v2086_v36 = vld [vmem:[#allocation8 + $0xbe0] sm:$0xff] }
 0x23b   : > { %v11736_v42 = vpack.c.bf16 %v1428_v14, %v1420_v41  ;;  %5791 = vmatprep.subr.bf16.mxu1 %v8912_v62  ;;  %v2074_v62 = vld [vmem:[#allocation8 + $0xb80] sm:$0xff]  ;;  %v1887_v14 = vld [vmem:[#allocation8 + $0x5a8] sm:$0xff] }
 0x23c   : > { %v11738_v32 = vpack.c.bf16 %v1429_v47, %v1421_v34  ;;  %v847_v8 = vpop.f32.mrb[92].mxu1  ;;  %5229 = vmatpush1.bf16.msra.mxu0 %v9101_v56  ;;  %v2078_v47 = vld [vmem:[#allocation8 + $0xba0] sm:$0xff]  ;;  %v8928_v56 = vcombine.high %v1875_v1, %v1879_v26 }
 0x23d   : > { %13429 = vst [vmem:[#allocation101_spill] sm:$0xff] %v11736_v42  ;;  %v848_v55 = vadd.f32 %v847_v8, %v11607_v63  ;;  %v849_v61 = vpop.f32.mrb[93].mxu1  ;;  %5230 = vmatprep.subr.bf16.mxu0 %v9110_v15  ;;  %v9117_v15 = vcombine.low %v2066_v31, %v2070_v2  ;;  %v9126_v54 = vcombine.high %v2074_v62, %v2078_v47  ;;  %v1891_v31 = vld [vmem:[#allocation8 + $0x5c8] sm:$0xff] }
 0x23e   : > { %13430 = vst [vmem:[#allocation102_spill] sm:$0xff] %v11738_v32  ;;  %v850_v30 = vadd.f32 %v849_v61, %v11614_v22  ;;  %v851_v18 = vpop.f32.mrb[94].mxu1  ;;  %5105 = vmatprep.mubr.bf16.mxu0 %v11738_v32  ;;  %5792 = vmatpush1.bf16.msra.mxu1 %v8911_v58 }
 0x23f   : > { %v852_v34 = vadd.f32 %v851_v18, %v11607_v63  ;;  %v853_v41 = vpop.f32.mrb[95].mxu1  ;;  %5106 = vmatmul.mubr.bf16.gmra.mrb[88].mxu0 %v11736_v42  ;;  %5793 = vmatprep.subr.bf16.mxu1 %v8920_v53  ;;  %v1436_v8 = vmax.f32 %v848_v55, 0.0  ;;  %v8927_v18 = vcombine.low %v1875_v1, %v1879_v26  ;;  %v2082_v53 = vld [vmem:[#allocation8 + $0xbc0] sm:$0xff]  ;;  %v1895_v55 = vld [vmem:[#allocation8 + $0x5e8] sm:$0xff] }
 0x240   : > { %v854_v35 = vadd.f32 %v853_v41, %v11614_v22  ;;  %5231 = vmatpush1.bf16.msra.mxu0 %v9109_v59  ;;  %v1437_v16 = vmax.f32 %v850_v30, 0.0  ;;  %v8936_v41 = vcombine.high %v1883_v38, %v1887_v14 }
 0x241   : > { %v1444_v61 = vmax.f32 %v852_v34, 0.0  ;;  %5645 = vmatmul.mubr.bf16.gmra.mrb[200].mxu1 %v11202_v28  ;;  %5232 = vmatprep.subr.bf16.mxu0 %v9118_v3  ;;  %v9125_v3 = vcombine.low %v2074_v62, %v2078_v47  ;;  %v1899_v47 = vld [vmem:[#allocation8 + $0x608] sm:$0xff] }
 0x242   : > { %v1445_v58 = vmax.f32 %v854_v35, 0.0  ;;  %5654 = vmatprep.mubr.bf16.mxu1 %v11227_v13  ;;  %5794 = vmatpush1.bf16.msra.mxu1 %v8919_v39  ;;  %v9134_v35 = vcombine.high %v2082_v53, %v2086_v36  ;;  %v8935_v39 = vcombine.low %v1883_v38, %v1887_v14  ;;  %v9142_v38 = vcombine.high %v11716_v45, %v11718_v21 }
 0x243   : > { %v11748_v7 = vpack.c.bf16 %v1444_v61, %v1436_v8  ;;  %5795 = vmatprep.subr.bf16.mxu1 %v8928_v56  ;;  %v1903_v61 = vld [vmem:[#allocation8 + $0x628] sm:$0xff] }
 0x244   : > { %v11750_v59 = vpack.c.bf16 %v1445_v58, %v1437_v16  ;;  %v857_v2 = vpop.f32.mrb[96].mxu1  ;;  %5233 = vmatpush1.bf16.msra.mxu0 %v9117_v15  ;;  %v8944_v15 = vcombine.high %v1891_v31, %v1895_v55 }
 0x245   : > { %13431 = vst [vmem:[#allocation103_spill] sm:$0xff] %v11748_v7  ;;  %v858_v30 = vadd.f32 %v857_v2, %v11607_v63  ;;  %v859_v34 = vpop.f32.mrb[97].mxu1  ;;  %5234 = vmatprep.subr.bf16.mxu0 %v9126_v54  ;;  %v9133_v54 = vcombine.low %v2082_v53, %v2086_v36  ;;  %v1907_v53 = vld [vmem:[#allocation8 + $0x648] sm:$0xff] }
 0x246   : > { %13432 = vst [vmem:[#allocation104_spill] sm:$0xff] %v11750_v59  ;;  %v860_v1 = vadd.f32 %v859_v34, %v11614_v22  ;;  %v861_v26 = vpop.f32.mrb[98].mxu1  ;;  %5115 = vmatprep.mubr.bf16.mxu0 %v11750_v59  ;;  %5796 = vmatpush1.bf16.msra.mxu1 %v8927_v18  ;;  %v8952_v34 = vcombine.high %v1899_v47, %v1903_v61 }
 0x247   : > { %v862_v56 = vadd.f32 %v861_v26, %v11607_v63  ;;  %v863_v8 = vpop.f32.mrb[99].mxu1  ;;  %5116 = vmatmul.mubr.bf16.gmra.mrb[92].mxu0 %v11748_v7  ;;  %5797 = vmatprep.subr.bf16.mxu1 %v8936_v41  ;;  %v1452_v16 = vmax.f32 %v858_v30, 0.0  ;;  %v8943_v41 = vcombine.low %v1891_v31, %v1895_v55  ;;  %v1911_v30 = vld [vmem:[#allocation8 + $0x668] sm:$0xff]  ;;  %v8951_v31 = vcombine.low %v1899_v47, %v1903_v61 }
 0x248   : > { %v864_v62 = vadd.f32 %v863_v8, %v11614_v22  ;;  %5235 = vmatpush1.bf16.msra.mxu0 %v9125_v3  ;;  %v1453_v14 = vmax.f32 %v860_v1, 0.0  ;;  %v8960_v8 = vcombine.high %v1907_v53, %v1911_v30  ;;  %v8959_v47 = vcombine.low %v1907_v53, %v1911_v30 }
 0x249   : > { %v1460_v58 = vmax.f32 %v862_v56, 0.0  ;;  %5655 = vmatmul.mubr.bf16.gmra.mrb[204].mxu1 %v11223_v51  ;;  %5236 = vmatprep.subr.bf16.mxu0 %v9134_v35 }
 0x24a   : > { %v1461_v18 = vmax.f32 %v864_v62, 0.0  ;;  %5664 = vmatprep.mubr.bf16.mxu1 %v11252_v11  ;;  %5798 = vmatpush1.bf16.msra.mxu1 %v8935_v39  ;;  %v1915_v62 = vld [vmem:[#allocation8 + $0x688] sm:$0xff]  ;;  %v2118_v11 = vld [vmem:[#allocation8 + $0xce0] sm:$0xff] }
 0x24b   : > { %v11762_v2 = vpack.c.bf16 %v1460_v58, %v1452_v16  ;;  %5799 = vmatprep.subr.bf16.mxu1 %v8944_v15 }
 0x24c   : > { %v11764_v3 = vpack.c.bf16 %v1461_v18, %v1453_v14  ;;  %v867_v36 = vpop.f32.mrb[100].mxu1  ;;  %5237 = vmatpush1.bf16.msra.mxu0 %v9133_v54  ;;  %v1919_v54 = vld [vmem:[#allocation8 + $0x6a8] sm:$0xff] }
 0x24d   : > { %13433 = vst [vmem:[#allocation105_spill] sm:$0xff] %v11762_v2  ;;  %v868_v35 = vadd.f32 %v867_v36, %v11607_v63  ;;  %v869_v26 = vpop.f32.mrb[101].mxu1  ;;  %5399 = vmatprep.subr.bf16.mxu0 %v9142_v38  ;;  %v8968_v18 = vcombine.high %v1915_v62, %v1919_v54  ;;  %v1923_v36 = vld [vmem:[#allocation8 + $0x6c8] sm:$0xff] }
 0x24e   : > { %13434 = vst [vmem:[#allocation106_spill] sm:$0xff] %v11764_v3  ;;  %v870_v1 = vadd.f32 %v869_v26, %v11614_v22  ;;  %v871_v56 = vpop.f32.mrb[102].mxu1  ;;  %5125 = vmatprep.mubr.bf16.mxu0 %v11764_v3  ;;  %5800 = vmatpush1.bf16.msra.mxu1 %v8943_v41  ;;  %v1927_v26 = vld [vmem:[#allocation8 + $0x6e8] sm:$0xff] }
 0x24f   : > { %v872_v55 = vadd.f32 %v871_v56, %v11607_v63  ;;  %v873_v39 = vpop.f32.mrb[103].mxu1  ;;  %5126 = vmatmul.mubr.bf16.gmra.mrb[96].mxu0 %v11762_v2  ;;  %5801 = vmatprep.subr.bf16.mxu1 %v8952_v34  ;;  %v1468_v16 = vmax.f32 %v868_v35, 0.0 }
 0x250   : > { %v874_v15 = vadd.f32 %v873_v39, %v11614_v22  ;;  %v1469_v38 = vmax.f32 %v870_v1, 0.0  ;;  %v8976_v39 = vcombine.high %v1923_v36, %v1927_v26 }
 0x251   : > { %v1476_v58 = vmax.f32 %v872_v55, 0.0  ;;  %5665 = vmatmul.mubr.bf16.gmra.mrb[208].mxu1 %v11248_v12  ;;  %v1959_v12 = vld [vmem:[#allocation8 + $0x7e8] sm:$0xff] }
 0x252   : > { %v1477_v14 = vmax.f32 %v874_v15, 0.0  ;;  %5674 = vmatprep.mubr.bf16.mxu1 %v11308_v4  ;;  %5802 = vmatpush1.bf16.msra.mxu1 %v8951_v31  ;;  %v8967_v31 = vcombine.low %v1915_v62, %v1919_v54  ;;  %v1931_v15 = vld [vmem:[#allocation8 + $0x708] sm:$0xff]  ;;  %v8975_v62 = vcombine.low %v1923_v36, %v1927_v26 }
 0x253   : > { %v11774_v61 = vpack.c.bf16 %v1476_v58, %v1468_v16  ;;  %5803 = vmatprep.subr.bf16.mxu1 %v8960_v8  ;;  %v1935_v16 = vld [vmem:[#allocation8 + $0x728] sm:$0xff] }
 0x254   : > { %v11776_v41 = vpack.c.bf16 %v1477_v14, %v1469_v38  ;;  %v877_v34 = vpop.f32.mrb[104].mxu1  ;;  %v13437_v14 = vld [vmem:[#allocation44_spill] sm:$0xff] }
 0x255   : > { %13435 = vst [vmem:[#allocation107_spill] sm:$0xff] %v11774_v61  ;;  %v878_v35 = vadd.f32 %v877_v34, %v11607_v63  ;;  %v879_v56 = vpop.f32.mrb[105].mxu1  ;;  %v1943_v4 = vld [vmem:[#allocation8 + $0x768] sm:$0xff] }
 0x256   : > { %13436 = vst [vmem:[#allocation108_spill] sm:$0xff] %v11776_v41  ;;  %v880_v55 = vadd.f32 %v879_v56, %v11614_v22  ;;  %v881_v1 = vpop.f32.mrb[106].mxu1  ;;  %5135 = vmatprep.mubr.bf16.mxu0 %v11776_v41  ;;  %5804 = vmatpush1.bf16.msra.mxu1 %v8959_v47  ;;  %v8984_v47 = vcombine.high %v1931_v15, %v1935_v16 }
 0x257   : > { %v882_v53 = vadd.f32 %v881_v1, %v11607_v63  ;;  %v883_v30 = vpop.f32.mrb[107].mxu1  ;;  %5136 = vmatmul.mubr.bf16.gmra.mrb[100].mxu0 %v11774_v61  ;;  %5805 = vmatprep.subr.bf16.mxu1 %v8968_v18  ;;  %v1484_v58 = vmax.f32 %v878_v35, 0.0 }
 0x258   : > { %v884_v8 = vadd.f32 %v883_v30, %v11614_v22  ;;  %v1485_v34 = vmax.f32 %v880_v55, 0.0  ;;  %v1939_v30 = vld [vmem:[#allocation8 + $0x748] sm:$0xff] }
 0x259   : > { %v1492_v38 = vmax.f32 %v882_v53, 0.0  ;;  %5675 = vmatmul.mubr.bf16.gmra.mrb[212].mxu1 %v13437_v14 }
 0x25a   : > { %v1493_v56 = vmax.f32 %v884_v8, 0.0  ;;  %5684 = vmatprep.mubr.bf16.mxu1 %v11369_v27  ;;  %5806 = vmatpush1.bf16.msra.mxu1 %v8967_v31  ;;  %v8983_v31 = vcombine.low %v1931_v15, %v1935_v16  ;;  %v8991_v15 = vcombine.low %v1939_v30, %v1943_v4 }
 0x25b   : > { %v11786_v54 = vpack.c.bf16 %v1492_v38, %v1484_v58  ;;  %5807 = vmatprep.subr.bf16.mxu1 %v8976_v39  ;;  %v8992_v39 = vcombine.high %v1939_v30, %v1943_v4  ;;  %v1947_v58 = vld [vmem:[#allocation8 + $0x788] sm:$0xff] }
 0x25c   : > { %v11788_v18 = vpack.c.bf16 %v1493_v56, %v1485_v34  ;;  %v887_v1 = vpop.f32.mrb[108].mxu1  ;;  %v1951_v38 = vld [vmem:[#allocation8 + $0x7a8] sm:$0xff] }
 0x25d   : > { %13438 = vst [vmem:[#allocation109_spill] sm:$0xff] %v11786_v54  ;;  %v888_v35 = vadd.f32 %v887_v1, %v11607_v63  ;;  %v889_v53 = vpop.f32.mrb[109].mxu1  ;;  %v13440_v1 = vld [vmem:[#allocation48_spill] sm:$0xff] }
 0x25e   : > { %13439 = vst [vmem:[#allocation110_spill] sm:$0xff] %v11788_v18  ;;  %v890_v14 = vadd.f32 %v889_v53, %v11614_v22  ;;  %v891_v55 = vpop.f32.mrb[110].mxu1  ;;  %5145 = vmatprep.mubr.bf16.mxu0 %v11788_v18  ;;  %5808 = vmatpush1.bf16.msra.mxu1 %v8975_v62  ;;  %v9000_v62 = vcombine.high %v1947_v58, %v1951_v38 }
 0x25f   : > { %v892_v36 = vadd.f32 %v891_v55, %v11607_v63  ;;  %v893_v26 = vpop.f32.mrb[111].mxu1  ;;  %5146 = vmatmul.mubr.bf16.gmra.mrb[104].mxu0 %v11786_v54  ;;  %5809 = vmatprep.subr.bf16.mxu1 %v8984_v47  ;;  %v1500_v34 = vmax.f32 %v888_v35, 0.0 }
 0x260   : > { %v894_v8 = vadd.f32 %v893_v26, %v11614_v22  ;;  %v1501_v53 = vmax.f32 %v890_v14, 0.0  ;;  %v1955_v26 = vld [vmem:[#allocation8 + $0x7c8] sm:$0xff] }
 0x261   : > { %v1508_v56 = vmax.f32 %v892_v36, 0.0  ;;  %5685 = vmatmul.mubr.bf16.gmra.mrb[216].mxu1 %v13440_v1 }
 0x262   : > { %v1509_v27 = vmax.f32 %v894_v8, 0.0  ;;  %5694 = vmatprep.mubr.bf16.mxu1 %v11422_v48  ;;  %5810 = vmatpush1.bf16.msra.mxu1 %v8983_v31  ;;  %v8999_v31 = vcombine.low %v1947_v58, %v1951_v38  ;;  %v9016_v38 = vcombine.high %v11720_v57, %v11725_v43  ;;  %v2114_v48 = vld [vmem:[#allocation8 + $0xcc0] sm:$0xff] }
 0x263   : > { %v11798_v16 = vpack.c.bf16 %v1508_v56, %v1500_v34  ;;  %5811 = vmatprep.subr.bf16.mxu1 %v8992_v39 }
 0x264   : > { %v11800_v47 = vpack.c.bf16 %v1509_v27, %v1501_v53  ;;  %v897_v55 = vpop.f32.mrb[112].mxu1  ;;  %v9008_v27 = vcombine.high %v1955_v26, %v1959_v12 }
 0x265   : > { %13441 = vst [vmem:[#allocation111_spill] sm:$0xff] %v11798_v16  ;;  %v898_v35 = vadd.f32 %v897_v55, %v11607_v63  ;;  %v899_v36 = vpop.f32.mrb[113].mxu1 }
 0x266   : > { %13442 = vst [vmem:[#allocation112_spill] sm:$0xff] %v11800_v47  ;;  %v900_v1 = vadd.f32 %v899_v36, %v11614_v22  ;;  %v901_v14 = vpop.f32.mrb[114].mxu1  ;;  %5155 = vmatprep.mubr.bf16.mxu0 %v11800_v47  ;;  %5812 = vmatpush1.bf16.msra.mxu1 %v8991_v15  ;;  %v9007_v15 = vcombine.low %v1955_v26, %v1959_v12 }
 0x267   : > { %v902_v4 = vadd.f32 %v901_v14, %v11607_v63  ;;  %v903_v30 = vpop.f32.mrb[115].mxu1  ;;  %5156 = vmatmul.mubr.bf16.gmra.mrb[108].mxu0 %v11798_v16  ;;  %5813 = vmatprep.subr.bf16.mxu1 %v9000_v62  ;;  %v1516_v8 = vmax.f32 %v898_v35, 0.0 }
 0x268   : > { %v904_v39 = vadd.f32 %v903_v30, %v11614_v22  ;;  %v1517_v56 = vmax.f32 %v900_v1, 0.0 }
 0x269   : > { %v1524_v34 = vmax.f32 %v902_v4, 0.0  ;;  %5695 = vmatmul.mubr.bf16.gmra.mrb[220].mxu1 %v11416_v25 }
 0x26a   : > { %v1525_v53 = vmax.f32 %v904_v39, 0.0  ;;  %5704 = vmatprep.mubr.bf16.mxu1 %v11461_v19  ;;  %5814 = vmatpush1.bf16.msra.mxu1 %v8999_v31 }
 0x26b   : > { %v11810_v58 = vpack.c.bf16 %v1524_v34, %v1516_v8  ;;  %5815 = vmatprep.subr.bf16.mxu1 %v9008_v27 }
 0x26c   : > { %v11814_v62 = vpack.c.bf16 %v1525_v53, %v1517_v56  ;;  %v907_v55 = vpop.f32.mrb[116].mxu1 }
 0x26d   : > { %13443 = vst [vmem:[#allocation113_spill] sm:$0xff] %v11810_v58  ;;  %v908_v35 = vadd.f32 %v907_v55, %v11607_v63  ;;  %v909_v36 = vpop.f32.mrb[117].mxu1 }
 0x26e   : > { %13444 = vst [vmem:[#allocation114_spill] sm:$0xff] %v11814_v62  ;;  %v910_v14 = vadd.f32 %v909_v36, %v11614_v22  ;;  %v911_v1 = vpop.f32.mrb[118].mxu1  ;;  %5165 = vmatprep.mubr.bf16.mxu0 %v11814_v62  ;;  %5816 = vmatpush1.bf16.msra.mxu1 %v9007_v15 }
 0x26f   : > { %v912_v12 = vadd.f32 %v911_v1, %v11607_v63  ;;  %v913_v26 = vpop.f32.mrb[119].mxu1  ;;  %5166 = vmatmul.mubr.bf16.gmra.mrb[112].mxu0 %v11810_v58  ;;  %5978 = vmatprep.subr.bf16.mxu1 %v9016_v38  ;;  %v1532_v4 = vmax.f32 %v908_v35, 0.0 }
 0x270   : > { %v914_v31 = vadd.f32 %v913_v26, %v11614_v22  ;;  %v1533_v27 = vmax.f32 %v910_v14, 0.0  ;;  %v13447_v26 = vld [vmem:[#allocation60_spill] sm:$0xff] }
 0x271   : > { %v1540_v30 = vmax.f32 %v912_v12, 0.0  ;;  %5705 = vmatmul.mubr.bf16.gmra.mrb[224].mxu1 %v11457_v29  ;;  %v2106_v29 = vld [vmem:[#allocation8 + $0xc80] sm:$0xff] }
 0x272   : > { %v1541_v39 = vmax.f32 %v914_v31, 0.0  ;;  %5714 = vmatprep.mubr.bf16.mxu1 %v11482_v6 }
 0x273   : > { %v11824_v8 = vpack.c.bf16 %v1540_v30, %v1532_v4 }
 0x274   : > { %v11826_v34 = vpack.c.bf16 %v1541_v39, %v1533_v27  ;;  %v917_v56 = vpop.f32.mrb[120].mxu1 }
 0x275   : > { %13445 = vst [vmem:[#allocation115_spill] sm:$0xff] %v11824_v8  ;;  %v918_v53 = vadd.f32 %v917_v56, %v11607_v63  ;;  %v919_v15 = vpop.f32.mrb[121].mxu1 }
 0x276   : > { %13446 = vst [vmem:[#allocation116_spill] sm:$0xff] %v11826_v34  ;;  %v920_v38 = vadd.f32 %v919_v15, %v11614_v22  ;;  %v921_v55 = vpop.f32.mrb[122].mxu1  ;;  %5175 = vmatprep.mubr.bf16.mxu0 %v11826_v34 }
 0x277   : > { %v922_v35 = vadd.f32 %v921_v55, %v11607_v63  ;;  %v923_v36 = vpop.f32.mrb[123].mxu1  ;;  %5176 = vmatmul.mubr.bf16.gmra.mrb[116].mxu0 %v11824_v8  ;;  %v1548_v1 = vmax.f32 %v918_v53, 0.0 }
 0x278   : > { %v924_v14 = vadd.f32 %v923_v36, %v11614_v22  ;;  %v1549_v31 = vmax.f32 %v920_v38, 0.0  ;;  %v13450_v36 = vsub.s32 6, %v10874_v5 }
 0x279   : > { %v1556_v12 = vmax.f32 %v922_v35, 0.0  ;;  %5715 = vmatmul.mubr.bf16.gmra.mrb[228].mxu1 %v13447_v26 }
 0x27a   : > { %v1557_v4 = vmax.f32 %v924_v14, 0.0  ;;  %5724 = vmatprep.mubr.bf16.mxu1 %v11503_v23  ;;  %v11849_v14 = vrot.slane %v11602_v24, %v13450_v36 }
 0x27b   : > { %v11836_v30 = vpack.c.bf16 %v1556_v12, %v1548_v1 }
 0x27c   : > { %v11838_v27 = vpack.c.bf16 %v1557_v4, %v1549_v31  ;;  %v927_v39 = vpop.f32.mrb[124].mxu1  ;;  %v13451_v31 = vld [vmem:[#allocation64_spill] sm:$0xff]  ;;  %v13452_v4 = vsub.s32 7, %v10874_v5 }
 0x27d   : > { %13448 = vst [vmem:[#allocation117_spill] sm:$0xff] %v11836_v30  ;;  %v928_v56 = vadd.f32 %v927_v39, %v11607_v63  ;;  %v929_v15 = vpop.f32.mrb[125].mxu1 }
 0x27e   : > { %13449 = vst [vmem:[#allocation118_spill] sm:$0xff] %v11838_v27  ;;  %v930_v55 = vadd.f32 %v929_v15, %v11614_v22  ;;  %v931_v6 = vpop.f32.mrb[126].mxu1  ;;  %5185 = vmatprep.mubr.bf16.mxu0 %v11838_v27  ;;  %v11855_v39 = vrot.slane %v11602_v24, %v13452_v4 }
 0x27f   : > { %v932_v53 = vadd.f32 %v931_v6, %v11607_v63  ;;  %v933_v35 = vpop.f32.mrb[127].mxu1  ;;  %5186 = vmatmul.mubr.bf16.gmra.mrb[120].mxu0 %v11836_v30  ;;  %v1564_v1 = vmax.f32 %v928_v56, 0.0 }
 0x280   : > { %v934_v38 = vadd.f32 %v933_v35, %v11614_v22  ;;  %v1565_v6 = vmax.f32 %v930_v55, 0.0 }
 0x281   : > { %v1572_v12 = vmax.f32 %v932_v53, 0.0  ;;  %5725 = vmatmul.mubr.bf16.gmra.mrb[232].mxu1 %v13451_v31 }
 0x282   : > { %v1573_v63 = vmax.f32 %v934_v38, 0.0  ;;  %5734 = vmatprep.mubr.bf16.mxu1 %v11524_v33  ;;  %v13455_v38 = vld [vmem:[#allocation29_spill] sm:$0xff] }
 0x283   : > { %v11858_v15 = vpack.c.bf16 %v1572_v12, %v1564_v1 }
 0x284   : > { %v11860_v22 = vpack.c.bf16 %v1573_v63, %v1565_v6  ;;  %v1163_v35 = vpop.f32.mrb[128].mxu1 }
 0x285   : > { %13453 = vst [vmem:[#allocation119_spill] sm:$0xff] %v11858_v15  ;;  %v1164_v36 = vadd.f32 %v1163_v35, %v11849_v14  ;;  %v1165_v56 = vpop.f32.mrb[129].mxu1  ;;  %v2098_v35 = vld [vmem:[#allocation8 + $0xc40] sm:$0xff] }
 0x286   : > { %13454 = vst [vmem:[#allocation120_spill] sm:$0xff] %v11860_v22  ;;  %v1166_v53 = vadd.f32 %v1165_v56, %v11855_v39  ;;  %v1167_v31 = vpop.f32.mrb[130].mxu1  ;;  %5195 = vmatprep.mubr.bf16.mxu0 %v11860_v22  ;;  %v2102_v56 = vld [vmem:[#allocation8 + $0xc60] sm:$0xff] }
 0x287   : > { %v1168_v24 = vadd.f32 %v1167_v31, %v11849_v14  ;;  %v1169_v4 = vpop.f32.mrb[131].mxu1  ;;  %5196 = vmatmul.mubr.bf16.gmra.mrb[124].mxu0 %v11858_v15  ;;  %v1328_v1 = vmax.f32 %v1164_v36, 0.0  ;;  %v9150_v26 = vcombine.high %v2098_v35, %v2102_v56 }
 0x288   : > { %v1170_v55 = vadd.f32 %v1169_v4, %v11855_v39  ;;  %5238 = vmatprep.mubr.bf16.mxu0 %v13455_v38  ;;  %v1329_v6 = vmax.f32 %v1166_v53, 0.0 }
 0x289   : > { %v1336_v12 = vmax.f32 %v1168_v24, 0.0  ;;  %5735 = vmatmul.mubr.bf16.gmra.mrb[236].mxu1 %v11520_v49  ;;  %v2110_v49 = vld [vmem:[#allocation8 + $0xca0] sm:$0xff] }
 0x28a   : > { %v1337_v63 = vmax.f32 %v1170_v55, 0.0  ;;  %5744 = vmatprep.mubr.bf16.mxu1 %v11547_v0  ;;  %v13458_v0 = vld [vmem:[#allocation27_spill] sm:$0xff] }
 0x28b   : > { %v11871_v5 = vpack.c.bf16 %v1336_v12, %v1328_v1  ;;  %v13459_v12 = vld [vmem:[#allocation33_spill] sm:$0xff] }
 0x28c   : > { %v11873_v31 = vpack.c.bf16 %v1337_v63, %v1329_v6  ;;  %v1173_v33 = vpop.f32.mrb[132].mxu1  ;;  %v13460_v6 = vcombine.low %v11716_v45, %v11718_v21  ;;  %v9157_v45 = vcombine.low %v2106_v29, %v2110_v49 }
 0x28d   : > { %13456 = vst [vmem:[#allocation121_spill] sm:$0xff] %v11871_v5  ;;  %v1174_v23 = vadd.f32 %v1173_v33, %v11849_v14  ;;  %v1175_v4 = vpop.f32.mrb[133].mxu1  ;;  %v9149_v33 = vcombine.low %v2098_v35, %v2102_v56  ;;  %v9166_v35 = vcombine.high %v2114_v48, %v2118_v11 }
 0x28e   : > { %13457 = vst [vmem:[#allocation122_spill] sm:$0xff] %v11873_v31  ;;  %v1176_v36 = vadd.f32 %v1175_v4, %v11855_v39  ;;  %v1177_v24 = vpop.f32.mrb[134].mxu1  ;;  %v9158_v4 = vcombine.high %v2106_v29, %v2110_v49  ;;  %v9165_v29 = vcombine.low %v2114_v48, %v2118_v11 }
 0x28f   : > { %v1178_v53 = vadd.f32 %v1177_v24, %v11849_v14  ;;  %v1179_v55 = vpop.f32.mrb[135].mxu1  ;;  %5239 = vmatmul.mubr.bf16.vlgmr.msra.gmra.mrb[64].mxu0 %v13458_v0  ;;  %v1344_v63 = vmax.f32 %v1174_v23, 0.0  ;;  %v2190_v0 = vld [vmem:[#allocation8 + $0xf20] sm:$0xff] }
 0x290   : > { %v1180_v1 = vadd.f32 %v1179_v55, %v11855_v39  ;;  %5248 = vmatprep.mubr.bf16.mxu0 %v13459_v12  ;;  %5400 = vmatpush1.bf16.msra.mxu0 %v13460_v6  ;;  %v1345_v25 = vmax.f32 %v1176_v36, 0.0  ;;  %v2122_v36 = vld [vmem:[#allocation8 + $0xd00] sm:$0xff] }
 0x291   : > { %v1352_v19 = vmax.f32 %v1178_v53, 0.0  ;;  %5745 = vmatmul.mubr.bf16.gmra.mrb[240].mxu1 %v11541_v50  ;;  %5401 = vmatprep.subr.bf16.mxu0 %v9150_v26  ;;  %v2126_v53 = vld [vmem:[#allocation8 + $0xd20] sm:$0xff] }
 0x292   : > { %v1353_v24 = vmax.f32 %v1180_v1, 0.0  ;;  %5754 = vmatprep.mubr.bf16.mxu1 %v11568_v60 }
 0x293   : > { %v11886_v55 = vpack.c.bf16 %v1352_v19, %v1344_v63  ;;  %v13463_v19 = vld [vmem:[#allocation31_spill] sm:$0xff]  ;;  %v13464_v63 = vld [vmem:[#allocation37_spill] sm:$0xff] }
 0x294   : > { %v11888_v51 = vpack.c.bf16 %v1353_v24, %v1345_v25  ;;  %v1183_v13 = vpop.f32.mrb[136].mxu1  ;;  %5402 = vmatpush1.bf16.msra.mxu0 %v9149_v33  ;;  %v9174_v33 = vcombine.high %v2122_v36, %v2126_v53 }
 0x295   : > { %13461 = vst [vmem:[#allocation123_spill] sm:$0xff] %v11886_v55  ;;  %v1184_v23 = vadd.f32 %v1183_v13, %v11849_v14  ;;  %v1185_v21 = vpop.f32.mrb[137].mxu1  ;;  %5403 = vmatprep.subr.bf16.mxu0 %v9158_v4 }
 0x296   : > { %13462 = vst [vmem:[#allocation124_spill] sm:$0xff] %v11888_v51  ;;  %v1186_v26 = vadd.f32 %v1185_v21, %v11855_v39  ;;  %v1187_v56 = vpop.f32.mrb[138].mxu1  ;;  %v2130_v21 = vld [vmem:[#allocation8 + $0xd40] sm:$0xff] }
 0x297   : > { %v1188_v1 = vadd.f32 %v1187_v56, %v11849_v14  ;;  %v1189_v6 = vpop.f32.mrb[139].mxu1  ;;  %5249 = vmatmul.mubr.bf16.gmra.mrb[68].mxu0 %v13463_v19  ;;  %v1360_v13 = vmax.f32 %v1184_v23, 0.0  ;;  %v2134_v56 = vld [vmem:[#allocation8 + $0xd60] sm:$0xff]  ;;  %v11933_v19 = vld [vmem:[#allocation8 + $0xc08] sm:$0xff] }
 0x298   : > { %v1190_v25 = vadd.f32 %v1189_v6, %v11855_v39  ;;  %5258 = vmatprep.mubr.bf16.mxu0 %v13464_v63  ;;  %5404 = vmatpush1.bf16.msra.mxu0 %v9157_v45  ;;  %v1361_v4 = vmax.f32 %v1186_v26, 0.0  ;;  %v9173_v45 = vcombine.low %v2122_v36, %v2126_v53  ;;  %v9182_v23 = vcombine.high %v2130_v21, %v2134_v56 }
 0x299   : > { %v1368_v49 = vmax.f32 %v1188_v1, 0.0  ;;  %5755 = vmatmul.mubr.bf16.gmra.mrb[244].mxu1 %v11564_v17  ;;  %5405 = vmatprep.subr.bf16.mxu0 %v9166_v35  ;;  %v2138_v1 = vld [vmem:[#allocation8 + $0xd80] sm:$0xff]  ;;  %v9181_v36 = vcombine.low %v2130_v21, %v2134_v56 }
 0x29a   : > { %v1369_v24 = vmax.f32 %v1190_v25, 0.0  ;;  %5764 = vmatprep.mubr.bf16.mxu1 %v11589_v46  ;;  %v2142_v25 = vld [vmem:[#allocation8 + $0xda0] sm:$0xff] }
 0x29b   : > { %v11898_v60 = vpack.c.bf16 %v1368_v49, %v1360_v13  ;;  %v13467_v13 = vld [vmem:[#allocation35_spill] sm:$0xff] }
 0x29c   : > { %v11900_v50 = vpack.c.bf16 %v1369_v24, %v1361_v4  ;;  %v1193_v6 = vpop.f32.mrb[140].mxu1  ;;  %5406 = vmatpush1.bf16.msra.mxu0 %v9165_v29  ;;  %v13468_v4 = vld [vmem:[#allocation41_spill] sm:$0xff] }
 0x29d   : > { %13465 = vst [vmem:[#allocation125_spill] sm:$0xff] %v11898_v60  ;;  %v1194_v11 = vadd.f32 %v1193_v6, %v11849_v14  ;;  %v1195_v48 = vpop.f32.mrb[141].mxu1  ;;  %5407 = vmatprep.subr.bf16.mxu0 %v9174_v33  ;;  %v9190_v33 = vcombine.high %v2138_v1, %v2142_v25 }
 0x29e   : > { %13466 = vst [vmem:[#allocation126_spill] sm:$0xff] %v11900_v50  ;;  %v1196_v35 = vadd.f32 %v1195_v48, %v11855_v39  ;;  %v1197_v26 = vpop.f32.mrb[142].mxu1  ;;  %v2146_v48 = vld [vmem:[#allocation8 + $0xdc0] sm:$0xff] }
 0x29f   : > { %v1198_v46 = vadd.f32 %v1197_v26, %v11849_v14  ;;  %v1199_v17 = vpop.f32.mrb[143].mxu1  ;;  %5259 = vmatmul.mubr.bf16.gmra.mrb[72].mxu0 %v13467_v13  ;;  %v1376_v53 = vmax.f32 %v1194_v11, 0.0  ;;  %v2150_v26 = vld [vmem:[#allocation8 + $0xde0] sm:$0xff] }
 0x2a0   : > { %v1200_v49 = vadd.f32 %v1199_v17, %v11855_v39  ;;  %5268 = vmatprep.mubr.bf16.mxu0 %v13468_v4  ;;  %5408 = vmatpush1.bf16.msra.mxu0 %v9173_v45  ;;  %v1377_v24 = vmax.f32 %v1196_v35, 0.0  ;;  %v9189_v45 = vcombine.low %v2138_v1, %v2142_v25  ;;  %v9198_v56 = vcombine.high %v2146_v48, %v2150_v26  ;;  %v2154_v35 = vld [vmem:[#allocation8 + $0xe00] sm:$0xff] }
 0x2a1   : > { %v1384_v29 = vmax.f32 %v1198_v46, 0.0  ;;  %5765 = vmatmul.mubr.bf16.gmra.mrb[248].mxu1 %v11585_v44  ;;  %5409 = vmatprep.subr.bf16.mxu0 %v9182_v23  ;;  %v9197_v1 = vcombine.low %v2146_v48, %v2150_v26 }
 0x2a2   : > { %v1385_v6 = vmax.f32 %v1200_v49, 0.0  ;;  %5774 = vmatprep.mubr.bf16.mxu1 %v11623_v40  ;;  %v2158_v49 = vld [vmem:[#allocation8 + $0xe20] sm:$0xff] }
 0x2a3   : > { %v11910_v28 = vpack.c.bf16 %v1384_v29, %v1376_v53  ;;  %v13471_v53 = vld [vmem:[#allocation39_spill] sm:$0xff]  ;;  %v9205_v48 = vcombine.low %v2154_v35, %v2158_v49 }
 0x2a4   : > { %v11912_v13 = vpack.c.bf16 %v1385_v6, %v1377_v24  ;;  %v1203_v17 = vpop.f32.mrb[144].mxu1  ;;  %5410 = vmatpush1.bf16.msra.mxu0 %v9181_v36  ;;  %v13472_v24 = vld [vmem:[#allocation45_spill] sm:$0xff] }
 0x2a5   : > { %13469 = vst [vmem:[#allocation127_spill] sm:$0xff] %v11910_v28  ;;  %v1204_v21 = vadd.f32 %v1203_v17, %v11849_v14  ;;  %v1205_v46 = vpop.f32.mrb[145].mxu1  ;;  %5411 = vmatprep.subr.bf16.mxu0 %v9190_v33  ;;  %v9206_v33 = vcombine.high %v2154_v35, %v2158_v49  ;;  %v1979_v35 = vld [vmem:[#allocation8 + $0x888] sm:$0xff] }
 0x2a6   : > { %13470 = vst [vmem:[#allocation128_spill] sm:$0xff] %v11912_v13  ;;  %v1206_v11 = vadd.f32 %v1205_v46, %v11855_v39  ;;  %v1207_v23 = vpop.f32.mrb[146].mxu1  ;;  %v2162_v46 = vld [vmem:[#allocation8 + $0xe40] sm:$0xff]  ;;  %v1983_v49 = vld [vmem:[#allocation8 + $0x8a8] sm:$0xff] }
 0x2a7   : > { %v1208_v40 = vadd.f32 %v1207_v23, %v11849_v14  ;;  %v1209_v44 = vpop.f32.mrb[147].mxu1  ;;  %5269 = vmatmul.mubr.bf16.gmra.mrb[76].mxu0 %v13471_v53  ;;  %v1392_v25 = vmax.f32 %v1204_v21, 0.0  ;;  %v2166_v23 = vld [vmem:[#allocation8 + $0xe60] sm:$0xff] }
 0x2a8   : > { %v1210_v29 = vadd.f32 %v1209_v44, %v11855_v39  ;;  %5278 = vmatprep.mubr.bf16.mxu0 %v13472_v24  ;;  %5412 = vmatpush1.bf16.msra.mxu0 %v9189_v45  ;;  %v1393_v6 = vmax.f32 %v1206_v11, 0.0  ;;  %v1971_v24 = vld [vmem:[#allocation8 + $0x848] sm:$0xff]  ;;  %v9214_v21 = vcombine.high %v2162_v46, %v2166_v23 }
 0x2a9   : > { %v1400_v36 = vmax.f32 %v1208_v40, 0.0  ;;  %5775 = vmatmul.mubr.bf16.gmra.mrb[252].mxu1 %v11619_v52  ;;  %5413 = vmatprep.subr.bf16.mxu0 %v9198_v56  ;;  %v1975_v45 = vld [vmem:[#allocation8 + $0x868] sm:$0xff] }
 0x2aa   : > { %v1401_v17 = vmax.f32 %v1210_v29, 0.0  ;;  %5817 = vmatprep.mubr.bf16.mxu1 %v11644_v37  ;;  %v2170_v29 = vld [vmem:[#allocation8 + $0xe80] sm:$0xff] }
 0x2ab   : > { %v11922_v4 = vpack.c.bf16 %v1400_v36, %v1392_v25  ;;  %v2174_v37 = vld [vmem:[#allocation8 + $0xea0] sm:$0xff] }
 0x2ac   : > { %v11924_v53 = vpack.c.bf16 %v1401_v17, %v1393_v6  ;;  %v1213_v44 = vpop.f32.mrb[148].mxu1  ;;  %5414 = vmatpush1.bf16.msra.mxu0 %v9197_v1  ;;  %v13475_v6 = vld [vmem:[#allocation43_spill] sm:$0xff]  ;;  %v9024_v17 = vcombine.high %v1971_v24, %v1975_v45  ;;  %v13476_v1 = vld [vmem:[#allocation49_spill] sm:$0xff] }
 0x2ad   : > { %13473 = vst [vmem:[#allocation129_spill] sm:$0xff] %v11922_v4  ;;  %v1214_v40 = vadd.f32 %v1213_v44, %v11849_v14  ;;  %v1215_v26 = vpop.f32.mrb[149].mxu1  ;;  %5415 = vmatprep.subr.bf16.mxu0 %v9206_v33  ;;  %v9213_v33 = vcombine.low %v2162_v46, %v2166_v23  ;;  %v9023_v46 = vcombine.low %v1971_v24, %v1975_v45  ;;  %v2178_v23 = vld [vmem:[#allocation8 + $0xec0] sm:$0xff] }
 0x2ae   : > { %13474 = vst [vmem:[#allocation130_spill] sm:$0xff] %v11924_v53  ;;  %v1216_v56 = vadd.f32 %v1215_v26, %v11855_v39  ;;  %v1217_v11 = vpop.f32.mrb[150].mxu1  ;;  %v9222_v26 = vcombine.high %v2170_v29, %v2174_v37  ;;  %v9221_v24 = vcombine.low %v2170_v29, %v2174_v37  ;;  %v1995_v29 = vld [vmem:[#allocation8 + $0x908] sm:$0xff]  ;;  %v13482_v4 = vld [vmem:[#allocation94_spill] sm:$0xff] }
 0x2af   : > { %v1218_v25 = vadd.f32 %v1217_v11, %v11849_v14  ;;  %v1219_v36 = vpop.f32.mrb[151].mxu1  ;;  %5279 = vmatmul.mubr.bf16.gmra.mrb[80].mxu0 %v13475_v6  ;;  %v1408_v44 = vmax.f32 %v1214_v40, 0.0  ;;  %v11935_v11 = vld [vmem:[#allocation8 + $0xc28] sm:$0xff]  ;;  %v11937_v6 = vld [vmem:[#allocation8 + $0x10] sm:$0xff]  ;;  %v2182_v40 = vld [vmem:[#allocation8 + $0xee0] sm:$0xff] }
 0x2b0   : > { %v1220_v52 = vadd.f32 %v1219_v36, %v11855_v39  ;;  %5288 = vmatprep.mubr.bf16.mxu0 %v13476_v1  ;;  %5416 = vmatpush1.bf16.msra.mxu0 %v9205_v48  ;;  %v1409_v12 = vmax.f32 %v1216_v56, 0.0  ;;  %v13477_v48 = vcombine.low %v11720_v57, %v11725_v43  ;;  %v9032_v1 = vcombine.high %v1979_v35, %v1983_v49  ;;  %v1987_v57 = vld [vmem:[#allocation8 + $0x8c8] sm:$0xff] }
 0x2b1   : > { %v1416_v63 = vmax.f32 %v1218_v25, 0.0  ;;  %5818 = vmatmul.mubr.bf16.vlgmr.msra.gmra.mrb[192].mxu1 %v11640_v9  ;;  %5417 = vmatprep.subr.bf16.mxu0 %v9214_v21  ;;  %v11945_v25 = vld [vmem:[#allocation8 + $0x30] sm:$0xff]  ;;  %v1991_v43 = vld [vmem:[#allocation8 + $0x8e8] sm:$0xff]  ;;  %v9230_v21 = vcombine.high %v2178_v23, %v2182_v40 }
 0x2b2   : > { %v1417_v36 = vmax.f32 %v1220_v52, 0.0  ;;  %5827 = vmatprep.mubr.bf16.mxu1 %v11660_v20  ;;  %5979 = vmatpush1.bf16.msra.mxu1 %v13477_v48  ;;  %v13480_v52 = vld [vmem:[#allocation47_spill] sm:$0xff] }
 0x2b3   : > { %v11947_v9 = vpack.c.bf16 %v1416_v63, %v1408_v44  ;;  %5980 = vmatprep.subr.bf16.mxu1 %v9024_v17  ;;  %v9031_v17 = vcombine.low %v1979_v35, %v1983_v49 }
 0x2b4   : > { %v11951_v56 = vpack.c.bf16 %v1417_v36, %v1409_v12  ;;  %v1223_v20 = vpop.f32.mrb[152].mxu1  ;;  %5418 = vmatpush1.bf16.msra.mxu0 %v9213_v33  ;;  %v9040_v33 = vcombine.high %v1987_v57, %v1991_v43 }
 0x2b5   : > { %13478 = vst [vmem:[#allocation131_spill] sm:$0xff] %v11947_v9  ;;  %v1224_v45 = vadd.f32 %v1223_v20, %v11849_v14  ;;  %v1225_v48 = vpop.f32.mrb[153].mxu1  ;;  %5419 = vmatprep.subr.bf16.mxu0 %v9222_v26  ;;  %v2186_v9 = vld [vmem:[#allocation8 + $0xf00] sm:$0xff]  ;;  %v13481_v20 = vld [vmem:[#allocation53_spill] sm:$0xff]  ;;  %v1999_v26 = vld [vmem:[#allocation8 + $0x928] sm:$0xff] }
 0x2b6   : > { %13479 = vst [vmem:[#allocation132_spill] sm:$0xff] %v11951_v56  ;;  %v1226_v63 = vadd.f32 %v1225_v48, %v11855_v39  ;;  %v1227_v44 = vpop.f32.mrb[154].mxu1  ;;  %5981 = vmatpush1.bf16.msra.mxu1 %v9023_v46  ;;  %v9229_v48 = vcombine.low %v2178_v23, %v2182_v40  ;;  %v9238_v35 = vcombine.high %v2186_v9, %v2190_v0  ;;  %v2003_v40 = vld [vmem:[#allocation8 + $0x948] sm:$0xff] }
 0x2b7   : > { %v1228_v12 = vadd.f32 %v1227_v44, %v11849_v14  ;;  %v1229_v36 = vpop.f32.mrb[155].mxu1  ;;  %5289 = vmatmul.mubr.bf16.gmra.mrb[84].mxu0 %v13480_v52  ;;  %5982 = vmatprep.subr.bf16.mxu1 %v9032_v1  ;;  %v1424_v56 = vmax.f32 %v1224_v45, 0.0  ;;  %v9039_v1 = vcombine.low %v1987_v57, %v1991_v43  ;;  %v2194_v52 = vld [vmem:[#allocation8 + $0xf40] sm:$0xff]  ;;  %v2007_v45 = vld [vmem:[#allocation8 + $0x968] sm:$0xff] }
 0x2b8   : > { %v1230_v37 = vadd.f32 %v1229_v36, %v11855_v39  ;;  %5298 = vmatprep.mubr.bf16.mxu0 %v13481_v20  ;;  %5420 = vmatpush1.bf16.msra.mxu0 %v9221_v24  ;;  %v1425_v49 = vmax.f32 %v1226_v63, 0.0  ;;  %v2198_v36 = vld [vmem:[#allocation8 + $0xf60] sm:$0xff]  ;;  %v9048_v20 = vcombine.high %v1995_v29, %v1999_v26 }
 0x2b9   : > { %v1432_v46 = vmax.f32 %v1228_v12, 0.0  ;;  %5828 = vmatmul.mubr.bf16.gmra.mrb[196].mxu1 %v11658_v10  ;;  %5421 = vmatprep.subr.bf16.mxu0 %v9230_v21  ;;  %v9237_v21 = vcombine.low %v2186_v9, %v2190_v0  ;;  %v13486_v9 = vld [vmem:[#allocation57_spill] sm:$0xff] }
 0x2ba   : > { %v1433_v44 = vmax.f32 %v1230_v37, 0.0  ;;  %5837 = vmatprep.mubr.bf16.mxu1 %v13482_v4  ;;  %5983 = vmatpush1.bf16.msra.mxu1 %v9031_v17  ;;  %v9246_v37 = vcombine.high %v2194_v52, %v2198_v36  ;;  %v2202_v17 = vld [vmem:[#allocation8 + $0xf80] sm:$0xff] }
 0x2bb   : > { %v11961_v38 = vpack.c.bf16 %v1432_v46, %v1424_v56  ;;  %5984 = vmatprep.subr.bf16.mxu1 %v9040_v33  ;;  %v9047_v56 = vcombine.low %v1995_v29, %v1999_v26  ;;  %v2206_v33 = vld [vmem:[#allocation8 + $0xfa0] sm:$0xff]  ;;  %v13487_v29 = vld [vmem:[#allocation93_spill] sm:$0xff] }
 0x2bc   : > { %v11963_v24 = vpack.c.bf16 %v1433_v44, %v1425_v49  ;;  %v1233_v23 = vpop.f32.mrb[156].mxu1  ;;  %5422 = vmatpush1.bf16.msra.mxu0 %v9229_v48  ;;  %v13485_v44 = vld [vmem:[#allocation51_spill] sm:$0xff]  ;;  %v9056_v48 = vcombine.high %v2003_v40, %v2007_v45  ;;  %v9254_v26 = vcombine.high %v2202_v17, %v2206_v33 }
 0x2bd   : > { %13483 = vst [vmem:[#allocation133_spill] sm:$0xff] %v11961_v38  ;;  %v1234_v63 = vadd.f32 %v1233_v23, %v11849_v14  ;;  %v1235_v12 = vpop.f32.mrb[157].mxu1  ;;  %5423 = vmatprep.subr.bf16.mxu0 %v9238_v35  ;;  %v2011_v35 = vld [vmem:[#allocation8 + $0x988] sm:$0xff] }
 0x2be   : > { %13484 = vst [vmem:[#allocation134_spill] sm:$0xff] %v11963_v24  ;;  %v1236_v57 = vadd.f32 %v1235_v12, %v11855_v39  ;;  %v1237_v43 = vpop.f32.mrb[158].mxu1  ;;  %5985 = vmatpush1.bf16.msra.mxu1 %v9039_v1  ;;  %v2015_v23 = vld [vmem:[#allocation8 + $0x9a8] sm:$0xff]  ;;  %v9245_v12 = vcombine.low %v2194_v52, %v2198_v36 }
 0x2bf   : > { %v1238_v46 = vadd.f32 %v1237_v43, %v11849_v14  ;;  %v1239_v49 = vpop.f32.mrb[159].mxu1  ;;  %5299 = vmatmul.mubr.bf16.gmra.mrb[88].mxu0 %v13485_v44  ;;  %5986 = vmatprep.subr.bf16.mxu1 %v9048_v20  ;;  %v1440_v4 = vmax.f32 %v1234_v63, 0.0  ;;  %v13488_v38 = vld [vmem:[#allocation96_spill] sm:$0xff]  ;;  %v9055_v20 = vcombine.low %v2003_v40, %v2007_v45  ;;  %v2210_v44 = vld [vmem:[#allocation8 + $0xfc0] sm:$0xff] }
 0x2c0   : > { %v1240_v0 = vadd.f32 %v1239_v49, %v11855_v39  ;;  %5308 = vmatprep.mubr.bf16.mxu0 %v13486_v9  ;;  %5424 = vmatpush1.bf16.msra.mxu0 %v9237_v21  ;;  %v1441_v43 = vmax.f32 %v1236_v57, 0.0  ;;  %v2214_v49 = vld [vmem:[#allocation8 + $0xfe0] sm:$0xff]  ;;  %v9064_v9 = vcombine.high %v2011_v35, %v2015_v23  ;;  %v2019_v36 = vld [vmem:[#allocation8 + $0x9c8] sm:$0xff] }
 0x2c1   : > { %v1448_v1 = vmax.f32 %v1238_v46, 0.0  ;;  %5838 = vmatmul.mubr.bf16.gmra.mrb[200].mxu1 %v13487_v29  ;;  %5425 = vmatprep.subr.bf16.mxu0 %v9246_v37  ;;  %v2023_v63 = vld [vmem:[#allocation8 + $0x9e8] sm:$0xff]  ;;  %v9253_v37 = vcombine.low %v2202_v17, %v2206_v33  ;;  %v13492_v17 = vld [vmem:[#allocation61_spill] sm:$0xff] }
 0x2c2   : > { %v1449_v10 = vmax.f32 %v1240_v0, 0.0  ;;  %5847 = vmatprep.mubr.bf16.mxu1 %v13488_v38  ;;  %5987 = vmatpush1.bf16.msra.mxu1 %v9047_v56  ;;  %v9262_v0 = vcombine.high %v2210_v44, %v2214_v49  ;;  %v2027_v33 = vld [vmem:[#allocation8 + $0xa08] sm:$0xff] }
 0x2c3   : > { %v11973_v24 = vpack.c.bf16 %v1448_v1, %v1440_v4  ;;  %5988 = vmatprep.subr.bf16.mxu1 %v9056_v48  ;;  %v9063_v4 = vcombine.low %v2011_v35, %v2015_v23  ;;  %v9072_v1 = vcombine.high %v2019_v36, %v2023_v63  ;;  %v13493_v38 = vld [vmem:[#allocation95_spill] sm:$0xff]  ;;  %v8762_v35 = vcombine.high %v11937_v6, %v11945_v25 }
 0x2c4   : > { %v11975_v21 = vpack.c.bf16 %v1449_v10, %v1441_v43  ;;  %v1243_v52 = vpop.f32.mrb[160].mxu1  ;;  %5426 = vmatpush1.bf16.msra.mxu0 %v9245_v12  ;;  %v13491_v10 = vld [vmem:[#allocation55_spill] sm:$0xff] }
 0x2c5   : > { %13489 = vst [vmem:[#allocation135_spill] sm:$0xff] %v11973_v24  ;;  %v1244_v57 = vadd.f32 %v1243_v52, %v11849_v14  ;;  %v1245_v46 = vpop.f32.mrb[161].mxu1  ;;  %5427 = vmatprep.subr.bf16.mxu0 %v9254_v26  ;;  %v2031_v43 = vld [vmem:[#allocation8 + $0xa28] sm:$0xff]  ;;  %v9261_v26 = vcombine.low %v2210_v44, %v2214_v49 }
 0x2c6   : > { %13490 = vst [vmem:[#allocation136_spill] sm:$0xff] %v11975_v21  ;;  %v1246_v40 = vadd.f32 %v1245_v46, %v11855_v39  ;;  %v1247_v45 = vpop.f32.mrb[162].mxu1  ;;  %5989 = vmatpush1.bf16.msra.mxu1 %v9055_v20  ;;  %v9080_v29 = vcombine.high %v2027_v33, %v2031_v43  ;;  %v2035_v49 = vld [vmem:[#allocation8 + $0xa48] sm:$0xff] }
 0x2c7   : > { %v1248_v56 = vadd.f32 %v1247_v45, %v11849_v14  ;;  %v1249_v48 = vpop.f32.mrb[163].mxu1  ;;  %5309 = vmatmul.mubr.bf16.gmra.mrb[92].mxu0 %v13491_v10  ;;  %5990 = vmatprep.subr.bf16.mxu1 %v9064_v9  ;;  %v1456_v52 = vmax.f32 %v1244_v57, 0.0  ;;  %v13494_v9 = vld [vmem:[#allocation98_spill] sm:$0xff]  ;;  %v9071_v45 = vcombine.low %v2019_v36, %v2023_v63  ;;  %v2039_v57 = vld [vmem:[#allocation8 + $0xa68] sm:$0xff] }
 0x2c8   : > { %v1250_v12 = vadd.f32 %v1249_v48, %v11855_v39  ;;  %5318 = vmatprep.mubr.bf16.mxu0 %v13492_v17  ;;  %5428 = vmatpush1.bf16.msra.mxu0 %v9253_v37  ;;  %v1457_v23 = vmax.f32 %v1246_v40, 0.0  ;;  %v13505_v17 = vld [vmem:[#allocation99_spill] sm:$0xff] }
 0x2c9   : > { %v1464_v46 = vmax.f32 %v1248_v56, 0.0  ;;  %5848 = vmatmul.mubr.bf16.gmra.mrb[204].mxu1 %v13493_v38  ;;  %5429 = vmatprep.subr.bf16.mxu0 %v9262_v0 }
 0x2ca   : > { %v1465_v20 = vmax.f32 %v1250_v12, 0.0  ;;  %5857 = vmatprep.mubr.bf16.mxu1 %v13494_v9  ;;  %5991 = vmatpush1.bf16.msra.mxu1 %v9063_v4  ;;  %v9079_v4 = vcombine.low %v2027_v33, %v2031_v43  ;;  %v13499_v9 = vld [vmem:[#allocation97_spill] sm:$0xff]  ;;  %v13500_v33 = vld [vmem:[#allocation100_spill] sm:$0xff]  ;;  %v9087_v43 = vcombine.low %v2035_v49, %v2039_v57 }
 0x2cb   : > { %v11987_v48 = vpack.c.bf16 %v1464_v46, %v1456_v52  ;;  %5992 = vmatprep.subr.bf16.mxu1 %v9072_v1  ;;  %v13497_v1 = vld [vmem:[#allocation59_spill] sm:$0xff]  ;;  %v9088_v52 = vcombine.high %v2035_v49, %v2039_v57 }
 0x2cc   : > { %v11989_v37 = vpack.c.bf16 %v1465_v20, %v1457_v23  ;;  %v1253_v44 = vpop.f32.mrb[164].mxu1  ;;  %5430 = vmatpush1.bf16.msra.mxu0 %v9261_v26  ;;  %v13498_v23 = vld [vmem:[#allocation65_spill] sm:$0xff]  ;;  %v2043_v26 = vld [vmem:[#allocation8 + $0xa88] sm:$0xff] }
 0x2cd   : > { %13495 = vst [vmem:[#allocation137_spill] sm:$0xff] %v11987_v48  ;;  %v1254_v0 = vadd.f32 %v1253_v44, %v11849_v14  ;;  %v1255_v56 = vpop.f32.mrb[165].mxu1  ;;  %6364 = vmatprep.subr.bf16.mxu0 %v8762_v35  ;;  %v2047_v20 = vld [vmem:[#allocation8 + $0xaa8] sm:$0xff] }
 0x2ce   : > { %13496 = vst [vmem:[#allocation138_spill] sm:$0xff] %v11989_v37  ;;  %v1256_v40 = vadd.f32 %v1255_v56, %v11855_v39  ;;  %v1257_v12 = vpop.f32.mrb[166].mxu1  ;;  %5993 = vmatpush1.bf16.msra.mxu1 %v9071_v45  ;;  %v13503_v57 = vld [vmem:[#allocation63_spill] sm:$0xff] }
 0x2cf   : > { %v1258_v36 = vadd.f32 %v1257_v12, %v11849_v14  ;;  %v1259_v63 = vpop.f32.mrb[167].mxu1  ;;  %5319 = vmatmul.mubr.bf16.gmra.mrb[96].mxu0 %v13497_v1  ;;  %5994 = vmatprep.subr.bf16.mxu1 %v9080_v29  ;;  %v1472_v44 = vmax.f32 %v1254_v0, 0.0  ;;  %v9096_v29 = vcombine.high %v2043_v26, %v2047_v20  ;;  %v2055_v1 = vld [vmem:[#allocation8 + $0xae8] sm:$0xff] }
 0x2d0   : > { %v1260_v46 = vadd.f32 %v1259_v63, %v11855_v39  ;;  %5328 = vmatprep.mubr.bf16.mxu0 %v13498_v23  ;;  %v1473_v56 = vmax.f32 %v1256_v40, 0.0  ;;  %v2051_v23 = vld [vmem:[#allocation8 + $0xac8] sm:$0xff] }
 0x2d1   : > { %v1480_v35 = vmax.f32 %v1258_v36, 0.0  ;;  %5858 = vmatmul.mubr.bf16.gmra.mrb[208].mxu1 %v13499_v9 }
 0x2d2   : > { %v1481_v45 = vmax.f32 %v1260_v46, 0.0  ;;  %5867 = vmatprep.mubr.bf16.mxu1 %v13500_v33  ;;  %5995 = vmatpush1.bf16.msra.mxu1 %v9079_v4  ;;  %v9095_v46 = vcombine.low %v2043_v26, %v2047_v20  ;;  %v9103_v26 = vcombine.low %v2051_v23, %v2055_v1 }
 0x2d3   : > { %v11999_v12 = vpack.c.bf16 %v1480_v35, %v1472_v44  ;;  %5996 = vmatprep.subr.bf16.mxu1 %v9088_v52  ;;  %v9104_v52 = vcombine.high %v2051_v23, %v2055_v1  ;;  %v13504_v35 = vld [vmem:[#allocation69_spill] sm:$0xff]  ;;  %v13508_v23 = vld [vmem:[#allocation67_spill] sm:$0xff] }
 0x2d4   : > { %v12001_v38 = vpack.c.bf16 %v1481_v45, %v1473_v56  ;;  %v1263_v63 = vpop.f32.mrb[168].mxu1  ;;  %v2059_v56 = vld [vmem:[#allocation8 + $0xb08] sm:$0xff] }
 0x2d5   : > { %13501 = vst [vmem:[#allocation139_spill] sm:$0xff] %v11999_v12  ;;  %v1264_v0 = vadd.f32 %v1263_v63, %v11849_v14  ;;  %v1265_v36 = vpop.f32.mrb[169].mxu1  ;;  %v2063_v45 = vld [vmem:[#allocation8 + $0xb28] sm:$0xff] }
 0x2d6   : > { %13502 = vst [vmem:[#allocation140_spill] sm:$0xff] %v12001_v38  ;;  %v1266_v9 = vadd.f32 %v1265_v36, %v11855_v39  ;;  %v1267_v40 = vpop.f32.mrb[170].mxu1  ;;  %5997 = vmatpush1.bf16.msra.mxu1 %v9087_v43 }
 0x2d7   : > { %v1268_v4 = vadd.f32 %v1267_v40, %v11849_v14  ;;  %v1269_v49 = vpop.f32.mrb[171].mxu1  ;;  %5329 = vmatmul.mubr.bf16.gmra.mrb[100].mxu0 %v13503_v57  ;;  %5998 = vmatprep.subr.bf16.mxu1 %v9096_v29  ;;  %v1488_v63 = vmax.f32 %v1264_v0, 0.0  ;;  %v9112_v29 = vcombine.high %v2059_v56, %v2063_v45  ;;  %v2071_v57 = vld [vmem:[#allocation8 + $0xb68] sm:$0xff] }
 0x2d8   : > { %v1270_v44 = vadd.f32 %v1269_v49, %v11855_v39  ;;  %5338 = vmatprep.mubr.bf16.mxu0 %v13504_v35  ;;  %v1489_v36 = vmax.f32 %v1266_v9, 0.0  ;;  %v2067_v35 = vld [vmem:[#allocation8 + $0xb48] sm:$0xff] }
 0x2d9   : > { %v1496_v33 = vmax.f32 %v1268_v4, 0.0  ;;  %5868 = vmatmul.mubr.bf16.gmra.mrb[212].mxu1 %v13505_v17 }
 0x2da   : > { %v1497_v43 = vmax.f32 %v1270_v44, 0.0  ;;  %5877 = vmatprep.mubr.bf16.mxu1 %v11738_v32  ;;  %5999 = vmatpush1.bf16.msra.mxu1 %v9095_v46  ;;  %v9111_v44 = vcombine.low %v2059_v56, %v2063_v45  ;;  %v9119_v56 = vcombine.low %v2067_v35, %v2071_v57 }
 0x2db   : > { %v12011_v20 = vpack.c.bf16 %v1496_v33, %v1488_v63  ;;  %6000 = vmatprep.subr.bf16.mxu1 %v9104_v52  ;;  %v9120_v33 = vcombine.high %v2067_v35, %v2071_v57  ;;  %v13509_v63 = vld [vmem:[#allocation73_spill] sm:$0xff] }
 0x2dc   : > { %v12013_v40 = vpack.c.bf16 %v1497_v43, %v1489_v36  ;;  %v1273_v49 = vpop.f32.mrb[172].mxu1  ;;  %v2075_v36 = vld [vmem:[#allocation8 + $0xb88] sm:$0xff] }
 0x2dd   : > { %13506 = vst [vmem:[#allocation141_spill] sm:$0xff] %v12011_v20  ;;  %v1274_v0 = vadd.f32 %v1273_v49, %v11849_v14  ;;  %v1275_v4 = vpop.f32.mrb[173].mxu1  ;;  %v2079_v43 = vld [vmem:[#allocation8 + $0xba8] sm:$0xff] }
 0x2de   : > { %13507 = vst [vmem:[#allocation142_spill] sm:$0xff] %v12013_v40  ;;  %v1276_v17 = vadd.f32 %v1275_v4, %v11855_v39  ;;  %v1277_v9 = vpop.f32.mrb[174].mxu1  ;;  %6001 = vmatpush1.bf16.msra.mxu1 %v9103_v26 }
 0x2df   : > { %v1278_v46 = vadd.f32 %v1277_v9, %v11849_v14  ;;  %v1279_v1 = vpop.f32.mrb[175].mxu1  ;;  %5339 = vmatmul.mubr.bf16.gmra.mrb[104].mxu0 %v13508_v23  ;;  %6002 = vmatprep.subr.bf16.mxu1 %v9112_v29  ;;  %v1504_v49 = vmax.f32 %v1274_v0, 0.0  ;;  %v9128_v29 = vcombine.high %v2075_v36, %v2079_v43  ;;  %v2087_v23 = vld [vmem:[#allocation8 + $0xbe8] sm:$0xff] }
 0x2e0   : > { %v1280_v52 = vadd.f32 %v1279_v1, %v11855_v39  ;;  %5348 = vmatprep.mubr.bf16.mxu0 %v13509_v63  ;;  %v1505_v4 = vmax.f32 %v1276_v17, 0.0  ;;  %v2083_v63 = vld [vmem:[#allocation8 + $0xbc8] sm:$0xff] }
 0x2e1   : > { %v1512_v32 = vmax.f32 %v1278_v46, 0.0  ;;  %5878 = vmatmul.mubr.bf16.gmra.mrb[216].mxu1 %v11736_v42  ;;  %v9136_v35 = vcombine.high %v2083_v63, %v2087_v23 }
 0x2e2   : > { %v1513_v26 = vmax.f32 %v1280_v52, 0.0  ;;  %5887 = vmatprep.mubr.bf16.mxu1 %v11750_v59  ;;  %6003 = vmatpush1.bf16.msra.mxu1 %v9111_v44  ;;  %v9127_v52 = vcombine.low %v2075_v36, %v2079_v43  ;;  %v9135_v36 = vcombine.low %v2083_v63, %v2087_v23  ;;  %v13516_v23 = vld [vmem:[#allocation75_spill] sm:$0xff] }
 0x2e3   : > { %v12023_v45 = vpack.c.bf16 %v1512_v32, %v1504_v49  ;;  %6004 = vmatprep.subr.bf16.mxu1 %v9120_v33  ;;  %v13512_v32 = vld [vmem:[#allocation71_spill] sm:$0xff]  ;;  %v13513_v49 = vld [vmem:[#allocation77_spill] sm:$0xff] }
 0x2e4   : > { %v12025_v9 = vpack.c.bf16 %v1513_v26, %v1505_v4  ;;  %v1283_v1 = vpop.f32.mrb[176].mxu1 }
 0x2e5   : > { %13510 = vst [vmem:[#allocation143_spill] sm:$0xff] %v12023_v45  ;;  %v1284_v0 = vadd.f32 %v1283_v1, %v11849_v14  ;;  %v1285_v46 = vpop.f32.mrb[177].mxu1 }
 0x2e6   : > { %13511 = vst [vmem:[#allocation144_spill] sm:$0xff] %v12025_v9  ;;  %v1286_v42 = vadd.f32 %v1285_v46, %v11855_v39  ;;  %v1287_v17 = vpop.f32.mrb[178].mxu1  ;;  %6005 = vmatpush1.bf16.msra.mxu1 %v9119_v56  ;;  %v9144_v56 = vcombine.high %v11933_v19, %v11935_v11 }
 0x2e7   : > { %v1288_v44 = vadd.f32 %v1287_v17, %v11849_v14  ;;  %v1289_v57 = vpop.f32.mrb[179].mxu1  ;;  %5349 = vmatmul.mubr.bf16.gmra.mrb[108].mxu0 %v13512_v32  ;;  %6006 = vmatprep.subr.bf16.mxu1 %v9128_v29  ;;  %v1520_v4 = vmax.f32 %v1284_v0, 0.0 }
 0x2e8   : > { %v1290_v33 = vadd.f32 %v1289_v57, %v11855_v39  ;;  %5358 = vmatprep.mubr.bf16.mxu0 %v13513_v49  ;;  %v1521_v1 = vmax.f32 %v1286_v42, 0.0 }
 0x2e9   : > { %v1528_v26 = vmax.f32 %v1288_v44, 0.0  ;;  %5888 = vmatmul.mubr.bf16.gmra.mrb[220].mxu1 %v11748_v7  ;;  %v13520_v7 = vld [vmem:[#allocation79_spill] sm:$0xff] }
 0x2ea   : > { %v1529_v46 = vmax.f32 %v1290_v33, 0.0  ;;  %5897 = vmatprep.mubr.bf16.mxu1 %v11764_v3  ;;  %6007 = vmatpush1.bf16.msra.mxu1 %v9127_v52 }
 0x2eb   : > { %v12035_v43 = vpack.c.bf16 %v1528_v26, %v1520_v4  ;;  %6008 = vmatprep.subr.bf16.mxu1 %v9136_v35  ;;  %v13517_v35 = vld [vmem:[#allocation81_spill] sm:$0xff] }
 0x2ec   : > { %v12039_v29 = vpack.c.bf16 %v1529_v46, %v1521_v1  ;;  %v1293_v17 = vpop.f32.mrb[180].mxu1 }
 0x2ed   : > { %13514 = vst [vmem:[#allocation145_spill] sm:$0xff] %v12035_v43  ;;  %v1294_v0 = vadd.f32 %v1293_v17, %v11849_v14  ;;  %v1295_v44 = vpop.f32.mrb[181].mxu1 }
 0x2ee   : > { %13515 = vst [vmem:[#allocation146_spill] sm:$0xff] %v12039_v29  ;;  %v1296_v57 = vadd.f32 %v1295_v44, %v11855_v39  ;;  %v1297_v42 = vpop.f32.mrb[182].mxu1  ;;  %6009 = vmatpush1.bf16.msra.mxu1 %v9135_v36 }
 0x2ef   : > { %v1298_v33 = vadd.f32 %v1297_v42, %v11849_v14  ;;  %v1299_v52 = vpop.f32.mrb[183].mxu1  ;;  %5359 = vmatmul.mubr.bf16.gmra.mrb[112].mxu0 %v13516_v23  ;;  %6171 = vmatprep.subr.bf16.mxu1 %v9144_v56  ;;  %v1536_v4 = vmax.f32 %v1294_v0, 0.0 }
 0x2f0   : > { %v1300_v63 = vadd.f32 %v1299_v52, %v11855_v39  ;;  %5368 = vmatprep.mubr.bf16.mxu0 %v13517_v35  ;;  %v1537_v1 = vmax.f32 %v1296_v57, 0.0 }
 0x2f1   : > { %v1544_v26 = vmax.f32 %v1298_v33, 0.0  ;;  %5898 = vmatmul.mubr.bf16.gmra.mrb[224].mxu1 %v11762_v2 }
 0x2f2   : > { %v1545_v46 = vmax.f32 %v1300_v63, 0.0  ;;  %5907 = vmatprep.mubr.bf16.mxu1 %v11776_v41  ;;  %v13521_v63 = vld [vmem:[#allocation85_spill] sm:$0xff] }
 0x2f3   : > { %v12049_v17 = vpack.c.bf16 %v1544_v26, %v1536_v4 }
 0x2f4   : > { %v12051_v36 = vpack.c.bf16 %v1545_v46, %v1537_v1  ;;  %v1303_v44 = vpop.f32.mrb[184].mxu1 }
 0x2f5   : > { %13518 = vst [vmem:[#allocation147_spill] sm:$0xff] %v12049_v17  ;;  %v1304_v42 = vadd.f32 %v1303_v44, %v11849_v14  ;;  %v1305_v56 = vpop.f32.mrb[185].mxu1 }
 0x2f6   : > { %13519 = vst [vmem:[#allocation148_spill] sm:$0xff] %v12051_v36  ;;  %v1306_v52 = vadd.f32 %v1305_v56, %v11855_v39  ;;  %v1307_v3 = vpop.f32.mrb[186].mxu1 }
 0x2f7   : > { %v1308_v0 = vadd.f32 %v1307_v3, %v11849_v14  ;;  %v1309_v33 = vpop.f32.mrb[187].mxu1  ;;  %5369 = vmatmul.mubr.bf16.gmra.mrb[116].mxu0 %v13520_v7  ;;  %v1552_v4 = vmax.f32 %v1304_v42, 0.0 }
 0x2f8   : > { %v1310_v57 = vadd.f32 %v1309_v33, %v11855_v39  ;;  %5378 = vmatprep.mubr.bf16.mxu0 %v13521_v63  ;;  %v1553_v1 = vmax.f32 %v1306_v52, 0.0  ;;  %v13524_v63 = vld [vmem:[#allocation83_spill] sm:$0xff] }
 0x2f9   : > { %v1560_v26 = vmax.f32 %v1308_v0, 0.0  ;;  %5908 = vmatmul.mubr.bf16.gmra.mrb[228].mxu1 %v11774_v61  ;;  %v13537_v61 = vld [vmem:[#allocation134_spill] sm:$0xff] }
 0x2fa   : > { %v1561_v46 = vmax.f32 %v1310_v57, 0.0  ;;  %5917 = vmatprep.mubr.bf16.mxu1 %v11788_v18  ;;  %v13525_v57 = vld [vmem:[#allocation89_spill] sm:$0xff]  ;;  %v2119_v18 = vld [vmem:[#allocation8 + $0xce8] sm:$0xff] }
 0x2fb   : > { %v12061_v44 = vpack.c.bf16 %v1560_v26, %v1552_v4 }
 0x2fc   : > { %v12063_v56 = vpack.c.bf16 %v1561_v46, %v1553_v1  ;;  %v1313_v3 = vpop.f32.mrb[188].mxu1 }
 0x2fd   : > { %13522 = vst [vmem:[#allocation149_spill] sm:$0xff] %v12061_v44  ;;  %v1314_v41 = vadd.f32 %v1313_v3, %v11849_v14  ;;  %v1315_v2 = vpop.f32.mrb[189].mxu1 }
 0x2fe   : > { %13523 = vst [vmem:[#allocation150_spill] sm:$0xff] %v12063_v56  ;;  %v1316_v33 = vadd.f32 %v1315_v2, %v11855_v39  ;;  %v1317_v59 = vpop.f32.mrb[190].mxu1 }
 0x2ff   : > { %v1318_v42 = vadd.f32 %v1317_v59, %v11849_v14  ;;  %v1319_v0 = vpop.f32.mrb[191].mxu1  ;;  %5379 = vmatmul.mubr.bf16.gmra.mrb[120].mxu0 %v13524_v63  ;;  %v1568_v4 = vmax.f32 %v1314_v41, 0.0  ;;  %v13528_v59 = vld [vmem:[#allocation87_spill] sm:$0xff]  ;;  %v1716_v41 = vld [vmem:[#allocation8 + $0x50] sm:$0xff] }
 0x300   : > { %v1320_v52 = vadd.f32 %v1319_v0, %v11855_v39  ;;  %5388 = vmatprep.mubr.bf16.mxu0 %v13525_v57  ;;  %v1569_v1 = vmax.f32 %v1316_v33, 0.0  ;;  %v1720_v14 = vld [vmem:[#allocation8 + $0x70] sm:$0xff]  ;;  %v13529_v0 = vcombine.low %v11937_v6, %v11945_v25 }
 0x301   : > { %v1576_v26 = vmax.f32 %v1318_v42, 0.0  ;;  %5918 = vmatmul.mubr.bf16.gmra.mrb[232].mxu1 %v11786_v54  ;;  %v8770_v39 = vcombine.high %v1716_v41, %v1720_v14  ;;  %v1724_v42 = vld [vmem:[#allocation8 + $0x90] sm:$0xff]  ;;  %v2115_v54 = vld [vmem:[#allocation8 + $0xcc8] sm:$0xff] }
 0x302   : > { %v1577_v46 = vmax.f32 %v1320_v52, 0.0  ;;  %5927 = vmatprep.mubr.bf16.mxu1 %v11800_v47  ;;  %v1728_v33 = vld [vmem:[#allocation8 + $0xb0] sm:$0xff]  ;;  %v8769_v52 = vcombine.low %v1716_v41, %v1720_v14 }
 0x303   : > { %v12073_v3 = vpack.c.bf16 %v1576_v26, %v1568_v4  ;;  %v8778_v4 = vcombine.high %v1724_v42, %v1728_v33  ;;  %v1732_v26 = vld [vmem:[#allocation8 + $0xd0] sm:$0xff] }
 0x304   : > { %v12075_v2 = vpack.c.bf16 %v1577_v46, %v1569_v1  ;;  %v1736_v1 = vld [vmem:[#allocation8 + $0xf0] sm:$0xff]  ;;  %v8777_v46 = vcombine.low %v1724_v42, %v1728_v33 }
 0x305   : > { %13526 = vst [vmem:[#allocation151_spill] sm:$0xff] %v12073_v3  ;;  %v1744_v47 = vld [vmem:[#allocation8 + $0x130] sm:$0xff]  ;;  %v8785_v6 = vcombine.low %v1732_v26, %v1736_v1 }
 0x306   : > { %13527 = vst [vmem:[#allocation152_spill] sm:$0xff] %v12075_v2  ;;  %v1748_v41 = vld [vmem:[#allocation8 + $0x150] sm:$0xff] }
 0x307   : > { %5389 = vmatmul.mubr.bf16.gmra.mrb[124].mxu0 %v13528_v59  ;;  %v1752_v14 = vld [vmem:[#allocation8 + $0x170] sm:$0xff] }
 0x308   : > { %5431 = vmatprep.mubr.bf16.mxu0 %v11873_v31  ;;  %v8802_v42 = vcombine.high %v1748_v41, %v1752_v14  ;;  %v1756_v33 = vld [vmem:[#allocation8 + $0x190] sm:$0xff] }
 0x309   : > { %5928 = vmatmul.mubr.bf16.gmra.mrb[236].mxu1 %v11798_v16  ;;  %v1740_v16 = vld [vmem:[#allocation8 + $0x110] sm:$0xff] }
 0x30a   : > { %5937 = vmatprep.mubr.bf16.mxu1 %v11814_v62  ;;  %v8786_v62 = vcombine.high %v1732_v26, %v1736_v1  ;;  %v8794_v25 = vcombine.high %v1740_v16, %v1744_v47  ;;  %v1768_v26 = vld [vmem:[#allocation8 + $0x1f0] sm:$0xff] }
 0x30b   : > { %v1772_v1 = vld [vmem:[#allocation8 + $0x210] sm:$0xff] }
 0x30f   : > { %5432 = vmatmul.mubr.bf16.vlgmr.msra.gmra.mrb[64].mxu0 %v11871_v5 }
 0x310   : > { %5441 = vmatprep.mubr.bf16.mxu0 %v11888_v51  ;;  %6365 = vmatpush1.bf16.msra.mxu0 %v13529_v0  ;;  %v1760_v0 = vld [vmem:[#allocation8 + $0x1b0] sm:$0xff] }
 0x311   : > { %5938 = vmatmul.mubr.bf16.gmra.mrb[240].mxu1 %v11810_v58  ;;  %6366 = vmatprep.subr.bf16.mxu0 %v8770_v39  ;;  %v8793_v39 = vcombine.low %v1740_v16, %v1744_v47  ;;  %v8809_v16 = vcombine.low %v1756_v33, %v1760_v0  ;;  %v1796_v58 = vld [vmem:[#allocation8 + $0x2d0] sm:$0xff] }
 0x312   : > { %5947 = vmatprep.mubr.bf16.mxu1 %v11826_v34 }
 0x314   : > { %6367 = vmatpush1.bf16.msra.mxu0 %v8769_v52  ;;  %v8801_v52 = vcombine.low %v1748_v41, %v1752_v14  ;;  %v13530_v41 = vld [vmem:[#allocation29_spill] sm:$0xff] }
 0x315   : > { %6368 = vmatprep.subr.bf16.mxu0 %v8778_v4  ;;  %v1764_v4 = vld [vmem:[#allocation8 + $0x1d0] sm:$0xff] }
 0x316   : > { %v8818_v47 = vcombine.high %v1764_v4, %v1768_v26  ;;  %v1780_v14 = vld [vmem:[#allocation8 + $0x250] sm:$0xff] }
 0x317   : > { %5442 = vmatmul.mubr.bf16.gmra.mrb[68].mxu0 %v11886_v55 }
 0x318   : > { %5451 = vmatprep.mubr.bf16.mxu0 %v11900_v50  ;;  %6369 = vmatpush1.bf16.msra.mxu0 %v8777_v46  ;;  %v1776_v46 = vld [vmem:[#allocation8 + $0x230] sm:$0xff] }
 0x319   : > { %5948 = vmatmul.mubr.bf16.gmra.mrb[244].mxu1 %v11824_v8  ;;  %6370 = vmatprep.subr.bf16.mxu0 %v8786_v62  ;;  %v8810_v62 = vcombine.high %v1756_v33, %v1760_v0  ;;  %v2103_v33 = vld [vmem:[#allocation8 + $0xc68] sm:$0xff]  ;;  %v8825_v0 = vcombine.low %v1772_v1, %v1776_v46  ;;  %v12103_v8 = vld [vmem:[#allocation8 + $0x410] sm:$0xff] }
 0x31a   : > { %5957 = vmatprep.mubr.bf16.mxu1 %v11838_v27 }
 0x31c   : > { %6371 = vmatpush1.bf16.msra.mxu0 %v8785_v6  ;;  %v8817_v6 = vcombine.low %v1764_v4, %v1768_v26  ;;  %v13532_v4 = vld [vmem:[#allocation132_spill] sm:$0xff] }
 0x31d   : > { %6372 = vmatprep.subr.bf16.mxu0 %v8794_v25  ;;  %v8826_v25 = vcombine.high %v1772_v1, %v1776_v46  ;;  %v2107_v26 = vld [vmem:[#allocation8 + $0xc88] sm:$0xff]  ;;  %v12105_v1 = vld [vmem:[#allocation8 + $0x430] sm:$0xff]  ;;  %v12107_v46 = vld [vmem:[#allocation8 + $0x18] sm:$0xff] }
 0x31f   : > { %5452 = vmatmul.mubr.bf16.gmra.mrb[72].mxu0 %v11898_v60 }
 0x320   : > { %5461 = vmatprep.mubr.bf16.mxu0 %v11912_v13  ;;  %6373 = vmatpush1.bf16.msra.mxu0 %v8793_v39  ;;  %v1784_v39 = vld [vmem:[#allocation8 + $0x270] sm:$0xff] }
 0x321   : > { %5958 = vmatmul.mubr.bf16.gmra.mrb[248].mxu1 %v11836_v30  ;;  %6374 = vmatprep.subr.bf16.mxu0 %v8802_v42  ;;  %v2099_v42 = vld [vmem:[#allocation8 + $0xc48] sm:$0xff]  ;;  %v13531_v30 = vld [vmem:[#allocation129_spill] sm:$0xff] }
 0x322   : > { %5967 = vmatprep.mubr.bf16.mxu1 %v11860_v22  ;;  %v1792_v22 = vld [vmem:[#allocation8 + $0x2b0] sm:$0xff]  ;;  %v9151_v34 = vcombine.low %v2099_v42, %v2103_v33 }
 0x324   : > { %6375 = vmatpush1.bf16.msra.mxu0 %v8801_v52  ;;  %v8834_v52 = vcombine.high %v1780_v14, %v1784_v39 }
 0x325   : > { %6376 = vmatprep.subr.bf16.mxu0 %v8810_v62  ;;  %v1788_v62 = vld [vmem:[#allocation8 + $0x290] sm:$0xff] }
 0x326   : > { %v8842_v27 = vcombine.high %v1788_v62, %v1792_v22 }
 0x327   : > { %5462 = vmatmul.mubr.bf16.gmra.mrb[76].mxu0 %v11910_v28 }
 0x328   : > { %5471 = vmatprep.mubr.bf16.mxu0 %v11924_v53  ;;  %6377 = vmatpush1.bf16.msra.mxu0 %v8809_v16  ;;  %v9152_v16 = vcombine.high %v2099_v42, %v2103_v33  ;;  %v1804_v42 = vld [vmem:[#allocation8 + $0x310] sm:$0xff] }
 0x329   : > { %5968 = vmatmul.mubr.bf16.gmra.mrb[252].mxu1 %v11858_v15  ;;  %6378 = vmatprep.subr.bf16.mxu0 %v8818_v47  ;;  %v2111_v47 = vld [vmem:[#allocation8 + $0xca8] sm:$0xff]  ;;  %v8833_v15 = vcombine.low %v1780_v14, %v1784_v39  ;;  %v12115_v39 = vld [vmem:[#allocation8 + $0x38] sm:$0xff]  ;;  %v1808_v33 = vld [vmem:[#allocation8 + $0x330] sm:$0xff]  ;;  %v9168_v14 = vcombine.high %v2115_v54, %v2119_v18 }
 0x32a   : > { %6010 = vmatprep.mubr.bf16.mxu1 %v13530_v41  ;;  %v13533_v41 = vld [vmem:[#allocation27_spill] sm:$0xff] }
 0x32c   : > { %6379 = vmatpush1.bf16.msra.mxu0 %v8817_v6  ;;  %v13534_v6 = vld [vmem:[#allocation33_spill] sm:$0xff] }
 0x32d   : > { %6380 = vmatprep.subr.bf16.mxu0 %v8826_v25  ;;  %v13535_v25 = vcombine.low %v11933_v19, %v11935_v11  ;;  %v9159_v11 = vcombine.low %v2107_v26, %v2111_v47 }
 0x32f   : > { %5472 = vmatmul.mubr.bf16.gmra.mrb[80].mxu0 %v13531_v30  ;;  %v13538_v30 = vld [vmem:[#allocation31_spill] sm:$0xff] }
 0x330   : > { %5481 = vmatprep.mubr.bf16.mxu0 %v13532_v4  ;;  %6381 = vmatpush1.bf16.msra.mxu0 %v8825_v0  ;;  %v1800_v0 = vld [vmem:[#allocation8 + $0x2f0] sm:$0xff]  ;;  %v2127_v4 = vld [vmem:[#allocation8 + $0xd28] sm:$0xff] }
 0x331   : > { %6011 = vmatmul.mubr.bf16.vlgmr.msra.gmra.mrb[192].mxu1 %v13533_v41  ;;  %6382 = vmatprep.subr.bf16.mxu0 %v8834_v52  ;;  %v9160_v52 = vcombine.high %v2107_v26, %v2111_v47  ;;  %v8850_v19 = vcombine.high %v1796_v58, %v1800_v0  ;;  %v8849_v41 = vcombine.low %v1796_v58, %v1800_v0  ;;  %v2131_v47 = vld [vmem:[#allocation8 + $0xd48] sm:$0xff]  ;;  %v1824_v0 = vld [vmem:[#allocation8 + $0x3b0] sm:$0xff] }
 0x332   : > { %6020 = vmatprep.mubr.bf16.mxu1 %v13534_v6  ;;  %6172 = vmatpush1.bf16.msra.mxu1 %v13535_v25  ;;  %v8841_v6 = vcombine.low %v1788_v62, %v1792_v22  ;;  %v13536_v25 = vld [vmem:[#allocation131_spill] sm:$0xff]  ;;  %v1812_v22 = vld [vmem:[#allocation8 + $0x350] sm:$0xff] }
 0x333   : > { %6173 = vmatprep.subr.bf16.mxu1 %v9152_v16  ;;  %v2123_v16 = vld [vmem:[#allocation8 + $0xd08] sm:$0xff]  ;;  %v1816_v62 = vld [vmem:[#allocation8 + $0x370] sm:$0xff] }
 0x334   : > { %6383 = vmatpush1.bf16.msra.mxu0 %v8833_v15  ;;  %v8858_v15 = vcombine.high %v1804_v42, %v1808_v33  ;;  %v9176_v26 = vcombine.high %v2123_v16, %v2127_v4  ;;  %v9175_v58 = vcombine.low %v2123_v16, %v2127_v4  ;;  %v1832_v16 = vld [vmem:[#allocation8 + $0x3f0] sm:$0xff] }
 0x335   : > { %6384 = vmatprep.subr.bf16.mxu0 %v8842_v27  ;;  %v13539_v27 = vld [vmem:[#allocation37_spill] sm:$0xff] }
 0x336   : > { %6174 = vmatpush1.bf16.msra.mxu1 %v9151_v34  ;;  %v9167_v34 = vcombine.low %v2115_v54, %v2119_v18  ;;  %v2139_v54 = vld [vmem:[#allocation8 + $0xd88] sm:$0xff] }
 0x337   : > { %5482 = vmatmul.mubr.bf16.gmra.mrb[84].mxu0 %v13536_v25  ;;  %6175 = vmatprep.subr.bf16.mxu1 %v9160_v52  ;;  %v2135_v52 = vld [vmem:[#allocation8 + $0xd68] sm:$0xff]  ;;  %v8866_v25 = vcombine.high %v1812_v22, %v1816_v62 }
 0x338   : > { %5491 = vmatprep.mubr.bf16.mxu0 %v13537_v61  ;;  %6385 = vmatpush1.bf16.msra.mxu0 %v8841_v6  ;;  %v8857_v61 = vcombine.low %v1804_v42, %v1808_v33  ;;  %v1820_v6 = vld [vmem:[#allocation8 + $0x390] sm:$0xff]  ;;  %v2143_v18 = vld [vmem:[#allocation8 + $0xda8] sm:$0xff]  ;;  %v9183_v4 = vcombine.low %v2131_v47, %v2135_v52 }
 0x339   : > { %6021 = vmatmul.mubr.bf16.gmra.mrb[196].mxu1 %v13538_v30  ;;  %6386 = vmatprep.subr.bf16.mxu0 %v8850_v19  ;;  %v13540_v19 = vld [vmem:[#allocation133_spill] sm:$0xff]  ;;  %v8873_v30 = vcombine.low %v1820_v6, %v1824_v0 }
 0x33a   : > { %6030 = vmatprep.mubr.bf16.mxu1 %v13539_v27  ;;  %6176 = vmatpush1.bf16.msra.mxu1 %v9159_v11  ;;  %v9184_v27 = vcombine.high %v2131_v47, %v2135_v52  ;;  %v13541_v11 = vld [vmem:[#allocation35_spill] sm:$0xff]  ;;  %v13542_v42 = vld [vmem:[#allocation41_spill] sm:$0xff]  ;;  %v8890_v52 = vcombine.high %v12103_v8, %v12105_v1 }
 0x33b   : > { %6177 = vmatprep.subr.bf16.mxu1 %v9168_v14  ;;  %v8865_v14 = vcombine.low %v1812_v22, %v1816_v62  ;;  %v1828_v33 = vld [vmem:[#allocation8 + $0x3d0] sm:$0xff]  ;;  %v2155_v22 = vld [vmem:[#allocation8 + $0xe08] sm:$0xff] }
 0x33c   : > { %6387 = vmatpush1.bf16.msra.mxu0 %v8849_v41  ;;  %v8874_v41 = vcombine.high %v1820_v6, %v1824_v0  ;;  %v2159_v62 = vld [vmem:[#allocation8 + $0xe28] sm:$0xff]  ;;  %v8881_v47 = vcombine.low %v1828_v33, %v1832_v16 }
 0x33d   : > { %6388 = vmatprep.subr.bf16.mxu0 %v8858_v15  ;;  %v9192_v15 = vcombine.high %v2139_v54, %v2143_v18  ;;  %v9208_v0 = vcombine.high %v2155_v22, %v2159_v62 }
 0x33e   : > { %6178 = vmatpush1.bf16.msra.mxu1 %v9167_v34  ;;  %v2147_v34 = vld [vmem:[#allocation8 + $0xdc8] sm:$0xff] }
 0x33f   : > { %5492 = vmatmul.mubr.bf16.gmra.mrb[88].mxu0 %v13540_v19  ;;  %6179 = vmatprep.subr.bf16.mxu1 %v9176_v26  ;;  %v2151_v26 = vld [vmem:[#allocation8 + $0xde8] sm:$0xff] }
 0x340   : > { %5501 = vmatprep.mubr.bf16.mxu0 %v11975_v21  ;;  %6389 = vmatpush1.bf16.msra.mxu0 %v8857_v61  ;;  %v8882_v21 = vcombine.high %v1828_v33, %v1832_v16  ;;  %v9191_v61 = vcombine.low %v2139_v54, %v2143_v18  ;;  %v9199_v6 = vcombine.low %v2147_v34, %v2151_v26  ;;  %v2163_v54 = vld [vmem:[#allocation8 + $0xe48] sm:$0xff]  ;;  %v13546_v33 = vld [vmem:[#allocation49_spill] sm:$0xff] }
 0x341   : > { %6031 = vmatmul.mubr.bf16.gmra.mrb[200].mxu1 %v13541_v11  ;;  %6390 = vmatprep.subr.bf16.mxu0 %v8866_v25  ;;  %v9200_v25 = vcombine.high %v2147_v34, %v2151_v26  ;;  %v2167_v18 = vld [vmem:[#allocation8 + $0xe68] sm:$0xff] }
 0x342   : > { %6040 = vmatprep.mubr.bf16.mxu1 %v13542_v42  ;;  %6180 = vmatpush1.bf16.msra.mxu1 %v9175_v58  ;;  %v13544_v58 = vld [vmem:[#allocation45_spill] sm:$0xff]  ;;  %v9215_v16 = vcombine.low %v2163_v54, %v2167_v18  ;;  %v2179_v34 = vld [vmem:[#allocation8 + $0xec8] sm:$0xff] }
 0x343   : > { %6181 = vmatprep.subr.bf16.mxu1 %v9184_v27  ;;  %v13543_v27 = vld [vmem:[#allocation39_spill] sm:$0xff] }
 0x344   : > { %6391 = vmatpush1.bf16.msra.mxu0 %v8865_v14  ;;  %v9207_v14 = vcombine.low %v2155_v22, %v2159_v62  ;;  %v2183_v26 = vld [vmem:[#allocation8 + $0xee8] sm:$0xff] }
 0x345   : > { %6392 = vmatprep.subr.bf16.mxu0 %v8874_v41  ;;  %v2175_v41 = vld [vmem:[#allocation8 + $0xea8] sm:$0xff] }
 0x346   : > { %6182 = vmatpush1.bf16.msra.mxu1 %v9183_v4  ;;  %v13545_v4 = vld [vmem:[#allocation43_spill] sm:$0xff] }
 0x347   : > { %5502 = vmatmul.mubr.bf16.gmra.mrb[92].mxu0 %v11973_v24  ;;  %6183 = vmatprep.subr.bf16.mxu1 %v9192_v15  ;;  %v2187_v22 = vld [vmem:[#allocation8 + $0xf08] sm:$0xff] }
 0x348   : > { %5511 = vmatprep.mubr.bf16.mxu0 %v11989_v37  ;;  %6393 = vmatpush1.bf16.msra.mxu0 %v8873_v30  ;;  %v9216_v30 = vcombine.high %v2163_v54, %v2167_v18  ;;  %v2191_v62 = vld [vmem:[#allocation8 + $0xf28] sm:$0xff] }
 0x349   : > { %6041 = vmatmul.mubr.bf16.gmra.mrb[204].mxu1 %v13543_v27  ;;  %6394 = vmatprep.subr.bf16.mxu0 %v8882_v21  ;;  %v2171_v21 = vld [vmem:[#allocation8 + $0xe88] sm:$0xff]  ;;  %v1745_v27 = vld [vmem:[#allocation8 + $0x138] sm:$0xff] }
 0x34a   : > { %6050 = vmatprep.mubr.bf16.mxu1 %v13544_v58  ;;  %6184 = vmatpush1.bf16.msra.mxu1 %v9191_v61  ;;  %v9224_v15 = vcombine.high %v2171_v21, %v2175_v41  ;;  %v9223_v61 = vcombine.low %v2171_v21, %v2175_v41  ;;  %v2195_v54 = vld [vmem:[#allocation8 + $0xf48] sm:$0xff]  ;;  %v1741_v58 = vld [vmem:[#allocation8 + $0x118] sm:$0xff] }
 0x34b   : > { %6185 = vmatprep.subr.bf16.mxu1 %v9200_v25  ;;  %v9232_v25 = vcombine.high %v2179_v34, %v2183_v26  ;;  %v2199_v18 = vld [vmem:[#allocation8 + $0xf68] sm:$0xff] }
 0x34c   : > { %6395 = vmatpush1.bf16.msra.mxu0 %v8881_v47  ;;  %v13547_v47 = vld [vmem:[#allocation47_spill] sm:$0xff] }
 0x34d   : > { %6557 = vmatprep.subr.bf16.mxu0 %v8890_v52  ;;  %v13548_v52 = vld [vmem:[#allocation53_spill] sm:$0xff]  ;;  %v2203_v21 = vld [vmem:[#allocation8 + $0xf88] sm:$0xff] }
 0x34e   : > { %6186 = vmatpush1.bf16.msra.mxu1 %v9199_v6  ;;  %v9231_v6 = vcombine.low %v2179_v34, %v2183_v26  ;;  %v2207_v41 = vld [vmem:[#allocation8 + $0xfa8] sm:$0xff]  ;;  %v9247_v34 = vcombine.low %v2195_v54, %v2199_v18 }
 0x34f   : > { %5512 = vmatmul.mubr.bf16.gmra.mrb[96].mxu0 %v11987_v48  ;;  %6187 = vmatprep.subr.bf16.mxu1 %v9208_v0  ;;  %v9240_v0 = vcombine.high %v2187_v22, %v2191_v62  ;;  %v9256_v26 = vcombine.high %v2203_v21, %v2207_v41 }
 0x350   : > { %5521 = vmatprep.mubr.bf16.mxu0 %v12001_v38 }
 0x351   : > { %6051 = vmatmul.mubr.bf16.gmra.mrb[208].mxu1 %v13545_v4 }
 0x352   : > { %6060 = vmatprep.mubr.bf16.mxu1 %v13546_v33  ;;  %6188 = vmatpush1.bf16.msra.mxu1 %v9207_v14  ;;  %v9239_v14 = vcombine.low %v2187_v22, %v2191_v62  ;;  %v9255_v22 = vcombine.low %v2203_v21, %v2207_v41  ;;  %v13555_v21 = vld [vmem:[#allocation69_spill] sm:$0xff]  ;;  %v13556_v41 = vld [vmem:[#allocation67_spill] sm:$0xff] }
 0x353   : > { %6189 = vmatprep.subr.bf16.mxu1 %v9216_v30  ;;  %v9248_v30 = vcombine.high %v2195_v54, %v2199_v18  ;;  %v8764_v54 = vcombine.high %v12107_v46, %v12115_v39  ;;  %v13552_v18 = vld [vmem:[#allocation59_spill] sm:$0xff]  ;;  %v12197_v33 = vld [vmem:[#allocation8 + $0x418] sm:$0xff] }
 0x356   : > { %6190 = vmatpush1.bf16.msra.mxu1 %v9215_v16  ;;  %v13549_v16 = vld [vmem:[#allocation51_spill] sm:$0xff] }
 0x357   : > { %5522 = vmatmul.mubr.bf16.gmra.mrb[100].mxu0 %v11999_v12  ;;  %6191 = vmatprep.subr.bf16.mxu1 %v9224_v15  ;;  %v13550_v15 = vld [vmem:[#allocation57_spill] sm:$0xff] }
 0x358   : > { %5531 = vmatprep.mubr.bf16.mxu0 %v12013_v40 }
 0x359   : > { %6061 = vmatmul.mubr.bf16.gmra.mrb[212].mxu1 %v13547_v47  ;;  %v12195_v47 = vld [vmem:[#allocation8 + $0x830] sm:$0xff] }
 0x35a   : > { %6070 = vmatprep.mubr.bf16.mxu1 %v13548_v52  ;;  %6192 = vmatpush1.bf16.msra.mxu1 %v9223_v61  ;;  %v2211_v61 = vld [vmem:[#allocation8 + $0xfc8] sm:$0xff]  ;;  %v1924_v52 = vld [vmem:[#allocation8 + $0x6d0] sm:$0xff] }
 0x35b   : > { %6193 = vmatprep.subr.bf16.mxu1 %v9232_v25  ;;  %v2215_v25 = vld [vmem:[#allocation8 + $0xfe8] sm:$0xff] }
 0x35c   : > { %v9264_v62 = vcombine.high %v2211_v61, %v2215_v25 }
 0x35e   : > { %6194 = vmatpush1.bf16.msra.mxu1 %v9231_v6  ;;  %v13551_v6 = vld [vmem:[#allocation61_spill] sm:$0xff] }
 0x35f   : > { %5532 = vmatmul.mubr.bf16.gmra.mrb[104].mxu0 %v12011_v20  ;;  %6195 = vmatprep.subr.bf16.mxu1 %v9240_v0  ;;  %v9263_v0 = vcombine.low %v2211_v61, %v2215_v25  ;;  %v1844_v61 = vld [vmem:[#allocation8 + $0x450] sm:$0xff] }
 0x360   : > { %5541 = vmatprep.mubr.bf16.mxu0 %v12025_v9  ;;  %v1848_v25 = vld [vmem:[#allocation8 + $0x470] sm:$0xff] }
 0x361   : > { %6071 = vmatmul.mubr.bf16.gmra.mrb[216].mxu1 %v13549_v16  ;;  %v13563_v16 = vld [vmem:[#allocation34_spill] sm:$0xff] }
 0x362   : > { %6080 = vmatprep.mubr.bf16.mxu1 %v13550_v15  ;;  %6196 = vmatpush1.bf16.msra.mxu1 %v9239_v14  ;;  %v13553_v14 = vld [vmem:[#allocation65_spill] sm:$0xff]  ;;  %v13562_v15 = vld [vmem:[#allocation28_spill] sm:$0xff] }
 0x363   : > { %6197 = vmatprep.subr.bf16.mxu1 %v9248_v30  ;;  %v13554_v30 = vld [vmem:[#allocation63_spill] sm:$0xff] }
 0x366   : > { %6198 = vmatpush1.bf16.msra.mxu1 %v9247_v34  ;;  %v13557_v34 = vld [vmem:[#allocation73_spill] sm:$0xff] }
 0x367   : > { %5542 = vmatmul.mubr.bf16.gmra.mrb[108].mxu0 %v12023_v45  ;;  %6199 = vmatprep.subr.bf16.mxu1 %v9256_v26  ;;  %v13558_v26 = vld [vmem:[#allocation26_spill] sm:$0xff] }
 0x368   : > { %5551 = vmatprep.mubr.bf16.mxu0 %v12039_v29 }
 0x369   : > { %6081 = vmatmul.mubr.bf16.gmra.mrb[220].mxu1 %v13491_v10  ;;  %v1872_v10 = vld [vmem:[#allocation8 + $0x530] sm:$0xff] }
 0x36a   : > { %6090 = vmatprep.mubr.bf16.mxu1 %v13551_v6  ;;  %6200 = vmatpush1.bf16.msra.mxu1 %v9255_v22  ;;  %v8898_v22 = vcombine.high %v1844_v61, %v1848_v25  ;;  %v1868_v6 = vld [vmem:[#allocation8 + $0x510] sm:$0xff] }
 0x36b   : > { %6201 = vmatprep.subr.bf16.mxu1 %v9264_v62  ;;  %v1852_v62 = vld [vmem:[#allocation8 + $0x490] sm:$0xff] }
 0x36e   : > { %6202 = vmatpush1.bf16.msra.mxu1 %v9263_v0  ;;  %v1856_v0 = vld [vmem:[#allocation8 + $0x4b0] sm:$0xff] }
 0x36f   : > { %5552 = vmatmul.mubr.bf16.gmra.mrb[112].mxu0 %v12035_v43  ;;  %7136 = vmatprep.subr.bf16.mxu1 %v8764_v54  ;;  %v13559_v54 = vld [vmem:[#allocation25_spill] sm:$0xff] }
 0x370   : > { %5561 = vmatprep.mubr.bf16.mxu0 %v12051_v36 }
 0x371   : > { %6091 = vmatmul.mubr.bf16.gmra.mrb[224].mxu1 %v13552_v18 }
 0x372   : > { %6100 = vmatprep.mubr.bf16.mxu1 %v13553_v14  ;;  %v8905_v14 = vcombine.low %v1852_v62, %v1856_v0 }
 0x377   : > { %5562 = vmatmul.mubr.bf16.gmra.mrb[116].mxu0 %v12049_v17 }
 0x378   : > { %5571 = vmatprep.mubr.bf16.mxu0 %v12063_v56 }
 0x379   : > { %6101 = vmatmul.mubr.bf16.gmra.mrb[228].mxu1 %v13554_v30  ;;  %v1864_v30 = vld [vmem:[#allocation8 + $0x4f0] sm:$0xff] }
 0x37a   : > { %6110 = vmatprep.mubr.bf16.mxu1 %v13555_v21  ;;  %v13560_v21 = vld [vmem:[#allocation30_spill] sm:$0xff] }
 0x37f   : > { %5572 = vmatmul.mubr.bf16.gmra.mrb[120].mxu0 %v12061_v44 }
 0x380   : > { %5581 = vmatprep.mubr.bf16.mxu0 %v12075_v2 }
 0x381   : > { %6111 = vmatmul.mubr.bf16.gmra.mrb[232].mxu1 %v13556_v41  ;;  %v8897_v41 = vcombine.low %v1844_v61, %v1848_v25  ;;  %v1876_v61 = vld [vmem:[#allocation8 + $0x550] sm:$0xff] }
 0x382   : > { %6120 = vmatprep.mubr.bf16.mxu1 %v13557_v34  ;;  %v13561_v34 = vcombine.low %v12103_v8, %v12105_v1  ;;  %v8922_v1 = vcombine.high %v1868_v6, %v1872_v10  ;;  %v1880_v25 = vld [vmem:[#allocation8 + $0x570] sm:$0xff] }
 0x387   : > { %5582 = vmatmul.mubr.bf16.gmra.mrb[124].mxu0 %v12073_v3 }
 0x388   : > { %6396 = vmatprep.mubr.bf16.mxu0 %v13558_v26 }
 0x389   : > { %6121 = vmatmul.mubr.bf16.gmra.mrb[236].mxu1 %v13512_v32  ;;  %v8906_v32 = vcombine.high %v1852_v62, %v1856_v0  ;;  %v1888_v62 = vld [vmem:[#allocation8 + $0x5b0] sm:$0xff] }
 0x38a   : > { %6130 = vmatprep.mubr.bf16.mxu1 %v13513_v49  ;;  %v1860_v49 = vld [vmem:[#allocation8 + $0x4d0] sm:$0xff] }
 0x38b   : > { %v8914_v18 = vcombine.high %v1860_v49, %v1864_v30  ;;  %v8913_v8 = vcombine.low %v1860_v49, %v1864_v30  ;;  %v13565_v0 = vld [vmem:[#allocation32_spill] sm:$0xff]  ;;  %v8929_v49 = vcombine.low %v1876_v61, %v1880_v25 }
 0x38c   : > { %v1896_v30 = vld [vmem:[#allocation8 + $0x5f0] sm:$0xff] }
 0x38f   : > { %6397 = vmatmul.mubr.bf16.vlgmr.msra.gmra.mrb[128].mxu0 %v13559_v54 }
 0x390   : > { %6406 = vmatprep.mubr.bf16.mxu0 %v13560_v21  ;;  %6558 = vmatpush1.bf16.msra.mxu0 %v13561_v34  ;;  %v13564_v34 = vld [vmem:[#allocation85_spill] sm:$0xff] }
 0x391   : > { %6131 = vmatmul.mubr.bf16.gmra.mrb[240].mxu1 %v13516_v23  ;;  %6559 = vmatprep.subr.bf16.mxu0 %v8898_v22  ;;  %v1884_v22 = vld [vmem:[#allocation8 + $0x590] sm:$0xff] }
 0x392   : > { %6140 = vmatprep.mubr.bf16.mxu1 %v13517_v35  ;;  %v13566_v35 = vld [vmem:[#allocation38_spill] sm:$0xff]  ;;  %v13569_v23 = vld [vmem:[#allocation40_spill] sm:$0xff] }
 0x394   : > { %6560 = vmatpush1.bf16.msra.mxu0 %v8897_v41  ;;  %v8921_v41 = vcombine.low %v1868_v6, %v1872_v10  ;;  %v8937_v10 = vcombine.low %v1884_v22, %v1888_v62 }
 0x395   : > { %6561 = vmatprep.subr.bf16.mxu0 %v8906_v32  ;;  %v8930_v32 = vcombine.high %v1876_v61, %v1880_v25 }
 0x397   : > { %6407 = vmatmul.mubr.bf16.gmra.mrb[132].mxu0 %v13562_v15 }
 0x398   : > { %6416 = vmatprep.mubr.bf16.mxu0 %v13563_v16  ;;  %6562 = vmatpush1.bf16.msra.mxu0 %v8905_v14  ;;  %v1892_v14 = vld [vmem:[#allocation8 + $0x5d0] sm:$0xff] }
 0x399   : > { %6141 = vmatmul.mubr.bf16.gmra.mrb[244].mxu1 %v13520_v7  ;;  %6563 = vmatprep.subr.bf16.mxu0 %v8914_v18  ;;  %v8938_v18 = vcombine.high %v1884_v22, %v1888_v62  ;;  %v8946_v6 = vcombine.high %v1892_v14, %v1896_v30  ;;  %v13568_v7 = vld [vmem:[#allocation42_spill] sm:$0xff]  ;;  %v8945_v61 = vcombine.low %v1892_v14, %v1896_v30 }
 0x39a   : > { %6150 = vmatprep.mubr.bf16.mxu1 %v13564_v34  ;;  %v13567_v34 = vld [vmem:[#allocation36_spill] sm:$0xff]  ;;  %v1721_v22 = vld [vmem:[#allocation8 + $0x78] sm:$0xff] }
 0x39b   : > { %v13570_v14 = vld [vmem:[#allocation46_spill] sm:$0xff] }
 0x39c   : > { %6564 = vmatpush1.bf16.msra.mxu0 %v8913_v8  ;;  %v1900_v8 = vld [vmem:[#allocation8 + $0x610] sm:$0xff]  ;;  %v1725_v30 = vld [vmem:[#allocation8 + $0x98] sm:$0xff] }
 0x39d   : > { %6565 = vmatprep.subr.bf16.mxu0 %v8922_v1  ;;  %v1904_v1 = vld [vmem:[#allocation8 + $0x630] sm:$0xff] }
 0x39e   : > { %v8954_v25 = vcombine.high %v1900_v8, %v1904_v1  ;;  %v8953_v62 = vcombine.low %v1900_v8, %v1904_v1  ;;  %v13571_v8 = vcombine.low %v12107_v46, %v12115_v39 }
 0x39f   : > { %6417 = vmatmul.mubr.bf16.gmra.mrb[136].mxu0 %v13565_v0 }
 0x3a0   : > { %6426 = vmatprep.mubr.bf16.mxu0 %v13566_v35  ;;  %6566 = vmatpush1.bf16.msra.mxu0 %v8921_v41  ;;  %v1908_v41 = vld [vmem:[#allocation8 + $0x650] sm:$0xff] }
 0x3a1   : > { %6151 = vmatmul.mubr.bf16.gmra.mrb[248].mxu1 %v13524_v63  ;;  %6567 = vmatprep.subr.bf16.mxu0 %v8930_v32  ;;  %v1912_v32 = vld [vmem:[#allocation8 + $0x670] sm:$0xff] }
 0x3a2   : > { %6160 = vmatprep.mubr.bf16.mxu1 %v13525_v57  ;;  %v1916_v57 = vld [vmem:[#allocation8 + $0x690] sm:$0xff] }
 0x3a3   : > { %v1920_v63 = vld [vmem:[#allocation8 + $0x6b0] sm:$0xff] }
 0x3a4   : > { %6568 = vmatpush1.bf16.msra.mxu0 %v8929_v49  ;;  %v1717_v49 = vld [vmem:[#allocation8 + $0x58] sm:$0xff] }
 0x3a5   : > { %6569 = vmatprep.subr.bf16.mxu0 %v8938_v18  ;;  %v8962_v18 = vcombine.high %v1908_v41, %v1912_v32  ;;  %v8771_v1 = vcombine.low %v1717_v49, %v1721_v22 }
 0x3a7   : > { %6427 = vmatmul.mubr.bf16.gmra.mrb[140].mxu0 %v13567_v34 }
 0x3a8   : > { %6436 = vmatprep.mubr.bf16.mxu0 %v13568_v7  ;;  %6570 = vmatpush1.bf16.msra.mxu0 %v8937_v10  ;;  %v8772_v10 = vcombine.high %v1717_v49, %v1721_v22  ;;  %v1932_v22 = vld [vmem:[#allocation8 + $0x710] sm:$0xff] }
 0x3a9   : > { %6161 = vmatmul.mubr.bf16.gmra.mrb[252].mxu1 %v13528_v59  ;;  %6571 = vmatprep.subr.bf16.mxu0 %v8946_v6  ;;  %v1729_v6 = vld [vmem:[#allocation8 + $0xb8] sm:$0xff]  ;;  %v8961_v59 = vcombine.low %v1908_v41, %v1912_v32 }
 0x3aa   : > { %6203 = vmatprep.mubr.bf16.mxu1 %v11873_v31  ;;  %v8970_v31 = vcombine.high %v1916_v57, %v1920_v63  ;;  %v8780_v41 = vcombine.high %v1725_v30, %v1729_v6  ;;  %v8779_v49 = vcombine.low %v1725_v30, %v1729_v6  ;;  %v13573_v32 = vld [vmem:[#allocation50_spill] sm:$0xff]  ;;  %v1944_v30 = vld [vmem:[#allocation8 + $0x770] sm:$0xff]  ;;  %v8796_v6 = vcombine.high %v1741_v58, %v1745_v27 }
 0x3ac   : > { %6572 = vmatpush1.bf16.msra.mxu0 %v8945_v61  ;;  %v1928_v61 = vld [vmem:[#allocation8 + $0x6f0] sm:$0xff] }
 0x3ad   : > { %6573 = vmatprep.subr.bf16.mxu0 %v8954_v25  ;;  %v12193_v25 = vld [vmem:[#allocation8 + $0x810] sm:$0xff]  ;;  %v8978_v39 = vcombine.high %v1924_v52, %v1928_v61 }
 0x3af   : > { %6437 = vmatmul.mubr.bf16.gmra.mrb[144].mxu0 %v13569_v23 }
 0x3b0   : > { %6446 = vmatprep.mubr.bf16.mxu0 %v13570_v14  ;;  %6574 = vmatpush1.bf16.msra.mxu0 %v8953_v62  ;;  %v12201_v62 = vld [vmem:[#allocation8 + $0x438] sm:$0xff] }
 0x3b1   : > { %6204 = vmatmul.mubr.bf16.vlgmr.msra.gmra.mrb[192].mxu1 %v11871_v5  ;;  %6575 = vmatprep.subr.bf16.mxu0 %v8962_v18  ;;  %v1733_v18 = vld [vmem:[#allocation8 + $0xd8] sm:$0xff]  ;;  %v8969_v5 = vcombine.low %v1916_v57, %v1920_v63  ;;  %v1940_v57 = vld [vmem:[#allocation8 + $0x750] sm:$0xff] }
 0x3b2   : > { %6213 = vmatprep.mubr.bf16.mxu1 %v11888_v51  ;;  %7137 = vmatpush1.bf16.msra.mxu1 %v13571_v8  ;;  %v1737_v51 = vld [vmem:[#allocation8 + $0xf8] sm:$0xff]  ;;  %v1936_v8 = vld [vmem:[#allocation8 + $0x730] sm:$0xff]  ;;  %v8994_v42 = vcombine.high %v1940_v57, %v1944_v30 }
 0x3b3   : > { %7138 = vmatprep.subr.bf16.mxu1 %v8772_v10  ;;  %v13572_v10 = vld [vmem:[#allocation44_spill] sm:$0xff]  ;;  %v8788_v4 = vcombine.high %v1733_v18, %v1737_v51  ;;  %v8986_v63 = vcombine.high %v1932_v22, %v1936_v8  ;;  %v8985_v46 = vcombine.low %v1932_v22, %v1936_v8 }
 0x3b4   : > { %6576 = vmatpush1.bf16.msra.mxu0 %v8961_v59  ;;  %v8977_v59 = vcombine.low %v1924_v52, %v1928_v61  ;;  %v1948_v52 = vld [vmem:[#allocation8 + $0x790] sm:$0xff] }
 0x3b5   : > { %6577 = vmatprep.subr.bf16.mxu0 %v8970_v31  ;;  %v8787_v31 = vcombine.low %v1733_v18, %v1737_v51  ;;  %v1952_v61 = vld [vmem:[#allocation8 + $0x7b0] sm:$0xff]  ;;  %v1757_v51 = vld [vmem:[#allocation8 + $0x198] sm:$0xff] }
 0x3b6   : > { %7139 = vmatpush1.bf16.msra.mxu1 %v8771_v1  ;;  %v1749_v1 = vld [vmem:[#allocation8 + $0x158] sm:$0xff]  ;;  %v9002_v22 = vcombine.high %v1948_v52, %v1952_v61  ;;  %v1960_v8 = vld [vmem:[#allocation8 + $0x7f0] sm:$0xff] }
 0x3b7   : > { %6447 = vmatmul.mubr.bf16.gmra.mrb[148].mxu0 %v13572_v10  ;;  %7140 = vmatprep.subr.bf16.mxu1 %v8780_v41  ;;  %v1753_v41 = vld [vmem:[#allocation8 + $0x178] sm:$0xff] }
 0x3b8   : > { %6456 = vmatprep.mubr.bf16.mxu0 %v13573_v32  ;;  %6578 = vmatpush1.bf16.msra.mxu0 %v8969_v5  ;;  %v8795_v5 = vcombine.low %v1741_v58, %v1745_v27  ;;  %v1761_v18 = vld [vmem:[#allocation8 + $0x1b8] sm:$0xff]  ;;  %v8803_v27 = vcombine.low %v1749_v1, %v1753_v41  ;;  %v1956_v58 = vld [vmem:[#allocation8 + $0x7d0] sm:$0xff] }
 0x3b9   : > { %6214 = vmatmul.mubr.bf16.gmra.mrb[196].mxu1 %v11886_v55  ;;  %6579 = vmatprep.subr.bf16.mxu0 %v8978_v39  ;;  %v13574_v39 = vld [vmem:[#allocation48_spill] sm:$0xff]  ;;  %v9010_v55 = vcombine.high %v1956_v58, %v1960_v8 }
 0x3ba   : > { %6223 = vmatprep.mubr.bf16.mxu1 %v11900_v50  ;;  %7141 = vmatpush1.bf16.msra.mxu1 %v8779_v49  ;;  %v8804_v50 = vcombine.high %v1749_v1, %v1753_v41  ;;  %v13575_v49 = vld [vmem:[#allocation54_spill] sm:$0xff]  ;;  %v9009_v41 = vcombine.low %v1956_v58, %v1960_v8 }
 0x3bb   : > { %7142 = vmatprep.subr.bf16.mxu1 %v8788_v4  ;;  %v8993_v4 = vcombine.low %v1940_v57, %v1944_v30  ;;  %v13576_v57 = vld [vmem:[#allocation52_spill] sm:$0xff]  ;;  %v13577_v30 = vld [vmem:[#allocation58_spill] sm:$0xff] }
 0x3bc   : > { %6580 = vmatpush1.bf16.msra.mxu0 %v8977_v59  ;;  %v8812_v59 = vcombine.high %v1757_v51, %v1761_v18  ;;  %v1777_v1 = vld [vmem:[#allocation8 + $0x238] sm:$0xff] }
 0x3bd   : > { %6581 = vmatprep.subr.bf16.mxu0 %v8986_v63  ;;  %v1765_v63 = vld [vmem:[#allocation8 + $0x1d8] sm:$0xff] }
 0x3be   : > { %7143 = vmatpush1.bf16.msra.mxu1 %v8787_v31  ;;  %v1769_v31 = vld [vmem:[#allocation8 + $0x1f8] sm:$0xff] }
 0x3bf   : > { %6457 = vmatmul.mubr.bf16.gmra.mrb[152].mxu0 %v13574_v39  ;;  %7144 = vmatprep.subr.bf16.mxu1 %v8796_v6  ;;  %v9001_v6 = vcombine.low %v1948_v52, %v1952_v61  ;;  %v8819_v52 = vcombine.low %v1765_v63, %v1769_v31  ;;  %v1789_v58 = vld [vmem:[#allocation8 + $0x298] sm:$0xff] }
 0x3c0   : > { %6466 = vmatprep.mubr.bf16.mxu0 %v13575_v49  ;;  %6582 = vmatpush1.bf16.msra.mxu0 %v8985_v46  ;;  %v8811_v46 = vcombine.low %v1757_v51, %v1761_v18  ;;  %v1781_v51 = vld [vmem:[#allocation8 + $0x258] sm:$0xff] }
 0x3c1   : > { %6224 = vmatmul.mubr.bf16.gmra.mrb[200].mxu1 %v11898_v60  ;;  %6583 = vmatprep.subr.bf16.mxu0 %v8994_v42  ;;  %v8820_v42 = vcombine.high %v1765_v63, %v1769_v31  ;;  %v1785_v18 = vld [vmem:[#allocation8 + $0x278] sm:$0xff] }
 0x3c2   : > { %6233 = vmatprep.mubr.bf16.mxu1 %v11912_v13  ;;  %7145 = vmatpush1.bf16.msra.mxu1 %v8795_v5  ;;  %v1773_v5 = vld [vmem:[#allocation8 + $0x218] sm:$0xff]  ;;  %v8835_v63 = vcombine.low %v1781_v51, %v1785_v18 }
 0x3c3   : > { %7146 = vmatprep.subr.bf16.mxu1 %v8804_v50  ;;  %v9018_v50 = vcombine.high %v12193_v25, %v12195_v47  ;;  %v8828_v61 = vcombine.high %v1773_v5, %v1777_v1  ;;  %v1793_v8 = vld [vmem:[#allocation8 + $0x2b8] sm:$0xff] }
 0x3c4   : > { %6584 = vmatpush1.bf16.msra.mxu0 %v8993_v4  ;;  %v8827_v4 = vcombine.low %v1773_v5, %v1777_v1  ;;  %v8844_v31 = vcombine.high %v1789_v58, %v1793_v8  ;;  %v8843_v5 = vcombine.low %v1789_v58, %v1793_v8  ;;  %v13582_v1 = vld [vmem:[#allocation60_spill] sm:$0xff]  ;;  %v10411_v8 = vld [vmem:[#allocation9] sm:$0xff]  ;;  %v1833_v60 = vld [vmem:[#allocation8 + $0x3f8] sm:$0xff] }
 0x3c5   : > { %6585 = vmatprep.subr.bf16.mxu0 %v9002_v22  ;;  %v13578_v22 = vld [vmem:[#allocation56_spill] sm:$0xff]  ;;  %v13588_v13 = vld [vmem:[#allocation70_spill] sm:$0xff] }
 0x3c6   : > { %7147 = vmatpush1.bf16.msra.mxu1 %v8803_v27  ;;  %v8836_v27 = vcombine.high %v1781_v51, %v1785_v18 }
 0x3c7   : > { %6467 = vmatmul.mubr.bf16.gmra.mrb[156].mxu0 %v13576_v57  ;;  %7148 = vmatprep.subr.bf16.mxu1 %v8812_v59  ;;  %v13580_v59 = vld [vmem:[#allocation129_spill] sm:$0xff] }
 0x3c8   : > { %6476 = vmatprep.mubr.bf16.mxu0 %v13577_v30  ;;  %6586 = vmatpush1.bf16.msra.mxu0 %v9001_v6  ;;  %v13581_v6 = vld [vmem:[#allocation132_spill] sm:$0xff] }
 0x3c9   : > { %6234 = vmatmul.mubr.bf16.gmra.mrb[204].mxu1 %v11910_v28  ;;  %6587 = vmatprep.subr.bf16.mxu0 %v9010_v55  ;;  %v13579_v55 = vld [vmem:[#allocation62_spill] sm:$0xff] }
 0x3ca   : > { %6243 = vmatprep.mubr.bf16.mxu1 %v11924_v53  ;;  %7149 = vmatpush1.bf16.msra.mxu1 %v8811_v46  ;;  %v1797_v46 = vld [vmem:[#allocation8 + $0x2d8] sm:$0xff]  ;;  %v13584_v53 = vld [vmem:[#allocation131_spill] sm:$0xff] }
 0x3cb   : > { %7150 = vmatprep.subr.bf16.mxu1 %v8820_v42  ;;  %v1801_v42 = vld [vmem:[#allocation8 + $0x2f8] sm:$0xff] }
 0x3cc   : > { %6588 = vmatpush1.bf16.msra.mxu0 %v9009_v41  ;;  %v8852_v41 = vcombine.high %v1797_v46, %v1801_v42  ;;  %v8851_v51 = vcombine.low %v1797_v46, %v1801_v42  ;;  %v13589_v42 = vld [vmem:[#allocation136_spill] sm:$0xff] }
 0x3cd   : > { %6750 = vmatprep.subr.bf16.mxu0 %v9018_v50  ;;  %v13583_v50 = vld [vmem:[#allocation66_spill] sm:$0xff] }
 0x3ce   : > { %7151 = vmatpush1.bf16.msra.mxu1 %v8819_v52  ;;  %v1805_v52 = vld [vmem:[#allocation8 + $0x318] sm:$0xff] }
 0x3cf   : > { %6477 = vmatmul.mubr.bf16.gmra.mrb[160].mxu0 %v13578_v22  ;;  %7152 = vmatprep.subr.bf16.mxu1 %v8828_v61  ;;  %v1809_v61 = vld [vmem:[#allocation8 + $0x338] sm:$0xff] }
 0x3d0   : > { %6486 = vmatprep.mubr.bf16.mxu0 %v13579_v55  ;;  %v8860_v18 = vcombine.high %v1805_v52, %v1809_v61  ;;  %v8859_v58 = vcombine.low %v1805_v52, %v1809_v61 }
 0x3d1   : > { %6244 = vmatmul.mubr.bf16.gmra.mrb[208].mxu1 %v13580_v59  ;;  %v13585_v59 = vld [vmem:[#allocation134_spill] sm:$0xff] }
 0x3d2   : > { %6253 = vmatprep.mubr.bf16.mxu1 %v13581_v6  ;;  %7153 = vmatpush1.bf16.msra.mxu1 %v8827_v4  ;;  %v1813_v4 = vld [vmem:[#allocation8 + $0x358] sm:$0xff]  ;;  %v13587_v6 = vld [vmem:[#allocation64_spill] sm:$0xff] }
 0x3d3   : > { %7154 = vmatprep.subr.bf16.mxu1 %v8836_v27  ;;  %v1817_v27 = vld [vmem:[#allocation8 + $0x378] sm:$0xff] }
 0x3d4   : > { %v8868_v28 = vcombine.high %v1813_v4, %v1817_v27 }
 0x3d6   : > { %7155 = vmatpush1.bf16.msra.mxu1 %v8835_v63  ;;  %v13586_v63 = vld [vmem:[#allocation24_spill] sm:$0xff] }
 0x3d7   : > { %6487 = vmatmul.mubr.bf16.gmra.mrb[164].mxu0 %v13582_v1  ;;  %7156 = vmatprep.subr.bf16.mxu1 %v8844_v31  ;;  %v12228_v31 = vrot.slane %v10411_v8, %v13586_v63  ;;  %v1829_v63 = vld [vmem:[#allocation8 + $0x3d8] sm:$0xff] }
 0x3d8   : > { %6496 = vmatprep.mubr.bf16.mxu0 %v13583_v50  ;;  %v13592_v50 = vld [vmem:[#allocation74_spill] sm:$0xff] }
 0x3d9   : > { %6254 = vmatmul.mubr.bf16.gmra.mrb[212].mxu1 %v13584_v53  ;;  %v1821_v53 = vld [vmem:[#allocation8 + $0x398] sm:$0xff] }
 0x3da   : > { %6263 = vmatprep.mubr.bf16.mxu1 %v13585_v59  ;;  %7157 = vmatpush1.bf16.msra.mxu1 %v8843_v5  ;;  %v1825_v59 = vld [vmem:[#allocation8 + $0x3b8] sm:$0xff]  ;;  %v8867_v5 = vcombine.low %v1813_v4, %v1817_v27  ;;  %v13591_v4 = vld [vmem:[#allocation68_spill] sm:$0xff]  ;;  %v8884_v27 = vcombine.high %v1829_v63, %v1833_v60 }
 0x3db   : > { %7158 = vmatprep.subr.bf16.mxu1 %v8852_v41  ;;  %v8876_v61 = vcombine.high %v1821_v53, %v1825_v59 }
 0x3de   : > { %7159 = vmatpush1.bf16.msra.mxu1 %v8851_v51  ;;  %v13590_v51 = vld [vmem:[#allocation18_spill] sm:$0xff] }
 0x3df   : > { %6497 = vmatmul.mubr.bf16.gmra.mrb[168].mxu0 %v13587_v6  ;;  %7160 = vmatprep.subr.bf16.mxu1 %v8860_v18  ;;  %v8875_v6 = vcombine.low %v1821_v53, %v1825_v59 }
 0x3e0   : > { %6506 = vmatprep.mubr.bf16.mxu0 %v13588_v13 }
 0x3e1   : > { %6264 = vmatmul.mubr.bf16.gmra.mrb[216].mxu1 %v13540_v19 }
 0x3e2   : > { %v5433_v46 = vpop.f32.mrb[64].mxu0  ;;  %6273 = vmatprep.mubr.bf16.mxu1 %v13589_v42  ;;  %7161 = vmatpush1.bf16.msra.mxu1 %v8859_v58 }
 0x3e3   : > { %v9275_v41 = vadd.f32 %v5433_v46, %v12228_v31  ;;  %v5435_v52 = vpop.f32.mrb[65].mxu0  ;;  %7162 = vmatprep.subr.bf16.mxu1 %v8868_v28 }
 0x3e4   : > { %v9276_v8 = vadd.f32 %v5435_v52, %v13590_v51  ;;  %v5437_v18 = vpop.f32.mrb[66].mxu0 }
 0x3e5   : > { %v9277_v11 = vadd.f32 %v5437_v18, %v12228_v31  ;;  %v5439_v13 = vpop.f32.mrb[67].mxu0  ;;  %v7908_v42 = vmax.f32 %v9275_v41, 0.0 }
 0x3e6   : > { %v9278_v19 = vadd.f32 %v5439_v13, %v13590_v51  ;;  %7163 = vmatpush1.bf16.msra.mxu1 %v8867_v5  ;;  %v7909_v28 = vmax.f32 %v9276_v8, 0.0  ;;  %v8883_v13 = vcombine.low %v1829_v63, %v1833_v60  ;;  %v13596_v63 = vld [vmem:[#allocation78_spill] sm:$0xff] }
 0x3e7   : > { %v7916_v58 = vmax.f32 %v9277_v11, 0.0  ;;  %6507 = vmatmul.mubr.bf16.gmra.mrb[172].mxu0 %v13591_v4  ;;  %7164 = vmatprep.subr.bf16.mxu1 %v8876_v61 }
 0x3e8   : > { %v7917_v46 = vmax.f32 %v9278_v19, 0.0  ;;  %6516 = vmatprep.mubr.bf16.mxu0 %v13592_v50  ;;  %v8892_v19 = vcombine.high %v12197_v33, %v12201_v62 }
 0x3e9   : > { %v12240_v52 = vpack.c.bf16 %v7916_v58, %v7908_v42  ;;  %6274 = vmatmul.mubr.bf16.gmra.mrb[220].mxu1 %v11973_v24 }
 0x3ea   : > { %v12243_v18 = vpack.c.bf16 %v7917_v46, %v7909_v28  ;;  %v5443_v1 = vpop.f32.mrb[68].mxu0  ;;  %6283 = vmatprep.mubr.bf16.mxu1 %v11989_v37  ;;  %7165 = vmatpush1.bf16.msra.mxu1 %v8875_v6  ;;  %v13595_v6 = vld [vmem:[#allocation72_spill] sm:$0xff] }
 0x3eb   : > { %13593 = vst [vmem:[#allocation26_spill] sm:$0xff] %v12240_v52  ;;  %v9279_v53 = vadd.f32 %v5443_v1, %v12228_v31  ;;  %v5445_v11 = vpop.f32.mrb[69].mxu0  ;;  %7166 = vmatprep.subr.bf16.mxu1 %v8884_v27  ;;  %v13612_v37 = vld [vmem:[#allocation92_spill] sm:$0xff] }
 0x3ec   : > { %13594 = vst [vmem:[#allocation25_spill] sm:$0xff] %v12243_v18  ;;  %v9280_v59 = vadd.f32 %v5445_v11, %v13590_v51  ;;  %v5447_v42 = vpop.f32.mrb[70].mxu0 }
 0x3ed   : > { %v9281_v5 = vadd.f32 %v5447_v42, %v12228_v31  ;;  %v5449_v41 = vpop.f32.mrb[71].mxu0  ;;  %v7924_v8 = vmax.f32 %v9279_v53, 0.0 }
 0x3ee   : > { %v9282_v61 = vadd.f32 %v5449_v41, %v13590_v51  ;;  %7167 = vmatpush1.bf16.msra.mxu1 %v8883_v13  ;;  %v7925_v60 = vmax.f32 %v9280_v59, 0.0 }
 0x3ef   : > { %v7932_v58 = vmax.f32 %v9281_v5, 0.0  ;;  %6517 = vmatmul.mubr.bf16.gmra.mrb[176].mxu0 %v13595_v6  ;;  %7329 = vmatprep.subr.bf16.mxu1 %v8892_v19 }
 0x3f0   : > { %v7933_v1 = vmax.f32 %v9282_v61, 0.0  ;;  %6526 = vmatprep.mubr.bf16.mxu0 %v13596_v63 }
 0x3f1   : > { %v12254_v27 = vpack.c.bf16 %v7932_v58, %v7924_v8  ;;  %6284 = vmatmul.mubr.bf16.gmra.mrb[224].mxu1 %v11987_v48  ;;  %v13599_v8 = vld [vmem:[#allocation76_spill] sm:$0xff] }
 0x3f2   : > { %v12257_v28 = vpack.c.bf16 %v7933_v1, %v7925_v60  ;;  %v5453_v46 = vpop.f32.mrb[72].mxu0  ;;  %6293 = vmatprep.mubr.bf16.mxu1 %v12001_v38  ;;  %v13600_v1 = vld [vmem:[#allocation82_spill] sm:$0xff] }
 0x3f3   : > { %13597 = vst [vmem:[#allocation30_spill] sm:$0xff] %v12254_v27  ;;  %v9283_v13 = vadd.f32 %v5453_v46, %v12228_v31  ;;  %v5455_v53 = vpop.f32.mrb[73].mxu0 }
 0x3f4   : > { %13598 = vst [vmem:[#allocation28_spill] sm:$0xff] %v12257_v28  ;;  %v9284_v11 = vadd.f32 %v5455_v53, %v13590_v51  ;;  %v5457_v42 = vpop.f32.mrb[74].mxu0 }
 0x3f5   : > { %v9285_v19 = vadd.f32 %v5457_v42, %v12228_v31  ;;  %v5459_v59 = vpop.f32.mrb[75].mxu0  ;;  %v7940_v41 = vmax.f32 %v9283_v13, 0.0 }
 0x3f6   : > { %v9286_v5 = vadd.f32 %v5459_v59, %v13590_v51  ;;  %v7941_v58 = vmax.f32 %v9284_v11, 0.0 }
 0x3f7   : > { %v7948_v61 = vmax.f32 %v9285_v19, 0.0  ;;  %6527 = vmatmul.mubr.bf16.gmra.mrb[180].mxu0 %v13599_v8 }
 0x3f8   : > { %v7949_v60 = vmax.f32 %v9286_v5, 0.0  ;;  %6536 = vmatprep.mubr.bf16.mxu0 %v13600_v1 }
 0x3f9   : > { %v12266_v27 = vpack.c.bf16 %v7948_v61, %v7940_v41  ;;  %6294 = vmatmul.mubr.bf16.gmra.mrb[228].mxu1 %v11999_v12  ;;  %v13611_v12 = vld [vmem:[#allocation88_spill] sm:$0xff] }
 0x3fa   : > { %v12269_v46 = vpack.c.bf16 %v7949_v60, %v7941_v58  ;;  %v5463_v53 = vpop.f32.mrb[76].mxu0  ;;  %6303 = vmatprep.mubr.bf16.mxu1 %v12013_v40 }
 0x3fb   : > { %13601 = vst [vmem:[#allocation34_spill] sm:$0xff] %v12266_v27  ;;  %v9287_v42 = vadd.f32 %v5463_v53, %v12228_v31  ;;  %v5465_v59 = vpop.f32.mrb[77].mxu0  ;;  %v13603_v27 = vld [vmem:[#allocation80_spill] sm:$0xff] }
 0x3fc   : > { %13602 = vst [vmem:[#allocation32_spill] sm:$0xff] %v12269_v46  ;;  %v9288_v13 = vadd.f32 %v5465_v59, %v13590_v51  ;;  %v5467_v19 = vpop.f32.mrb[78].mxu0  ;;  %v13604_v46 = vld [vmem:[#allocation86_spill] sm:$0xff] }
 0x3fd   : > { %v9289_v11 = vadd.f32 %v5467_v19, %v12228_v31  ;;  %v5469_v5 = vpop.f32.mrb[79].mxu0  ;;  %v7956_v41 = vmax.f32 %v9287_v42, 0.0 }
 0x3fe   : > { %v9290_v28 = vadd.f32 %v5469_v5, %v13590_v51  ;;  %v7957_v58 = vmax.f32 %v9288_v13, 0.0 }
 0x3ff   : > { %v7964_v61 = vmax.f32 %v9289_v11, 0.0  ;;  %6537 = vmatmul.mubr.bf16.gmra.mrb[184].mxu0 %v13603_v27 }
 0x400   : > { %v7965_v60 = vmax.f32 %v9290_v28, 0.0  ;;  %6546 = vmatprep.mubr.bf16.mxu0 %v13604_v46 }
 0x401   : > { %v12278_v52 = vpack.c.bf16 %v7964_v61, %v7956_v41  ;;  %6304 = vmatmul.mubr.bf16.gmra.mrb[232].mxu1 %v12011_v20  ;;  %v1976_v20 = vld [vmem:[#allocation8 + $0x870] sm:$0xff] }
 0x402   : > { %v12281_v53 = vpack.c.bf16 %v7965_v60, %v7957_v58  ;;  %v5473_v59 = vpop.f32.mrb[80].mxu0  ;;  %6313 = vmatprep.mubr.bf16.mxu1 %v12025_v9 }
 0x403   : > { %13605 = vst [vmem:[#allocation38_spill] sm:$0xff] %v12278_v52  ;;  %v9291_v19 = vadd.f32 %v5473_v59, %v12228_v31  ;;  %v5475_v5 = vpop.f32.mrb[81].mxu0  ;;  %v13607_v52 = vld [vmem:[#allocation84_spill] sm:$0xff] }
 0x404   : > { %13606 = vst [vmem:[#allocation36_spill] sm:$0xff] %v12281_v53  ;;  %v9292_v42 = vadd.f32 %v5475_v5, %v13590_v51  ;;  %v5477_v11 = vpop.f32.mrb[82].mxu0  ;;  %v13608_v53 = vld [vmem:[#allocation90_spill] sm:$0xff] }
 0x405   : > { %v9293_v13 = vadd.f32 %v5477_v11, %v12228_v31  ;;  %v5479_v28 = vpop.f32.mrb[83].mxu0  ;;  %v7972_v41 = vmax.f32 %v9291_v19, 0.0  ;;  %v1972_v11 = vld [vmem:[#allocation8 + $0x850] sm:$0xff] }
 0x406   : > { %v9294_v18 = vadd.f32 %v5479_v28, %v13590_v51  ;;  %v7973_v58 = vmax.f32 %v9292_v42, 0.0  ;;  %v12297_v28 = vld [vmem:[#allocation8 + $0xc10] sm:$0xff] }
 0x407   : > { %v7980_v61 = vmax.f32 %v9293_v13, 0.0  ;;  %6547 = vmatmul.mubr.bf16.gmra.mrb[188].mxu0 %v13607_v52  ;;  %v12299_v42 = vld [vmem:[#allocation8 + $0xc30] sm:$0xff] }
 0x408   : > { %v7981_v60 = vmax.f32 %v9294_v18, 0.0  ;;  %6589 = vmatprep.mubr.bf16.mxu0 %v13608_v53 }
 0x409   : > { %v12290_v9 = vpack.c.bf16 %v7980_v61, %v7972_v41  ;;  %6314 = vmatmul.mubr.bf16.gmra.mrb[236].mxu1 %v12023_v45 }
 0x40a   : > { %v12293_v59 = vpack.c.bf16 %v7981_v60, %v7973_v58  ;;  %v5483_v5 = vpop.f32.mrb[84].mxu0  ;;  %6323 = vmatprep.mubr.bf16.mxu1 %v12039_v29  ;;  %v9026_v58 = vcombine.high %v1972_v11, %v1976_v20  ;;  %v1984_v29 = vld [vmem:[#allocation8 + $0x8b0] sm:$0xff] }
 0x40b   : > { %13609 = vst [vmem:[#allocation42_spill] sm:$0xff] %v12290_v9  ;;  %v9295_v19 = vadd.f32 %v5483_v5, %v12228_v31  ;;  %v5485_v13 = vpop.f32.mrb[85].mxu0 }
 0x40c   : > { %13610 = vst [vmem:[#allocation40_spill] sm:$0xff] %v12293_v59  ;;  %v9296_v18 = vadd.f32 %v5485_v13, %v13590_v51  ;;  %v5487_v41 = vpop.f32.mrb[86].mxu0  ;;  %v1980_v59 = vld [vmem:[#allocation8 + $0x890] sm:$0xff]  ;;  %v13613_v13 = vcombine.low %v12193_v25, %v12195_v47 }
 0x40d   : > { %v9297_v61 = vadd.f32 %v5487_v41, %v12228_v31  ;;  %v5489_v9 = vpop.f32.mrb[87].mxu0  ;;  %v7988_v5 = vmax.f32 %v9295_v19, 0.0  ;;  %v9025_v41 = vcombine.low %v1972_v11, %v1976_v20  ;;  %v9033_v20 = vcombine.low %v1980_v59, %v1984_v29 }
 0x40e   : > { %v9298_v60 = vadd.f32 %v5489_v9, %v13590_v51  ;;  %v7989_v38 = vmax.f32 %v9296_v18, 0.0  ;;  %v9034_v9 = vcombine.high %v1980_v59, %v1984_v29  ;;  %v1988_v18 = vld [vmem:[#allocation8 + $0x8d0] sm:$0xff] }
 0x40f   : > { %v7996_v40 = vmax.f32 %v9297_v61, 0.0  ;;  %6590 = vmatmul.mubr.bf16.vlgmr.msra.gmra.mrb[128].mxu0 %v13611_v12  ;;  %v1992_v61 = vld [vmem:[#allocation8 + $0x8f0] sm:$0xff] }
 0x410   : > { %v7997_v48 = vmax.f32 %v9298_v60, 0.0  ;;  %6599 = vmatprep.mubr.bf16.mxu0 %v13612_v37  ;;  %6751 = vmatpush1.bf16.msra.mxu0 %v13613_v13 }
 0x411   : > { %v12311_v24 = vpack.c.bf16 %v7996_v40, %v7988_v5  ;;  %6324 = vmatmul.mubr.bf16.gmra.mrb[240].mxu1 %v12035_v43  ;;  %6752 = vmatprep.subr.bf16.mxu0 %v9026_v58  ;;  %v9042_v58 = vcombine.high %v1988_v18, %v1992_v61  ;;  %v2000_v5 = vld [vmem:[#allocation8 + $0x930] sm:$0xff]  ;;  %v13617_v43 = vld [vmem:[#allocation94_spill] sm:$0xff] }
 0x412   : > { %v12314_v45 = vpack.c.bf16 %v7997_v48, %v7989_v38  ;;  %v5493_v19 = vpop.f32.mrb[88].mxu0  ;;  %6333 = vmatprep.mubr.bf16.mxu1 %v12051_v36  ;;  %v1996_v48 = vld [vmem:[#allocation8 + $0x910] sm:$0xff] }
 0x413   : > { %13614 = vst [vmem:[#allocation46_spill] sm:$0xff] %v12311_v24  ;;  %v9299_v60 = vadd.f32 %v5493_v19, %v12228_v31  ;;  %v5495_v37 = vpop.f32.mrb[89].mxu0  ;;  %v9050_v59 = vcombine.high %v1996_v48, %v2000_v5 }
 0x414   : > { %13615 = vst [vmem:[#allocation44_spill] sm:$0xff] %v12314_v45  ;;  %v9300_v47 = vadd.f32 %v5495_v37, %v13590_v51  ;;  %v5497_v25 = vpop.f32.mrb[90].mxu0  ;;  %6753 = vmatpush1.bf16.msra.mxu0 %v9025_v41  ;;  %v13616_v45 = vld [vmem:[#allocation91_spill] sm:$0xff]  ;;  %v9041_v37 = vcombine.low %v1988_v18, %v1992_v61 }
 0x415   : > { %v9301_v40 = vadd.f32 %v5497_v25, %v12228_v31  ;;  %v5499_v11 = vpop.f32.mrb[91].mxu0  ;;  %6754 = vmatprep.subr.bf16.mxu0 %v9034_v9  ;;  %v8004_v13 = vmax.f32 %v9299_v60, 0.0  ;;  %v2004_v60 = vld [vmem:[#allocation8 + $0x950] sm:$0xff] }
 0x416   : > { %v9302_v38 = vadd.f32 %v5499_v11, %v13590_v51  ;;  %v8005_v19 = vmax.f32 %v9300_v47, 0.0  ;;  %v2008_v25 = vld [vmem:[#allocation8 + $0x970] sm:$0xff] }
 0x417   : > { %v8012_v24 = vmax.f32 %v9301_v40, 0.0  ;;  %6600 = vmatmul.mubr.bf16.gmra.mrb[132].mxu0 %v13616_v45 }
 0x418   : > { %v8013_v36 = vmax.f32 %v9302_v38, 0.0  ;;  %6609 = vmatprep.mubr.bf16.mxu0 %v13617_v43  ;;  %6755 = vmatpush1.bf16.msra.mxu0 %v9033_v20  ;;  %v2012_v38 = vld [vmem:[#allocation8 + $0x990] sm:$0xff] }
 0x419   : > { %v12323_v29 = vpack.c.bf16 %v8012_v24, %v8004_v13  ;;  %6334 = vmatmul.mubr.bf16.gmra.mrb[244].mxu1 %v12049_v17  ;;  %6756 = vmatprep.subr.bf16.mxu0 %v9042_v58  ;;  %v9049_v24 = vcombine.low %v1996_v48, %v2000_v5  ;;  %v9058_v58 = vcombine.high %v2004_v60, %v2008_v25  ;;  %v2016_v13 = vld [vmem:[#allocation8 + $0x9b0] sm:$0xff] }
 0x41a   : > { %v12326_v41 = vpack.c.bf16 %v8013_v36, %v8005_v19  ;;  %v5503_v9 = vpop.f32.mrb[92].mxu0  ;;  %6343 = vmatprep.mubr.bf16.mxu1 %v12063_v56  ;;  %v13621_v17 = vld [vmem:[#allocation96_spill] sm:$0xff]  ;;  %v9066_v5 = vcombine.high %v2012_v38, %v2016_v13 }
 0x41b   : > { %13618 = vst [vmem:[#allocation50_spill] sm:$0xff] %v12323_v29  ;;  %v9303_v47 = vadd.f32 %v5503_v9, %v12228_v31  ;;  %v5505_v40 = vpop.f32.mrb[93].mxu0 }
 0x41c   : > { %13619 = vst [vmem:[#allocation48_spill] sm:$0xff] %v12326_v41  ;;  %v9304_v11 = vadd.f32 %v5505_v40, %v13590_v51  ;;  %v5507_v20 = vpop.f32.mrb[94].mxu0  ;;  %6757 = vmatpush1.bf16.msra.mxu0 %v9041_v37  ;;  %v13620_v41 = vld [vmem:[#allocation93_spill] sm:$0xff]  ;;  %v9057_v37 = vcombine.low %v2004_v60, %v2008_v25 }
 0x41d   : > { %v9305_v18 = vadd.f32 %v5507_v20, %v12228_v31  ;;  %v5509_v61 = vpop.f32.mrb[95].mxu0  ;;  %6758 = vmatprep.subr.bf16.mxu0 %v9050_v59  ;;  %v8020_v19 = vmax.f32 %v9303_v47, 0.0  ;;  %v2020_v47 = vld [vmem:[#allocation8 + $0x9d0] sm:$0xff] }
 0x41e   : > { %v9306_v36 = vadd.f32 %v5509_v61, %v13590_v51  ;;  %v8021_v9 = vmax.f32 %v9304_v11, 0.0  ;;  %v2024_v20 = vld [vmem:[#allocation8 + $0x9f0] sm:$0xff] }
 0x41f   : > { %v8028_v29 = vmax.f32 %v9305_v18, 0.0  ;;  %6610 = vmatmul.mubr.bf16.gmra.mrb[136].mxu0 %v13620_v41 }
 0x420   : > { %v8029_v56 = vmax.f32 %v9306_v36, 0.0  ;;  %6619 = vmatprep.mubr.bf16.mxu0 %v13621_v17  ;;  %6759 = vmatpush1.bf16.msra.mxu0 %v9049_v24  ;;  %v2028_v36 = vld [vmem:[#allocation8 + $0xa10] sm:$0xff]  ;;  %v1873_v17 = vld [vmem:[#allocation8 + $0x538] sm:$0xff] }
 0x421   : > { %v12335_v48 = vpack.c.bf16 %v8028_v29, %v8020_v19  ;;  %6344 = vmatmul.mubr.bf16.gmra.mrb[248].mxu1 %v12061_v44  ;;  %6760 = vmatprep.subr.bf16.mxu0 %v9058_v58  ;;  %v9065_v29 = vcombine.low %v2012_v38, %v2016_v13  ;;  %v9074_v58 = vcombine.high %v2020_v47, %v2024_v20  ;;  %v2032_v19 = vld [vmem:[#allocation8 + $0xa30] sm:$0xff]  ;;  %v13625_v44 = vld [vmem:[#allocation98_spill] sm:$0xff] }
 0x422   : > { %v12338_v59 = vpack.c.bf16 %v8029_v56, %v8021_v9  ;;  %v5513_v40 = vpop.f32.mrb[96].mxu0  ;;  %6353 = vmatprep.mubr.bf16.mxu1 %v12075_v2  ;;  %v9082_v13 = vcombine.high %v2028_v36, %v2032_v19 }
 0x423   : > { %13622 = vst [vmem:[#allocation54_spill] sm:$0xff] %v12335_v48  ;;  %v9307_v11 = vadd.f32 %v5513_v40, %v12228_v31  ;;  %v5515_v18 = vpop.f32.mrb[97].mxu0 }
 0x424   : > { %13623 = vst [vmem:[#allocation52_spill] sm:$0xff] %v12338_v59  ;;  %v9308_v61 = vadd.f32 %v5515_v18, %v13590_v51  ;;  %v5517_v24 = vpop.f32.mrb[98].mxu0  ;;  %6761 = vmatpush1.bf16.msra.mxu0 %v9057_v37  ;;  %v13624_v59 = vld [vmem:[#allocation95_spill] sm:$0xff]  ;;  %v9073_v37 = vcombine.low %v2020_v47, %v2024_v20  ;;  %v1845_v47 = vld [vmem:[#allocation8 + $0x458] sm:$0xff]  ;;  %v9081_v20 = vcombine.low %v2028_v36, %v2032_v19 }
 0x425   : > { %v9309_v60 = vadd.f32 %v5517_v24, %v12228_v31  ;;  %v5519_v25 = vpop.f32.mrb[99].mxu0  ;;  %6762 = vmatprep.subr.bf16.mxu0 %v9066_v5  ;;  %v8036_v9 = vmax.f32 %v9307_v11, 0.0  ;;  %v2036_v11 = vld [vmem:[#allocation8 + $0xa50] sm:$0xff]  ;;  %v1857_v36 = vld [vmem:[#allocation8 + $0x4b8] sm:$0xff] }
 0x426   : > { %v9310_v56 = vadd.f32 %v5519_v25, %v13590_v51  ;;  %v8037_v40 = vmax.f32 %v9308_v61, 0.0  ;;  %v2040_v24 = vld [vmem:[#allocation8 + $0xa70] sm:$0xff] }
 0x427   : > { %v8044_v48 = vmax.f32 %v9309_v60, 0.0  ;;  %6620 = vmatmul.mubr.bf16.gmra.mrb[140].mxu0 %v13624_v59  ;;  %v13629_v59 = vld [vmem:[#allocation100_spill] sm:$0xff]  ;;  %v9089_v19 = vcombine.low %v2036_v11, %v2040_v24 }
 0x428   : > { %v8045_v2 = vmax.f32 %v9310_v56, 0.0  ;;  %6629 = vmatprep.mubr.bf16.mxu0 %v13625_v44  ;;  %6763 = vmatpush1.bf16.msra.mxu0 %v9065_v29 }
 0x429   : > { %v12347_v38 = vpack.c.bf16 %v8044_v48, %v8036_v9  ;;  %6354 = vmatmul.mubr.bf16.gmra.mrb[252].mxu1 %v12073_v3  ;;  %6764 = vmatprep.subr.bf16.mxu0 %v9074_v58  ;;  %v1849_v48 = vld [vmem:[#allocation8 + $0x478] sm:$0xff] }
 0x42a   : > { %v12350_v5 = vpack.c.bf16 %v8045_v2, %v8037_v40  ;;  %v5523_v18 = vpop.f32.mrb[100].mxu0  ;;  %7168 = vmatprep.mubr.bf16.mxu1 %v13558_v26  ;;  %v9090_v2 = vcombine.high %v2036_v11, %v2040_v24  ;;  %v2044_v26 = vld [vmem:[#allocation8 + $0xa90] sm:$0xff]  ;;  %v8900_v3 = vcombine.high %v1845_v47, %v1849_v48 }
 0x42b   : > { %13626 = vst [vmem:[#allocation58_spill] sm:$0xff] %v12347_v38  ;;  %v9311_v61 = vadd.f32 %v5523_v18, %v12228_v31  ;;  %v5525_v60 = vpop.f32.mrb[101].mxu0  ;;  %v2048_v40 = vld [vmem:[#allocation8 + $0xab0] sm:$0xff] }
 0x42c   : > { %13627 = vst [vmem:[#allocation56_spill] sm:$0xff] %v12350_v5  ;;  %v9312_v25 = vadd.f32 %v5525_v60, %v13590_v51  ;;  %v5527_v29 = vpop.f32.mrb[102].mxu0  ;;  %6765 = vmatpush1.bf16.msra.mxu0 %v9073_v37  ;;  %v13628_v18 = vld [vmem:[#allocation97_spill] sm:$0xff] }
 0x42d   : > { %v9313_v58 = vadd.f32 %v5527_v29, %v12228_v31  ;;  %v5529_v56 = vpop.f32.mrb[103].mxu0  ;;  %6766 = vmatprep.subr.bf16.mxu0 %v9082_v13  ;;  %v8052_v38 = vmax.f32 %v9311_v61, 0.0  ;;  %v1853_v37 = vld [vmem:[#allocation8 + $0x498] sm:$0xff]  ;;  %v9098_v13 = vcombine.high %v2044_v26, %v2048_v40 }
 0x42e   : > { %v9314_v9 = vadd.f32 %v5529_v56, %v13590_v51  ;;  %v8053_v60 = vmax.f32 %v9312_v25, 0.0  ;;  %v13632_v25 = vcombine.low %v12197_v33, %v12201_v62 }
 0x42f   : > { %v8060_v5 = vmax.f32 %v9313_v58, 0.0  ;;  %6630 = vmatmul.mubr.bf16.gmra.mrb[144].mxu0 %v13628_v18  ;;  %v8899_v58 = vcombine.low %v1845_v47, %v1849_v48  ;;  %v13634_v18 = vld [vmem:[#allocation102_spill] sm:$0xff] }
 0x430   : > { %v8061_v44 = vmax.f32 %v9314_v9, 0.0  ;;  %6639 = vmatprep.mubr.bf16.mxu0 %v13629_v59  ;;  %6767 = vmatpush1.bf16.msra.mxu0 %v9081_v20  ;;  %v2052_v9 = vld [vmem:[#allocation8 + $0xad0] sm:$0xff]  ;;  %v1865_v20 = vld [vmem:[#allocation8 + $0x4f8] sm:$0xff] }
 0x431   : > { %v12359_v29 = vpack.c.bf16 %v8060_v5, %v8052_v38  ;;  %7169 = vmatmul.mubr.bf16.vlgmr.msra.gmra.mrb[0].mxu1 %v13559_v54  ;;  %6768 = vmatprep.subr.bf16.mxu0 %v9090_v2  ;;  %v2056_v59 = vld [vmem:[#allocation8 + $0xaf0] sm:$0xff]  ;;  %v8908_v5 = vcombine.high %v1853_v37, %v1857_v36  ;;  %v1861_v54 = vld [vmem:[#allocation8 + $0x4d8] sm:$0xff]  ;;  %v9097_v2 = vcombine.low %v2044_v26, %v2048_v40  ;;  %v13633_v40 = vld [vmem:[#allocation99_spill] sm:$0xff] }
 0x432   : > { %v12362_v56 = vpack.c.bf16 %v8061_v44, %v8053_v60  ;;  %v5533_v61 = vpop.f32.mrb[104].mxu0  ;;  %7178 = vmatprep.mubr.bf16.mxu1 %v13560_v21  ;;  %7330 = vmatpush1.bf16.msra.mxu1 %v13632_v25  ;;  %v12370_v21 = vld [vmem:[#allocation8 + $0x818] sm:$0xff]  ;;  %v9106_v47 = vcombine.high %v2052_v9, %v2056_v59  ;;  %v2060_v25 = vld [vmem:[#allocation8 + $0xb10] sm:$0xff] }
 0x433   : > { %13630 = vst [vmem:[#allocation62_spill] sm:$0xff] %v12359_v29  ;;  %v9315_v11 = vadd.f32 %v5533_v61, %v12228_v31  ;;  %v5535_v38 = vpop.f32.mrb[105].mxu0  ;;  %7331 = vmatprep.subr.bf16.mxu1 %v8900_v3  ;;  %v12372_v60 = vld [vmem:[#allocation8 + $0x838] sm:$0xff]  ;;  %v8907_v61 = vcombine.low %v1853_v37, %v1857_v36  ;;  %v8916_v29 = vcombine.high %v1861_v54, %v1865_v20 }
 0x434   : > { %13631 = vst [vmem:[#allocation18_spill] sm:$0xff] %v12362_v56  ;;  %v9316_v24 = vadd.f32 %v5535_v38, %v13590_v51  ;;  %v5537_v44 = vpop.f32.mrb[106].mxu0  ;;  %6769 = vmatpush1.bf16.msra.mxu0 %v9089_v19  ;;  %v2064_v38 = vld [vmem:[#allocation8 + $0xb30] sm:$0xff]  ;;  %v9105_v3 = vcombine.low %v2052_v9, %v2056_v59 }
 0x435   : > { %v9317_v33 = vadd.f32 %v5537_v44, %v12228_v31  ;;  %v5539_v62 = vpop.f32.mrb[107].mxu0  ;;  %6770 = vmatprep.subr.bf16.mxu0 %v9098_v13  ;;  %v8068_v19 = vmax.f32 %v9315_v11, 0.0  ;;  %v1869_v13 = vld [vmem:[#allocation8 + $0x518] sm:$0xff]  ;;  %v9114_v37 = vcombine.high %v2060_v25, %v2064_v38  ;;  %v8915_v11 = vcombine.low %v1861_v54, %v1865_v20 }
 0x436   : > { %v9318_v48 = vadd.f32 %v5539_v62, %v13590_v51  ;;  %7332 = vmatpush1.bf16.msra.mxu1 %v8899_v58  ;;  %v8069_v56 = vmax.f32 %v9316_v24, 0.0  ;;  %v2072_v24 = vld [vmem:[#allocation8 + $0xb70] sm:$0xff]  ;;  %v8924_v59 = vcombine.high %v1869_v13, %v1873_v17  ;;  %v8923_v20 = vcombine.low %v1869_v13, %v1873_v17 }
 0x437   : > { %v8076_v26 = vmax.f32 %v9317_v33, 0.0  ;;  %6640 = vmatmul.mubr.bf16.gmra.mrb[148].mxu0 %v13633_v40  ;;  %7333 = vmatprep.subr.bf16.mxu1 %v8908_v5  ;;  %v2068_v5 = vld [vmem:[#allocation8 + $0xb50] sm:$0xff] }
 0x438   : > { %v8077_v44 = vmax.f32 %v9318_v48, 0.0  ;;  %6649 = vmatprep.mubr.bf16.mxu0 %v13634_v18  ;;  %6771 = vmatpush1.bf16.msra.mxu0 %v9097_v2 }
 0x439   : > { %v12380_v41 = vpack.c.bf16 %v8076_v26, %v8068_v19  ;;  %7179 = vmatmul.mubr.bf16.gmra.mrb[4].mxu1 %v13562_v15  ;;  %6772 = vmatprep.subr.bf16.mxu0 %v9106_v47  ;;  %v1877_v15 = vld [vmem:[#allocation8 + $0x558] sm:$0xff]  ;;  %v2080_v26 = vld [vmem:[#allocation8 + $0xbb0] sm:$0xff] }
 0x43a   : > { %v12383_v36 = vpack.c.bf16 %v8077_v44, %v8069_v56  ;;  %v5543_v58 = vpop.f32.mrb[108].mxu0  ;;  %7188 = vmatprep.mubr.bf16.mxu1 %v13563_v16  ;;  %7334 = vmatpush1.bf16.msra.mxu1 %v8907_v61  ;;  %v1881_v47 = vld [vmem:[#allocation8 + $0x578] sm:$0xff]  ;;  %v9113_v56 = vcombine.low %v2060_v25, %v2064_v38  ;;  %v9122_v16 = vcombine.high %v2068_v5, %v2072_v24  ;;  %v2076_v61 = vld [vmem:[#allocation8 + $0xb90] sm:$0xff] }
 0x43b   : > { %13635 = vst [vmem:[#allocation68_spill] sm:$0xff] %v12380_v41  ;;  %v9319_v33 = vadd.f32 %v5543_v58, %v12228_v31  ;;  %v5545_v62 = vpop.f32.mrb[109].mxu0  ;;  %7335 = vmatprep.subr.bf16.mxu1 %v8916_v29  ;;  %v13637_v58 = vld [vmem:[#allocation101_spill] sm:$0xff]  ;;  %v13638_v25 = vld [vmem:[#allocation104_spill] sm:$0xff]  ;;  %v9130_v17 = vcombine.high %v2076_v61, %v2080_v26 }
 0x43c   : > { %13636 = vst [vmem:[#allocation74_spill] sm:$0xff] %v12383_v36  ;;  %v9320_v9 = vadd.f32 %v5545_v62, %v13590_v51  ;;  %v5547_v2 = vpop.f32.mrb[110].mxu0  ;;  %6773 = vmatpush1.bf16.msra.mxu0 %v9105_v3  ;;  %v8932_v62 = vcombine.high %v1877_v15, %v1881_v47  ;;  %v1885_v38 = vld [vmem:[#allocation8 + $0x598] sm:$0xff] }
 0x43d   : > { %v9321_v48 = vadd.f32 %v5547_v2, %v12228_v31  ;;  %v5549_v19 = vpop.f32.mrb[111].mxu0  ;;  %6774 = vmatprep.subr.bf16.mxu0 %v9114_v37  ;;  %v8084_v29 = vmax.f32 %v9319_v33, 0.0  ;;  %v1889_v2 = vld [vmem:[#allocation8 + $0x5b8] sm:$0xff]  ;;  %v9121_v37 = vcombine.low %v2068_v5, %v2072_v24  ;;  %v8931_v33 = vcombine.low %v1877_v15, %v1881_v47 }
 0x43e   : > { %v9322_v54 = vadd.f32 %v5549_v19, %v13590_v51  ;;  %7336 = vmatpush1.bf16.msra.mxu1 %v8915_v11  ;;  %v8085_v41 = vmax.f32 %v9320_v9, 0.0  ;;  %v2088_v9 = vld [vmem:[#allocation8 + $0xbf0] sm:$0xff]  ;;  %v8940_v5 = vcombine.high %v1885_v38, %v1889_v2  ;;  %v8939_v47 = vcombine.low %v1885_v38, %v1889_v2 }
 0x43f   : > { %v8092_v44 = vmax.f32 %v9321_v48, 0.0  ;;  %6650 = vmatmul.mubr.bf16.gmra.mrb[152].mxu0 %v13637_v58  ;;  %7337 = vmatprep.subr.bf16.mxu1 %v8924_v59  ;;  %v2084_v59 = vld [vmem:[#allocation8 + $0xbd0] sm:$0xff]  ;;  %v9146_v38 = vcombine.high %v12297_v28, %v12299_v42 }
 0x440   : > { %v8093_v3 = vmax.f32 %v9322_v54, 0.0  ;;  %6659 = vmatprep.mubr.bf16.mxu0 %v13638_v25  ;;  %6775 = vmatpush1.bf16.msra.mxu0 %v9113_v56 }
 0x441   : > { %v12392_v36 = vpack.c.bf16 %v8092_v44, %v8084_v29  ;;  %7189 = vmatmul.mubr.bf16.gmra.mrb[8].mxu1 %v13565_v0  ;;  %6776 = vmatprep.subr.bf16.mxu0 %v9122_v16  ;;  %v1893_v0 = vld [vmem:[#allocation8 + $0x5d8] sm:$0xff] }
 0x442   : > { %v12395_v13 = vpack.c.bf16 %v8093_v3, %v8085_v41  ;;  %v5553_v11 = vpop.f32.mrb[112].mxu0  ;;  %7198 = vmatprep.mubr.bf16.mxu1 %v13566_v35  ;;  %7338 = vmatpush1.bf16.msra.mxu1 %v8923_v20  ;;  %v1897_v16 = vld [vmem:[#allocation8 + $0x5f8] sm:$0xff]  ;;  %v9129_v41 = vcombine.low %v2076_v61, %v2080_v26  ;;  %v9138_v35 = vcombine.high %v2084_v59, %v2088_v9 }
 0x443   : > { %13639 = vst [vmem:[#allocation72_spill] sm:$0xff] %v12392_v36  ;;  %v9323_v48 = vadd.f32 %v5553_v11, %v12228_v31  ;;  %v5555_v19 = vpop.f32.mrb[113].mxu0  ;;  %7339 = vmatprep.subr.bf16.mxu1 %v8932_v62  ;;  %v13641_v62 = vld [vmem:[#allocation103_spill] sm:$0xff]  ;;  %v8948_v3 = vcombine.high %v1893_v0, %v1897_v16  ;;  %v13642_v36 = vld [vmem:[#allocation106_spill] sm:$0xff] }
 0x444   : > { %13640 = vst [vmem:[#allocation78_spill] sm:$0xff] %v12395_v13  ;;  %v9324_v24 = vadd.f32 %v5555_v19, %v13590_v51  ;;  %v5557_v56 = vpop.f32.mrb[114].mxu0  ;;  %6777 = vmatpush1.bf16.msra.mxu0 %v9121_v37  ;;  %v1901_v61 = vld [vmem:[#allocation8 + $0x618] sm:$0xff]  ;;  %v9137_v37 = vcombine.low %v2084_v59, %v2088_v9 }
 0x445   : > { %v9325_v54 = vadd.f32 %v5557_v56, %v12228_v31  ;;  %v5559_v29 = vpop.f32.mrb[115].mxu0  ;;  %6778 = vmatprep.subr.bf16.mxu0 %v9130_v17  ;;  %v8100_v20 = vmax.f32 %v9323_v48, 0.0  ;;  %v1905_v26 = vld [vmem:[#allocation8 + $0x638] sm:$0xff]  ;;  %v8947_v48 = vcombine.low %v1893_v0, %v1897_v16 }
 0x446   : > { %v9326_v15 = vadd.f32 %v5559_v29, %v13590_v51  ;;  %7340 = vmatpush1.bf16.msra.mxu1 %v8931_v33  ;;  %v8101_v11 = vmax.f32 %v9324_v24, 0.0  ;;  %v8956_v59 = vcombine.high %v1901_v61, %v1905_v26 }
 0x447   : > { %v8108_v44 = vmax.f32 %v9325_v54, 0.0  ;;  %6660 = vmatmul.mubr.bf16.gmra.mrb[156].mxu0 %v13641_v62  ;;  %7341 = vmatprep.subr.bf16.mxu1 %v8940_v5 }
 0x448   : > { %v8109_v19 = vmax.f32 %v9326_v15, 0.0  ;;  %6669 = vmatprep.mubr.bf16.mxu0 %v13642_v36  ;;  %6779 = vmatpush1.bf16.msra.mxu0 %v9129_v41  ;;  %v1913_v41 = vld [vmem:[#allocation8 + $0x678] sm:$0xff] }
 0x449   : > { %v12404_v17 = vpack.c.bf16 %v8108_v44, %v8100_v20  ;;  %7199 = vmatmul.mubr.bf16.gmra.mrb[12].mxu1 %v13567_v34  ;;  %6780 = vmatprep.subr.bf16.mxu0 %v9138_v35  ;;  %v1909_v34 = vld [vmem:[#allocation8 + $0x658] sm:$0xff] }
 0x44a   : > { %v12409_v2 = vpack.c.bf16 %v8109_v19, %v8101_v11  ;;  %v5563_v33 = vpop.f32.mrb[116].mxu0  ;;  %7208 = vmatprep.mubr.bf16.mxu1 %v13568_v7  ;;  %7342 = vmatpush1.bf16.msra.mxu1 %v8939_v47  ;;  %v8955_v7 = vcombine.low %v1901_v61, %v1905_v26  ;;  %v13645_v15 = vld [vmem:[#allocation105_spill] sm:$0xff]  ;;  %v8964_v47 = vcombine.high %v1909_v34, %v1913_v41 }
 0x44b   : > { %13643 = vst [vmem:[#allocation76_spill] sm:$0xff] %v12404_v17  ;;  %v9327_v5 = vadd.f32 %v5563_v33, %v12228_v31  ;;  %v5565_v24 = vpop.f32.mrb[117].mxu0  ;;  %7343 = vmatprep.subr.bf16.mxu1 %v8948_v3  ;;  %v13646_v3 = vld [vmem:[#allocation108_spill] sm:$0xff]  ;;  %v1917_v11 = vld [vmem:[#allocation8 + $0x698] sm:$0xff]  ;;  %v8963_v61 = vcombine.low %v1909_v34, %v1913_v41  ;;  %v13649_v34 = vld [vmem:[#allocation107_spill] sm:$0xff] }
 0x44c   : > { %13644 = vst [vmem:[#allocation82_spill] sm:$0xff] %v12409_v2  ;;  %v9328_v9 = vadd.f32 %v5565_v24, %v13590_v51  ;;  %v5567_v56 = vpop.f32.mrb[118].mxu0  ;;  %6781 = vmatpush1.bf16.msra.mxu0 %v9137_v37  ;;  %v1921_v19 = vld [vmem:[#allocation8 + $0x6b8] sm:$0xff]  ;;  %v2116_v17 = vld [vmem:[#allocation8 + $0xcd0] sm:$0xff] }
 0x44d   : > { %v9329_v54 = vadd.f32 %v5567_v56, %v12228_v31  ;;  %v5569_v29 = vpop.f32.mrb[119].mxu0  ;;  %6943 = vmatprep.subr.bf16.mxu0 %v9146_v38  ;;  %v8116_v0 = vmax.f32 %v9327_v5, 0.0  ;;  %v8972_v5 = vcombine.high %v1917_v11, %v1921_v19  ;;  %v1929_v56 = vld [vmem:[#allocation8 + $0x6f8] sm:$0xff]  ;;  %v2120_v2 = vld [vmem:[#allocation8 + $0xcf0] sm:$0xff] }
 0x44e   : > { %v9330_v35 = vadd.f32 %v5569_v29, %v13590_v51  ;;  %7344 = vmatpush1.bf16.msra.mxu1 %v8947_v48  ;;  %v8117_v20 = vmax.f32 %v9328_v9, 0.0  ;;  %v1925_v9 = vld [vmem:[#allocation8 + $0x6d8] sm:$0xff] }
 0x44f   : > { %v8124_v16 = vmax.f32 %v9329_v54, 0.0  ;;  %6670 = vmatmul.mubr.bf16.gmra.mrb[160].mxu0 %v13645_v15  ;;  %7345 = vmatprep.subr.bf16.mxu1 %v8956_v59  ;;  %v8980_v41 = vcombine.high %v1925_v9, %v1929_v56 }
 0x450   : > { %v8125_v44 = vmax.f32 %v9330_v35, 0.0  ;;  %6679 = vmatprep.mubr.bf16.mxu0 %v13646_v3  ;;  %v8971_v35 = vcombine.low %v1917_v11, %v1921_v19  ;;  %v8979_v11 = vcombine.low %v1925_v9, %v1929_v56  ;;  %v13653_v9 = vld [vmem:[#allocation109_spill] sm:$0xff] }
 0x451   : > { %v12418_v37 = vpack.c.bf16 %v8124_v16, %v8116_v0  ;;  %7209 = vmatmul.mubr.bf16.gmra.mrb[16].mxu1 %v13569_v23 }
 0x452   : > { %v12421_v38 = vpack.c.bf16 %v8125_v44, %v8117_v20  ;;  %v5573_v33 = vpop.f32.mrb[120].mxu0  ;;  %7218 = vmatprep.mubr.bf16.mxu1 %v13570_v14  ;;  %7346 = vmatpush1.bf16.msra.mxu1 %v8955_v7  ;;  %v1933_v20 = vld [vmem:[#allocation8 + $0x718] sm:$0xff] }
 0x453   : > { %13647 = vst [vmem:[#allocation80_spill] sm:$0xff] %v12418_v37  ;;  %v9331_v26 = vadd.f32 %v5573_v33, %v12228_v31  ;;  %v5575_v48 = vpop.f32.mrb[121].mxu0  ;;  %7347 = vmatprep.subr.bf16.mxu1 %v8964_v47  ;;  %v13650_v47 = vld [vmem:[#allocation110_spill] sm:$0xff] }
 0x454   : > { %13648 = vst [vmem:[#allocation86_spill] sm:$0xff] %v12421_v38  ;;  %v9332_v24 = vadd.f32 %v5575_v48, %v13590_v51  ;;  %v5577_v59 = vpop.f32.mrb[122].mxu0  ;;  %v1937_v44 = vld [vmem:[#allocation8 + $0x738] sm:$0xff] }
 0x455   : > { %v9333_v54 = vadd.f32 %v5577_v59, %v12228_v31  ;;  %v5579_v23 = vpop.f32.mrb[123].mxu0  ;;  %v8132_v14 = vmax.f32 %v9331_v26, 0.0 }
 0x456   : > { %v9334_v29 = vadd.f32 %v5579_v23, %v13590_v51  ;;  %7348 = vmatpush1.bf16.msra.mxu1 %v8963_v61  ;;  %v8133_v0 = vmax.f32 %v9332_v24, 0.0  ;;  %v1945_v23 = vld [vmem:[#allocation8 + $0x778] sm:$0xff] }
 0x457   : > { %v8140_v7 = vmax.f32 %v9333_v54, 0.0  ;;  %6680 = vmatmul.mubr.bf16.gmra.mrb[164].mxu0 %v13649_v34  ;;  %7349 = vmatprep.subr.bf16.mxu1 %v8972_v5  ;;  %v8988_v5 = vcombine.high %v1933_v20, %v1937_v44  ;;  %v1941_v54 = vld [vmem:[#allocation8 + $0x758] sm:$0xff] }
 0x458   : > { %v8141_v16 = vmax.f32 %v9334_v29, 0.0  ;;  %6689 = vmatprep.mubr.bf16.mxu0 %v13650_v47  ;;  %v8996_v56 = vcombine.high %v1941_v54, %v1945_v23 }
 0x459   : > { %v12430_v33 = vpack.c.bf16 %v8140_v7, %v8132_v14  ;;  %7219 = vmatmul.mubr.bf16.gmra.mrb[20].mxu1 %v13572_v10  ;;  %v8987_v7 = vcombine.low %v1933_v20, %v1937_v44  ;;  %v1957_v44 = vld [vmem:[#allocation8 + $0x7d8] sm:$0xff] }
 0x45a   : > { %v12433_v48 = vpack.c.bf16 %v8141_v16, %v8133_v0  ;;  %v5583_v61 = vpop.f32.mrb[124].mxu0  ;;  %7228 = vmatprep.mubr.bf16.mxu1 %v13573_v32  ;;  %7350 = vmatpush1.bf16.msra.mxu1 %v8971_v35  ;;  %v13654_v16 = vld [vmem:[#allocation112_spill] sm:$0xff] }
 0x45b   : > { %13651 = vst [vmem:[#allocation84_spill] sm:$0xff] %v12430_v33  ;;  %v9335_v19 = vadd.f32 %v5583_v61, %v12228_v31  ;;  %v5585_v26 = vpop.f32.mrb[125].mxu0  ;;  %7351 = vmatprep.subr.bf16.mxu1 %v8980_v41  ;;  %v1949_v61 = vld [vmem:[#allocation8 + $0x798] sm:$0xff] }
 0x45c   : > { %13652 = vst [vmem:[#allocation90_spill] sm:$0xff] %v12433_v48  ;;  %v9336_v24 = vadd.f32 %v5585_v26, %v13590_v51  ;;  %v5587_v59 = vpop.f32.mrb[126].mxu0  ;;  %v1953_v26 = vld [vmem:[#allocation8 + $0x7b8] sm:$0xff]  ;;  %v2108_v48 = vld [vmem:[#allocation8 + $0xc90] sm:$0xff] }
 0x45d   : > { %v9337_v29 = vadd.f32 %v5587_v59, %v12228_v31  ;;  %v5589_v10 = vpop.f32.mrb[127].mxu0  ;;  %v8148_v32 = vmax.f32 %v9335_v19, 0.0  ;;  %v9004_v20 = vcombine.high %v1949_v61, %v1953_v26  ;;  %v9003_v19 = vcombine.low %v1949_v61, %v1953_v26  ;;  %v13658_v59 = vld [vmem:[#allocation114_spill] sm:$0xff]  ;;  %v13671_v61 = vld [vmem:[#allocation19_spill] sm:$0xff] }
 0x45e   : > { %v9338_v14 = vadd.f32 %v5589_v10, %v13590_v51  ;;  %7352 = vmatpush1.bf16.msra.mxu1 %v8979_v11  ;;  %v8149_v41 = vmax.f32 %v9336_v24, 0.0  ;;  %v8995_v51 = vcombine.low %v1941_v54, %v1945_v23  ;;  %v1961_v11 = vld [vmem:[#allocation8 + $0x7f8] sm:$0xff]  ;;  %v13660_v23 = vld [vmem:[#allocation116_spill] sm:$0xff] }
 0x45f   : > { %v8156_v35 = vmax.f32 %v9337_v29, 0.0  ;;  %6690 = vmatmul.mubr.bf16.gmra.mrb[168].mxu0 %v13653_v9  ;;  %7353 = vmatprep.subr.bf16.mxu1 %v8988_v5  ;;  %v13657_v5 = vld [vmem:[#allocation111_spill] sm:$0xff]  ;;  %v9012_v24 = vcombine.high %v1957_v44, %v1961_v11  ;;  %v13659_v54 = vld [vmem:[#allocation113_spill] sm:$0xff]  ;;  %v13664_v10 = vld [vmem:[#allocation66_spill] sm:$0xff] }
 0x460   : > { %v8157_v0 = vmax.f32 %v9338_v14, 0.0  ;;  %6699 = vmatprep.mubr.bf16.mxu0 %v13654_v16  ;;  %v13661_v29 = vld [vmem:[#allocation115_spill] sm:$0xff]  ;;  %v13665_v14 = vld [vmem:[#allocation117_spill] sm:$0xff] }
 0x461   : > { %v12442_v33 = vpack.c.bf16 %v8156_v35, %v8148_v32  ;;  %7229 = vmatmul.mubr.bf16.gmra.mrb[24].mxu1 %v13574_v39  ;;  %v9011_v39 = vcombine.low %v1957_v44, %v1961_v11  ;;  %v13667_v32 = vld [vmem:[#allocation64_spill] sm:$0xff]  ;;  %v10412_v35 = vld [vmem:[#allocation9] sm:$0xff] }
 0x462   : > { %v12445_v31 = vpack.c.bf16 %v8157_v0, %v8149_v41  ;;  %7238 = vmatprep.mubr.bf16.mxu1 %v13575_v49  ;;  %7354 = vmatpush1.bf16.msra.mxu1 %v8987_v7  ;;  %v9020_v49 = vcombine.high %v12370_v21, %v12372_v60  ;;  %v13666_v7 = vld [vmem:[#allocation120_spill] sm:$0xff] }
 0x463   : > { %13655 = vst [vmem:[#allocation88_spill] sm:$0xff] %v12442_v33  ;;  %7355 = vmatprep.subr.bf16.mxu1 %v8996_v56  ;;  %v13668_v56 = vld [vmem:[#allocation17_spill] sm:$0xff] }
 0x464   : > { %13656 = vst [vmem:[#allocation91_spill] sm:$0xff] %v12445_v31  ;;  %v13669_v41 = vsub.s32 3, %v13668_v56 }
 0x466   : > { %7356 = vmatpush1.bf16.msra.mxu1 %v8995_v51 }
 0x467   : > { %6700 = vmatmul.mubr.bf16.gmra.mrb[172].mxu0 %v13657_v5  ;;  %7357 = vmatprep.subr.bf16.mxu1 %v9004_v20 }
 0x468   : > { %6709 = vmatprep.mubr.bf16.mxu0 %v13658_v59 }
 0x469   : > { %7239 = vmatmul.mubr.bf16.gmra.mrb[28].mxu1 %v13576_v57  ;;  %v13662_v57 = vld [vmem:[#allocation118_spill] sm:$0xff] }
 0x46a   : > { %7248 = vmatprep.mubr.bf16.mxu1 %v13577_v30  ;;  %7358 = vmatpush1.bf16.msra.mxu1 %v9003_v19  ;;  %v13663_v30 = vld [vmem:[#allocation60_spill] sm:$0xff] }
 0x46b   : > { %7359 = vmatprep.subr.bf16.mxu1 %v9012_v24  ;;  %v13672_v24 = vld [vmem:[#allocation119_spill] sm:$0xff] }
 0x46e   : > { %7360 = vmatpush1.bf16.msra.mxu1 %v9011_v39 }
 0x46f   : > { %6710 = vmatmul.mubr.bf16.gmra.mrb[176].mxu0 %v13659_v54  ;;  %7522 = vmatprep.subr.bf16.mxu1 %v9020_v49  ;;  %v13673_v49 = vld [vmem:[#allocation29_spill] sm:$0xff] }
 0x470   : > { %6719 = vmatprep.mubr.bf16.mxu0 %v13660_v23 }
 0x471   : > { %7249 = vmatmul.mubr.bf16.gmra.mrb[32].mxu1 %v13578_v22  ;;  %v12467_v22 = vrot.slane %v10412_v35, %v13669_v41  ;;  %v2100_v41 = vld [vmem:[#allocation8 + $0xc50] sm:$0xff] }
 0x472   : > { %7258 = vmatprep.mubr.bf16.mxu1 %v13579_v55  ;;  %v13670_v55 = vld [vmem:[#allocation70_spill] sm:$0xff] }
 0x477   : > { %6720 = vmatmul.mubr.bf16.gmra.mrb[180].mxu0 %v13661_v29 }
 0x478   : > { %6729 = vmatprep.mubr.bf16.mxu0 %v13662_v57 }
 0x479   : > { %7259 = vmatmul.mubr.bf16.gmra.mrb[36].mxu1 %v13663_v30 }
 0x47a   : > { %7268 = vmatprep.mubr.bf16.mxu1 %v13664_v10 }
 0x47f   : > { %6730 = vmatmul.mubr.bf16.gmra.mrb[184].mxu0 %v13665_v14 }
 0x480   : > { %6739 = vmatprep.mubr.bf16.mxu0 %v13666_v7 }
 0x481   : > { %7269 = vmatmul.mubr.bf16.gmra.mrb[40].mxu1 %v13667_v32 }
 0x482   : > { %7278 = vmatprep.mubr.bf16.mxu1 %v13670_v55  ;;  %v2104_v55 = vld [vmem:[#allocation8 + $0xc70] sm:$0xff] }
 0x483   : > { %v9154_v31 = vcombine.high %v2100_v41, %v2104_v55 }
 0x484   : > { %v6205_v0 = vpop.f32.mrb[192].mxu1 }
 0x485   : > { %v9339_v26 = vadd.f32 %v6205_v0, %v13671_v61  ;;  %v6207_v51 = vpop.f32.mrb[193].mxu1 }
 0x486   : > { %v9340_v20 = vadd.f32 %v6207_v51, %v12467_v22  ;;  %v6209_v44 = vpop.f32.mrb[194].mxu1 }
 0x487   : > { %v9341_v11 = vadd.f32 %v6209_v44, %v13671_v61  ;;  %v6211_v19 = vpop.f32.mrb[195].mxu1  ;;  %6740 = vmatmul.mubr.bf16.gmra.mrb[188].mxu0 %v13672_v24  ;;  %v7910_v30 = vmax.f32 %v9339_v26, 0.0 }
 0x488   : > { %v9342_v39 = vadd.f32 %v6211_v19, %v12467_v22  ;;  %6782 = vmatprep.mubr.bf16.mxu0 %v13673_v49  ;;  %v7911_v32 = vmax.f32 %v9340_v20, 0.0  ;;  %v13686_v49 = vld [vmem:[#allocation92_spill] sm:$0xff] }
 0x489   : > { %v7918_v10 = vmax.f32 %v9341_v11, 0.0  ;;  %7279 = vmatmul.mubr.bf16.gmra.mrb[44].mxu1 %v13591_v4  ;;  %v2112_v4 = vld [vmem:[#allocation8 + $0xcb0] sm:$0xff] }
 0x48a   : > { %v7919_v35 = vmax.f32 %v9342_v39, 0.0  ;;  %7288 = vmatprep.mubr.bf16.mxu1 %v13592_v50  ;;  %v13674_v50 = vld [vmem:[#allocation27_spill] sm:$0xff] }
 0x48b   : > { %v12478_v0 = vpack.c.bf16 %v7918_v10, %v7910_v30  ;;  %v13675_v10 = vcombine.low %v12297_v28, %v12299_v42  ;;  %v9161_v42 = vcombine.low %v2108_v48, %v2112_v4 }
 0x48c   : > { %v12480_v51 = vpack.c.bf16 %v7919_v35, %v7911_v32  ;;  %v6215_v44 = vpop.f32.mrb[196].mxu1  ;;  %v13676_v32 = vld [vmem:[#allocation33_spill] sm:$0xff]  ;;  %v9153_v35 = vcombine.low %v2100_v41, %v2104_v55 }
 0x48d   : > { %v9343_v33 = vadd.f32 %v6215_v44, %v13671_v61  ;;  %v6217_v19 = vpop.f32.mrb[197].mxu1 }
 0x48e   : > { %v9344_v26 = vadd.f32 %v6217_v19, %v12467_v22  ;;  %v6219_v11 = vpop.f32.mrb[198].mxu1  ;;  %v9162_v19 = vcombine.high %v2108_v48, %v2112_v4  ;;  %v9169_v48 = vcombine.low %v2116_v17, %v2120_v2 }
 0x48f   : > { %v9345_v20 = vadd.f32 %v6219_v11, %v13671_v61  ;;  %v6221_v39 = vpop.f32.mrb[199].mxu1  ;;  %6783 = vmatmul.mubr.bf16.vlgmr.msra.gmra.mrb[128].mxu0 %v13674_v50  ;;  %v7926_v44 = vmax.f32 %v9343_v33, 0.0 }
 0x490   : > { %v9346_v30 = vadd.f32 %v6221_v39, %v12467_v22  ;;  %6944 = vmatpush1.bf16.msra.mxu0 %v13675_v10  ;;  %6792 = vmatprep.mubr.bf16.mxu0 %v13676_v32  ;;  %v7927_v38 = vmax.f32 %v9344_v26, 0.0  ;;  %v2124_v26 = vld [vmem:[#allocation8 + $0xd10] sm:$0xff] }
 0x491   : > { %v7934_v37 = vmax.f32 %v9345_v20, 0.0  ;;  %7289 = vmatmul.mubr.bf16.gmra.mrb[48].mxu1 %v13595_v6  ;;  %6945 = vmatprep.subr.bf16.mxu0 %v9154_v31  ;;  %v9170_v6 = vcombine.high %v2116_v17, %v2120_v2  ;;  %v2128_v20 = vld [vmem:[#allocation8 + $0xd30] sm:$0xff] }
 0x492   : > { %v7935_v11 = vmax.f32 %v9346_v30, 0.0  ;;  %7298 = vmatprep.mubr.bf16.mxu1 %v13596_v63  ;;  %v13678_v10 = vld [vmem:[#allocation37_spill] sm:$0xff] }
 0x493   : > { %v12493_v39 = vpack.c.bf16 %v7934_v37, %v7926_v44  ;;  %v13677_v37 = vld [vmem:[#allocation31_spill] sm:$0xff]  ;;  %v9178_v44 = vcombine.high %v2124_v26, %v2128_v20 }
 0x494   : > { %v12495_v13 = vpack.c.bf16 %v7935_v11, %v7927_v38  ;;  %6946 = vmatpush1.bf16.msra.mxu0 %v9153_v35  ;;  %v6225_v28 = vpop.f32.mrb[200].mxu1 }
 0x495   : > { %v9347_v33 = vadd.f32 %v6225_v28, %v13671_v61  ;;  %v6227_v41 = vpop.f32.mrb[201].mxu1  ;;  %6947 = vmatprep.subr.bf16.mxu0 %v9162_v19  ;;  %v2132_v28 = vld [vmem:[#allocation8 + $0xd50] sm:$0xff] }
 0x496   : > { %v9348_v31 = vadd.f32 %v6227_v41, %v12467_v22  ;;  %v6229_v55 = vpop.f32.mrb[202].mxu1  ;;  %v2136_v41 = vld [vmem:[#allocation8 + $0xd70] sm:$0xff] }
 0x497   : > { %v9349_v63 = vadd.f32 %v6229_v55, %v13671_v61  ;;  %v6231_v30 = vpop.f32.mrb[203].mxu1  ;;  %6793 = vmatmul.mubr.bf16.gmra.mrb[132].mxu0 %v13677_v37  ;;  %v7942_v4 = vmax.f32 %v9347_v33, 0.0 }
 0x498   : > { %v9350_v38 = vadd.f32 %v6231_v30, %v12467_v22  ;;  %6948 = vmatpush1.bf16.msra.mxu0 %v9161_v42  ;;  %6802 = vmatprep.mubr.bf16.mxu0 %v13678_v10  ;;  %v7943_v19 = vmax.f32 %v9348_v31, 0.0  ;;  %v9177_v30 = vcombine.low %v2124_v26, %v2128_v20  ;;  %v2140_v31 = vld [vmem:[#allocation8 + $0xd90] sm:$0xff]  ;;  %v9185_v26 = vcombine.low %v2132_v28, %v2136_v41 }
 0x499   : > { %v7950_v35 = vmax.f32 %v9349_v63, 0.0  ;;  %7299 = vmatmul.mubr.bf16.gmra.mrb[52].mxu1 %v13599_v8  ;;  %6949 = vmatprep.subr.bf16.mxu0 %v9170_v6  ;;  %v9186_v8 = vcombine.high %v2132_v28, %v2136_v41  ;;  %v2144_v63 = vld [vmem:[#allocation8 + $0xdb0] sm:$0xff] }
 0x49a   : > { %v7951_v11 = vmax.f32 %v9350_v38, 0.0  ;;  %7308 = vmatprep.mubr.bf16.mxu1 %v13600_v1 }
 0x49b   : > { %v12505_v55 = vpack.c.bf16 %v7950_v35, %v7942_v4  ;;  %v13679_v4 = vld [vmem:[#allocation35_spill] sm:$0xff] }
 0x49c   : > { %v12507_v56 = vpack.c.bf16 %v7951_v11, %v7943_v19  ;;  %6950 = vmatpush1.bf16.msra.mxu0 %v9169_v48  ;;  %v6235_v42 = vpop.f32.mrb[204].mxu1  ;;  %v13680_v48 = vld [vmem:[#allocation41_spill] sm:$0xff] }
 0x49d   : > { %v9351_v17 = vadd.f32 %v6235_v42, %v13671_v61  ;;  %v6237_v2 = vpop.f32.mrb[205].mxu1  ;;  %6951 = vmatprep.subr.bf16.mxu0 %v9178_v44  ;;  %v9194_v44 = vcombine.high %v2140_v31, %v2144_v63 }
 0x49e   : > { %v9352_v33 = vadd.f32 %v6237_v2, %v12467_v22  ;;  %v6239_v6 = vpop.f32.mrb[206].mxu1  ;;  %v2148_v2 = vld [vmem:[#allocation8 + $0xdd0] sm:$0xff] }
 0x49f   : > { %v9353_v1 = vadd.f32 %v6239_v6, %v13671_v61  ;;  %v6241_v38 = vpop.f32.mrb[207].mxu1  ;;  %6803 = vmatmul.mubr.bf16.gmra.mrb[136].mxu0 %v13679_v4  ;;  %v7958_v20 = vmax.f32 %v9351_v17, 0.0  ;;  %v2152_v6 = vld [vmem:[#allocation8 + $0xdf0] sm:$0xff] }
 0x4a0   : > { %v9354_v35 = vadd.f32 %v6241_v38, %v12467_v22  ;;  %6952 = vmatpush1.bf16.msra.mxu0 %v9177_v30  ;;  %6812 = vmatprep.mubr.bf16.mxu0 %v13680_v48  ;;  %v7959_v11 = vmax.f32 %v9352_v33, 0.0  ;;  %v9193_v38 = vcombine.low %v2140_v31, %v2144_v63  ;;  %v2156_v33 = vld [vmem:[#allocation8 + $0xe10] sm:$0xff]  ;;  %v9201_v31 = vcombine.low %v2148_v2, %v2152_v6 }
 0x4a1   : > { %v7966_v19 = vmax.f32 %v9353_v1, 0.0  ;;  %7309 = vmatmul.mubr.bf16.gmra.mrb[56].mxu1 %v13603_v27  ;;  %6953 = vmatprep.subr.bf16.mxu0 %v9186_v8  ;;  %v9202_v27 = vcombine.high %v2148_v2, %v2152_v6  ;;  %v2160_v1 = vld [vmem:[#allocation8 + $0xe30] sm:$0xff]  ;;  %v1973_v2 = vld [vmem:[#allocation8 + $0x858] sm:$0xff] }
 0x4a2   : > { %v7967_v42 = vmax.f32 %v9354_v35, 0.0  ;;  %7318 = vmatprep.mubr.bf16.mxu1 %v13604_v46  ;;  %v1977_v6 = vld [vmem:[#allocation8 + $0x878] sm:$0xff] }
 0x4a3   : > { %v12517_v10 = vpack.c.bf16 %v7966_v19, %v7958_v20  ;;  %v13681_v20 = vld [vmem:[#allocation39_spill] sm:$0xff] }
 0x4a4   : > { %v12519_v4 = vpack.c.bf16 %v7967_v42, %v7959_v11  ;;  %6954 = vmatpush1.bf16.msra.mxu0 %v9185_v26  ;;  %v6245_v30 = vpop.f32.mrb[208].mxu1  ;;  %v13682_v26 = vld [vmem:[#allocation45_spill] sm:$0xff] }
 0x4a5   : > { %v9355_v28 = vadd.f32 %v6245_v30, %v13671_v61  ;;  %v6247_v41 = vpop.f32.mrb[209].mxu1  ;;  %6955 = vmatprep.subr.bf16.mxu0 %v9194_v44  ;;  %v9210_v44 = vcombine.high %v2156_v33, %v2160_v1 }
 0x4a6   : > { %v9356_v17 = vadd.f32 %v6247_v41, %v12467_v22  ;;  %v6249_v8 = vpop.f32.mrb[210].mxu1  ;;  %v2164_v41 = vld [vmem:[#allocation8 + $0xe50] sm:$0xff] }
 0x4a7   : > { %v9357_v46 = vadd.f32 %v6249_v8, %v13671_v61  ;;  %v6251_v35 = vpop.f32.mrb[211].mxu1  ;;  %6813 = vmatmul.mubr.bf16.gmra.mrb[140].mxu0 %v13681_v20  ;;  %v7974_v63 = vmax.f32 %v9355_v28, 0.0  ;;  %v2168_v8 = vld [vmem:[#allocation8 + $0xe70] sm:$0xff] }
 0x4a8   : > { %v9358_v19 = vadd.f32 %v6251_v35, %v12467_v22  ;;  %6956 = vmatpush1.bf16.msra.mxu0 %v9193_v38  ;;  %6822 = vmatprep.mubr.bf16.mxu0 %v13682_v26  ;;  %v7975_v42 = vmax.f32 %v9356_v17, 0.0  ;;  %v9209_v35 = vcombine.low %v2156_v33, %v2160_v1  ;;  %v2172_v17 = vld [vmem:[#allocation8 + $0xe90] sm:$0xff]  ;;  %v12535_v26 = vld [vmem:[#allocation8 + $0xc18] sm:$0xff]  ;;  %v13684_v33 = vld [vmem:[#allocation43_spill] sm:$0xff]  ;;  %v9028_v1 = vcombine.high %v1973_v2, %v1977_v6 }
 0x4a9   : > { %v7982_v11 = vmax.f32 %v9357_v46, 0.0  ;;  %7319 = vmatmul.mubr.bf16.gmra.mrb[60].mxu1 %v13607_v52  ;;  %6957 = vmatprep.subr.bf16.mxu0 %v9202_v27  ;;  %v9218_v27 = vcombine.high %v2164_v41, %v2168_v8 }
 0x4aa   : > { %v7983_v30 = vmax.f32 %v9358_v19, 0.0  ;;  %7361 = vmatprep.mubr.bf16.mxu1 %v13608_v53  ;;  %v2176_v19 = vld [vmem:[#allocation8 + $0xeb0] sm:$0xff] }
 0x4ab   : > { %v12529_v48 = vpack.c.bf16 %v7982_v11, %v7974_v63  ;;  %v12537_v63 = vld [vmem:[#allocation8 + $0xc38] sm:$0xff] }
 0x4ac   : > { %v12531_v20 = vpack.c.bf16 %v7983_v30, %v7975_v42  ;;  %6958 = vmatpush1.bf16.msra.mxu0 %v9201_v31  ;;  %v6255_v38 = vpop.f32.mrb[212].mxu1  ;;  %v9217_v30 = vcombine.low %v2164_v41, %v2168_v8  ;;  %v9027_v41 = vcombine.low %v1973_v2, %v1977_v6  ;;  %v2180_v8 = vld [vmem:[#allocation8 + $0xed0] sm:$0xff] }
 0x4ad   : > { %13683 = vst [vmem:[#allocation94_spill] sm:$0xff] %v12529_v48  ;;  %v9359_v28 = vadd.f32 %v6255_v38, %v13671_v61  ;;  %v6257_v52 = vpop.f32.mrb[213].mxu1  ;;  %6959 = vmatprep.subr.bf16.mxu0 %v9210_v44  ;;  %v13685_v44 = vld [vmem:[#allocation49_spill] sm:$0xff] }
 0x4ae   : > { %v9360_v46 = vadd.f32 %v6257_v52, %v12467_v22  ;;  %v6259_v53 = vpop.f32.mrb[214].mxu1  ;;  %v1981_v38 = vld [vmem:[#allocation8 + $0x898] sm:$0xff] }
 0x4af   : > { %v9361_v31 = vadd.f32 %v6259_v53, %v13671_v61  ;;  %v6261_v11 = vpop.f32.mrb[215].mxu1  ;;  %6823 = vmatmul.mubr.bf16.gmra.mrb[144].mxu0 %v13684_v33  ;;  %v1985_v52 = vld [vmem:[#allocation8 + $0x8b8] sm:$0xff]  ;;  %v7990_v32 = vmax.f32 %v9359_v28, 0.0  ;;  %v9226_v53 = vcombine.high %v2172_v17, %v2176_v19 }
 0x4b0   : > { %v9362_v42 = vadd.f32 %v6261_v11, %v12467_v22  ;;  %6960 = vmatpush1.bf16.msra.mxu0 %v9209_v35  ;;  %6832 = vmatprep.mubr.bf16.mxu0 %v13685_v44  ;;  %v7991_v48 = vmax.f32 %v9360_v46, 0.0  ;;  %v13687_v35 = vcombine.low %v12370_v21, %v12372_v60  ;;  %v2184_v11 = vld [vmem:[#allocation8 + $0xef0] sm:$0xff]  ;;  %v9036_v28 = vcombine.high %v1981_v38, %v1985_v52  ;;  %v1989_v46 = vld [vmem:[#allocation8 + $0x8d8] sm:$0xff] }
 0x4b1   : > { %v7998_v50 = vmax.f32 %v9361_v31, 0.0  ;;  %7362 = vmatmul.mubr.bf16.vlgmr.msra.gmra.mrb[0].mxu1 %v13611_v12  ;;  %6961 = vmatprep.subr.bf16.mxu0 %v9218_v27  ;;  %v9225_v27 = vcombine.low %v2172_v17, %v2176_v19  ;;  %v9234_v21 = vcombine.high %v2180_v8, %v2184_v11  ;;  %v9035_v6 = vcombine.low %v1981_v38, %v1985_v52 }
 0x4b2   : > { %v7999_v33 = vmax.f32 %v9362_v42, 0.0  ;;  %7371 = vmatprep.mubr.bf16.mxu1 %v13686_v49  ;;  %7523 = vmatpush1.bf16.msra.mxu1 %v13687_v35  ;;  %v1993_v42 = vld [vmem:[#allocation8 + $0x8f8] sm:$0xff] }
 0x4b3   : > { %v12550_v44 = vpack.c.bf16 %v7998_v50, %v7990_v32  ;;  %7524 = vmatprep.subr.bf16.mxu1 %v9028_v1  ;;  %v2188_v50 = vld [vmem:[#allocation8 + $0xf10] sm:$0xff]  ;;  %v13688_v1 = vld [vmem:[#allocation47_spill] sm:$0xff]  ;;  %v9044_v17 = vcombine.high %v1989_v46, %v1993_v42  ;;  %v1997_v35 = vld [vmem:[#allocation8 + $0x918] sm:$0xff] }
 0x4b4   : > { %v12552_v31 = vpack.c.bf16 %v7999_v33, %v7991_v48  ;;  %6962 = vmatpush1.bf16.msra.mxu0 %v9217_v30  ;;  %v6265_v12 = vpop.f32.mrb[216].mxu1  ;;  %v2192_v32 = vld [vmem:[#allocation8 + $0xf30] sm:$0xff] }
 0x4b5   : > { %v9363_v49 = vadd.f32 %v6265_v12, %v13671_v61  ;;  %v6267_v37 = vpop.f32.mrb[217].mxu1  ;;  %6963 = vmatprep.subr.bf16.mxu0 %v9226_v53  ;;  %v13689_v30 = vld [vmem:[#allocation53_spill] sm:$0xff]  ;;  %v9233_v53 = vcombine.low %v2180_v8, %v2184_v11  ;;  %v9242_v38 = vcombine.high %v2188_v50, %v2192_v32 }
 0x4b6   : > { %v9364_v60 = vadd.f32 %v6267_v37, %v12467_v22  ;;  %v6269_v2 = vpop.f32.mrb[218].mxu1  ;;  %7525 = vmatpush1.bf16.msra.mxu1 %v9027_v41  ;;  %v2001_v37 = vld [vmem:[#allocation8 + $0x938] sm:$0xff] }
 0x4b7   : > { %v9365_v48 = vadd.f32 %v6269_v2, %v13671_v61  ;;  %v6271_v33 = vpop.f32.mrb[219].mxu1  ;;  %6833 = vmatmul.mubr.bf16.gmra.mrb[148].mxu0 %v13688_v1  ;;  %7526 = vmatprep.subr.bf16.mxu1 %v9036_v28  ;;  %v8006_v12 = vmax.f32 %v9363_v49, 0.0  ;;  %v2196_v28 = vld [vmem:[#allocation8 + $0xf50] sm:$0xff]  ;;  %v9052_v8 = vcombine.high %v1997_v35, %v2001_v37 }
 0x4b8   : > { %v9366_v19 = vadd.f32 %v6271_v33, %v12467_v22  ;;  %6964 = vmatpush1.bf16.msra.mxu0 %v9225_v27  ;;  %6842 = vmatprep.mubr.bf16.mxu0 %v13689_v30  ;;  %v8007_v52 = vmax.f32 %v9364_v60, 0.0  ;;  %v2200_v1 = vld [vmem:[#allocation8 + $0xf70] sm:$0xff]  ;;  %v9043_v33 = vcombine.low %v1989_v46, %v1993_v42 }
 0x4b9   : > { %v8014_v41 = vmax.f32 %v9365_v48, 0.0  ;;  %7372 = vmatmul.mubr.bf16.gmra.mrb[4].mxu1 %v13616_v45  ;;  %6965 = vmatprep.subr.bf16.mxu0 %v9234_v21  ;;  %v9241_v48 = vcombine.low %v2188_v50, %v2192_v32  ;;  %v2005_v45 = vld [vmem:[#allocation8 + $0x958] sm:$0xff]  ;;  %v2204_v46 = vld [vmem:[#allocation8 + $0xf90] sm:$0xff] }
 0x4ba   : > { %v8015_v2 = vmax.f32 %v9366_v19, 0.0  ;;  %7381 = vmatprep.mubr.bf16.mxu1 %v13617_v43  ;;  %7527 = vmatpush1.bf16.msra.mxu1 %v9035_v6  ;;  %v2009_v21 = vld [vmem:[#allocation8 + $0x978] sm:$0xff]  ;;  %v9250_v43 = vcombine.high %v2196_v28, %v2200_v1  ;;  %v2208_v42 = vld [vmem:[#allocation8 + $0xfb0] sm:$0xff] }
 0x4bb   : > { %v12562_v27 = vpack.c.bf16 %v8014_v41, %v8006_v12  ;;  %7528 = vmatprep.subr.bf16.mxu1 %v9044_v17  ;;  %v9051_v17 = vcombine.low %v1997_v35, %v2001_v37  ;;  %v9060_v50 = vcombine.high %v2005_v45, %v2009_v21  ;;  %v9258_v35 = vcombine.high %v2204_v46, %v2208_v42 }
 0x4bc   : > { %v12564_v11 = vpack.c.bf16 %v8015_v2, %v8007_v52  ;;  %6966 = vmatpush1.bf16.msra.mxu0 %v9233_v53  ;;  %v6275_v49 = vpop.f32.mrb[220].mxu1  ;;  %v13692_v53 = vld [vmem:[#allocation51_spill] sm:$0xff]  ;;  %v13693_v52 = vld [vmem:[#allocation57_spill] sm:$0xff] }
 0x4bd   : > { %13690 = vst [vmem:[#allocation99_spill] sm:$0xff] %v12562_v27  ;;  %v9367_v60 = vadd.f32 %v6275_v49, %v13671_v61  ;;  %v6277_v19 = vpop.f32.mrb[221].mxu1  ;;  %6967 = vmatprep.subr.bf16.mxu0 %v9242_v38  ;;  %v9249_v38 = vcombine.low %v2196_v28, %v2200_v1  ;;  %v2013_v2 = vld [vmem:[#allocation8 + $0x998] sm:$0xff] }
 0x4be   : > { %13691 = vst [vmem:[#allocation102_spill] sm:$0xff] %v12564_v11  ;;  %v9368_v30 = vadd.f32 %v6277_v19, %v12467_v22  ;;  %v6279_v6 = vpop.f32.mrb[222].mxu1  ;;  %7529 = vmatpush1.bf16.msra.mxu1 %v9043_v33  ;;  %v2017_v49 = vld [vmem:[#allocation8 + $0x9b8] sm:$0xff] }
 0x4bf   : > { %v9369_v12 = vadd.f32 %v6279_v6, %v13671_v61  ;;  %v6281_v41 = vpop.f32.mrb[223].mxu1  ;;  %6843 = vmatmul.mubr.bf16.gmra.mrb[152].mxu0 %v13692_v53  ;;  %7530 = vmatprep.subr.bf16.mxu1 %v9052_v8  ;;  %v8022_v19 = vmax.f32 %v9367_v60, 0.0  ;;  %v13694_v11 = vld [vmem:[#allocation93_spill] sm:$0xff]  ;;  %v13695_v6 = vld [vmem:[#allocation96_spill] sm:$0xff]  ;;  %v9068_v1 = vcombine.high %v2013_v2, %v2017_v49 }
 0x4c0   : > { %v9370_v32 = vadd.f32 %v6281_v41, %v12467_v22  ;;  %6968 = vmatpush1.bf16.msra.mxu0 %v9241_v48  ;;  %6852 = vmatprep.mubr.bf16.mxu0 %v13693_v52  ;;  %v8023_v37 = vmax.f32 %v9368_v30, 0.0  ;;  %v2212_v8 = vld [vmem:[#allocation8 + $0xfd0] sm:$0xff]  ;;  %v9059_v41 = vcombine.low %v2005_v45, %v2009_v21 }
 0x4c1   : > { %v8030_v27 = vmax.f32 %v9369_v12, 0.0  ;;  %7382 = vmatmul.mubr.bf16.gmra.mrb[8].mxu1 %v13694_v11  ;;  %6969 = vmatprep.subr.bf16.mxu0 %v9250_v43  ;;  %v2216_v53 = vld [vmem:[#allocation8 + $0xff0] sm:$0xff]  ;;  %v9257_v12 = vcombine.low %v2204_v46, %v2208_v42  ;;  %v2021_v11 = vld [vmem:[#allocation8 + $0x9d8] sm:$0xff] }
 0x4c2   : > { %v8031_v33 = vmax.f32 %v9370_v32, 0.0  ;;  %7391 = vmatprep.mubr.bf16.mxu1 %v13695_v6  ;;  %7531 = vmatpush1.bf16.msra.mxu1 %v9051_v17  ;;  %v2025_v43 = vld [vmem:[#allocation8 + $0x9f8] sm:$0xff]  ;;  %v9266_v6 = vcombine.high %v2212_v8, %v2216_v53 }
 0x4c3   : > { %v12574_v48 = vpack.c.bf16 %v8030_v27, %v8022_v19  ;;  %7532 = vmatprep.subr.bf16.mxu1 %v9060_v50  ;;  %v9067_v27 = vcombine.low %v2013_v2, %v2017_v49  ;;  %v13696_v50 = vld [vmem:[#allocation55_spill] sm:$0xff]  ;;  %v13697_v42 = vld [vmem:[#allocation61_spill] sm:$0xff]  ;;  %v9265_v19 = vcombine.low %v2212_v8, %v2216_v53 }
 0x4c4   : > { %v12576_v28 = vpack.c.bf16 %v8031_v33, %v8023_v37  ;;  %6970 = vmatpush1.bf16.msra.mxu0 %v9249_v38  ;;  %v6285_v60 = vpop.f32.mrb[224].mxu1  ;;  %v9076_v38 = vcombine.high %v2021_v11, %v2025_v43  ;;  %v2033_v37 = vld [vmem:[#allocation8 + $0xa38] sm:$0xff] }
 0x4c5   : > { %v9371_v30 = vadd.f32 %v6285_v60, %v13671_v61  ;;  %v6287_v32 = vpop.f32.mrb[225].mxu1  ;;  %6971 = vmatprep.subr.bf16.mxu0 %v9258_v35  ;;  %v2029_v35 = vld [vmem:[#allocation8 + $0xa18] sm:$0xff] }
 0x4c6   : > { %v9372_v52 = vadd.f32 %v6287_v32, %v12467_v22  ;;  %v6289_v17 = vpop.f32.mrb[226].mxu1  ;;  %7533 = vmatpush1.bf16.msra.mxu1 %v9059_v41  ;;  %v13698_v32 = vld [vmem:[#allocation95_spill] sm:$0xff]  ;;  %v13699_v41 = vld [vmem:[#allocation98_spill] sm:$0xff] }
 0x4c7   : > { %v9373_v45 = vadd.f32 %v6289_v17, %v13671_v61  ;;  %v6291_v21 = vpop.f32.mrb[227].mxu1  ;;  %6853 = vmatmul.mubr.bf16.gmra.mrb[156].mxu0 %v13696_v50  ;;  %7534 = vmatprep.subr.bf16.mxu1 %v9068_v1  ;;  %v8038_v33 = vmax.f32 %v9371_v30, 0.0  ;;  %v9075_v1 = vcombine.low %v2021_v11, %v2025_v43  ;;  %v2037_v8 = vld [vmem:[#allocation8 + $0xa58] sm:$0xff]  ;;  %v9083_v11 = vcombine.low %v2029_v35, %v2033_v37 }
 0x4c8   : > { %v9374_v46 = vadd.f32 %v6291_v21, %v12467_v22  ;;  %6972 = vmatpush1.bf16.msra.mxu0 %v9257_v12  ;;  %6862 = vmatprep.mubr.bf16.mxu0 %v13697_v42  ;;  %v8039_v2 = vmax.f32 %v9372_v52, 0.0  ;;  %v9084_v12 = vcombine.high %v2029_v35, %v2033_v37  ;;  %v2041_v30 = vld [vmem:[#allocation8 + $0xa78] sm:$0xff]  ;;  %v13703_v35 = vld [vmem:[#allocation100_spill] sm:$0xff] }
 0x4c9   : > { %v8046_v60 = vmax.f32 %v9373_v45, 0.0  ;;  %7392 = vmatmul.mubr.bf16.gmra.mrb[12].mxu1 %v13698_v32  ;;  %6973 = vmatprep.subr.bf16.mxu0 %v9266_v6  ;;  %v2045_v32 = vld [vmem:[#allocation8 + $0xa98] sm:$0xff]  ;;  %v9091_v37 = vcombine.low %v2037_v8, %v2041_v30 }
 0x4ca   : > { %v8047_v49 = vmax.f32 %v9374_v46, 0.0  ;;  %7401 = vmatprep.mubr.bf16.mxu1 %v13699_v41  ;;  %7535 = vmatpush1.bf16.msra.mxu1 %v9067_v27  ;;  %v13702_v41 = vld [vmem:[#allocation97_spill] sm:$0xff] }
 0x4cb   : > { %v12586_v17 = vpack.c.bf16 %v8046_v60, %v8038_v33  ;;  %7536 = vmatprep.subr.bf16.mxu1 %v9076_v38  ;;  %v13700_v38 = vld [vmem:[#allocation59_spill] sm:$0xff]  ;;  %v13701_v60 = vld [vmem:[#allocation65_spill] sm:$0xff] }
 0x4cc   : > { %v12588_v21 = vpack.c.bf16 %v8047_v49, %v8039_v2  ;;  %6974 = vmatpush1.bf16.msra.mxu0 %v9265_v19  ;;  %v6295_v53 = vpop.f32.mrb[228].mxu1  ;;  %v9092_v19 = vcombine.high %v2037_v8, %v2041_v30  ;;  %v2049_v2 = vld [vmem:[#allocation8 + $0xab8] sm:$0xff]  ;;  %v13704_v30 = vld [vmem:[#allocation63_spill] sm:$0xff] }
 0x4cd   : > { %v9375_v45 = vadd.f32 %v6295_v53, %v13671_v61  ;;  %8402 = vmatprep.subr.bf16.mxu0 %v12480_v51  ;;  %v6297_v52 = vpop.f32.mrb[229].mxu1 }
 0x4ce   : > { %v9376_v6 = vadd.f32 %v6297_v52, %v12467_v22  ;;  %v6299_v46 = vpop.f32.mrb[230].mxu1  ;;  %7537 = vmatpush1.bf16.msra.mxu1 %v9075_v1 }
 0x4cf   : > { %v9377_v43 = vadd.f32 %v6299_v46, %v13671_v61  ;;  %v6301_v27 = vpop.f32.mrb[231].mxu1  ;;  %6863 = vmatmul.mubr.bf16.gmra.mrb[160].mxu0 %v13700_v38  ;;  %7538 = vmatprep.subr.bf16.mxu1 %v9084_v12  ;;  %v8054_v51 = vmax.f32 %v9375_v45, 0.0  ;;  %v9100_v12 = vcombine.high %v2045_v32, %v2049_v2  ;;  %v2057_v38 = vld [vmem:[#allocation8 + $0xaf8] sm:$0xff] }
 0x4d0   : > { %v9378_v33 = vadd.f32 %v6301_v27, %v12467_v22  ;;  %6872 = vmatprep.mubr.bf16.mxu0 %v13701_v60  ;;  %v8055_v53 = vmax.f32 %v9376_v6, 0.0  ;;  %v2053_v60 = vld [vmem:[#allocation8 + $0xad8] sm:$0xff] }
 0x4d1   : > { %v8062_v49 = vmax.f32 %v9377_v43, 0.0  ;;  %7402 = vmatmul.mubr.bf16.gmra.mrb[16].mxu1 %v13702_v41 }
 0x4d2   : > { %v8063_v1 = vmax.f32 %v9378_v33, 0.0  ;;  %7411 = vmatprep.mubr.bf16.mxu1 %v13703_v35  ;;  %7539 = vmatpush1.bf16.msra.mxu1 %v9083_v11  ;;  %v9099_v33 = vcombine.low %v2045_v32, %v2049_v2  ;;  %v9107_v32 = vcombine.low %v2053_v60, %v2057_v38 }
 0x4d3   : > { %v12599_v52 = vpack.c.bf16 %v8062_v49, %v8054_v51  ;;  %7540 = vmatprep.subr.bf16.mxu1 %v9092_v19  ;;  %v9108_v19 = vcombine.high %v2053_v60, %v2057_v38  ;;  %v13705_v49 = vld [vmem:[#allocation69_spill] sm:$0xff]  ;;  %v13706_v60 = vld [vmem:[#allocation67_spill] sm:$0xff] }
 0x4d4   : > { %v12601_v46 = vpack.c.bf16 %v8063_v1, %v8055_v53  ;;  %v6305_v27 = vpop.f32.mrb[232].mxu1  ;;  %v2061_v53 = vld [vmem:[#allocation8 + $0xb18] sm:$0xff] }
 0x4d5   : > { %v9379_v45 = vadd.f32 %v6305_v27, %v13671_v61  ;;  %v6307_v43 = vpop.f32.mrb[233].mxu1  ;;  %v2065_v1 = vld [vmem:[#allocation8 + $0xb38] sm:$0xff] }
 0x4d6   : > { %v9380_v41 = vadd.f32 %v6307_v43, %v12467_v22  ;;  %v6309_v6 = vpop.f32.mrb[234].mxu1  ;;  %7541 = vmatpush1.bf16.msra.mxu1 %v9091_v37 }
 0x4d7   : > { %v9381_v11 = vadd.f32 %v6309_v6, %v13671_v61  ;;  %v6311_v8 = vpop.f32.mrb[235].mxu1  ;;  %6873 = vmatmul.mubr.bf16.gmra.mrb[164].mxu0 %v13704_v30  ;;  %7542 = vmatprep.subr.bf16.mxu1 %v9100_v12  ;;  %v8070_v35 = vmax.f32 %v9379_v45, 0.0  ;;  %v9116_v12 = vcombine.high %v2061_v53, %v2065_v1  ;;  %v2073_v30 = vld [vmem:[#allocation8 + $0xb78] sm:$0xff] }
 0x4d8   : > { %v9382_v51 = vadd.f32 %v6311_v8, %v12467_v22  ;;  %6882 = vmatprep.mubr.bf16.mxu0 %v13705_v49  ;;  %v8071_v43 = vmax.f32 %v9380_v41, 0.0  ;;  %v2069_v49 = vld [vmem:[#allocation8 + $0xb58] sm:$0xff] }
 0x4d9   : > { %v8078_v27 = vmax.f32 %v9381_v11, 0.0  ;;  %7412 = vmatmul.mubr.bf16.gmra.mrb[20].mxu1 %v13633_v40 }
 0x4da   : > { %v8079_v37 = vmax.f32 %v9382_v51, 0.0  ;;  %7421 = vmatprep.mubr.bf16.mxu1 %v13634_v18  ;;  %7543 = vmatpush1.bf16.msra.mxu1 %v9099_v33  ;;  %v9115_v51 = vcombine.low %v2061_v53, %v2065_v1  ;;  %v9124_v33 = vcombine.high %v2069_v49, %v2073_v30  ;;  %v9123_v53 = vcombine.low %v2069_v49, %v2073_v30  ;;  %v13708_v49 = vld [vmem:[#allocation71_spill] sm:$0xff] }
 0x4db   : > { %v12611_v2 = vpack.c.bf16 %v8078_v27, %v8070_v35  ;;  %7544 = vmatprep.subr.bf16.mxu1 %v9108_v19  ;;  %v13707_v35 = vld [vmem:[#allocation73_spill] sm:$0xff] }
 0x4dc   : > { %v12613_v6 = vpack.c.bf16 %v8079_v37, %v8071_v43  ;;  %v6315_v8 = vpop.f32.mrb[236].mxu1  ;;  %v2077_v27 = vld [vmem:[#allocation8 + $0xb98] sm:$0xff] }
 0x4dd   : > { %v9383_v45 = vadd.f32 %v6315_v8, %v13671_v61  ;;  %v6317_v11 = vpop.f32.mrb[237].mxu1  ;;  %v2081_v43 = vld [vmem:[#allocation8 + $0xbb8] sm:$0xff] }
 0x4de   : > { %v9384_v40 = vadd.f32 %v6317_v11, %v12467_v22  ;;  %v6319_v41 = vpop.f32.mrb[238].mxu1  ;;  %7545 = vmatpush1.bf16.msra.mxu1 %v9107_v32 }
 0x4df   : > { %v9385_v18 = vadd.f32 %v6319_v41, %v13671_v61  ;;  %v6321_v38 = vpop.f32.mrb[239].mxu1  ;;  %6883 = vmatmul.mubr.bf16.gmra.mrb[168].mxu0 %v13706_v60  ;;  %7546 = vmatprep.subr.bf16.mxu1 %v9116_v12  ;;  %v8086_v37 = vmax.f32 %v9383_v45, 0.0  ;;  %v9132_v12 = vcombine.high %v2077_v27, %v2081_v43  ;;  %v2089_v60 = vld [vmem:[#allocation8 + $0xbf8] sm:$0xff] }
 0x4e0   : > { %v9386_v19 = vadd.f32 %v6321_v38, %v12467_v22  ;;  %6892 = vmatprep.mubr.bf16.mxu0 %v13707_v35  ;;  %v8087_v11 = vmax.f32 %v9384_v40, 0.0  ;;  %v2085_v35 = vld [vmem:[#allocation8 + $0xbd8] sm:$0xff] }
 0x4e1   : > { %v8094_v8 = vmax.f32 %v9385_v18, 0.0  ;;  %7422 = vmatmul.mubr.bf16.gmra.mrb[24].mxu1 %v13637_v58 }
 0x4e2   : > { %v8095_v32 = vmax.f32 %v9386_v19, 0.0  ;;  %7431 = vmatprep.mubr.bf16.mxu1 %v13638_v25  ;;  %7547 = vmatpush1.bf16.msra.mxu1 %v9115_v51  ;;  %v9131_v19 = vcombine.low %v2077_v27, %v2081_v43  ;;  %v9140_v51 = vcombine.high %v2085_v35, %v2089_v60  ;;  %v9139_v27 = vcombine.low %v2085_v35, %v2089_v60  ;;  %v13710_v60 = vld [vmem:[#allocation75_spill] sm:$0xff] }
 0x4e3   : > { %v12623_v1 = vpack.c.bf16 %v8094_v8, %v8086_v37  ;;  %7548 = vmatprep.subr.bf16.mxu1 %v9124_v33  ;;  %v13709_v37 = vld [vmem:[#allocation77_spill] sm:$0xff] }
 0x4e4   : > { %v12625_v41 = vpack.c.bf16 %v8095_v32, %v8087_v11  ;;  %v6325_v38 = vpop.f32.mrb[240].mxu1 }
 0x4e5   : > { %v9387_v45 = vadd.f32 %v6325_v38, %v13671_v61  ;;  %v6327_v18 = vpop.f32.mrb[241].mxu1 }
 0x4e6   : > { %v9388_v58 = vadd.f32 %v6327_v18, %v12467_v22  ;;  %v6329_v40 = vpop.f32.mrb[242].mxu1  ;;  %7549 = vmatpush1.bf16.msra.mxu1 %v9123_v53  ;;  %v9148_v53 = vcombine.high %v12535_v26, %v12537_v63 }
 0x4e7   : > { %v9389_v25 = vadd.f32 %v6329_v40, %v13671_v61  ;;  %v6331_v30 = vpop.f32.mrb[243].mxu1  ;;  %6893 = vmatmul.mubr.bf16.gmra.mrb[172].mxu0 %v13708_v49  ;;  %7550 = vmatprep.subr.bf16.mxu1 %v9132_v12  ;;  %v8102_v8 = vmax.f32 %v9387_v45, 0.0 }
 0x4e8   : > { %v9390_v33 = vadd.f32 %v6331_v30, %v12467_v22  ;;  %6902 = vmatprep.mubr.bf16.mxu0 %v13709_v37  ;;  %v8103_v32 = vmax.f32 %v9388_v58, 0.0 }
 0x4e9   : > { %v8110_v11 = vmax.f32 %v9389_v25, 0.0  ;;  %7432 = vmatmul.mubr.bf16.gmra.mrb[28].mxu1 %v13641_v62  ;;  %v13711_v25 = vld [vmem:[#allocation81_spill] sm:$0xff] }
 0x4ea   : > { %v8111_v38 = vmax.f32 %v9390_v33, 0.0  ;;  %7441 = vmatprep.mubr.bf16.mxu1 %v13642_v36  ;;  %7551 = vmatpush1.bf16.msra.mxu1 %v9131_v19 }
 0x4eb   : > { %v12635_v43 = vpack.c.bf16 %v8110_v11, %v8102_v8  ;;  %7552 = vmatprep.subr.bf16.mxu1 %v9140_v51 }
 0x4ec   : > { %v12639_v12 = vpack.c.bf16 %v8111_v38, %v8103_v32  ;;  %v6335_v18 = vpop.f32.mrb[244].mxu1 }
 0x4ed   : > { %v9391_v45 = vadd.f32 %v6335_v18, %v13671_v61  ;;  %v6337_v40 = vpop.f32.mrb[245].mxu1 }
 0x4ee   : > { %v9392_v62 = vadd.f32 %v6337_v40, %v12467_v22  ;;  %v6339_v58 = vpop.f32.mrb[246].mxu1  ;;  %7553 = vmatpush1.bf16.msra.mxu1 %v9139_v27 }
 0x4ef   : > { %v9393_v36 = vadd.f32 %v6339_v58, %v13671_v61  ;;  %v6341_v19 = vpop.f32.mrb[247].mxu1  ;;  %6903 = vmatmul.mubr.bf16.gmra.mrb[176].mxu0 %v13710_v60  ;;  %7715 = vmatprep.subr.bf16.mxu1 %v9148_v53  ;;  %v8118_v30 = vmax.f32 %v9391_v45, 0.0 }
 0x4f0   : > { %v9394_v35 = vadd.f32 %v6341_v19, %v12467_v22  ;;  %6912 = vmatprep.mubr.bf16.mxu0 %v13711_v25  ;;  %v8119_v33 = vmax.f32 %v9392_v62, 0.0  ;;  %v13713_v62 = vld [vmem:[#allocation85_spill] sm:$0xff] }
 0x4f1   : > { %v8126_v51 = vmax.f32 %v9393_v36, 0.0  ;;  %7442 = vmatmul.mubr.bf16.gmra.mrb[32].mxu1 %v13645_v15  ;;  %v13712_v36 = vld [vmem:[#allocation79_spill] sm:$0xff] }
 0x4f2   : > { %v8127_v8 = vmax.f32 %v9394_v35, 0.0  ;;  %7451 = vmatprep.mubr.bf16.mxu1 %v13646_v3 }
 0x4f3   : > { %v12649_v11 = vpack.c.bf16 %v8126_v51, %v8118_v30 }
 0x4f4   : > { %v12651_v32 = vpack.c.bf16 %v8127_v8, %v8119_v33  ;;  %v6345_v38 = vpop.f32.mrb[248].mxu1 }
 0x4f5   : > { %v9395_v27 = vadd.f32 %v6345_v38, %v13671_v61  ;;  %v6347_v53 = vpop.f32.mrb[249].mxu1 }
 0x4f6   : > { %v9396_v18 = vadd.f32 %v6347_v53, %v12467_v22  ;;  %v6349_v40 = vpop.f32.mrb[250].mxu1 }
 0x4f7   : > { %v9397_v45 = vadd.f32 %v6349_v40, %v13671_v61  ;;  %v6351_v58 = vpop.f32.mrb[251].mxu1  ;;  %6913 = vmatmul.mubr.bf16.gmra.mrb[180].mxu0 %v13712_v36  ;;  %v8134_v3 = vmax.f32 %v9395_v27, 0.0 }
 0x4f8   : > { %v9398_v15 = vadd.f32 %v6351_v58, %v12467_v22  ;;  %6922 = vmatprep.mubr.bf16.mxu0 %v13713_v62  ;;  %v8135_v35 = vmax.f32 %v9396_v18, 0.0  ;;  %v13714_v62 = vld [vmem:[#allocation83_spill] sm:$0xff]  ;;  %v13715_v18 = vld [vmem:[#allocation89_spill] sm:$0xff] }
 0x4f9   : > { %v8142_v19 = vmax.f32 %v9397_v45, 0.0  ;;  %7452 = vmatmul.mubr.bf16.gmra.mrb[36].mxu1 %v13649_v34 }
 0x4fa   : > { %v8143_v30 = vmax.f32 %v9398_v15, 0.0  ;;  %7461 = vmatprep.mubr.bf16.mxu1 %v13650_v47 }
 0x4fb   : > { %v12661_v51 = vpack.c.bf16 %v8142_v19, %v8134_v3 }
 0x4fc   : > { %v12663_v33 = vpack.c.bf16 %v8143_v30, %v8135_v35  ;;  %v6355_v8 = vpop.f32.mrb[252].mxu1 }
 0x4fd   : > { %v9399_v38 = vadd.f32 %v6355_v8, %v13671_v61  ;;  %v6357_v53 = vpop.f32.mrb[253].mxu1  ;;  %v13717_v8 = vld [vmem:[#allocation122_spill] sm:$0xff] }
 0x4fe   : > { %v9400_v40 = vadd.f32 %v6357_v53, %v12467_v22  ;;  %v6359_v58 = vpop.f32.mrb[254].mxu1 }
 0x4ff   : > { %v9401_v27 = vadd.f32 %v6359_v58, %v13671_v61  ;;  %v6361_v45 = vpop.f32.mrb[255].mxu1  ;;  %6923 = vmatmul.mubr.bf16.gmra.mrb[184].mxu0 %v13714_v62  ;;  %v8150_v47 = vmax.f32 %v9399_v38, 0.0  ;;  %v13716_v61 = vld [vmem:[#allocation87_spill] sm:$0xff]  ;;  %v13721_v38 = vld [vmem:[#allocation126_spill] sm:$0xff] }
 0x500   : > { %v9402_v34 = vadd.f32 %v6361_v45, %v12467_v22  ;;  %6932 = vmatprep.mubr.bf16.mxu0 %v13715_v18  ;;  %v8151_v3 = vmax.f32 %v9400_v40, 0.0  ;;  %v13718_v22 = vld [vmem:[#allocation121_spill] sm:$0xff]  ;;  %v13733_v45 = vld [vmem:[#allocation131_spill] sm:$0xff] }
 0x501   : > { %v8158_v15 = vmax.f32 %v9401_v27, 0.0  ;;  %7462 = vmatmul.mubr.bf16.gmra.mrb[40].mxu1 %v13653_v9  ;;  %v13719_v9 = vld [vmem:[#allocation124_spill] sm:$0xff]  ;;  %v2117_v40 = vld [vmem:[#allocation8 + $0xcd8] sm:$0xff] }
 0x502   : > { %v8159_v19 = vmax.f32 %v9402_v34, 0.0  ;;  %7471 = vmatprep.mubr.bf16.mxu1 %v13654_v16  ;;  %v13720_v16 = vld [vmem:[#allocation123_spill] sm:$0xff]  ;;  %v2121_v58 = vld [vmem:[#allocation8 + $0xcf8] sm:$0xff] }
 0x503   : > { %v12673_v35 = vpack.c.bf16 %v8158_v15, %v8150_v47  ;;  %v9172_v34 = vcombine.high %v2117_v40, %v2121_v58  ;;  %v2125_v47 = vld [vmem:[#allocation8 + $0xd18] sm:$0xff]  ;;  %v13736_v15 = vld [vmem:[#allocation31_spill] sm:$0xff] }
 0x504   : > { %v12675_v30 = vpack.c.bf16 %v8159_v19, %v8151_v3  ;;  %v13737_v3 = vld [vmem:[#allocation37_spill] sm:$0xff]  ;;  %v9171_v19 = vcombine.low %v2117_v40, %v2121_v58 }
 0x505   : > { %v2149_v58 = vld [vmem:[#allocation8 + $0xdd8] sm:$0xff] }
 0x507   : > { %6933 = vmatmul.mubr.bf16.gmra.mrb[188].mxu0 %v13716_v61 }
 0x508   : > { %6975 = vmatprep.mubr.bf16.mxu0 %v13717_v8 }
 0x509   : > { %7472 = vmatmul.mubr.bf16.gmra.mrb[44].mxu1 %v13657_v5  ;;  %v13722_v5 = vld [vmem:[#allocation125_spill] sm:$0xff] }
 0x50a   : > { %7481 = vmatprep.mubr.bf16.mxu1 %v13658_v59  ;;  %v13724_v59 = vld [vmem:[#allocation127_spill] sm:$0xff] }
 0x50f   : > { %6976 = vmatmul.mubr.bf16.vlgmr.msra.gmra.mrb[128].mxu0 %v13718_v22 }
 0x510   : > { %8403 = vmatpush1.bf16.xpose.msra.mxu0 %v12478_v0  ;;  %6985 = vmatprep.mubr.bf16.mxu0 %v13719_v9 }
 0x511   : > { %8404 = vmatprep.subr.bf16.mxu0 %v12495_v13  ;;  %7482 = vmatmul.mubr.bf16.gmra.mrb[48].mxu1 %v13659_v54  ;;  %v13723_v13 = vld [vmem:[#allocation128_spill] sm:$0xff]  ;;  %v13725_v54 = vld [vmem:[#allocation130_spill] sm:$0xff] }
 0x512   : > { %7491 = vmatprep.mubr.bf16.mxu1 %v13660_v23  ;;  %v13726_v23 = vld [vmem:[#allocation29_spill] sm:$0xff] }
 0x517   : > { %6986 = vmatmul.mubr.bf16.gmra.mrb[132].mxu0 %v13720_v16 }
 0x518   : > { %8405 = vmatpush1.bf16.xpose.msra.mxu0 %v12493_v39  ;;  %6995 = vmatprep.mubr.bf16.mxu0 %v13721_v38  ;;  %v2109_v39 = vld [vmem:[#allocation8 + $0xc98] sm:$0xff] }
 0x519   : > { %8406 = vmatprep.subr.bf16.mxu0 %v12507_v56  ;;  %7492 = vmatmul.mubr.bf16.gmra.mrb[52].mxu1 %v13661_v29  ;;  %v2101_v29 = vld [vmem:[#allocation8 + $0xc58] sm:$0xff] }
 0x51a   : > { %7501 = vmatprep.mubr.bf16.mxu1 %v13662_v57  ;;  %v2105_v57 = vld [vmem:[#allocation8 + $0xc78] sm:$0xff] }
 0x51b   : > { %v13727_v56 = vld [vmem:[#allocation129_spill] sm:$0xff]  ;;  %v9156_v0 = vcombine.high %v2101_v29, %v2105_v57 }
 0x51f   : > { %6996 = vmatmul.mubr.bf16.gmra.mrb[136].mxu0 %v13722_v5 }
 0x520   : > { %8407 = vmatpush1.bf16.xpose.msra.mxu0 %v12505_v55  ;;  %7005 = vmatprep.mubr.bf16.mxu0 %v13723_v13  ;;  %v2113_v55 = vld [vmem:[#allocation8 + $0xcb8] sm:$0xff] }
 0x521   : > { %8408 = vmatprep.subr.bf16.mxu0 %v12519_v4  ;;  %7502 = vmatmul.mubr.bf16.gmra.mrb[56].mxu1 %v13665_v14  ;;  %v13728_v14 = vld [vmem:[#allocation94_spill] sm:$0xff]  ;;  %v13732_v4 = vld [vmem:[#allocation33_spill] sm:$0xff]  ;;  %v9164_v53 = vcombine.high %v2109_v39, %v2113_v55  ;;  %v9163_v27 = vcombine.low %v2109_v39, %v2113_v55  ;;  %v13739_v39 = vld [vmem:[#allocation99_spill] sm:$0xff] }
 0x522   : > { %7511 = vmatprep.mubr.bf16.mxu1 %v13666_v7  ;;  %v13729_v7 = vld [vmem:[#allocation132_spill] sm:$0xff] }
 0x523   : > { %v13740_v55 = vld [vmem:[#allocation136_spill] sm:$0xff] }
 0x527   : > { %7006 = vmatmul.mubr.bf16.gmra.mrb[140].mxu0 %v13724_v59 }
 0x528   : > { %8409 = vmatpush1.bf16.xpose.msra.mxu0 %v12517_v10  ;;  %7015 = vmatprep.mubr.bf16.mxu0 %v13725_v54  ;;  %v13730_v10 = vld [vmem:[#allocation27_spill] sm:$0xff] }
 0x529   : > { %8410 = vmatprep.subr.bf16.mxu0 %v12531_v20  ;;  %7512 = vmatmul.mubr.bf16.gmra.mrb[60].mxu1 %v13672_v24  ;;  %v13731_v24 = vcombine.low %v12535_v26, %v12537_v63  ;;  %v9155_v20 = vcombine.low %v2101_v29, %v2105_v57  ;;  %v2129_v26 = vld [vmem:[#allocation8 + $0xd38] sm:$0xff] }
 0x52a   : > { %7554 = vmatprep.mubr.bf16.mxu1 %v13726_v23  ;;  %v13735_v63 = vld [vmem:[#allocation102_spill] sm:$0xff]  ;;  %v9180_v23 = vcombine.high %v2125_v47, %v2129_v26 }
 0x52b   : > { %v2133_v29 = vld [vmem:[#allocation8 + $0xd58] sm:$0xff] }
 0x52c   : > { %v2137_v57 = vld [vmem:[#allocation8 + $0xd78] sm:$0xff] }
 0x52f   : > { %7016 = vmatmul.mubr.bf16.gmra.mrb[144].mxu0 %v13727_v56 }
 0x530   : > { %8411 = vmatpush1.bf16.xpose.msra.mxu0 %v13728_v14  ;;  %7025 = vmatprep.mubr.bf16.mxu0 %v13729_v7  ;;  %v13738_v14 = vld [vmem:[#allocation133_spill] sm:$0xff] }
 0x531   : > { %8412 = vmatprep.subr.bf16.mxu0 %v12552_v31  ;;  %7555 = vmatmul.mubr.bf16.vlgmr.msra.gmra.mrb[0].mxu1 %v13730_v10  ;;  %v13734_v31 = vld [vmem:[#allocation134_spill] sm:$0xff] }
 0x532   : > { %7716 = vmatpush1.bf16.msra.mxu1 %v13731_v24  ;;  %7564 = vmatprep.mubr.bf16.mxu1 %v13732_v4  ;;  %v2141_v10 = vld [vmem:[#allocation8 + $0xd98] sm:$0xff]  ;;  %v13741_v4 = vld [vmem:[#allocation35_spill] sm:$0xff] }
 0x533   : > { %7717 = vmatprep.subr.bf16.mxu1 %v9156_v0  ;;  %v9179_v0 = vcombine.low %v2125_v47, %v2129_v26  ;;  %v2145_v24 = vld [vmem:[#allocation8 + $0xdb8] sm:$0xff]  ;;  %v13743_v47 = vld [vmem:[#allocation135_spill] sm:$0xff] }
 0x534   : > { %v9196_v40 = vcombine.high %v2141_v10, %v2145_v24 }
 0x536   : > { %7718 = vmatpush1.bf16.msra.mxu1 %v9155_v20  ;;  %v13742_v20 = vld [vmem:[#allocation41_spill] sm:$0xff] }
 0x537   : > { %7026 = vmatmul.mubr.bf16.gmra.mrb[148].mxu0 %v13733_v45  ;;  %7719 = vmatprep.subr.bf16.mxu1 %v9164_v53  ;;  %v9187_v53 = vcombine.low %v2133_v29, %v2137_v57 }
 0x538   : > { %8413 = vmatpush1.bf16.xpose.msra.mxu0 %v12550_v44  ;;  %7035 = vmatprep.mubr.bf16.mxu0 %v13734_v31  ;;  %v9188_v44 = vcombine.high %v2133_v29, %v2137_v57  ;;  %v2165_v57 = vld [vmem:[#allocation8 + $0xe58] sm:$0xff] }
 0x539   : > { %8414 = vmatprep.subr.bf16.mxu0 %v13735_v63  ;;  %7565 = vmatmul.mubr.bf16.gmra.mrb[4].mxu1 %v13736_v15  ;;  %v13744_v63 = vld [vmem:[#allocation138_spill] sm:$0xff] }
 0x53a   : > { %7720 = vmatpush1.bf16.msra.mxu1 %v9163_v27  ;;  %7574 = vmatprep.mubr.bf16.mxu1 %v13737_v3  ;;  %v2153_v27 = vld [vmem:[#allocation8 + $0xdf8] sm:$0xff]  ;;  %v13745_v3 = vld [vmem:[#allocation39_spill] sm:$0xff] }
 0x53b   : > { %7721 = vmatprep.subr.bf16.mxu1 %v9172_v34  ;;  %v9195_v34 = vcombine.low %v2141_v10, %v2145_v24  ;;  %v9204_v26 = vcombine.high %v2149_v58, %v2153_v27  ;;  %v2161_v15 = vld [vmem:[#allocation8 + $0xe38] sm:$0xff]  ;;  %v13748_v10 = vld [vmem:[#allocation140_spill] sm:$0xff] }
 0x53c   : > { %v2177_v24 = vld [vmem:[#allocation8 + $0xeb8] sm:$0xff] }
 0x53e   : > { %7722 = vmatpush1.bf16.msra.mxu1 %v9171_v19  ;;  %v13746_v19 = vld [vmem:[#allocation45_spill] sm:$0xff] }
 0x53f   : > { %7036 = vmatmul.mubr.bf16.gmra.mrb[152].mxu0 %v13738_v14  ;;  %7723 = vmatprep.subr.bf16.mxu1 %v9180_v23  ;;  %v9203_v23 = vcombine.low %v2149_v58, %v2153_v27  ;;  %v2181_v58 = vld [vmem:[#allocation8 + $0xed8] sm:$0xff] }
 0x540   : > { %8415 = vmatpush1.bf16.xpose.msra.mxu0 %v13739_v39  ;;  %7045 = vmatprep.mubr.bf16.mxu0 %v13740_v55  ;;  %v13747_v39 = vld [vmem:[#allocation137_spill] sm:$0xff] }
 0x541   : > { %8416 = vmatprep.subr.bf16.mxu0 %v12576_v28  ;;  %7575 = vmatmul.mubr.bf16.gmra.mrb[8].mxu1 %v13741_v4  ;;  %v2157_v28 = vld [vmem:[#allocation8 + $0xe18] sm:$0xff]  ;;  %v13749_v4 = vld [vmem:[#allocation43_spill] sm:$0xff] }
 0x542   : > { %7724 = vmatpush1.bf16.msra.mxu1 %v9179_v0  ;;  %7584 = vmatprep.mubr.bf16.mxu1 %v13742_v20  ;;  %v9212_v29 = vcombine.high %v2157_v28, %v2161_v15  ;;  %v2169_v0 = vld [vmem:[#allocation8 + $0xe78] sm:$0xff] }
 0x543   : > { %7725 = vmatprep.subr.bf16.mxu1 %v9188_v44  ;;  %v9211_v44 = vcombine.low %v2157_v28, %v2161_v15  ;;  %v13750_v20 = vld [vmem:[#allocation49_spill] sm:$0xff]  ;;  %v13752_v28 = vld [vmem:[#allocation142_spill] sm:$0xff] }
 0x544   : > { %v2185_v27 = vld [vmem:[#allocation8 + $0xef8] sm:$0xff] }
 0x545   : > { %v2193_v15 = vld [vmem:[#allocation8 + $0xf38] sm:$0xff] }
 0x546   : > { %7726 = vmatpush1.bf16.msra.mxu1 %v9187_v53  ;;  %v9219_v53 = vcombine.low %v2165_v57, %v2169_v0 }
 0x547   : > { %7046 = vmatmul.mubr.bf16.gmra.mrb[156].mxu0 %v13743_v47  ;;  %7727 = vmatprep.subr.bf16.mxu1 %v9196_v40 }
 0x548   : > { %8417 = vmatpush1.bf16.xpose.msra.mxu0 %v12574_v48  ;;  %7055 = vmatprep.mubr.bf16.mxu0 %v13744_v63  ;;  %v9220_v48 = vcombine.high %v2165_v57, %v2169_v0  ;;  %v2197_v57 = vld [vmem:[#allocation8 + $0xf58] sm:$0xff] }
 0x549   : > { %8418 = vmatprep.subr.bf16.mxu0 %v12588_v21  ;;  %7585 = vmatmul.mubr.bf16.gmra.mrb[12].mxu1 %v13745_v3  ;;  %v2173_v21 = vld [vmem:[#allocation8 + $0xe98] sm:$0xff]  ;;  %v13753_v3 = vld [vmem:[#allocation47_spill] sm:$0xff] }
 0x54a   : > { %7728 = vmatpush1.bf16.msra.mxu1 %v9195_v34  ;;  %7594 = vmatprep.mubr.bf16.mxu1 %v13746_v19  ;;  %v9228_v40 = vcombine.high %v2173_v21, %v2177_v24  ;;  %v9227_v34 = vcombine.low %v2173_v21, %v2177_v24  ;;  %v13754_v19 = vld [vmem:[#allocation53_spill] sm:$0xff]  ;;  %v13756_v21 = vld [vmem:[#allocation144_spill] sm:$0xff] }
 0x54b   : > { %7729 = vmatprep.subr.bf16.mxu1 %v9204_v26  ;;  %v13751_v26 = vld [vmem:[#allocation139_spill] sm:$0xff]  ;;  %v2201_v0 = vld [vmem:[#allocation8 + $0xf78] sm:$0xff] }
 0x54c   : > { %v2209_v24 = vld [vmem:[#allocation8 + $0xfb8] sm:$0xff] }
 0x54e   : > { %7730 = vmatpush1.bf16.msra.mxu1 %v9203_v23  ;;  %v9235_v23 = vcombine.low %v2181_v58, %v2185_v27 }
 0x54f   : > { %7056 = vmatmul.mubr.bf16.gmra.mrb[160].mxu0 %v13747_v39  ;;  %7731 = vmatprep.subr.bf16.mxu1 %v9212_v29 }
 0x550   : > { %8419 = vmatpush1.bf16.xpose.msra.mxu0 %v12586_v17  ;;  %7065 = vmatprep.mubr.bf16.mxu0 %v13748_v10  ;;  %v9236_v17 = vcombine.high %v2181_v58, %v2185_v27  ;;  %v2213_v58 = vld [vmem:[#allocation8 + $0xfd8] sm:$0xff] }
 0x551   : > { %8420 = vmatprep.subr.bf16.mxu0 %v12601_v46  ;;  %7595 = vmatmul.mubr.bf16.gmra.mrb[16].mxu1 %v13749_v4  ;;  %v2189_v46 = vld [vmem:[#allocation8 + $0xf18] sm:$0xff]  ;;  %v13757_v4 = vld [vmem:[#allocation51_spill] sm:$0xff] }
 0x552   : > { %7732 = vmatpush1.bf16.msra.mxu1 %v9211_v44  ;;  %7604 = vmatprep.mubr.bf16.mxu1 %v13750_v20  ;;  %v9244_v29 = vcombine.high %v2189_v46, %v2193_v15  ;;  %v9243_v44 = vcombine.low %v2189_v46, %v2193_v15  ;;  %v13758_v20 = vld [vmem:[#allocation57_spill] sm:$0xff]  ;;  %v13760_v46 = vld [vmem:[#allocation146_spill] sm:$0xff]  ;;  %v10638_v15 = vmov 1966171168  }
 0x553   : > { %7733 = vmatprep.subr.bf16.mxu1 %v9220_v48  ;;  %v13755_v48 = vld [vmem:[#allocation141_spill] sm:$0xff] }
 0x554   : > { %v2217_v27 = vld [vmem:[#allocation8 + $0xff8] sm:$0xff] }
 0x556   : > { %7734 = vmatpush1.bf16.msra.mxu1 %v9219_v53  ;;  %v9251_v53 = vcombine.low %v2197_v57, %v2201_v0 }
 0x557   : > { %7066 = vmatmul.mubr.bf16.gmra.mrb[164].mxu0 %v13751_v26  ;;  %7735 = vmatprep.subr.bf16.mxu1 %v9228_v40 }
 0x558   : > { %8421 = vmatpush1.bf16.xpose.msra.mxu0 %v12599_v52  ;;  %7075 = vmatprep.mubr.bf16.mxu0 %v13752_v28  ;;  %v9252_v52 = vcombine.high %v2197_v57, %v2201_v0  ;;  %v12766_v0 = vld [vmem:[#allocation11] sm:$0xff] }
 0x559   : > { %8422 = vmatprep.subr.bf16.mxu0 %v12613_v6  ;;  %7605 = vmatmul.mubr.bf16.gmra.mrb[20].mxu1 %v13753_v3  ;;  %v2205_v6 = vld [vmem:[#allocation8 + $0xf98] sm:$0xff]  ;;  %v8306_v3 = vunpack.c.l.s4 %v10638_v15 }
 0x55a   : > { %7736 = vmatpush1.bf16.msra.mxu1 %v9227_v34  ;;  %7614 = vmatprep.mubr.bf16.mxu1 %v13754_v19  ;;  %v9260_v40 = vcombine.high %v2205_v6, %v2209_v24  ;;  %v9259_v34 = vcombine.low %v2205_v6, %v2209_v24  ;;  %v13761_v19 = vld [vmem:[#allocation25_spill] sm:$0xff] }
 0x55b   : > { %7737 = vmatprep.subr.bf16.mxu1 %v9236_v17  ;;  %v13759_v17 = vld [vmem:[#allocation143_spill] sm:$0xff]  ;;  %v13770_v6 = vld [vmem:[#allocation69_spill] sm:$0xff] }
 0x55e   : > { %7738 = vmatpush1.bf16.msra.mxu1 %v9235_v23  ;;  %v13762_v23 = vld [vmem:[#allocation145_spill] sm:$0xff] }
 0x55f   : > { %7076 = vmatmul.mubr.bf16.gmra.mrb[168].mxu0 %v13755_v48  ;;  %7739 = vmatprep.subr.bf16.mxu1 %v9244_v29  ;;  %v8307_v29 = vunpack.c.0.s8 %v8306_v3 }
 0x560   : > { %8423 = vmatpush1.bf16.xpose.msra.mxu0 %v12611_v2  ;;  %7085 = vmatprep.mubr.bf16.mxu0 %v13756_v21  ;;  %v9268_v2 = vcombine.high %v2213_v58, %v2217_v27 }
 0x561   : > { %8424 = vmatprep.subr.bf16.mxu0 %v12625_v41  ;;  %7615 = vmatmul.mubr.bf16.gmra.mrb[24].mxu1 %v13757_v4  ;;  %v9267_v41 = vcombine.low %v2213_v58, %v2217_v27  ;;  %v13771_v4 = vld [vmem:[#allocation149_spill] sm:$0xff]  ;;  %v13775_v58 = vld [vmem:[#allocation151_spill] sm:$0xff] }
 0x562   : > { %7740 = vmatpush1.bf16.msra.mxu1 %v9243_v44  ;;  %7624 = vmatprep.mubr.bf16.mxu1 %v13758_v20  ;;  %v13767_v44 = vld [vmem:[#allocation147_spill] sm:$0xff]  ;;  %v13772_v20 = vld [vmem:[#allocation152_spill] sm:$0xff] }
 0x563   : > { %7741 = vmatprep.subr.bf16.mxu1 %v9252_v52  ;;  %v13768_v52 = vld [vmem:[#allocation150_spill] sm:$0xff] }
 0x566   : > { %7742 = vmatpush1.bf16.msra.mxu1 %v9251_v53  ;;  %v13773_v53 = vld [vmem:[#allocation67_spill] sm:$0xff] }
 0x567   : > { %7086 = vmatmul.mubr.bf16.gmra.mrb[172].mxu0 %v13759_v17  ;;  %7743 = vmatprep.subr.bf16.mxu1 %v9260_v40  ;;  %v13774_v40 = vld [vmem:[#allocation73_spill] sm:$0xff] }
 0x568   : > { %8425 = vmatpush1.bf16.xpose.msra.mxu0 %v12623_v1  ;;  %7095 = vmatprep.mubr.bf16.mxu0 %v13760_v46  ;;  %v13763_v1 = vld [vmem:[#allocation148_spill] sm:$0xff] }
 0x569   : > { %8426 = vmatprep.subr.bf16.mxu0 %v12639_v12  ;;  %7625 = vmatmul.mubr.bf16.gmra.mrb[28].mxu1 %v13696_v50  ;;  %v13764_v50 = vld [vmem:[#allocation59_spill] sm:$0xff]  ;;  %v13765_v12 = vld [vmem:[#allocation65_spill] sm:$0xff] }
 0x56a   : > { %7744 = vmatpush1.bf16.msra.mxu1 %v9259_v34  ;;  %7634 = vmatprep.mubr.bf16.mxu1 %v13697_v42  ;;  %v13766_v42 = vld [vmem:[#allocation17_spill] sm:$0xff] }
 0x56b   : > { %7745 = vmatprep.subr.bf16.mxu1 %v9268_v2  ;;  %v12764_v57 = vsub.s32 %v8307_v29, %v13766_v42  ;;  %v13793_v29 = vld [vmem:[#allocation54_spill] sm:$0xff]  ;;  %v13794_v42 = vld [vmem:[#allocation56_spill] sm:$0xff] }
 0x56e   : > { %7746 = vmatpush1.bf16.msra.mxu1 %v9267_v41 }
 0x56f   : > { %8361 = vmatprep.subr.bf16.mxu1 %v13761_v19  ;;  %7096 = vmatmul.mubr.bf16.gmra.mrb[176].mxu0 %v13762_v23 }
 0x570   : > { %8427 = vmatpush1.bf16.xpose.msra.mxu0 %v12635_v43  ;;  %7105 = vmatprep.mubr.bf16.mxu0 %v13763_v1  ;;  %v8311_v43 = vrot.slane %v12766_v0, %v12764_v57 }
 0x571   : > { %8428 = vmatprep.subr.bf16.mxu0 %v12651_v32  ;;  %7635 = vmatmul.mubr.bf16.gmra.mrb[32].mxu1 %v13764_v50  ;;  %v13769_v32 = vld [vmem:[#allocation63_spill] sm:$0xff] }
 0x572   : > { %7644 = vmatprep.mubr.bf16.mxu1 %v13765_v12  ;;  %v8319_v24 = vcombine.high %v8311_v43, %v8311_v43  ;;  %v12789_v27 = vrot.slane %v8311_v43, %v12764_v57 }
 0x577   : > { %7106 = vmatmul.mubr.bf16.gmra.mrb[180].mxu0 %v13767_v44 }
 0x578   : > { %8429 = vmatpush1.bf16.xpose.msra.mxu0 %v12649_v11  ;;  %7115 = vmatprep.mubr.bf16.mxu0 %v13768_v52  ;;  %v12780_v11 = vrot.slane %v8319_v24, %v12764_v57 }
 0x579   : > { %8430 = vmatprep.subr.bf16.mxu0 %v12663_v33  ;;  %7645 = vmatmul.mubr.bf16.gmra.mrb[36].mxu1 %v13769_v32 }
 0x57a   : > { %7654 = vmatprep.mubr.bf16.mxu1 %v13770_v6  ;;  %v8351_v33 = vcombine.high %v12780_v11, %v12780_v11 }
 0x57f   : > { %7116 = vmatmul.mubr.bf16.gmra.mrb[184].mxu0 %v13771_v4 }
 0x580   : > { %8431 = vmatpush1.bf16.xpose.msra.mxu0 %v12661_v51  ;;  %7125 = vmatprep.mubr.bf16.mxu0 %v13772_v20  ;;  %v8349_v51 = vcombine.high %v12789_v27, %v12789_v27 }
 0x581   : > { %8432 = vmatprep.subr.bf16.mxu0 %v12675_v30  ;;  %7655 = vmatmul.mubr.bf16.gmra.mrb[40].mxu1 %v13773_v53  ;;  %v13776_v30 = vld [vmem:[#allocation85_spill] sm:$0xff] }
 0x582   : > { %7664 = vmatprep.mubr.bf16.mxu1 %v13774_v40 }
 0x587   : > { %7126 = vmatmul.mubr.bf16.gmra.mrb[188].mxu0 %v13775_v58 }
 0x588   : > { %8433 = vmatpush1.bf16.xpose.msra.mxu0 %v12673_v35  ;;  %8434 = vmatprep.mubr.bf16.mxu0 %v8351_v33  ;;  %v13784_v35 = vld [vmem:[#allocation40_spill] sm:$0xff] }
 0x589   : > { %7665 = vmatmul.mubr.bf16.gmra.mrb[44].mxu1 %v13708_v49  ;;  %v13777_v49 = vld [vmem:[#allocation26_spill] sm:$0xff] }
 0x58a   : > { %7674 = vmatprep.mubr.bf16.mxu1 %v13709_v37  ;;  %v13778_v37 = vld [vmem:[#allocation28_spill] sm:$0xff] }
 0x58f   : > { %8435 = vmatmul.mubr.bf16.vlgmr.msra.gmra.mrb[192].mxu0 %v8349_v51 }
 0x591   : > { %7675 = vmatmul.mubr.bf16.gmra.mrb[48].mxu1 %v13710_v60  ;;  %v13779_v60 = vld [vmem:[#allocation30_spill] sm:$0xff] }
 0x592   : > { %7684 = vmatprep.mubr.bf16.mxu1 %v13711_v25  ;;  %v13780_v25 = vld [vmem:[#allocation32_spill] sm:$0xff] }
 0x599   : > { %7685 = vmatmul.mubr.bf16.gmra.mrb[52].mxu1 %v13712_v36  ;;  %v13781_v36 = vld [vmem:[#allocation34_spill] sm:$0xff] }
 0x59a   : > { %7694 = vmatprep.mubr.bf16.mxu1 %v13776_v30 }
 0x5a1   : > { %7695 = vmatmul.mubr.bf16.gmra.mrb[56].mxu1 %v13714_v62  ;;  %v13782_v62 = vld [vmem:[#allocation36_spill] sm:$0xff] }
 0x5a2   : > { %7704 = vmatprep.mubr.bf16.mxu1 %v13715_v18  ;;  %v13783_v18 = vld [vmem:[#allocation38_spill] sm:$0xff] }
 0x5a9   : > { %7705 = vmatmul.mubr.bf16.gmra.mrb[60].mxu1 %v13716_v61  ;;  %v13785_v61 = vld [vmem:[#allocation42_spill] sm:$0xff] }
 0x5aa   : > { %7747 = vmatprep.mubr.bf16.mxu1 %v13717_v8  ;;  %v13786_v8 = vld [vmem:[#allocation44_spill] sm:$0xff] }
 0x5b1   : > { %7748 = vmatmul.mubr.bf16.vlgmr.msra.gmra.mrb[0].mxu1 %v13718_v22  ;;  %v13787_v22 = vld [vmem:[#allocation46_spill] sm:$0xff] }
 0x5b2   : > { %8362 = vmatpush1.bf16.xpose.msra.mxu1 %v13777_v49  ;;  %7757 = vmatprep.mubr.bf16.mxu1 %v13719_v9  ;;  %v13788_v9 = vld [vmem:[#allocation48_spill] sm:$0xff] }
 0x5b3   : > { %8363 = vmatprep.subr.bf16.mxu1 %v13778_v37  ;;  %v13795_v37 = vld [vmem:[#allocation58_spill] sm:$0xff] }
 0x5b9   : > { %7758 = vmatmul.mubr.bf16.gmra.mrb[4].mxu1 %v13720_v16  ;;  %v13789_v16 = vld [vmem:[#allocation50_spill] sm:$0xff] }
 0x5ba   : > { %8364 = vmatpush1.bf16.xpose.msra.mxu1 %v13779_v60  ;;  %7767 = vmatprep.mubr.bf16.mxu1 %v13721_v38 }
 0x5bb   : > { %8365 = vmatprep.subr.bf16.mxu1 %v13780_v25 }
 0x5c1   : > { %7768 = vmatmul.mubr.bf16.gmra.mrb[8].mxu1 %v13722_v5  ;;  %v13790_v5 = vld [vmem:[#allocation20_spill] sm:$0xff] }
 0x5c2   : > { %8366 = vmatpush1.bf16.xpose.msra.mxu1 %v13781_v36  ;;  %7777 = vmatprep.mubr.bf16.mxu1 %v13723_v13  ;;  %v13796_v36 = vld [vmem:[#allocation18_spill] sm:$0xff] }
 0x5c3   : > { %8367 = vmatprep.subr.bf16.mxu1 %v13782_v62 }
 0x5c9   : > { %7778 = vmatmul.mubr.bf16.gmra.mrb[12].mxu1 %v13724_v59  ;;  %v13791_v59 = vld [vmem:[#allocation52_spill] sm:$0xff] }
 0x5ca   : > { %8368 = vmatpush1.bf16.xpose.msra.mxu1 %v13783_v18  ;;  %7787 = vmatprep.mubr.bf16.mxu1 %v13725_v54 }
 0x5cb   : > { %8369 = vmatprep.subr.bf16.mxu1 %v13784_v35 }
 0x5d1   : > { %7788 = vmatmul.mubr.bf16.gmra.mrb[16].mxu1 %v13727_v56  ;;  %v13792_v56 = vld [vmem:[#allocation21_spill] sm:$0xff] }
 0x5d2   : > { %8370 = vmatpush1.bf16.xpose.msra.mxu1 %v13785_v61  ;;  %7797 = vmatprep.mubr.bf16.mxu1 %v13729_v7 }
 0x5d3   : > { %8371 = vmatprep.subr.bf16.mxu1 %v13786_v8 }
 0x5d9   : > { %7798 = vmatmul.mubr.bf16.gmra.mrb[20].mxu1 %v13733_v45 }
 0x5da   : > { %8372 = vmatpush1.bf16.xpose.msra.mxu1 %v13787_v22  ;;  %7807 = vmatprep.mubr.bf16.mxu1 %v13734_v31 }
 0x5db   : > { %8373 = vmatprep.subr.bf16.mxu1 %v13788_v9 }
 0x5e1   : > { %7808 = vmatmul.mubr.bf16.gmra.mrb[24].mxu1 %v13738_v14 }
 0x5e2   : > { %8374 = vmatpush1.bf16.xpose.msra.mxu1 %v13789_v16  ;;  %v6977_v38 = vpop.f32.mrb[128].mxu0  ;;  %7817 = vmatprep.mubr.bf16.mxu1 %v13740_v55 }
 0x5e3   : > { %v9403_v13 = vadd.f32 %v6977_v38, %v13790_v5  ;;  %8375 = vmatprep.subr.bf16.mxu1 %v13791_v59  ;;  %v6979_v54 = vpop.f32.mrb[129].mxu0  ;;  %v13797_v59 = vld [vmem:[#allocation62_spill] sm:$0xff] }
 0x5e4   : > { %v9404_v7 = vadd.f32 %v6979_v54, %v13792_v56  ;;  %v6981_v45 = vpop.f32.mrb[130].mxu0 }
 0x5e5   : > { %v9405_v34 = vadd.f32 %v6981_v45, %v13790_v5  ;;  %v6983_v31 = vpop.f32.mrb[131].mxu0  ;;  %v7912_v41 = vmax.f32 %v9403_v13, 0.0  ;;  %v13798_v45 = vld [vmem:[#allocation74_spill] sm:$0xff] }
 0x5e6   : > { %v9406_v2 = vadd.f32 %v6983_v31, %v13792_v56  ;;  %v7913_v15 = vmax.f32 %v9404_v7, 0.0 }
 0x5e7   : > { %v7920_v14 = vmax.f32 %v9405_v34, 0.0 }
 0x5e8   : > { %v7921_v3 = vmax.f32 %v9406_v2, 0.0 }
 0x5e9   : > { %v8169_v19 = vpack.c.bf16 %v7920_v14, %v7912_v41  ;;  %7818 = vmatmul.mubr.bf16.gmra.mrb[28].mxu1 %v13743_v47 }
 0x5ea   : > { %v8170_v55 = vpack.c.bf16 %v7921_v3, %v7913_v15  ;;  %8376 = vmatpush1.bf16.xpose.msra.mxu1 %v13793_v29  ;;  %v6987_v50 = vpop.f32.mrb[132].mxu0  ;;  %7827 = vmatprep.mubr.bf16.mxu1 %v13744_v63 }
 0x5eb   : > { %v9407_v12 = vadd.f32 %v6987_v50, %v13790_v5  ;;  %8377 = vmatprep.subr.bf16.mxu1 %v13794_v42  ;;  %v6989_v43 = vpop.f32.mrb[133].mxu0  ;;  %v13799_v50 = vld [vmem:[#allocation68_spill] sm:$0xff] }
 0x5ec   : > { %v9408_v32 = vadd.f32 %v6989_v43, %v13792_v56  ;;  %v6991_v6 = vpop.f32.mrb[134].mxu0  ;;  %8443 = vmatprep.subr.bf16.mxu0 %v8170_v55  ;;  %v13800_v43 = vld [vmem:[#allocation78_spill] sm:$0xff] }
 0x5ed   : > { %v9409_v24 = vadd.f32 %v6991_v6, %v13790_v5  ;;  %v6993_v53 = vpop.f32.mrb[135].mxu0  ;;  %8444 = vmatpush1.bf16.xpose.msra.mxu0 %v8169_v19  ;;  %v7928_v40 = vmax.f32 %v9407_v12, 0.0 }
 0x5ee   : > { %v9410_v47 = vadd.f32 %v6993_v53, %v13792_v56  ;;  %v7929_v51 = vmax.f32 %v9408_v32, 0.0 }
 0x5ef   : > { %v7936_v33 = vmax.f32 %v9409_v24, 0.0 }
 0x5f0   : > { %v7937_v30 = vmax.f32 %v9410_v47, 0.0 }
 0x5f1   : > { %v8177_v63 = vpack.c.bf16 %v7936_v33, %v7928_v40  ;;  %7828 = vmatmul.mubr.bf16.gmra.mrb[32].mxu1 %v13747_v39 }
 0x5f2   : > { %v8178_v49 = vpack.c.bf16 %v7937_v30, %v7929_v51  ;;  %8378 = vmatpush1.bf16.xpose.msra.mxu1 %v13795_v37  ;;  %v6997_v60 = vpop.f32.mrb[136].mxu0  ;;  %7837 = vmatprep.mubr.bf16.mxu1 %v13748_v10 }
 0x5f3   : > { %v9411_v25 = vadd.f32 %v6997_v60, %v13790_v5  ;;  %8379 = vmatprep.subr.bf16.mxu1 %v13796_v36  ;;  %v6999_v62 = vpop.f32.mrb[137].mxu0  ;;  %v13801_v60 = vld [vmem:[#allocation72_spill] sm:$0xff] }
 0x5f4   : > { %v9412_v18 = vadd.f32 %v6999_v62, %v13792_v56  ;;  %v7001_v35 = vpop.f32.mrb[138].mxu0  ;;  %8445 = vmatprep.subr.bf16.mxu0 %v8178_v49  ;;  %v13802_v62 = vld [vmem:[#allocation82_spill] sm:$0xff] }
 0x5f5   : > { %v9413_v61 = vadd.f32 %v7001_v35, %v13790_v5  ;;  %v7003_v8 = vpop.f32.mrb[139].mxu0  ;;  %8446 = vmatpush1.bf16.xpose.msra.mxu0 %v8177_v63  ;;  %v7944_v22 = vmax.f32 %v9411_v25, 0.0 }
 0x5f6   : > { %v9414_v39 = vadd.f32 %v7003_v8, %v13792_v56  ;;  %v7945_v16 = vmax.f32 %v9412_v18, 0.0 }
 0x5f7   : > { %v7952_v9 = vmax.f32 %v9413_v61, 0.0 }
 0x5f8   : > { %v7953_v38 = vmax.f32 %v9414_v39, 0.0 }
 0x5f9   : > { %v8185_v10 = vpack.c.bf16 %v7952_v9, %v7944_v22  ;;  %7838 = vmatmul.mubr.bf16.gmra.mrb[36].mxu1 %v13751_v26 }
 0x5fa   : > { %v8186_v13 = vpack.c.bf16 %v7953_v38, %v7945_v16  ;;  %8380 = vmatpush1.bf16.xpose.msra.mxu1 %v13797_v59  ;;  %v7007_v54 = vpop.f32.mrb[140].mxu0  ;;  %7847 = vmatprep.mubr.bf16.mxu1 %v13752_v28  ;;  %v13803_v59 = vld [vmem:[#allocation76_spill] sm:$0xff] }
 0x5fb   : > { %v9415_v7 = vadd.f32 %v7007_v54, %v13790_v5  ;;  %8381 = vmatprep.subr.bf16.mxu1 %v13798_v45  ;;  %v7009_v34 = vpop.f32.mrb[141].mxu0  ;;  %v13804_v45 = vld [vmem:[#allocation86_spill] sm:$0xff] }
 0x5fc   : > { %v9416_v31 = vadd.f32 %v7009_v34, %v13792_v56  ;;  %v7011_v2 = vpop.f32.mrb[142].mxu0  ;;  %8447 = vmatprep.subr.bf16.mxu0 %v8186_v13 }
 0x5fd   : > { %v9417_v41 = vadd.f32 %v7011_v2, %v13790_v5  ;;  %v7013_v14 = vpop.f32.mrb[143].mxu0  ;;  %8448 = vmatpush1.bf16.xpose.msra.mxu0 %v8185_v10  ;;  %v7960_v15 = vmax.f32 %v9415_v7, 0.0 }
 0x5fe   : > { %v9418_v26 = vadd.f32 %v7013_v14, %v13792_v56  ;;  %v7961_v19 = vmax.f32 %v9416_v31, 0.0 }
 0x5ff   : > { %v7968_v3 = vmax.f32 %v9417_v41, 0.0 }
 0x600   : > { %v7969_v55 = vmax.f32 %v9418_v26, 0.0 }
 0x601   : > { %v8193_v28 = vpack.c.bf16 %v7968_v3, %v7960_v15  ;;  %7848 = vmatmul.mubr.bf16.gmra.mrb[40].mxu1 %v13755_v48 }
 0x602   : > { %v8194_v29 = vpack.c.bf16 %v7969_v55, %v7961_v19  ;;  %8382 = vmatpush1.bf16.xpose.msra.mxu1 %v13799_v50  ;;  %v7017_v12 = vpop.f32.mrb[144].mxu0  ;;  %7857 = vmatprep.mubr.bf16.mxu1 %v13756_v21  ;;  %v8304_v21 = vcombine.high %v12766_v0, %v12766_v0 }
 0x603   : > { %v9419_v42 = vadd.f32 %v7017_v12, %v13790_v5  ;;  %8383 = vmatprep.subr.bf16.mxu1 %v13800_v43  ;;  %v7019_v32 = vpop.f32.mrb[145].mxu0  ;;  %v13806_v12 = vld [vmem:[#allocation90_spill] sm:$0xff] }
 0x604   : > { %v9420_v6 = vadd.f32 %v7019_v32, %v13792_v56  ;;  %v7021_v24 = vpop.f32.mrb[146].mxu0  ;;  %8449 = vmatprep.subr.bf16.mxu0 %v8194_v29  ;;  %v12872_v49 = vrot.slane %v8304_v21, %v12764_v57  ;;  %v13807_v21 = vld [vmem:[#allocation84_spill] sm:$0xff] }
 0x605   : > { %v9421_v53 = vadd.f32 %v7021_v24, %v13790_v5  ;;  %v7023_v47 = vpop.f32.mrb[147].mxu0  ;;  %8450 = vmatpush1.bf16.xpose.msra.mxu0 %v8193_v28  ;;  %v7976_v40 = vmax.f32 %v9419_v42, 0.0  ;;  %v13805_v28 = vld [vmem:[#allocation80_spill] sm:$0xff] }
 0x606   : > { %v9422_v48 = vadd.f32 %v7023_v47, %v13792_v56  ;;  %v7977_v51 = vmax.f32 %v9420_v6, 0.0  ;;  %v8320_v0 = vcombine.high %v12872_v49, %v12872_v49 }
 0x607   : > { %v7984_v33 = vmax.f32 %v9421_v53, 0.0 }
 0x608   : > { %v7985_v30 = vmax.f32 %v9422_v48, 0.0  ;;  %v12883_v39 = vrot.slane %v8320_v0, %v12764_v57 }
 0x609   : > { %v8201_v63 = vpack.c.bf16 %v7984_v33, %v7976_v40  ;;  %7858 = vmatmul.mubr.bf16.gmra.mrb[44].mxu1 %v13759_v17 }
 0x60a   : > { %v8202_v37 = vpack.c.bf16 %v7985_v30, %v7977_v51  ;;  %8384 = vmatpush1.bf16.xpose.msra.mxu1 %v13801_v60  ;;  %v7027_v25 = vpop.f32.mrb[148].mxu0  ;;  %7867 = vmatprep.mubr.bf16.mxu1 %v13760_v46 }
 0x60b   : > { %v9423_v36 = vadd.f32 %v7027_v25, %v13790_v5  ;;  %8385 = vmatprep.subr.bf16.mxu1 %v13802_v62  ;;  %v7029_v18 = vpop.f32.mrb[149].mxu0  ;;  %8475 = vmatprep.mubr.bf16.mxu0 %v12883_v39 }
 0x60c   : > { %v9424_v35 = vadd.f32 %v7029_v18, %v13792_v56  ;;  %v7031_v17 = vpop.f32.mrb[150].mxu0  ;;  %8451 = vmatprep.subr.bf16.mxu0 %v8202_v37 }
 0x60d   : > { %v9425_v61 = vadd.f32 %v7031_v17, %v13790_v5  ;;  %v7033_v8 = vpop.f32.mrb[151].mxu0  ;;  %8452 = vmatpush1.bf16.xpose.msra.mxu0 %v8201_v63  ;;  %v7992_v22 = vmax.f32 %v9423_v36, 0.0  ;;  %v13808_v63 = vld [vmem:[#allocation91_spill] sm:$0xff] }
 0x60e   : > { %v9426_v46 = vadd.f32 %v7033_v8, %v13792_v56  ;;  %v7993_v16 = vmax.f32 %v9424_v35, 0.0  ;;  %v13809_v8 = vld [vmem:[#allocation88_spill] sm:$0xff] }
 0x60f   : > { %v8000_v9 = vmax.f32 %v9425_v61, 0.0 }
 0x610   : > { %v8001_v38 = vmax.f32 %v9426_v46, 0.0 }
 0x611   : > { %v8209_v10 = vpack.c.bf16 %v8000_v9, %v7992_v22  ;;  %7868 = vmatmul.mubr.bf16.gmra.mrb[48].mxu1 %v13762_v23 }
 0x612   : > { %v8210_v13 = vpack.c.bf16 %v8001_v38, %v7993_v16  ;;  %8386 = vmatpush1.bf16.xpose.msra.mxu1 %v13803_v59  ;;  %v7037_v54 = vpop.f32.mrb[152].mxu0  ;;  %7877 = vmatprep.mubr.bf16.mxu1 %v13763_v1 }
 0x613   : > { %v9427_v7 = vadd.f32 %v7037_v54, %v13790_v5  ;;  %8387 = vmatprep.subr.bf16.mxu1 %v13804_v45  ;;  %v7039_v34 = vpop.f32.mrb[153].mxu0 }
 0x614   : > { %v9428_v31 = vadd.f32 %v7039_v34, %v13792_v56  ;;  %v7041_v2 = vpop.f32.mrb[154].mxu0  ;;  %8453 = vmatprep.subr.bf16.mxu0 %v8210_v13 }
 0x615   : > { %v9429_v41 = vadd.f32 %v7041_v2, %v13790_v5  ;;  %v7043_v14 = vpop.f32.mrb[155].mxu0  ;;  %8454 = vmatpush1.bf16.xpose.msra.mxu0 %v8209_v10  ;;  %v8008_v26 = vmax.f32 %v9427_v7, 0.0 }
 0x616   : > { %v9430_v23 = vadd.f32 %v7043_v14, %v13792_v56  ;;  %v8009_v3 = vmax.f32 %v9428_v31, 0.0 }
 0x617   : > { %v8016_v15 = vmax.f32 %v9429_v41, 0.0 }
 0x618   : > { %v8017_v19 = vmax.f32 %v9430_v23, 0.0 }
 0x619   : > { %v8217_v1 = vpack.c.bf16 %v8016_v15, %v8008_v26  ;;  %7878 = vmatmul.mubr.bf16.gmra.mrb[52].mxu1 %v13767_v44 }
 0x61a   : > { %v8218_v55 = vpack.c.bf16 %v8017_v19, %v8009_v3  ;;  %8388 = vmatpush1.bf16.xpose.msra.mxu1 %v13805_v28  ;;  %v7047_v29 = vpop.f32.mrb[156].mxu0  ;;  %7887 = vmatprep.mubr.bf16.mxu1 %v13768_v52 }
 0x61b   : > { %v9431_v50 = vadd.f32 %v7047_v29, %v13790_v5  ;;  %8389 = vmatprep.subr.bf16.mxu1 %v13806_v12  ;;  %v7049_v42 = vpop.f32.mrb[157].mxu0 }
 0x61c   : > { %v9432_v43 = vadd.f32 %v7049_v42, %v13792_v56  ;;  %v7051_v32 = vpop.f32.mrb[158].mxu0  ;;  %8455 = vmatprep.subr.bf16.mxu0 %v8218_v55 }
 0x61d   : > { %v9433_v6 = vadd.f32 %v7051_v32, %v13790_v5  ;;  %v7053_v24 = vpop.f32.mrb[159].mxu0  ;;  %8456 = vmatpush1.bf16.xpose.msra.mxu0 %v8217_v1  ;;  %v8024_v53 = vmax.f32 %v9431_v50, 0.0 }
 0x61e   : > { %v9434_v44 = vadd.f32 %v7053_v24, %v13792_v56  ;;  %v8025_v48 = vmax.f32 %v9432_v43, 0.0 }
 0x61f   : > { %v8032_v47 = vmax.f32 %v9433_v6, 0.0 }
 0x620   : > { %v8033_v40 = vmax.f32 %v9434_v44, 0.0 }
 0x621   : > { %v8225_v52 = vpack.c.bf16 %v8032_v47, %v8024_v53  ;;  %7888 = vmatmul.mubr.bf16.gmra.mrb[56].mxu1 %v13771_v4 }
 0x622   : > { %v8226_v33 = vpack.c.bf16 %v8033_v40, %v8025_v48  ;;  %8390 = vmatpush1.bf16.xpose.msra.mxu1 %v13807_v21  ;;  %v7057_v51 = vpop.f32.mrb[160].mxu0  ;;  %7897 = vmatprep.mubr.bf16.mxu1 %v13772_v20 }
 0x623   : > { %v9435_v30 = vadd.f32 %v7057_v51, %v13790_v5  ;;  %8391 = vmatprep.subr.bf16.mxu1 %v13808_v63  ;;  %v7059_v37 = vpop.f32.mrb[161].mxu0 }
 0x624   : > { %v9436_v60 = vadd.f32 %v7059_v37, %v13792_v56  ;;  %v7061_v25 = vpop.f32.mrb[162].mxu0  ;;  %8457 = vmatprep.subr.bf16.mxu0 %v8226_v33 }
 0x625   : > { %v9437_v36 = vadd.f32 %v7061_v25, %v13790_v5  ;;  %v7063_v62 = vpop.f32.mrb[163].mxu0  ;;  %8458 = vmatpush1.bf16.xpose.msra.mxu0 %v8225_v52  ;;  %v8040_v18 = vmax.f32 %v9435_v30, 0.0 }
 0x626   : > { %v9438_v4 = vadd.f32 %v7063_v62, %v13792_v56  ;;  %v8041_v35 = vmax.f32 %v9436_v60, 0.0 }
 0x627   : > { %v8048_v0 = vmax.f32 %v9437_v36, 0.0 }
 0x628   : > { %v8049_v17 = vmax.f32 %v9438_v4, 0.0 }
 0x629   : > { %v8233_v20 = vpack.c.bf16 %v8048_v0, %v8040_v18  ;;  %7898 = vmatmul.mubr.bf16.gmra.mrb[60].mxu1 %v13775_v58 }
 0x62a   : > { %v8234_v61 = vpack.c.bf16 %v8049_v17, %v8041_v35  ;;  %8392 = vmatpush1.bf16.xpose.msra.mxu1 %v13809_v8  ;;  %v7067_v46 = vpop.f32.mrb[164].mxu0  ;;  %8393 = vmatprep.mubr.bf16.mxu1 %v12780_v11 }
 0x62b   : > { %v9439_v22 = vadd.f32 %v7067_v46, %v13790_v5  ;;  %v7069_v9 = vpop.f32.mrb[165].mxu0 }
 0x62c   : > { %v9440_v16 = vadd.f32 %v7069_v9, %v13792_v56  ;;  %v7071_v38 = vpop.f32.mrb[166].mxu0  ;;  %8459 = vmatprep.subr.bf16.mxu0 %v8234_v61 }
 0x62d   : > { %v9441_v10 = vadd.f32 %v7071_v38, %v13790_v5  ;;  %v7073_v13 = vpop.f32.mrb[167].mxu0  ;;  %8460 = vmatpush1.bf16.xpose.msra.mxu0 %v8233_v20  ;;  %v8056_v58 = vmax.f32 %v9439_v22, 0.0 }
 0x62e   : > { %v9442_v59 = vadd.f32 %v7073_v13, %v13792_v56  ;;  %v8057_v7 = vmax.f32 %v9440_v16, 0.0 }
 0x62f   : > { %v8064_v54 = vmax.f32 %v9441_v10, 0.0 }
 0x630   : > { %v8065_v45 = vmax.f32 %v9442_v59, 0.0 }
 0x631   : > { %v8241_v34 = vpack.c.bf16 %v8064_v54, %v8056_v58  ;;  %8394 = vmatmul.mubr.bf16.vlgmr.msra.gmra.mrb[64].mxu1 %v12789_v27 }
 0x632   : > { %v8242_v11 = vpack.c.bf16 %v8065_v45, %v8057_v7  ;;  %v7077_v31 = vpop.f32.mrb[168].mxu0 }
 0x633   : > { %v9443_v2 = vadd.f32 %v7077_v31, %v13790_v5  ;;  %v7079_v41 = vpop.f32.mrb[169].mxu0 }
 0x634   : > { %v9444_v14 = vadd.f32 %v7079_v41, %v13792_v56  ;;  %v7081_v23 = vpop.f32.mrb[170].mxu0  ;;  %8461 = vmatprep.subr.bf16.mxu0 %v8242_v11 }
 0x635   : > { %v9445_v26 = vadd.f32 %v7081_v23, %v13790_v5  ;;  %v7083_v15 = vpop.f32.mrb[171].mxu0  ;;  %8462 = vmatpush1.bf16.xpose.msra.mxu0 %v8241_v34  ;;  %v8072_v19 = vmax.f32 %v9443_v2, 0.0 }
 0x636   : > { %v9446_v3 = vadd.f32 %v7083_v15, %v13792_v56  ;;  %v8073_v55 = vmax.f32 %v9444_v14, 0.0 }
 0x637   : > { %v8080_v1 = vmax.f32 %v9445_v26, 0.0 }
 0x638   : > { %v8081_v28 = vmax.f32 %v9446_v3, 0.0 }
 0x639   : > { %v8249_v27 = vpack.c.bf16 %v8080_v1, %v8072_v19 }
 0x63a   : > { %v8250_v29 = vpack.c.bf16 %v8081_v28, %v8073_v55  ;;  %v7087_v50 = vpop.f32.mrb[172].mxu0 }
 0x63b   : > { %v9447_v12 = vadd.f32 %v7087_v50, %v13790_v5  ;;  %v7089_v42 = vpop.f32.mrb[173].mxu0 }
 0x63c   : > { %v9448_v43 = vadd.f32 %v7089_v42, %v13792_v56  ;;  %v7091_v32 = vpop.f32.mrb[174].mxu0  ;;  %8463 = vmatprep.subr.bf16.mxu0 %v8250_v29 }
 0x63d   : > { %v9449_v6 = vadd.f32 %v7091_v32, %v13790_v5  ;;  %v7093_v24 = vpop.f32.mrb[175].mxu0  ;;  %8464 = vmatpush1.bf16.xpose.msra.mxu0 %v8249_v27  ;;  %v8088_v53 = vmax.f32 %v9447_v12, 0.0 }
 0x63e   : > { %v9450_v44 = vadd.f32 %v7093_v24, %v13792_v56  ;;  %v8089_v48 = vmax.f32 %v9448_v43, 0.0 }
 0x63f   : > { %v8096_v47 = vmax.f32 %v9449_v6, 0.0 }
 0x640   : > { %v8097_v40 = vmax.f32 %v9450_v44, 0.0 }
 0x641   : > { %v8257_v52 = vpack.c.bf16 %v8096_v47, %v8088_v53 }
 0x642   : > { %v8258_v33 = vpack.c.bf16 %v8097_v40, %v8089_v48  ;;  %v7097_v21 = vpop.f32.mrb[176].mxu0  ;;  %v12945_v40 = vrot.slane %v12872_v49, %v12764_v57 }
 0x643   : > { %v9451_v51 = vadd.f32 %v7097_v21, %v13790_v5  ;;  %v7099_v30 = vpop.f32.mrb[177].mxu0 }
 0x644   : > { %v9452_v63 = vadd.f32 %v7099_v30, %v13792_v56  ;;  %v7101_v37 = vpop.f32.mrb[178].mxu0  ;;  %8465 = vmatprep.subr.bf16.mxu0 %v8258_v33 }
 0x645   : > { %v9453_v60 = vadd.f32 %v7101_v37, %v13790_v5  ;;  %v7103_v25 = vpop.f32.mrb[179].mxu0  ;;  %8466 = vmatpush1.bf16.xpose.msra.mxu0 %v8257_v52  ;;  %v8104_v62 = vmax.f32 %v9451_v51, 0.0  ;;  %v13811_v51 = vld [vmem:[#allocation23_spill] sm:$0xff] }
 0x646   : > { %v9454_v36 = vadd.f32 %v7103_v25, %v13792_v56  ;;  %v8105_v18 = vmax.f32 %v9452_v63, 0.0 }
 0x647   : > { %v8112_v4 = vmax.f32 %v9453_v60, 0.0  ;;  %v8352_v60 = vcombine.high %v12883_v39, %v12883_v39 }
 0x648   : > { %v8113_v0 = vmax.f32 %v9454_v36, 0.0 }
 0x649   : > { %v8265_v35 = vpack.c.bf16 %v8112_v4, %v8104_v62 }
 0x64a   : > { %v8266_v17 = vpack.c.bf16 %v8113_v0, %v8105_v18  ;;  %v7107_v20 = vpop.f32.mrb[180].mxu0 }
 0x64b   : > { %v9455_v61 = vadd.f32 %v7107_v20, %v13790_v5  ;;  %v7109_v8 = vpop.f32.mrb[181].mxu0 }
 0x64c   : > { %v9456_v46 = vadd.f32 %v7109_v8, %v13792_v56  ;;  %v7111_v22 = vpop.f32.mrb[182].mxu0  ;;  %8467 = vmatprep.subr.bf16.mxu0 %v8266_v17 }
 0x64d   : > { %v9457_v9 = vadd.f32 %v7111_v22, %v13790_v5  ;;  %v7113_v16 = vpop.f32.mrb[183].mxu0  ;;  %8468 = vmatpush1.bf16.xpose.msra.mxu0 %v8265_v35  ;;  %v8120_v10 = vmax.f32 %v9455_v61, 0.0 }
 0x64e   : > { %v9458_v38 = vadd.f32 %v7113_v16, %v13792_v56  ;;  %v8121_v59 = vmax.f32 %v9456_v46, 0.0  ;;  %v8293_v46 = vld [vmem:[#allocation2] sm:$0x1] }
 0x64f   : > { %v8128_v13 = vmax.f32 %v9457_v9, 0.0  ;;  %8296 = vperm.xlu0 %10406, %v8293_v46  }
 0x650   : > { %v8129_v58 = vmax.f32 %v9458_v38, 0.0 }
 0x651   : > { %v8273_v54 = vpack.c.bf16 %v8128_v13, %v8120_v10 }
 0x652   : > { %v8274_v7 = vpack.c.bf16 %v8129_v58, %v8121_v59  ;;  %v7117_v45 = vpop.f32.mrb[184].mxu0 }
 0x653   : > { %v9459_v34 = vadd.f32 %v7117_v45, %v13790_v5  ;;  %v7119_v11 = vpop.f32.mrb[185].mxu0 }
 0x654   : > { %v9460_v31 = vadd.f32 %v7119_v11, %v13792_v56  ;;  %v7121_v2 = vpop.f32.mrb[186].mxu0  ;;  %8469 = vmatprep.subr.bf16.mxu0 %v8274_v7 }
 0x655   : > { %v9461_v41 = vadd.f32 %v7121_v2, %v13790_v5  ;;  %v7123_v14 = vpop.f32.mrb[187].mxu0  ;;  %8470 = vmatpush1.bf16.xpose.msra.mxu0 %v8273_v54  ;;  %v8136_v26 = vmax.f32 %v9459_v34, 0.0 }
 0x656   : > { %v9462_v23 = vadd.f32 %v7123_v14, %v13792_v56  ;;  %v8137_v3 = vmax.f32 %v9460_v31, 0.0 }
 0x657   : > { %v8144_v15 = vmax.f32 %v9461_v41, 0.0 }
 0x658   : > { %v8145_v19 = vmax.f32 %v9462_v23, 0.0 }
 0x659   : > { %v8281_v1 = vpack.c.bf16 %v8144_v15, %v8136_v26 }
 0x65a   : > { %v8282_v55 = vpack.c.bf16 %v8145_v19, %v8137_v3  ;;  %v7127_v28 = vpop.f32.mrb[188].mxu0 }
 0x65b   : > { %v9463_v27 = vadd.f32 %v7127_v28, %v13790_v5  ;;  %v7129_v29 = vpop.f32.mrb[189].mxu0 }
 0x65c   : > { %v9464_v50 = vadd.f32 %v7129_v29, %v13792_v56  ;;  %v7131_v12 = vpop.f32.mrb[190].mxu0  ;;  %8471 = vmatprep.subr.bf16.mxu0 %v8282_v55 }
 0x65d   : > { %v9465_v42 = vadd.f32 %v7131_v12, %v13790_v5  ;;  %v7133_v43 = vpop.f32.mrb[191].mxu0  ;;  %8472 = vmatpush1.bf16.xpose.msra.mxu0 %v8281_v1  ;;  %v8152_v6 = vmax.f32 %v9463_v27, 0.0  ;;  %v13810_v5 = vld [vmem:[#allocation22_spill] sm:$0xff] }
 0x65e   : > { %v9466_v32 = vadd.f32 %v7133_v43, %v13792_v56  ;;  %v8153_v44 = vmax.f32 %v9464_v50, 0.0 }
 0x65f   : > { %v8160_v24 = vmax.f32 %v9465_v42, 0.0 }
 0x660   : > { %v8161_v53 = vmax.f32 %v9466_v32, 0.0 }
 0x661   : > { %v8289_v47 = vpack.c.bf16 %v8160_v24, %v8152_v6 }
 0x662   : > { %v8290_v48 = vpack.c.bf16 %v8161_v53, %v8153_v44 }
 0x664   : > { %8473 = vmatprep.subr.bf16.mxu0 %v8290_v48 }
 0x665   : > { %8474 = vmatpush1.bf16.xpose.msra.mxu0 %v8289_v47 }
 0x66c   : > { %8476 = vmatmul.mubr.bf16.vlgmr.msra.gmra.mrb[192].mxu0 %v12945_v40 }
 0x66d   : > { %8516 = vmatprep.mubr.bf16.mxu0 %v8352_v60 }
 0x684   : > { %v7749_v52 = vpop.f32.mrb[0].mxu1 }
 0x685   : > { %v9467_v33 = vadd.f32 %v7749_v52, %v13810_v5  ;;  %v7751_v21 = vpop.f32.mrb[1].mxu1 }
 0x686   : > { %v9468_v56 = vadd.f32 %v7751_v21, %v13811_v51  ;;  %v7753_v30 = vpop.f32.mrb[2].mxu1 }
 0x687   : > { %v9469_v63 = vadd.f32 %v7753_v30, %v13810_v5  ;;  %v7755_v37 = vpop.f32.mrb[3].mxu1  ;;  %v7914_v36 = vmax.f32 %v9467_v33, 0.0 }
 0x688   : > { %v9470_v25 = vadd.f32 %v7755_v37, %v13811_v51  ;;  %v7915_v62 = vmax.f32 %v9468_v56, 0.0 }
 0x689   : > { %v7922_v49 = vmax.f32 %v9469_v63, 0.0 }
 0x68a   : > { %v7923_v4 = vmax.f32 %v9470_v25, 0.0 }
 0x68b   : > { %v8171_v18 = vpack.c.bf16 %v7922_v49, %v7914_v36 }
 0x68c   : > { %v8172_v0 = vpack.c.bf16 %v7923_v4, %v7915_v62  ;;  %v7759_v35 = vpop.f32.mrb[4].mxu1 }
 0x68d   : > { %v9471_v17 = vadd.f32 %v7759_v35, %v13810_v5  ;;  %v7761_v20 = vpop.f32.mrb[5].mxu1 }
 0x68e   : > { %v9472_v61 = vadd.f32 %v7761_v20, %v13811_v51  ;;  %v7763_v8 = vpop.f32.mrb[6].mxu1  ;;  %8484 = vmatprep.subr.bf16.mxu0 %v8172_v0 }
 0x68f   : > { %v9473_v39 = vadd.f32 %v7763_v8, %v13810_v5  ;;  %v7765_v22 = vpop.f32.mrb[7].mxu1  ;;  %8485 = vmatpush1.bf16.xpose.msra.mxu0 %v8171_v18  ;;  %v7930_v16 = vmax.f32 %v9471_v17, 0.0 }
 0x690   : > { %v9474_v9 = vadd.f32 %v7765_v22, %v13811_v51  ;;  %v7931_v10 = vmax.f32 %v9472_v61, 0.0 }
 0x691   : > { %v7938_v38 = vmax.f32 %v9473_v39, 0.0 }
 0x692   : > { %v7939_v13 = vmax.f32 %v9474_v9, 0.0 }
 0x693   : > { %v8179_v59 = vpack.c.bf16 %v7938_v38, %v7930_v16 }
 0x694   : > { %v8180_v58 = vpack.c.bf16 %v7939_v13, %v7931_v10  ;;  %v7769_v54 = vpop.f32.mrb[8].mxu1 }
 0x695   : > { %v9475_v7 = vadd.f32 %v7769_v54, %v13810_v5  ;;  %v7771_v45 = vpop.f32.mrb[9].mxu1 }
 0x696   : > { %v9476_v34 = vadd.f32 %v7771_v45, %v13811_v51  ;;  %v7773_v11 = vpop.f32.mrb[10].mxu1  ;;  %8486 = vmatprep.subr.bf16.mxu0 %v8180_v58 }
 0x697   : > { %v9477_v31 = vadd.f32 %v7773_v11, %v13810_v5  ;;  %v7775_v2 = vpop.f32.mrb[11].mxu1  ;;  %8487 = vmatpush1.bf16.xpose.msra.mxu0 %v8179_v59  ;;  %v7946_v14 = vmax.f32 %v9475_v7, 0.0 }
 0x698   : > { %v9478_v41 = vadd.f32 %v7775_v2, %v13811_v51  ;;  %v7947_v26 = vmax.f32 %v9476_v34, 0.0 }
 0x699   : > { %v7954_v23 = vmax.f32 %v9477_v31, 0.0 }
 0x69a   : > { %v7955_v15 = vmax.f32 %v9478_v41, 0.0 }
 0x69b   : > { %v8187_v3 = vpack.c.bf16 %v7954_v23, %v7946_v14 }
 0x69c   : > { %v8188_v19 = vpack.c.bf16 %v7955_v15, %v7947_v26  ;;  %v7779_v1 = vpop.f32.mrb[12].mxu1 }
 0x69d   : > { %v9479_v55 = vadd.f32 %v7779_v1, %v13810_v5  ;;  %v7781_v28 = vpop.f32.mrb[13].mxu1 }
 0x69e   : > { %v9480_v27 = vadd.f32 %v7781_v28, %v13811_v51  ;;  %v7783_v29 = vpop.f32.mrb[14].mxu1  ;;  %8488 = vmatprep.subr.bf16.mxu0 %v8188_v19 }
 0x69f   : > { %v9481_v50 = vadd.f32 %v7783_v29, %v13810_v5  ;;  %v7785_v12 = vpop.f32.mrb[15].mxu1  ;;  %8489 = vmatpush1.bf16.xpose.msra.mxu0 %v8187_v3  ;;  %v7962_v43 = vmax.f32 %v9479_v55, 0.0 }
 0x6a0   : > { %v9482_v42 = vadd.f32 %v7785_v12, %v13811_v51  ;;  %v7963_v6 = vmax.f32 %v9480_v27, 0.0 }
 0x6a1   : > { %v7970_v32 = vmax.f32 %v9481_v50, 0.0 }
 0x6a2   : > { %v7971_v24 = vmax.f32 %v9482_v42, 0.0 }
 0x6a3   : > { %v8195_v44 = vpack.c.bf16 %v7970_v32, %v7962_v43 }
 0x6a4   : > { %v8196_v53 = vpack.c.bf16 %v7971_v24, %v7963_v6  ;;  %v7789_v47 = vpop.f32.mrb[16].mxu1 }
 0x6a5   : > { %v9483_v48 = vadd.f32 %v7789_v47, %v13810_v5  ;;  %v7791_v52 = vpop.f32.mrb[17].mxu1 }
 0x6a6   : > { %v9484_v33 = vadd.f32 %v7791_v52, %v13811_v51  ;;  %v7793_v21 = vpop.f32.mrb[18].mxu1  ;;  %8490 = vmatprep.subr.bf16.mxu0 %v8196_v53 }
 0x6a7   : > { %v9485_v56 = vadd.f32 %v7793_v21, %v13810_v5  ;;  %v7795_v30 = vpop.f32.mrb[19].mxu1  ;;  %8491 = vmatpush1.bf16.xpose.msra.mxu0 %v8195_v44  ;;  %v7978_v37 = vmax.f32 %v9483_v48, 0.0 }
 0x6a8   : > { %v9486_v63 = vadd.f32 %v7795_v30, %v13811_v51  ;;  %v7979_v25 = vmax.f32 %v9484_v33, 0.0 }
 0x6a9   : > { %v7986_v60 = vmax.f32 %v9485_v56, 0.0 }
 0x6aa   : > { %v7987_v36 = vmax.f32 %v9486_v63, 0.0 }
 0x6ab   : > { %v8203_v49 = vpack.c.bf16 %v7986_v60, %v7978_v37 }
 0x6ac   : > { %v8204_v62 = vpack.c.bf16 %v7987_v36, %v7979_v25  ;;  %v7799_v4 = vpop.f32.mrb[20].mxu1 }
 0x6ad   : > { %v9487_v18 = vadd.f32 %v7799_v4, %v13810_v5  ;;  %v7801_v0 = vpop.f32.mrb[21].mxu1 }
 0x6ae   : > { %v9488_v35 = vadd.f32 %v7801_v0, %v13811_v51  ;;  %v7803_v17 = vpop.f32.mrb[22].mxu1  ;;  %8492 = vmatprep.subr.bf16.mxu0 %v8204_v62 }
 0x6af   : > { %v9489_v20 = vadd.f32 %v7803_v17, %v13810_v5  ;;  %v7805_v61 = vpop.f32.mrb[23].mxu1  ;;  %8493 = vmatpush1.bf16.xpose.msra.mxu0 %v8203_v49  ;;  %v7994_v46 = vmax.f32 %v9487_v18, 0.0 }
 0x6b0   : > { %v9490_v8 = vadd.f32 %v7805_v61, %v13811_v51  ;;  %v7995_v22 = vmax.f32 %v9488_v35, 0.0 }
 0x6b1   : > { %v8002_v39 = vmax.f32 %v9489_v20, 0.0 }
 0x6b2   : > { %v8003_v9 = vmax.f32 %v9490_v8, 0.0 }
 0x6b3   : > { %v8211_v16 = vpack.c.bf16 %v8002_v39, %v7994_v46 }
 0x6b4   : > { %v8212_v38 = vpack.c.bf16 %v8003_v9, %v7995_v22  ;;  %v7809_v10 = vpop.f32.mrb[24].mxu1 }
 0x6b5   : > { %v9491_v13 = vadd.f32 %v7809_v10, %v13810_v5  ;;  %v7811_v59 = vpop.f32.mrb[25].mxu1 }
 0x6b6   : > { %v9492_v58 = vadd.f32 %v7811_v59, %v13811_v51  ;;  %v7813_v54 = vpop.f32.mrb[26].mxu1  ;;  %8494 = vmatprep.subr.bf16.mxu0 %v8212_v38 }
 0x6b7   : > { %v9493_v7 = vadd.f32 %v7813_v54, %v13810_v5  ;;  %v7815_v45 = vpop.f32.mrb[27].mxu1  ;;  %8495 = vmatpush1.bf16.xpose.msra.mxu0 %v8211_v16  ;;  %v8010_v11 = vmax.f32 %v9491_v13, 0.0 }
 0x6b8   : > { %v9494_v34 = vadd.f32 %v7815_v45, %v13811_v51  ;;  %v8011_v2 = vmax.f32 %v9492_v58, 0.0 }
 0x6b9   : > { %v8018_v31 = vmax.f32 %v9493_v7, 0.0 }
 0x6ba   : > { %v8019_v41 = vmax.f32 %v9494_v34, 0.0 }
 0x6bb   : > { %v8219_v14 = vpack.c.bf16 %v8018_v31, %v8010_v11 }
 0x6bc   : > { %v8220_v23 = vpack.c.bf16 %v8019_v41, %v8011_v2  ;;  %v7819_v26 = vpop.f32.mrb[28].mxu1 }
 0x6bd   : > { %v9495_v15 = vadd.f32 %v7819_v26, %v13810_v5  ;;  %v7821_v3 = vpop.f32.mrb[29].mxu1 }
 0x6be   : > { %v9496_v19 = vadd.f32 %v7821_v3, %v13811_v51  ;;  %v7823_v1 = vpop.f32.mrb[30].mxu1  ;;  %8496 = vmatprep.subr.bf16.mxu0 %v8220_v23 }
 0x6bf   : > { %v9497_v55 = vadd.f32 %v7823_v1, %v13810_v5  ;;  %v7825_v28 = vpop.f32.mrb[31].mxu1  ;;  %8497 = vmatpush1.bf16.xpose.msra.mxu0 %v8219_v14  ;;  %v8026_v29 = vmax.f32 %v9495_v15, 0.0 }
 0x6c0   : > { %v9498_v27 = vadd.f32 %v7825_v28, %v13811_v51  ;;  %v8027_v12 = vmax.f32 %v9496_v19, 0.0 }
 0x6c1   : > { %v8034_v50 = vmax.f32 %v9497_v55, 0.0 }
 0x6c2   : > { %v8035_v42 = vmax.f32 %v9498_v27, 0.0 }
 0x6c3   : > { %v8227_v43 = vpack.c.bf16 %v8034_v50, %v8026_v29 }
 0x6c4   : > { %v8228_v32 = vpack.c.bf16 %v8035_v42, %v8027_v12  ;;  %v7829_v6 = vpop.f32.mrb[32].mxu1 }
 0x6c5   : > { %v9499_v24 = vadd.f32 %v7829_v6, %v13810_v5  ;;  %v7831_v44 = vpop.f32.mrb[33].mxu1 }
 0x6c6   : > { %v9500_v53 = vadd.f32 %v7831_v44, %v13811_v51  ;;  %v7833_v47 = vpop.f32.mrb[34].mxu1  ;;  %8498 = vmatprep.subr.bf16.mxu0 %v8228_v32 }
 0x6c7   : > { %v9501_v48 = vadd.f32 %v7833_v47, %v13810_v5  ;;  %v7835_v52 = vpop.f32.mrb[35].mxu1  ;;  %8499 = vmatpush1.bf16.xpose.msra.mxu0 %v8227_v43  ;;  %v8042_v21 = vmax.f32 %v9499_v24, 0.0 }
 0x6c8   : > { %v9502_v33 = vadd.f32 %v7835_v52, %v13811_v51  ;;  %v8043_v30 = vmax.f32 %v9500_v53, 0.0 }
 0x6c9   : > { %v8050_v56 = vmax.f32 %v9501_v48, 0.0 }
 0x6ca   : > { %v8051_v63 = vmax.f32 %v9502_v33, 0.0 }
 0x6cb   : > { %v8235_v37 = vpack.c.bf16 %v8050_v56, %v8042_v21 }
 0x6cc   : > { %v8236_v60 = vpack.c.bf16 %v8051_v63, %v8043_v30  ;;  %v7839_v25 = vpop.f32.mrb[36].mxu1 }
 0x6cd   : > { %v9503_v36 = vadd.f32 %v7839_v25, %v13810_v5  ;;  %v7841_v49 = vpop.f32.mrb[37].mxu1 }
 0x6ce   : > { %v9504_v62 = vadd.f32 %v7841_v49, %v13811_v51  ;;  %v7843_v4 = vpop.f32.mrb[38].mxu1  ;;  %8500 = vmatprep.subr.bf16.mxu0 %v8236_v60 }
 0x6cf   : > { %v9505_v18 = vadd.f32 %v7843_v4, %v13810_v5  ;;  %v7845_v0 = vpop.f32.mrb[39].mxu1  ;;  %8501 = vmatpush1.bf16.xpose.msra.mxu0 %v8235_v37  ;;  %v8058_v17 = vmax.f32 %v9503_v36, 0.0 }
 0x6d0   : > { %v9506_v35 = vadd.f32 %v7845_v0, %v13811_v51  ;;  %v8059_v61 = vmax.f32 %v9504_v62, 0.0 }
 0x6d1   : > { %v8066_v20 = vmax.f32 %v9505_v18, 0.0 }
 0x6d2   : > { %v8067_v8 = vmax.f32 %v9506_v35, 0.0 }
 0x6d3   : > { %v8243_v46 = vpack.c.bf16 %v8066_v20, %v8058_v17 }
 0x6d4   : > { %v8244_v39 = vpack.c.bf16 %v8067_v8, %v8059_v61  ;;  %v7849_v22 = vpop.f32.mrb[40].mxu1 }
 0x6d5   : > { %v9507_v9 = vadd.f32 %v7849_v22, %v13810_v5  ;;  %v7851_v16 = vpop.f32.mrb[41].mxu1 }
 0x6d6   : > { %v9508_v38 = vadd.f32 %v7851_v16, %v13811_v51  ;;  %v7853_v10 = vpop.f32.mrb[42].mxu1  ;;  %8502 = vmatprep.subr.bf16.mxu0 %v8244_v39 }
 0x6d7   : > { %v9509_v13 = vadd.f32 %v7853_v10, %v13810_v5  ;;  %v7855_v59 = vpop.f32.mrb[43].mxu1  ;;  %8503 = vmatpush1.bf16.xpose.msra.mxu0 %v8243_v46  ;;  %v8074_v54 = vmax.f32 %v9507_v9, 0.0 }
 0x6d8   : > { %v9510_v58 = vadd.f32 %v7855_v59, %v13811_v51  ;;  %v8075_v45 = vmax.f32 %v9508_v38, 0.0 }
 0x6d9   : > { %v8082_v7 = vmax.f32 %v9509_v13, 0.0 }
 0x6da   : > { %v8083_v34 = vmax.f32 %v9510_v58, 0.0 }
 0x6db   : > { %v8251_v11 = vpack.c.bf16 %v8082_v7, %v8074_v54 }
 0x6dc   : > { %v8252_v31 = vpack.c.bf16 %v8083_v34, %v8075_v45  ;;  %v7859_v2 = vpop.f32.mrb[44].mxu1 }
 0x6dd   : > { %v9511_v41 = vadd.f32 %v7859_v2, %v13810_v5  ;;  %v7861_v14 = vpop.f32.mrb[45].mxu1 }
 0x6de   : > { %v9512_v23 = vadd.f32 %v7861_v14, %v13811_v51  ;;  %v7863_v26 = vpop.f32.mrb[46].mxu1  ;;  %8504 = vmatprep.subr.bf16.mxu0 %v8252_v31 }
 0x6df   : > { %v9513_v15 = vadd.f32 %v7863_v26, %v13810_v5  ;;  %v7865_v3 = vpop.f32.mrb[47].mxu1  ;;  %8505 = vmatpush1.bf16.xpose.msra.mxu0 %v8251_v11  ;;  %v8090_v1 = vmax.f32 %v9511_v41, 0.0 }
 0x6e0   : > { %v9514_v19 = vadd.f32 %v7865_v3, %v13811_v51  ;;  %v8091_v28 = vmax.f32 %v9512_v23, 0.0 }
 0x6e1   : > { %v8098_v55 = vmax.f32 %v9513_v15, 0.0 }
 0x6e2   : > { %v8099_v27 = vmax.f32 %v9514_v19, 0.0 }
 0x6e3   : > { %v8259_v29 = vpack.c.bf16 %v8098_v55, %v8090_v1 }
 0x6e4   : > { %v8260_v50 = vpack.c.bf16 %v8099_v27, %v8091_v28  ;;  %v7869_v12 = vpop.f32.mrb[48].mxu1 }
 0x6e5   : > { %v9515_v42 = vadd.f32 %v7869_v12, %v13810_v5  ;;  %v7871_v43 = vpop.f32.mrb[49].mxu1  ;;  %v8297_v12 = vpop.permute.xlu0 %8296 }
 0x6e6   : > { %v9516_v32 = vadd.f32 %v7871_v43, %v13811_v51  ;;  %v7873_v6 = vpop.f32.mrb[50].mxu1  ;;  %8506 = vmatprep.subr.bf16.mxu0 %v8260_v50 }
 0x6e7   : > { %v9517_v24 = vadd.f32 %v7873_v6, %v13810_v5  ;;  %v7875_v44 = vpop.f32.mrb[51].mxu1  ;;  %8507 = vmatpush1.bf16.xpose.msra.mxu0 %v8259_v29  ;;  %v8106_v47 = vmax.f32 %v9515_v42, 0.0  ;;  %v13812_v42 = vld [vmem:[#allocation24_spill] sm:$0xff] }
 0x6e8   : > { %v9518_v53 = vadd.f32 %v7875_v44, %v13811_v51  ;;  %v8107_v52 = vmax.f32 %v9516_v32, 0.0 }
 0x6e9   : > { %v8114_v48 = vmax.f32 %v9517_v24, 0.0 }
 0x6ea   : > { %v8115_v33 = vmax.f32 %v9518_v53, 0.0 }
 0x6eb   : > { %v8267_v21 = vpack.c.bf16 %v8114_v48, %v8106_v47 }
 0x6ec   : > { %v8268_v56 = vpack.c.bf16 %v8115_v33, %v8107_v52  ;;  %v7879_v30 = vpop.f32.mrb[52].mxu1  ;;  %v13813_v33 = vlaneseq }
 0x6ed   : > { %v9519_v63 = vadd.f32 %v7879_v30, %v13810_v5  ;;  %v7881_v37 = vpop.f32.mrb[53].mxu1 }
 0x6ee   : > { %v9520_v60 = vadd.f32 %v7881_v37, %v13811_v51  ;;  %v7883_v25 = vpop.f32.mrb[54].mxu1  ;;  %8508 = vmatprep.subr.bf16.mxu0 %v8268_v56  ;;  %vm8545_vm2 = vcmp.lt.s32.totalorder %v13813_v33, 256 }
 0x6ef   : > { %v9521_v36 = vadd.f32 %v7883_v25, %v13810_v5  ;;  %v7885_v49 = vpop.f32.mrb[55].mxu1  ;;  %8509 = vmatpush1.bf16.xpose.msra.mxu0 %v8267_v21  ;;  %v8122_v4 = vmax.f32 %v9519_v63, 0.0 }
 0x6f0   : > { %v9522_v62 = vadd.f32 %v7885_v49, %v13811_v51  ;;  %v8123_v0 = vmax.f32 %v9520_v60, 0.0 }
 0x6f1   : > { %v8130_v18 = vmax.f32 %v9521_v36, 0.0 }
 0x6f2   : > { %v8131_v35 = vmax.f32 %v9522_v62, 0.0 }
 0x6f3   : > { %v8275_v17 = vpack.c.bf16 %v8130_v18, %v8122_v4 }
 0x6f4   : > { %v8276_v20 = vpack.c.bf16 %v8131_v35, %v8123_v0  ;;  %v7889_v61 = vpop.f32.mrb[56].mxu1 }
 0x6f5   : > { %v9523_v8 = vadd.f32 %v7889_v61, %v13810_v5  ;;  %v7891_v46 = vpop.f32.mrb[57].mxu1 }
 0x6f6   : > { %v9524_v39 = vadd.f32 %v7891_v46, %v13811_v51  ;;  %v7893_v22 = vpop.f32.mrb[58].mxu1  ;;  %8510 = vmatprep.subr.bf16.mxu0 %v8276_v20 }
 0x6f7   : > { %v9525_v9 = vadd.f32 %v7893_v22, %v13810_v5  ;;  %v7895_v16 = vpop.f32.mrb[59].mxu1  ;;  %8511 = vmatpush1.bf16.xpose.msra.mxu0 %v8275_v17  ;;  %v8138_v10 = vmax.f32 %v9523_v8, 0.0 }
 0x6f8   : > { %v9526_v38 = vadd.f32 %v7895_v16, %v13811_v51  ;;  %v8139_v59 = vmax.f32 %v9524_v39, 0.0 }
 0x6f9   : > { %v8146_v13 = vmax.f32 %v9525_v9, 0.0 }
 0x6fa   : > { %v8147_v58 = vmax.f32 %v9526_v38, 0.0 }
 0x6fb   : > { %v8283_v54 = vpack.c.bf16 %v8146_v13, %v8138_v10 }
 0x6fc   : > { %v8284_v7 = vpack.c.bf16 %v8147_v58, %v8139_v59  ;;  %v7899_v45 = vpop.f32.mrb[60].mxu1 }
 0x6fd   : > { %v9527_v34 = vadd.f32 %v7899_v45, %v13810_v5  ;;  %v7901_v11 = vpop.f32.mrb[61].mxu1 }
 0x6fe   : > { %v9528_v31 = vadd.f32 %v7901_v11, %v13811_v51  ;;  %v7903_v2 = vpop.f32.mrb[62].mxu1  ;;  %8512 = vmatprep.subr.bf16.mxu0 %v8284_v7 }
 0x6ff   : > { %v9529_v41 = vadd.f32 %v7903_v2, %v13810_v5  ;;  %v7905_v14 = vpop.f32.mrb[63].mxu1  ;;  %8513 = vmatpush1.bf16.xpose.msra.mxu0 %v8283_v54  ;;  %v8154_v26 = vmax.f32 %v9527_v34, 0.0  ;;  %v8350_v5 = vcombine.high %v12945_v40, %v12945_v40 }
 0x700   : > { %v9530_v23 = vadd.f32 %v7905_v14, %v13811_v51  ;;  %v8155_v3 = vmax.f32 %v9528_v31, 0.0  ;;  %v8302_v51 = vrot.slane %v8297_v12, %v13812_v42 }
 0x701   : > { %v8162_v15 = vmax.f32 %v9529_v41, 0.0 }
 0x702   : > { %v8163_v19 = vmax.f32 %v9530_v23, 0.0 }
 0x703   : > { %v8291_v1 = vpack.c.bf16 %v8162_v15, %v8154_v26 }
 0x704   : > { %v8292_v55 = vpack.c.bf16 %v8163_v19, %v8155_v3  ;;  %v8395_v28 = vpop.f32.mrb[64].mxu1 }
 0x705   : > { %v8397_v27 = vpop.f32.mrb[65].mxu1  ;;  %v8396_v43 = vadd.f32 %v8395_v28, %v8302_v51 }
 0x706   : > { %8514 = vmatprep.subr.bf16.mxu0 %v8292_v55  ;;  %v8399_v29 = vpop.f32.mrb[66].mxu1  ;;  %v8398_v32 = vadd.f32 %v8397_v27, %v8302_v51 }
 0x707   : > { %8515 = vmatpush1.bf16.xpose.msra.mxu0 %v8291_v1  ;;  %v8400_v50 = vpop.f32.mrb[67].mxu1 }
 0x70e   : > { %8517 = vmatmul.mubr.bf16.vlgmr.msra.gmra.mrb[192].mxu0 %v8350_v5 }
 0x7e1   : > { %v8518_v6 = vpop.f32.mrb[192].mxu0 }
 0x7e2   : > { %v9532_v24 = vadd.f32 %v8518_v6, %v8396_v43  ;;  %v8520_v44 = vpop.f32.mrb[193].mxu0 }
 0x7e3   : > { %v9534_v53 = vadd.f32 %v8520_v44, %v8398_v32  ;;  %v8522_v47 = vpop.f32.mrb[194].mxu0 }
 0x7e4   : > { %v8523_v48 = vpop.f32.mrb[195].mxu0 }
 0x7e5   : > { %v8527_v52 = vcombine.low %v9532_v24, %v9534_v53 }
 0x7e7   : > { %v8534_v40 = vrot.slane %v8527_v52, %v12764_v57 }
 0x7e9   : > { %v8541_v21 = vrot.slane %v8534_v40, %v12764_v57 }
 0x7eb   : > { %8547 = vst.msk [vmem:[%s339_s25] sm:$0x3] %vm8545_vm2, %v8541_v21 }
 0x7ec   : > { %10566 = shalt.err (!%p10563_p1)
}
 0x7ed   : > { %s10567_s1 = scalar_lea.hbm %s13025_s17, 32  ;;  %s10571_s6 = scalar_lea.hbm %s13074_s7, 64 }
 0x7ee   : > { %p10568_p0 = scmp.ne.s32.totalorder %s13025_s17, %s10567_s1  ;;  %p10572_p9 = scmp.lt.u32.totalorder %s13025_s17, %s13074_s7 }
 0x7ef   : > { %p10573_p12 = scmp.lt.u32.totalorder %s10571_s6, %s10567_s1  ;;  %p10575_p2 = scmp.lt.u32.totalorder %s10567_s1, %s13025_s17 }
 0x7f0   : > { %p10569_p6 = pnand %p10568_p0, %p13814_p3 }
 0x7f1   : > { %p10574_p10 = por %p10573_p12, %p10572_p9 }
 0x7f2   : > { %p10570_p5 = pneg %p10569_p6 }
 0x7f3   : > { %p10576_p4 = por %p10575_p2, %p10574_p10 }
 0x7f5   : > { %p10577_p7 = pnand %p10576_p4, %p10570_p5 }
 0x7f7   : > { %10580 = shalt.err (!%p10577_p7)
}
 0x7f8   : > { %10331 = dma.vmem_to_hbm [thread:$0]  (%p13814_p3), %s13027_s30, 32, %s13025_s17, %s8549_s18  }
 0x7f9 PF: > { %p10363_p8 = scmp.ge.s32.totalorder %s10627_s29, 2  ;;  %s8575_s22 = sand.u32 1, %s10615_s26  }
 0x7fa   : > { %p13815_p11 = scmp.ne.s32.totalorder %s13326_s13, 0  ;;  %s8576_s24 = scalar_lea.sflag [#allocation5], %s8575_s22 }
 0x7fc   : > { %p10350_p13 = pnand %p10363_p8, %p13815_p11 }
 0x7fe   : > { %10610 = dma.done.wait (!%p10350_p13), %s8576_s24, 32  }
 0x7ff   : > { %10612 = vsyncadd (!%p10350_p13), %s8576_s24, 4294967264  ;;  %p22_p1 = scmp.ge.s32.totalorder %s10708_s8, 4   ;;  %s13816_s26 = smov %s10619_s27 }
 0x800   : > { %s13817_s27 = smov %s10623_s28  ;;  %s13818_s28 = smov %s10719_s11 }
 0x801   : > { %s13819_s29 = smov %s10708_s8  ;;  %24 = sbr.rel (!%p22_p1) target bundleno = 9 (0x9), region = 104 }
 0x808   :  { %8581 = vsyncpa [#allocation4], 1 }
 0x809   :  { %8583 = vsyncpa [#allocation4 + $0x1], 1 }
 0x80a   :  { %8584 = vsyncpa [#allocation7], 1 }
 0x80b   :  { %8585 = vsyncpa [#allocation10], 1 }
 0x80c   :  { %8586 = vsyncpa [#allocation5], 1 }
 0x80d   :  { %8588 = vsyncpa [#allocation5 + $0x1], 1 }

</bundles_post_ra>
